<compile_context>
chip_gen: v6e
topology: v6e:2x2x1
jax: 0.10.0
libtpu: 0.0.40
codegen_flags: <defaults>
</compile_context>

<pallas_src>
import functools
import math

import jax
import jax.numpy as jnp
from jax.experimental import pallas as pl
from jax.experimental.pallas import tpu as pltpu

INTERNAL = 512   # nn.Linear internal width
EMB_DIM = 64     # GRU input embedding width
LANE = 128       # all packed gate blocks are 128-lane aligned


# ----------------------------------------------------------------------------
# The single fused kernel.
#   x_ref   : [S*2B, F]  time-major-flattened timestep rows (sign rows then vsign)
#   len_ref : [2B, 1]    sequence lengths as f32 (used for masks AND ffc features)
#   out_ref : [B, 2]
# Packed weight layouts (built by pack_params):
#   gi0_w  [128, 768]  : emb -> layer-0 input gates; 256-lane slabs (r | z | n_in),
#                        layer-0 half = lanes [0:128) of each slab, layer-1 half zero.
#   w_rec  [256, 1024] : rows [0:128)=h0 lanes, [128:256)=h1 lanes; 256-lane output
#                        slabs (r | z | n_in | n_hid); within each slab lanes
#                        [0:128)=layer-0, [128:256)=layer-1.  h0 also feeds layer-1's
#                        input-side gates (skewed schedule).
#   gru_b  [2, 768]    : row 0 = input-side gate biases (both layers), row 1[:256] =
#                        (b_hn0 | b_hn1).
#   bias_mlp [10, 512] : ifc_b1, ifc_b2, ifc_b3, fc_b1, fc_b2, ffc_b1, ffc_b2,
#                        ffc_b3, ffc_w1[len_sign row], ffc_w1[len_vsign row].
# ----------------------------------------------------------------------------
def _siamese_kernel(S, B,
                    x_ref, len_ref,
                    ifc_w1, ifc_w2, ifc_w3,
                    gi0_w, w_rec, fc_w1, fc_w2,
                    ffc_w1sv, ffc_w2, ffc_w3,
                    bias_mlp, gru_b,
                    out_ref):
    TB = 2 * B
    L = LANE

    def mm(a, w):
        # single-pass bf16 MXU matmul with f32 accumulation
        return jnp.dot(a.astype(jnp.bfloat16), w, preferred_element_type=jnp.float32)

    # ---- hoisted loads: every operand is read exactly once -------------------
    biases = bias_mlp[...]                                   # [10, 512] f32
    gb = gru_b[...]                                          # [2, 768]  f32
    gi0_bias = gb[0:1, :]                                    # [1, 768]
    b_hn = gb[1:2, :2 * L]                                   # [1, 256]  (b_hn0 | b_hn1)
    w_rec_v = w_rec[...]                                     # [256, 1024] bf16
    lens = len_ref[...]                                      # [TB, 1] f32
    lane_lo = jax.lax.broadcasted_iota(jnp.int32, (1, 2 * L), 1) < L   # [1, 256]

    # ---- initialFc on every timestep of both branches in one shot ------------
    a = jnp.maximum(mm(x_ref[...], ifc_w1[...]) + biases[0:1, :], 0.0)
    a = jnp.maximum(mm(a, ifc_w2[...]) + biases[1:2, :], 0.0)
    emb = mm(a, ifc_w3[...]) + biases[2:3, :L]               # [S*TB, 128] (pad lanes 0)

    # ---- GRU layer-0 input projection hoisted out of the time loop -----------
    # pre slabs: [0:256)=r, [256:512)=z, [512:768)=n_input; layer-1 halves carry
    # the (constant) layer-1 input-side biases.
    pre = mm(emb, gi0_w[...]) + gi0_bias                     # [S*TB, 768]

    # ---- skewed, fully-unrolled 2-layer GRU -----------------------------------
    # carried state hh = [h0 | h1] (each 128-lane padded).  Iteration i runs
    # layer-0 step i and layer-1 step i-1 with ONE combined MXU call.
    hh = jnp.zeros((TB, 2 * L), jnp.float32)
    for i in range(S + 1):
        if i == 0:
            g = jnp.zeros((TB, 8 * L), jnp.float32)          # hh == 0 -> matmul is 0
        else:
            g = mm(hh, w_rec_v)                              # [TB, 1024]
        step = min(i, S - 1)                                 # drain iter reuses last
        p_t = pre[step * TB:(step + 1) * TB, :]              # [TB, 768]

        r = jax.nn.sigmoid(p_t[:, 0:2 * L] + g[:, 0:2 * L])
        z = jax.nn.sigmoid(p_t[:, 2 * L:4 * L] + g[:, 2 * L:4 * L])
        n = jnp.tanh(p_t[:, 4 * L:6 * L] + g[:, 4 * L:6 * L]
                     + r * (g[:, 6 * L:8 * L] + b_hn))

        m0 = (lens > float(i)).astype(jnp.float32)           # layer-0 step-i validity
        if i == 0:
            m1 = jnp.zeros_like(m0)                          # no layer-1 step yet
        else:
            m1 = (lens > float(i - 1)).astype(jnp.float32)   # layer-1 step-(i-1)
        m = jnp.where(lane_lo, m0, m1)                       # [TB, 256]
        hh = m * ((1.0 - z) * n + z * hh) + (1.0 - m) * hh

    h1_final = hh[:, L:2 * L]                                # hn[-1] for both branches

    # ---- fc head on hn[-1] (shared weights, both branches at once) -----------
    f = jnp.maximum(mm(h1_final, fc_w1[...]) + biases[3:4, :], 0.0)
    f = mm(f, fc_w2[...]) + biases[4:5, :L]                  # [TB, 128]

    # ---- ffc; the concat is folded into one matmul + a rank-2 length term ----
    gg = mm(f, ffc_w1sv[...])                                # [TB, 1024]
    c = (gg[:B, :INTERNAL] + gg[B:TB, INTERNAL:]
         + biases[5:6, :]
         + lens[:B] * biases[8:9, :] + lens[B:TB] * biases[9:10, :])
    c = jnp.maximum(c, 0.0)
    c = jnp.maximum(mm(c, ffc_w2[...]) + biases[6:7, :], 0.0)
    o = mm(c, ffc_w3[...]) + biases[7:8, :L]                 # [B, 128] (pad lanes 0)
    out_ref[...] = o[:, :2]


# ----------------------------------------------------------------------------
# PyTorch-faithful parameter init (uniform +-1/sqrt(fan_in); GRU +-1/sqrt(H)).
# ----------------------------------------------------------------------------
def init_params(key, input_features, hidden):
    H = hidden
    keys = iter(jax.random.split(key, 48))

    def uni(shape, scale):
        return jax.random.uniform(next(keys), shape, jnp.float32, -scale, scale)

    def linear(fan_in, fan_out):
        s = 1.0 / math.sqrt(fan_in)
        return uni((fan_in, fan_out), s), uni((fan_out,), s)

    p = {}
    p["ifc_w1"], p["ifc_b1"] = linear(input_features, INTERNAL)
    p["ifc_w2"], p["ifc_b2"] = linear(INTERNAL, INTERNAL)
    p["ifc_w3"], p["ifc_b3"] = linear(INTERNAL, EMB_DIM)

    sg = 1.0 / math.sqrt(H)

    def gru_layer(in_dim):
        layer = {}
        for name in ("wir", "wiz", "win"):
            layer[name] = uni((in_dim, H), sg)
        for name in ("whr", "whz", "whn"):
            layer[name] = uni((H, H), sg)
        for name in ("bir", "biz", "bin", "bhr", "bhz", "bhn"):
            layer[name] = uni((H,), sg)
        return layer

    p["gru0"] = gru_layer(EMB_DIM)
    p["gru1"] = gru_layer(H)

    p["fc_w1"], p["fc_b1"] = linear(H, INTERNAL)
    p["fc_w2"], p["fc_b2"] = linear(INTERNAL, H)

    p["ffc_w1"], p["ffc_b1"] = linear(2 * H + 2, INTERNAL)
    p["ffc_w2"], p["ffc_b2"] = linear(INTERNAL, INTERNAL)
    p["ffc_w3"], p["ffc_b3"] = linear(INTERNAL, 2)
    return p


# ----------------------------------------------------------------------------
# Pack parameters into the 12 kernel operands (bf16 matrices, f32 bias slabs).
# ----------------------------------------------------------------------------
def pack_params(p, hidden):
    H = hidden
    L = LANE
    assert H <= L
    bf = lambda x: x.astype(jnp.bfloat16)
    g0, g1 = p["gru0"], p["gru1"]

    ifc_w1 = bf(p["ifc_w1"])
    ifc_w2 = bf(p["ifc_w2"])
    ifc_w3 = bf(jnp.zeros((INTERNAL, L), jnp.float32).at[:, :EMB_DIM].set(p["ifc_w3"]))

    gi0_w = jnp.zeros((L, 6 * L), jnp.float32)
    gi0_w = gi0_w.at[:EMB_DIM, 0:H].set(g0["wir"])
    gi0_w = gi0_w.at[:EMB_DIM, 2 * L:2 * L + H].set(g0["wiz"])
    gi0_w = gi0_w.at[:EMB_DIM, 4 * L:4 * L + H].set(g0["win"])
    gi0_w = bf(gi0_w)

    w_rec = jnp.zeros((2 * L, 8 * L), jnp.float32)
    # r slab [0:256)
    w_rec = w_rec.at[0:H, 0:H].set(g0["whr"])
    w_rec = w_rec.at[0:H, L:L + H].set(g1["wir"])
    w_rec = w_rec.at[L:L + H, L:L + H].set(g1["whr"])
    # z slab [256:512)
    w_rec = w_rec.at[0:H, 2 * L:2 * L + H].set(g0["whz"])
    w_rec = w_rec.at[0:H, 3 * L:3 * L + H].set(g1["wiz"])
    w_rec = w_rec.at[L:L + H, 3 * L:3 * L + H].set(g1["whz"])
    # n input-side slab [512:768)  (layer-0 half comes from hoisted gi0)
    w_rec = w_rec.at[0:H, 5 * L:5 * L + H].set(g1["win"])
    # n hidden-side slab [768:1024)
    w_rec = w_rec.at[0:H, 6 * L:6 * L + H].set(g0["whn"])
    w_rec = w_rec.at[L:L + H, 7 * L:7 * L + H].set(g1["whn"])
    w_rec = bf(w_rec)

    gru_b = jnp.zeros((2, 6 * L), jnp.float32)
    gru_b = gru_b.at[0, 0:H].set(g0["bir"] + g0["bhr"])
    gru_b = gru_b.at[0, L:L + H].set(g1["bir"] + g1["bhr"])
    gru_b = gru_b.at[0, 2 * L:2 * L + H].set(g0["biz"] + g0["bhz"])
    gru_b = gru_b.at[0, 3 * L:3 * L + H].set(g1["biz"] + g1["bhz"])
    gru_b = gru_b.at[0, 4 * L:4 * L + H].set(g0["bin"])
    gru_b = gru_b.at[0, 5 * L:5 * L + H].set(g1["bin"])
    gru_b = gru_b.at[1, 0:H].set(g0["bhn"])
    gru_b = gru_b.at[1, L:L + H].set(g1["bhn"])

    fc_w1 = bf(jnp.zeros((L, INTERNAL), jnp.float32).at[:H, :].set(p["fc_w1"]))
    fc_w2 = bf(jnp.zeros((INTERNAL, L), jnp.float32).at[:, :H].set(p["fc_w2"]))

    w1 = p["ffc_w1"]                                          # [2H+2, 512]
    ffc_w1sv = jnp.zeros((L, 2 * INTERNAL), jnp.float32)
    ffc_w1sv = ffc_w1sv.at[:H, :INTERNAL].set(w1[:H])         # sign_final rows
    ffc_w1sv = ffc_w1sv.at[:H, INTERNAL:].set(w1[H:2 * H])    # vsign_final rows
    ffc_w1sv = bf(ffc_w1sv)
    ffc_w2 = bf(p["ffc_w2"])
    ffc_w3 = bf(jnp.zeros((INTERNAL, L), jnp.float32).at[:, :2].set(p["ffc_w3"]))

    bias_mlp = jnp.zeros((10, INTERNAL), jnp.float32)
    bias_mlp = bias_mlp.at[0, :].set(p["ifc_b1"])
    bias_mlp = bias_mlp.at[1, :].set(p["ifc_b2"])
    bias_mlp = bias_mlp.at[2, :EMB_DIM].set(p["ifc_b3"])
    bias_mlp = bias_mlp.at[3, :].set(p["fc_b1"])
    bias_mlp = bias_mlp.at[4, :H].set(p["fc_b2"])
    bias_mlp = bias_mlp.at[5, :].set(p["ffc_b1"])
    bias_mlp = bias_mlp.at[6, :].set(p["ffc_b2"])
    bias_mlp = bias_mlp.at[7, :2].set(p["ffc_b3"])
    bias_mlp = bias_mlp.at[8, :].set(w1[2 * H])               # sign_len weight row
    bias_mlp = bias_mlp.at[9, :].set(w1[2 * H + 1])           # vsign_len weight row

    return [ifc_w1, ifc_w2, ifc_w3, gi0_w, w_rec, fc_w1, fc_w2,
            ffc_w1sv, ffc_w2, ffc_w3, bias_mlp, gru_b]


# ----------------------------------------------------------------------------
# Forward pass == SiameseNetBatch.forward (padded-tensor + lengths interface).
# ----------------------------------------------------------------------------
def siamese_forward(packed, sign, sign_len, vsign, vsign_len):
    """sign/vsign: [B, S, F] padded f32.  sign_len/vsign_len: [B] int32 (>=1, <=S)."""
    B, S, F = sign.shape
    TB = 2 * B
    # Raw-input plumbing only; every intermediate stays inside the single kernel.
    x = jnp.concatenate([sign, vsign], axis=0)                  # [TB, S, F]
    x = jnp.transpose(x, (1, 0, 2)).reshape(S * TB, F)          # time-major rows
    lens = jnp.concatenate([sign_len, vsign_len], axis=0)
    lens = lens.astype(jnp.float32).reshape(TB, 1)

    args = [x, lens] + list(packed)
    vmem = pl.BlockSpec(memory_space=pltpu.MemorySpace.VMEM)
    return pl.pallas_call(
        functools.partial(_siamese_kernel, S, B),
        out_shape=jax.ShapeDtypeStruct((B, 2), jnp.float32),
        in_specs=[vmem] * len(args),
        out_specs=vmem,
    )(*args)


if __name__ == "__main__":
    B, S, F, H = 2, 8, 16, 32

    key = jax.random.PRNGKey(0)
    kp, ks, kv = jax.random.split(key, 3)
    params = init_params(kp, input_features=F, hidden=H)
    packed = pack_params(params, hidden=H)

    # Padded variable-length sequences (pad positions zeroed; masked in-kernel).
    sign = jax.random.normal(ks, (B, S, F), jnp.float32)
    vsign = jax.random.normal(kv, (B, S, F), jnp.float32)
    sign_len = jnp.array([8, 5], dtype=jnp.int32)
    vsign_len = jnp.array([6, 8], dtype=jnp.int32)
    sign = sign * (jnp.arange(S)[None, :] < sign_len[:, None]).astype(jnp.float32)[..., None]
    vsign = vsign * (jnp.arange(S)[None, :] < vsign_len[:, None]).astype(jnp.float32)[..., None]

    out = jax.jit(siamese_forward)(packed, sign, sign_len, vsign, vsign_len)
    jax.block_until_ready(out)
    assert out.shape == (B, 2)
    print("KERNEL_OK")
</pallas_src>

<mosaic_0001>
module attributes {stable_mosaic.version = 11 : i64} {
  func.func @_siamese_kernel(%arg0: memref<32x16xf32, #tpu.memory_space<vmem>>, %arg1: memref<4x1xf32, #tpu.memory_space<vmem>>, %arg2: memref<16x512xbf16, #tpu.memory_space<vmem>>, %arg3: memref<512x512xbf16, #tpu.memory_space<vmem>>, %arg4: memref<512x128xbf16, #tpu.memory_space<vmem>>, %arg5: memref<128x768xbf16, #tpu.memory_space<vmem>>, %arg6: memref<256x1024xbf16, #tpu.memory_space<vmem>>, %arg7: memref<128x512xbf16, #tpu.memory_space<vmem>>, %arg8: memref<512x128xbf16, #tpu.memory_space<vmem>>, %arg9: memref<128x1024xbf16, #tpu.memory_space<vmem>>, %arg10: memref<512x512xbf16, #tpu.memory_space<vmem>>, %arg11: memref<512x128xbf16, #tpu.memory_space<vmem>>, %arg12: memref<10x512xf32, #tpu.memory_space<vmem>>, %arg13: memref<2x768xf32, #tpu.memory_space<vmem>>, %arg14: memref<2x2xf32, #tpu.memory_space<vmem>>) attributes {dimension_semantics = [], scalar_prefetch = 0 : i64, scratch_operands = 0 : i64, tpu.core_type = #tpu.core_type<tc>} {
    %c0 = arith.constant 0 : index
    %c0_0 = arith.constant 0 : index
    %0 = vector.load %arg12[%c0, %c0_0] : memref<10x512xf32, #tpu.memory_space<vmem>>, vector<10x512xf32>
    %c0_1 = arith.constant 0 : index
    %c0_2 = arith.constant 0 : index
    %1 = vector.load %arg13[%c0_1, %c0_2] : memref<2x768xf32, #tpu.memory_space<vmem>>, vector<2x768xf32>
    %2 = vector.extract_strided_slice %1 {offsets = [0, 0], sizes = [1, 768], strides = [1, 1]} : vector<2x768xf32> to vector<1x768xf32>
    %3 = vector.extract_strided_slice %1 {offsets = [1, 0], sizes = [1, 256], strides = [1, 1]} : vector<2x768xf32> to vector<1x256xf32>
    %c0_3 = arith.constant 0 : index
    %c0_4 = arith.constant 0 : index
    %4 = vector.load %arg6[%c0_3, %c0_4] : memref<256x1024xbf16, #tpu.memory_space<vmem>>, vector<256x1024xbf16>
    %c0_5 = arith.constant 0 : index
    %c0_6 = arith.constant 0 : index
    %5 = vector.load %arg1[%c0_5, %c0_6] : memref<4x1xf32, #tpu.memory_space<vmem>>, vector<4x1xf32>
    %6 = tpu.iota {dimensions = array<i32: 1>} : vector<1x256xi32>
    %c128_i32 = arith.constant 128 : i32
    %7 = vector.broadcast %c128_i32 : i32 to vector<1x256xi32>
    %8 = arith.cmpi slt, %6, %7 : vector<1x256xi32>
    %c0_7 = arith.constant 0 : index
    %c0_8 = arith.constant 0 : index
    %9 = vector.load %arg0[%c0_7, %c0_8] : memref<32x16xf32, #tpu.memory_space<vmem>>, vector<32x16xf32>
    %c0_9 = arith.constant 0 : index
    %c0_10 = arith.constant 0 : index
    %10 = vector.load %arg2[%c0_9, %c0_10] : memref<16x512xbf16, #tpu.memory_space<vmem>>, vector<16x512xbf16>
    %11 = arith.truncf %9 : vector<32x16xf32> to vector<32x16xbf16>
    %cst = arith.constant dense<0.000000e+00> : vector<32x512xf32>
    %12 = tpu.matmul %11, %10, %cst {dimension_numbers = #tpu.dot_dimension_numbers<[1], [0], [0], [1], [0, 0, 1, 1], [], []>} : vector<32x16xbf16>, vector<16x512xbf16>, vector<32x512xf32> -> vector<32x512xf32>
    %13 = vector.extract_strided_slice %0 {offsets = [0, 0], sizes = [1, 512], strides = [1, 1]} : vector<10x512xf32> to vector<1x512xf32>
    %14 = vector.broadcast %13 : vector<1x512xf32> to vector<32x512xf32>
    %15 = arith.addf %12, %14 : vector<32x512xf32>
    %cst_11 = arith.constant 0.000000e+00 : f32
    %16 = vector.broadcast %cst_11 : f32 to vector<32x512xf32>
    %17 = arith.maximumf %15, %16 : vector<32x512xf32>
    %c0_12 = arith.constant 0 : index
    %c0_13 = arith.constant 0 : index
    %18 = vector.load %arg3[%c0_12, %c0_13] : memref<512x512xbf16, #tpu.memory_space<vmem>>, vector<512x512xbf16>
    %19 = arith.truncf %17 : vector<32x512xf32> to vector<32x512xbf16>
    %cst_14 = arith.constant dense<0.000000e+00> : vector<32x512xf32>
    %20 = tpu.matmul %19, %18, %cst_14 {dimension_numbers = #tpu.dot_dimension_numbers<[1], [0], [0], [1], [0, 0, 1, 1], [], []>} : vector<32x512xbf16>, vector<512x512xbf16>, vector<32x512xf32> -> vector<32x512xf32>
    %21 = vector.extract_strided_slice %0 {offsets = [1, 0], sizes = [1, 512], strides = [1, 1]} : vector<10x512xf32> to vector<1x512xf32>
    %22 = vector.broadcast %21 : vector<1x512xf32> to vector<32x512xf32>
    %23 = arith.addf %20, %22 : vector<32x512xf32>
    %cst_15 = arith.constant 0.000000e+00 : f32
    %24 = vector.broadcast %cst_15 : f32 to vector<32x512xf32>
    %25 = arith.maximumf %23, %24 : vector<32x512xf32>
    %c0_16 = arith.constant 0 : index
    %c0_17 = arith.constant 0 : index
    %26 = vector.load %arg4[%c0_16, %c0_17] : memref<512x128xbf16, #tpu.memory_space<vmem>>, vector<512x128xbf16>
    %27 = arith.truncf %25 : vector<32x512xf32> to vector<32x512xbf16>
    %cst_18 = arith.constant dense<0.000000e+00> : vector<32x128xf32>
    %28 = tpu.matmul %27, %26, %cst_18 {dimension_numbers = #tpu.dot_dimension_numbers<[1], [0], [0], [1], [0, 0, 1, 1], [], []>} : vector<32x512xbf16>, vector<512x128xbf16>, vector<32x128xf32> -> vector<32x128xf32>
    %29 = vector.extract_strided_slice %0 {offsets = [2, 0], sizes = [1, 128], strides = [1, 1]} : vector<10x512xf32> to vector<1x128xf32>
    %30 = vector.broadcast %29 : vector<1x128xf32> to vector<32x128xf32>
    %31 = arith.addf %28, %30 : vector<32x128xf32>
    %c0_19 = arith.constant 0 : index
    %c0_20 = arith.constant 0 : index
    %32 = vector.load %arg5[%c0_19, %c0_20] : memref<128x768xbf16, #tpu.memory_space<vmem>>, vector<128x768xbf16>
    %33 = arith.truncf %31 : vector<32x128xf32> to vector<32x128xbf16>
    %cst_21 = arith.constant dense<0.000000e+00> : vector<32x768xf32>
    %34 = tpu.matmul %33, %32, %cst_21 {dimension_numbers = #tpu.dot_dimension_numbers<[1], [0], [0], [1], [0, 0, 1, 1], [], []>} : vector<32x128xbf16>, vector<128x768xbf16>, vector<32x768xf32> -> vector<32x768xf32>
    %35 = vector.broadcast %2 : vector<1x768xf32> to vector<32x768xf32>
    %36 = arith.addf %34, %35 : vector<32x768xf32>
    %cst_22 = arith.constant 0.000000e+00 : f32
    %37 = vector.broadcast %cst_22 : f32 to vector<4x256xf32>
    %cst_23 = arith.constant 0.000000e+00 : f32
    %38 = vector.broadcast %cst_23 : f32 to vector<4x1024xf32>
    %39 = vector.extract_strided_slice %36 {offsets = [0, 0], sizes = [4, 768], strides = [1, 1]} : vector<32x768xf32> to vector<4x768xf32>
    %40 = vector.extract_strided_slice %39 {offsets = [0, 0], sizes = [4, 256], strides = [1, 1]} : vector<4x768xf32> to vector<4x256xf32>
    %41 = vector.extract_strided_slice %38 {offsets = [0, 0], sizes = [4, 256], strides = [1, 1]} : vector<4x1024xf32> to vector<4x256xf32>
    %42 = arith.addf %40, %41 : vector<4x256xf32>
    %43 = arith.negf %42 : vector<4x256xf32>
    %44 = math.exp %43 : vector<4x256xf32>
    %cst_24 = arith.constant 1.000000e+00 : f32
    %45 = vector.broadcast %cst_24 : f32 to vector<4x256xf32>
    %46 = arith.addf %45, %44 : vector<4x256xf32>
    %47 = arith.divf %45, %46 : vector<4x256xf32>
    %48 = vector.extract_strided_slice %39 {offsets = [0, 256], sizes = [4, 256], strides = [1, 1]} : vector<4x768xf32> to vector<4x256xf32>
    %49 = vector.extract_strided_slice %38 {offsets = [0, 256], sizes = [4, 256], strides = [1, 1]} : vector<4x1024xf32> to vector<4x256xf32>
    %50 = arith.addf %48, %49 : vector<4x256xf32>
    %51 = arith.negf %50 : vector<4x256xf32>
    %52 = math.exp %51 : vector<4x256xf32>
    %cst_25 = arith.constant 1.000000e+00 : f32
    %53 = vector.broadcast %cst_25 : f32 to vector<4x256xf32>
    %54 = arith.addf %53, %52 : vector<4x256xf32>
    %55 = arith.divf %53, %54 : vector<4x256xf32>
    %56 = vector.extract_strided_slice %39 {offsets = [0, 512], sizes = [4, 256], strides = [1, 1]} : vector<4x768xf32> to vector<4x256xf32>
    %57 = vector.extract_strided_slice %38 {offsets = [0, 512], sizes = [4, 256], strides = [1, 1]} : vector<4x1024xf32> to vector<4x256xf32>
    %58 = arith.addf %56, %57 : vector<4x256xf32>
    %59 = vector.extract_strided_slice %38 {offsets = [0, 768], sizes = [4, 256], strides = [1, 1]} : vector<4x1024xf32> to vector<4x256xf32>
    %60 = vector.broadcast %3 : vector<1x256xf32> to vector<4x256xf32>
    %61 = arith.addf %59, %60 : vector<4x256xf32>
    %62 = arith.mulf %47, %61 : vector<4x256xf32>
    %63 = arith.addf %58, %62 : vector<4x256xf32>
    %64 = math.tanh %63 : vector<4x256xf32>
    %cst_26 = arith.constant 0.000000e+00 : f32
    %65 = vector.broadcast %cst_26 : f32 to vector<4x1xf32>
    %66 = arith.cmpf ogt, %5, %65 : vector<4x1xf32>
    %67 = arith.extui %66 : vector<4x1xi1> to vector<4x1xi32>
    %68 = arith.sitofp %67 : vector<4x1xi32> to vector<4x1xf32>
    %cst_27 = arith.constant 0.000000e+00 : f32
    %69 = vector.broadcast %cst_27 : f32 to vector<4x1xf32>
    %70 = vector.shape_cast %8 : vector<1x256xi1> to vector<1x256xi1>
    %71 = vector.broadcast %70 : vector<1x256xi1> to vector<4x256xi1>
    %72 = vector.shape_cast %68 : vector<4x1xf32> to vector<4x1xf32>
    %73 = vector.broadcast %72 : vector<4x1xf32> to vector<4x256xf32>
    %74 = vector.shape_cast %69 : vector<4x1xf32> to vector<4x1xf32>
    %75 = vector.broadcast %74 : vector<4x1xf32> to vector<4x256xf32>
    %76 = arith.select %71, %73, %75 : vector<4x256xi1>, vector<4x256xf32>
    %cst_28 = arith.constant 1.000000e+00 : f32
    %77 = vector.broadcast %cst_28 : f32 to vector<4x256xf32>
    %78 = arith.subf %77, %55 : vector<4x256xf32>
    %79 = arith.mulf %78, %64 : vector<4x256xf32>
    %80 = arith.mulf %55, %37 : vector<4x256xf32>
    %81 = arith.addf %79, %80 : vector<4x256xf32>
    %82 = arith.mulf %76, %81 : vector<4x256xf32>
    %cst_29 = arith.constant 1.000000e+00 : f32
    %83 = vector.broadcast %cst_29 : f32 to vector<4x256xf32>
    %84 = arith.subf %83, %76 : vector<4x256xf32>
    %85 = arith.mulf %84, %37 : vector<4x256xf32>
    %86 = arith.addf %82, %85 : vector<4x256xf32>
    %87 = arith.truncf %86 : vector<4x256xf32> to vector<4x256xbf16>
    %cst_30 = arith.constant dense<0.000000e+00> : vector<4x1024xf32>
    %88 = tpu.matmul %87, %4, %cst_30 {dimension_numbers = #tpu.dot_dimension_numbers<[1], [0], [0], [1], [0, 0, 1, 1], [], []>} : vector<4x256xbf16>, vector<256x1024xbf16>, vector<4x1024xf32> -> vector<4x1024xf32>
    %89 = vector.extract_strided_slice %36 {offsets = [4, 0], sizes = [4, 768], strides = [1, 1]} : vector<32x768xf32> to vector<4x768xf32>
    %90 = vector.extract_strided_slice %89 {offsets = [0, 0], sizes = [4, 256], strides = [1, 1]} : vector<4x768xf32> to vector<4x256xf32>
    %91 = vector.extract_strided_slice %88 {offsets = [0, 0], sizes = [4, 256], strides = [1, 1]} : vector<4x1024xf32> to vector<4x256xf32>
    %92 = arith.addf %90, %91 : vector<4x256xf32>
    %93 = arith.negf %92 : vector<4x256xf32>
    %94 = math.exp %93 : vector<4x256xf32>
    %cst_31 = arith.constant 1.000000e+00 : f32
    %95 = vector.broadcast %cst_31 : f32 to vector<4x256xf32>
    %96 = arith.addf %95, %94 : vector<4x256xf32>
    %97 = arith.divf %95, %96 : vector<4x256xf32>
    %98 = vector.extract_strided_slice %89 {offsets = [0, 256], sizes = [4, 256], strides = [1, 1]} : vector<4x768xf32> to vector<4x256xf32>
    %99 = vector.extract_strided_slice %88 {offsets = [0, 256], sizes = [4, 256], strides = [1, 1]} : vector<4x1024xf32> to vector<4x256xf32>
    %100 = arith.addf %98, %99 : vector<4x256xf32>
    %101 = arith.negf %100 : vector<4x256xf32>
    %102 = math.exp %101 : vector<4x256xf32>
    %cst_32 = arith.constant 1.000000e+00 : f32
    %103 = vector.broadcast %cst_32 : f32 to vector<4x256xf32>
    %104 = arith.addf %103, %102 : vector<4x256xf32>
    %105 = arith.divf %103, %104 : vector<4x256xf32>
    %106 = vector.extract_strided_slice %89 {offsets = [0, 512], sizes = [4, 256], strides = [1, 1]} : vector<4x768xf32> to vector<4x256xf32>
    %107 = vector.extract_strided_slice %88 {offsets = [0, 512], sizes = [4, 256], strides = [1, 1]} : vector<4x1024xf32> to vector<4x256xf32>
    %108 = arith.addf %106, %107 : vector<4x256xf32>
    %109 = vector.extract_strided_slice %88 {offsets = [0, 768], sizes = [4, 256], strides = [1, 1]} : vector<4x1024xf32> to vector<4x256xf32>
    %110 = vector.broadcast %3 : vector<1x256xf32> to vector<4x256xf32>
    %111 = arith.addf %109, %110 : vector<4x256xf32>
    %112 = arith.mulf %97, %111 : vector<4x256xf32>
    %113 = arith.addf %108, %112 : vector<4x256xf32>
    %114 = math.tanh %113 : vector<4x256xf32>
    %cst_33 = arith.constant 1.000000e+00 : f32
    %115 = vector.broadcast %cst_33 : f32 to vector<4x1xf32>
    %116 = arith.cmpf ogt, %5, %115 : vector<4x1xf32>
    %117 = arith.extui %116 : vector<4x1xi1> to vector<4x1xi32>
    %118 = arith.sitofp %117 : vector<4x1xi32> to vector<4x1xf32>
    %cst_34 = arith.constant 0.000000e+00 : f32
    %119 = vector.broadcast %cst_34 : f32 to vector<4x1xf32>
    %120 = arith.cmpf ogt, %5, %119 : vector<4x1xf32>
    %121 = arith.extui %120 : vector<4x1xi1> to vector<4x1xi32>
    %122 = arith.sitofp %121 : vector<4x1xi32> to vector<4x1xf32>
    %123 = vector.shape_cast %8 : vector<1x256xi1> to vector<1x256xi1>
    %124 = vector.broadcast %123 : vector<1x256xi1> to vector<4x256xi1>
    %125 = vector.shape_cast %118 : vector<4x1xf32> to vector<4x1xf32>
    %126 = vector.broadcast %125 : vector<4x1xf32> to vector<4x256xf32>
    %127 = vector.shape_cast %122 : vector<4x1xf32> to vector<4x1xf32>
    %128 = vector.broadcast %127 : vector<4x1xf32> to vector<4x256xf32>
    %129 = arith.select %124, %126, %128 : vector<4x256xi1>, vector<4x256xf32>
    %cst_35 = arith.constant 1.000000e+00 : f32
    %130 = vector.broadcast %cst_35 : f32 to vector<4x256xf32>
    %131 = arith.subf %130, %105 : vector<4x256xf32>
    %132 = arith.mulf %131, %114 : vector<4x256xf32>
    %133 = arith.mulf %105, %86 : vector<4x256xf32>
    %134 = arith.addf %132, %133 : vector<4x256xf32>
    %135 = arith.mulf %129, %134 : vector<4x256xf32>
    %cst_36 = arith.constant 1.000000e+00 : f32
    %136 = vector.broadcast %cst_36 : f32 to vector<4x256xf32>
    %137 = arith.subf %136, %129 : vector<4x256xf32>
    %138 = arith.mulf %137, %86 : vector<4x256xf32>
    %139 = arith.addf %135, %138 : vector<4x256xf32>
    %140 = arith.truncf %139 : vector<4x256xf32> to vector<4x256xbf16>
    %cst_37 = arith.constant dense<0.000000e+00> : vector<4x1024xf32>
    %141 = tpu.matmul %140, %4, %cst_37 {dimension_numbers = #tpu.dot_dimension_numbers<[1], [0], [0], [1], [0, 0, 1, 1], [], []>} : vector<4x256xbf16>, vector<256x1024xbf16>, vector<4x1024xf32> -> vector<4x1024xf32>
    %142 = vector.extract_strided_slice %36 {offsets = [8, 0], sizes = [4, 768], strides = [1, 1]} : vector<32x768xf32> to vector<4x768xf32>
    %143 = vector.extract_strided_slice %142 {offsets = [0, 0], sizes = [4, 256], strides = [1, 1]} : vector<4x768xf32> to vector<4x256xf32>
    %144 = vector.extract_strided_slice %141 {offsets = [0, 0], sizes = [4, 256], strides = [1, 1]} : vector<4x1024xf32> to vector<4x256xf32>
    %145 = arith.addf %143, %144 : vector<4x256xf32>
    %146 = arith.negf %145 : vector<4x256xf32>
    %147 = math.exp %146 : vector<4x256xf32>
    %cst_38 = arith.constant 1.000000e+00 : f32
    %148 = vector.broadcast %cst_38 : f32 to vector<4x256xf32>
    %149 = arith.addf %148, %147 : vector<4x256xf32>
    %150 = arith.divf %148, %149 : vector<4x256xf32>
    %151 = vector.extract_strided_slice %142 {offsets = [0, 256], sizes = [4, 256], strides = [1, 1]} : vector<4x768xf32> to vector<4x256xf32>
    %152 = vector.extract_strided_slice %141 {offsets = [0, 256], sizes = [4, 256], strides = [1, 1]} : vector<4x1024xf32> to vector<4x256xf32>
    %153 = arith.addf %151, %152 : vector<4x256xf32>
    %154 = arith.negf %153 : vector<4x256xf32>
    %155 = math.exp %154 : vector<4x256xf32>
    %cst_39 = arith.constant 1.000000e+00 : f32
    %156 = vector.broadcast %cst_39 : f32 to vector<4x256xf32>
    %157 = arith.addf %156, %155 : vector<4x256xf32>
    %158 = arith.divf %156, %157 : vector<4x256xf32>
    %159 = vector.extract_strided_slice %142 {offsets = [0, 512], sizes = [4, 256], strides = [1, 1]} : vector<4x768xf32> to vector<4x256xf32>
    %160 = vector.extract_strided_slice %141 {offsets = [0, 512], sizes = [4, 256], strides = [1, 1]} : vector<4x1024xf32> to vector<4x256xf32>
    %161 = arith.addf %159, %160 : vector<4x256xf32>
    %162 = vector.extract_strided_slice %141 {offsets = [0, 768], sizes = [4, 256], strides = [1, 1]} : vector<4x1024xf32> to vector<4x256xf32>
    %163 = vector.broadcast %3 : vector<1x256xf32> to vector<4x256xf32>
    %164 = arith.addf %162, %163 : vector<4x256xf32>
    %165 = arith.mulf %150, %164 : vector<4x256xf32>
    %166 = arith.addf %161, %165 : vector<4x256xf32>
    %167 = math.tanh %166 : vector<4x256xf32>
    %cst_40 = arith.constant 2.000000e+00 : f32
    %168 = vector.broadcast %cst_40 : f32 to vector<4x1xf32>
    %169 = arith.cmpf ogt, %5, %168 : vector<4x1xf32>
    %170 = arith.extui %169 : vector<4x1xi1> to vector<4x1xi32>
    %171 = arith.sitofp %170 : vector<4x1xi32> to vector<4x1xf32>
    %cst_41 = arith.constant 1.000000e+00 : f32
    %172 = vector.broadcast %cst_41 : f32 to vector<4x1xf32>
    %173 = arith.cmpf ogt, %5, %172 : vector<4x1xf32>
    %174 = arith.extui %173 : vector<4x1xi1> to vector<4x1xi32>
    %175 = arith.sitofp %174 : vector<4x1xi32> to vector<4x1xf32>
    %176 = vector.shape_cast %8 : vector<1x256xi1> to vector<1x256xi1>
    %177 = vector.broadcast %176 : vector<1x256xi1> to vector<4x256xi1>
    %178 = vector.shape_cast %171 : vector<4x1xf32> to vector<4x1xf32>
    %179 = vector.broadcast %178 : vector<4x1xf32> to vector<4x256xf32>
    %180 = vector.shape_cast %175 : vector<4x1xf32> to vector<4x1xf32>
    %181 = vector.broadcast %180 : vector<4x1xf32> to vector<4x256xf32>
    %182 = arith.select %177, %179, %181 : vector<4x256xi1>, vector<4x256xf32>
    %cst_42 = arith.constant 1.000000e+00 : f32
    %183 = vector.broadcast %cst_42 : f32 to vector<4x256xf32>
    %184 = arith.subf %183, %158 : vector<4x256xf32>
    %185 = arith.mulf %184, %167 : vector<4x256xf32>
    %186 = arith.mulf %158, %139 : vector<4x256xf32>
    %187 = arith.addf %185, %186 : vector<4x256xf32>
    %188 = arith.mulf %182, %187 : vector<4x256xf32>
    %cst_43 = arith.constant 1.000000e+00 : f32
    %189 = vector.broadcast %cst_43 : f32 to vector<4x256xf32>
    %190 = arith.subf %189, %182 : vector<4x256xf32>
    %191 = arith.mulf %190, %139 : vector<4x256xf32>
    %192 = arith.addf %188, %191 : vector<4x256xf32>
    %193 = arith.truncf %192 : vector<4x256xf32> to vector<4x256xbf16>
    %cst_44 = arith.constant dense<0.000000e+00> : vector<4x1024xf32>
    %194 = tpu.matmul %193, %4, %cst_44 {dimension_numbers = #tpu.dot_dimension_numbers<[1], [0], [0], [1], [0, 0, 1, 1], [], []>} : vector<4x256xbf16>, vector<256x1024xbf16>, vector<4x1024xf32> -> vector<4x1024xf32>
    %195 = vector.extract_strided_slice %36 {offsets = [12, 0], sizes = [4, 768], strides = [1, 1]} : vector<32x768xf32> to vector<4x768xf32>
    %196 = vector.extract_strided_slice %195 {offsets = [0, 0], sizes = [4, 256], strides = [1, 1]} : vector<4x768xf32> to vector<4x256xf32>
    %197 = vector.extract_strided_slice %194 {offsets = [0, 0], sizes = [4, 256], strides = [1, 1]} : vector<4x1024xf32> to vector<4x256xf32>
    %198 = arith.addf %196, %197 : vector<4x256xf32>
    %199 = arith.negf %198 : vector<4x256xf32>
    %200 = math.exp %199 : vector<4x256xf32>
    %cst_45 = arith.constant 1.000000e+00 : f32
    %201 = vector.broadcast %cst_45 : f32 to vector<4x256xf32>
    %202 = arith.addf %201, %200 : vector<4x256xf32>
    %203 = arith.divf %201, %202 : vector<4x256xf32>
    %204 = vector.extract_strided_slice %195 {offsets = [0, 256], sizes = [4, 256], strides = [1, 1]} : vector<4x768xf32> to vector<4x256xf32>
    %205 = vector.extract_strided_slice %194 {offsets = [0, 256], sizes = [4, 256], strides = [1, 1]} : vector<4x1024xf32> to vector<4x256xf32>
    %206 = arith.addf %204, %205 : vector<4x256xf32>
    %207 = arith.negf %206 : vector<4x256xf32>
    %208 = math.exp %207 : vector<4x256xf32>
    %cst_46 = arith.constant 1.000000e+00 : f32
    %209 = vector.broadcast %cst_46 : f32 to vector<4x256xf32>
    %210 = arith.addf %209, %208 : vector<4x256xf32>
    %211 = arith.divf %209, %210 : vector<4x256xf32>
    %212 = vector.extract_strided_slice %195 {offsets = [0, 512], sizes = [4, 256], strides = [1, 1]} : vector<4x768xf32> to vector<4x256xf32>
    %213 = vector.extract_strided_slice %194 {offsets = [0, 512], sizes = [4, 256], strides = [1, 1]} : vector<4x1024xf32> to vector<4x256xf32>
    %214 = arith.addf %212, %213 : vector<4x256xf32>
    %215 = vector.extract_strided_slice %194 {offsets = [0, 768], sizes = [4, 256], strides = [1, 1]} : vector<4x1024xf32> to vector<4x256xf32>
    %216 = vector.broadcast %3 : vector<1x256xf32> to vector<4x256xf32>
    %217 = arith.addf %215, %216 : vector<4x256xf32>
    %218 = arith.mulf %203, %217 : vector<4x256xf32>
    %219 = arith.addf %214, %218 : vector<4x256xf32>
    %220 = math.tanh %219 : vector<4x256xf32>
    %cst_47 = arith.constant 3.000000e+00 : f32
    %221 = vector.broadcast %cst_47 : f32 to vector<4x1xf32>
    %222 = arith.cmpf ogt, %5, %221 : vector<4x1xf32>
    %223 = arith.extui %222 : vector<4x1xi1> to vector<4x1xi32>
    %224 = arith.sitofp %223 : vector<4x1xi32> to vector<4x1xf32>
    %cst_48 = arith.constant 2.000000e+00 : f32
    %225 = vector.broadcast %cst_48 : f32 to vector<4x1xf32>
    %226 = arith.cmpf ogt, %5, %225 : vector<4x1xf32>
    %227 = arith.extui %226 : vector<4x1xi1> to vector<4x1xi32>
    %228 = arith.sitofp %227 : vector<4x1xi32> to vector<4x1xf32>
    %229 = vector.shape_cast %8 : vector<1x256xi1> to vector<1x256xi1>
    %230 = vector.broadcast %229 : vector<1x256xi1> to vector<4x256xi1>
    %231 = vector.shape_cast %224 : vector<4x1xf32> to vector<4x1xf32>
    %232 = vector.broadcast %231 : vector<4x1xf32> to vector<4x256xf32>
    %233 = vector.shape_cast %228 : vector<4x1xf32> to vector<4x1xf32>
    %234 = vector.broadcast %233 : vector<4x1xf32> to vector<4x256xf32>
    %235 = arith.select %230, %232, %234 : vector<4x256xi1>, vector<4x256xf32>
    %cst_49 = arith.constant 1.000000e+00 : f32
    %236 = vector.broadcast %cst_49 : f32 to vector<4x256xf32>
    %237 = arith.subf %236, %211 : vector<4x256xf32>
    %238 = arith.mulf %237, %220 : vector<4x256xf32>
    %239 = arith.mulf %211, %192 : vector<4x256xf32>
    %240 = arith.addf %238, %239 : vector<4x256xf32>
    %241 = arith.mulf %235, %240 : vector<4x256xf32>
    %cst_50 = arith.constant 1.000000e+00 : f32
    %242 = vector.broadcast %cst_50 : f32 to vector<4x256xf32>
    %243 = arith.subf %242, %235 : vector<4x256xf32>
    %244 = arith.mulf %243, %192 : vector<4x256xf32>
    %245 = arith.addf %241, %244 : vector<4x256xf32>
    %246 = arith.truncf %245 : vector<4x256xf32> to vector<4x256xbf16>
    %cst_51 = arith.constant dense<0.000000e+00> : vector<4x1024xf32>
    %247 = tpu.matmul %246, %4, %cst_51 {dimension_numbers = #tpu.dot_dimension_numbers<[1], [0], [0], [1], [0, 0, 1, 1], [], []>} : vector<4x256xbf16>, vector<256x1024xbf16>, vector<4x1024xf32> -> vector<4x1024xf32>
    %248 = vector.extract_strided_slice %36 {offsets = [16, 0], sizes = [4, 768], strides = [1, 1]} : vector<32x768xf32> to vector<4x768xf32>
    %249 = vector.extract_strided_slice %248 {offsets = [0, 0], sizes = [4, 256], strides = [1, 1]} : vector<4x768xf32> to vector<4x256xf32>
    %250 = vector.extract_strided_slice %247 {offsets = [0, 0], sizes = [4, 256], strides = [1, 1]} : vector<4x1024xf32> to vector<4x256xf32>
    %251 = arith.addf %249, %250 : vector<4x256xf32>
    %252 = arith.negf %251 : vector<4x256xf32>
    %253 = math.exp %252 : vector<4x256xf32>
    %cst_52 = arith.constant 1.000000e+00 : f32
    %254 = vector.broadcast %cst_52 : f32 to vector<4x256xf32>
    %255 = arith.addf %254, %253 : vector<4x256xf32>
    %256 = arith.divf %254, %255 : vector<4x256xf32>
    %257 = vector.extract_strided_slice %248 {offsets = [0, 256], sizes = [4, 256], strides = [1, 1]} : vector<4x768xf32> to vector<4x256xf32>
    %258 = vector.extract_strided_slice %247 {offsets = [0, 256], sizes = [4, 256], strides = [1, 1]} : vector<4x1024xf32> to vector<4x256xf32>
    %259 = arith.addf %257, %258 : vector<4x256xf32>
    %260 = arith.negf %259 : vector<4x256xf32>
    %261 = math.exp %260 : vector<4x256xf32>
    %cst_53 = arith.constant 1.000000e+00 : f32
    %262 = vector.broadcast %cst_53 : f32 to vector<4x256xf32>
    %263 = arith.addf %262, %261 : vector<4x256xf32>
    %264 = arith.divf %262, %263 : vector<4x256xf32>
    %265 = vector.extract_strided_slice %248 {offsets = [0, 512], sizes = [4, 256], strides = [1, 1]} : vector<4x768xf32> to vector<4x256xf32>
    %266 = vector.extract_strided_slice %247 {offsets = [0, 512], sizes = [4, 256], strides = [1, 1]} : vector<4x1024xf32> to vector<4x256xf32>
    %267 = arith.addf %265, %266 : vector<4x256xf32>
    %268 = vector.extract_strided_slice %247 {offsets = [0, 768], sizes = [4, 256], strides = [1, 1]} : vector<4x1024xf32> to vector<4x256xf32>
    %269 = vector.broadcast %3 : vector<1x256xf32> to vector<4x256xf32>
    %270 = arith.addf %268, %269 : vector<4x256xf32>
    %271 = arith.mulf %256, %270 : vector<4x256xf32>
    %272 = arith.addf %267, %271 : vector<4x256xf32>
    %273 = math.tanh %272 : vector<4x256xf32>
    %cst_54 = arith.constant 4.000000e+00 : f32
    %274 = vector.broadcast %cst_54 : f32 to vector<4x1xf32>
    %275 = arith.cmpf ogt, %5, %274 : vector<4x1xf32>
    %276 = arith.extui %275 : vector<4x1xi1> to vector<4x1xi32>
    %277 = arith.sitofp %276 : vector<4x1xi32> to vector<4x1xf32>
    %cst_55 = arith.constant 3.000000e+00 : f32
    %278 = vector.broadcast %cst_55 : f32 to vector<4x1xf32>
    %279 = arith.cmpf ogt, %5, %278 : vector<4x1xf32>
    %280 = arith.extui %279 : vector<4x1xi1> to vector<4x1xi32>
    %281 = arith.sitofp %280 : vector<4x1xi32> to vector<4x1xf32>
    %282 = vector.shape_cast %8 : vector<1x256xi1> to vector<1x256xi1>
    %283 = vector.broadcast %282 : vector<1x256xi1> to vector<4x256xi1>
    %284 = vector.shape_cast %277 : vector<4x1xf32> to vector<4x1xf32>
    %285 = vector.broadcast %284 : vector<4x1xf32> to vector<4x256xf32>
    %286 = vector.shape_cast %281 : vector<4x1xf32> to vector<4x1xf32>
    %287 = vector.broadcast %286 : vector<4x1xf32> to vector<4x256xf32>
    %288 = arith.select %283, %285, %287 : vector<4x256xi1>, vector<4x256xf32>
    %cst_56 = arith.constant 1.000000e+00 : f32
    %289 = vector.broadcast %cst_56 : f32 to vector<4x256xf32>
    %290 = arith.subf %289, %264 : vector<4x256xf32>
    %291 = arith.mulf %290, %273 : vector<4x256xf32>
    %292 = arith.mulf %264, %245 : vector<4x256xf32>
    %293 = arith.addf %291, %292 : vector<4x256xf32>
    %294 = arith.mulf %288, %293 : vector<4x256xf32>
    %cst_57 = arith.constant 1.000000e+00 : f32
    %295 = vector.broadcast %cst_57 : f32 to vector<4x256xf32>
    %296 = arith.subf %295, %288 : vector<4x256xf32>
    %297 = arith.mulf %296, %245 : vector<4x256xf32>
    %298 = arith.addf %294, %297 : vector<4x256xf32>
    %299 = arith.truncf %298 : vector<4x256xf32> to vector<4x256xbf16>
    %cst_58 = arith.constant dense<0.000000e+00> : vector<4x1024xf32>
    %300 = tpu.matmul %299, %4, %cst_58 {dimension_numbers = #tpu.dot_dimension_numbers<[1], [0], [0], [1], [0, 0, 1, 1], [], []>} : vector<4x256xbf16>, vector<256x1024xbf16>, vector<4x1024xf32> -> vector<4x1024xf32>
    %301 = vector.extract_strided_slice %36 {offsets = [20, 0], sizes = [4, 768], strides = [1, 1]} : vector<32x768xf32> to vector<4x768xf32>
    %302 = vector.extract_strided_slice %301 {offsets = [0, 0], sizes = [4, 256], strides = [1, 1]} : vector<4x768xf32> to vector<4x256xf32>
    %303 = vector.extract_strided_slice %300 {offsets = [0, 0], sizes = [4, 256], strides = [1, 1]} : vector<4x1024xf32> to vector<4x256xf32>
    %304 = arith.addf %302, %303 : vector<4x256xf32>
    %305 = arith.negf %304 : vector<4x256xf32>
    %306 = math.exp %305 : vector<4x256xf32>
    %cst_59 = arith.constant 1.000000e+00 : f32
    %307 = vector.broadcast %cst_59 : f32 to vector<4x256xf32>
    %308 = arith.addf %307, %306 : vector<4x256xf32>
    %309 = arith.divf %307, %308 : vector<4x256xf32>
    %310 = vector.extract_strided_slice %301 {offsets = [0, 256], sizes = [4, 256], strides = [1, 1]} : vector<4x768xf32> to vector<4x256xf32>
    %311 = vector.extract_strided_slice %300 {offsets = [0, 256], sizes = [4, 256], strides = [1, 1]} : vector<4x1024xf32> to vector<4x256xf32>
    %312 = arith.addf %310, %311 : vector<4x256xf32>
    %313 = arith.negf %312 : vector<4x256xf32>
    %314 = math.exp %313 : vector<4x256xf32>
    %cst_60 = arith.constant 1.000000e+00 : f32
    %315 = vector.broadcast %cst_60 : f32 to vector<4x256xf32>
    %316 = arith.addf %315, %314 : vector<4x256xf32>
    %317 = arith.divf %315, %316 : vector<4x256xf32>
    %318 = vector.extract_strided_slice %301 {offsets = [0, 512], sizes = [4, 256], strides = [1, 1]} : vector<4x768xf32> to vector<4x256xf32>
    %319 = vector.extract_strided_slice %300 {offsets = [0, 512], sizes = [4, 256], strides = [1, 1]} : vector<4x1024xf32> to vector<4x256xf32>
    %320 = arith.addf %318, %319 : vector<4x256xf32>
    %321 = vector.extract_strided_slice %300 {offsets = [0, 768], sizes = [4, 256], strides = [1, 1]} : vector<4x1024xf32> to vector<4x256xf32>
    %322 = vector.broadcast %3 : vector<1x256xf32> to vector<4x256xf32>
    %323 = arith.addf %321, %322 : vector<4x256xf32>
    %324 = arith.mulf %309, %323 : vector<4x256xf32>
    %325 = arith.addf %320, %324 : vector<4x256xf32>
    %326 = math.tanh %325 : vector<4x256xf32>
    %cst_61 = arith.constant 5.000000e+00 : f32
    %327 = vector.broadcast %cst_61 : f32 to vector<4x1xf32>
    %328 = arith.cmpf ogt, %5, %327 : vector<4x1xf32>
    %329 = arith.extui %328 : vector<4x1xi1> to vector<4x1xi32>
    %330 = arith.sitofp %329 : vector<4x1xi32> to vector<4x1xf32>
    %cst_62 = arith.constant 4.000000e+00 : f32
    %331 = vector.broadcast %cst_62 : f32 to vector<4x1xf32>
    %332 = arith.cmpf ogt, %5, %331 : vector<4x1xf32>
    %333 = arith.extui %332 : vector<4x1xi1> to vector<4x1xi32>
    %334 = arith.sitofp %333 : vector<4x1xi32> to vector<4x1xf32>
    %335 = vector.shape_cast %8 : vector<1x256xi1> to vector<1x256xi1>
    %336 = vector.broadcast %335 : vector<1x256xi1> to vector<4x256xi1>
    %337 = vector.shape_cast %330 : vector<4x1xf32> to vector<4x1xf32>
    %338 = vector.broadcast %337 : vector<4x1xf32> to vector<4x256xf32>
    %339 = vector.shape_cast %334 : vector<4x1xf32> to vector<4x1xf32>
    %340 = vector.broadcast %339 : vector<4x1xf32> to vector<4x256xf32>
    %341 = arith.select %336, %338, %340 : vector<4x256xi1>, vector<4x256xf32>
    %cst_63 = arith.constant 1.000000e+00 : f32
    %342 = vector.broadcast %cst_63 : f32 to vector<4x256xf32>
    %343 = arith.subf %342, %317 : vector<4x256xf32>
    %344 = arith.mulf %343, %326 : vector<4x256xf32>
    %345 = arith.mulf %317, %298 : vector<4x256xf32>
    %346 = arith.addf %344, %345 : vector<4x256xf32>
    %347 = arith.mulf %341, %346 : vector<4x256xf32>
    %cst_64 = arith.constant 1.000000e+00 : f32
    %348 = vector.broadcast %cst_64 : f32 to vector<4x256xf32>
    %349 = arith.subf %348, %341 : vector<4x256xf32>
    %350 = arith.mulf %349, %298 : vector<4x256xf32>
    %351 = arith.addf %347, %350 : vector<4x256xf32>
    %352 = arith.truncf %351 : vector<4x256xf32> to vector<4x256xbf16>
    %cst_65 = arith.constant dense<0.000000e+00> : vector<4x1024xf32>
    %353 = tpu.matmul %352, %4, %cst_65 {dimension_numbers = #tpu.dot_dimension_numbers<[1], [0], [0], [1], [0, 0, 1, 1], [], []>} : vector<4x256xbf16>, vector<256x1024xbf16>, vector<4x1024xf32> -> vector<4x1024xf32>
    %354 = vector.extract_strided_slice %36 {offsets = [24, 0], sizes = [4, 768], strides = [1, 1]} : vector<32x768xf32> to vector<4x768xf32>
    %355 = vector.extract_strided_slice %354 {offsets = [0, 0], sizes = [4, 256], strides = [1, 1]} : vector<4x768xf32> to vector<4x256xf32>
    %356 = vector.extract_strided_slice %353 {offsets = [0, 0], sizes = [4, 256], strides = [1, 1]} : vector<4x1024xf32> to vector<4x256xf32>
    %357 = arith.addf %355, %356 : vector<4x256xf32>
    %358 = arith.negf %357 : vector<4x256xf32>
    %359 = math.exp %358 : vector<4x256xf32>
    %cst_66 = arith.constant 1.000000e+00 : f32
    %360 = vector.broadcast %cst_66 : f32 to vector<4x256xf32>
    %361 = arith.addf %360, %359 : vector<4x256xf32>
    %362 = arith.divf %360, %361 : vector<4x256xf32>
    %363 = vector.extract_strided_slice %354 {offsets = [0, 256], sizes = [4, 256], strides = [1, 1]} : vector<4x768xf32> to vector<4x256xf32>
    %364 = vector.extract_strided_slice %353 {offsets = [0, 256], sizes = [4, 256], strides = [1, 1]} : vector<4x1024xf32> to vector<4x256xf32>
    %365 = arith.addf %363, %364 : vector<4x256xf32>
    %366 = arith.negf %365 : vector<4x256xf32>
    %367 = math.exp %366 : vector<4x256xf32>
    %cst_67 = arith.constant 1.000000e+00 : f32
    %368 = vector.broadcast %cst_67 : f32 to vector<4x256xf32>
    %369 = arith.addf %368, %367 : vector<4x256xf32>
    %370 = arith.divf %368, %369 : vector<4x256xf32>
    %371 = vector.extract_strided_slice %354 {offsets = [0, 512], sizes = [4, 256], strides = [1, 1]} : vector<4x768xf32> to vector<4x256xf32>
    %372 = vector.extract_strided_slice %353 {offsets = [0, 512], sizes = [4, 256], strides = [1, 1]} : vector<4x1024xf32> to vector<4x256xf32>
    %373 = arith.addf %371, %372 : vector<4x256xf32>
    %374 = vector.extract_strided_slice %353 {offsets = [0, 768], sizes = [4, 256], strides = [1, 1]} : vector<4x1024xf32> to vector<4x256xf32>
    %375 = vector.broadcast %3 : vector<1x256xf32> to vector<4x256xf32>
    %376 = arith.addf %374, %375 : vector<4x256xf32>
    %377 = arith.mulf %362, %376 : vector<4x256xf32>
    %378 = arith.addf %373, %377 : vector<4x256xf32>
    %379 = math.tanh %378 : vector<4x256xf32>
    %cst_68 = arith.constant 6.000000e+00 : f32
    %380 = vector.broadcast %cst_68 : f32 to vector<4x1xf32>
    %381 = arith.cmpf ogt, %5, %380 : vector<4x1xf32>
    %382 = arith.extui %381 : vector<4x1xi1> to vector<4x1xi32>
    %383 = arith.sitofp %382 : vector<4x1xi32> to vector<4x1xf32>
    %cst_69 = arith.constant 5.000000e+00 : f32
    %384 = vector.broadcast %cst_69 : f32 to vector<4x1xf32>
    %385 = arith.cmpf ogt, %5, %384 : vector<4x1xf32>
    %386 = arith.extui %385 : vector<4x1xi1> to vector<4x1xi32>
    %387 = arith.sitofp %386 : vector<4x1xi32> to vector<4x1xf32>
    %388 = vector.shape_cast %8 : vector<1x256xi1> to vector<1x256xi1>
    %389 = vector.broadcast %388 : vector<1x256xi1> to vector<4x256xi1>
    %390 = vector.shape_cast %383 : vector<4x1xf32> to vector<4x1xf32>
    %391 = vector.broadcast %390 : vector<4x1xf32> to vector<4x256xf32>
    %392 = vector.shape_cast %387 : vector<4x1xf32> to vector<4x1xf32>
    %393 = vector.broadcast %392 : vector<4x1xf32> to vector<4x256xf32>
    %394 = arith.select %389, %391, %393 : vector<4x256xi1>, vector<4x256xf32>
    %cst_70 = arith.constant 1.000000e+00 : f32
    %395 = vector.broadcast %cst_70 : f32 to vector<4x256xf32>
    %396 = arith.subf %395, %370 : vector<4x256xf32>
    %397 = arith.mulf %396, %379 : vector<4x256xf32>
    %398 = arith.mulf %370, %351 : vector<4x256xf32>
    %399 = arith.addf %397, %398 : vector<4x256xf32>
    %400 = arith.mulf %394, %399 : vector<4x256xf32>
    %cst_71 = arith.constant 1.000000e+00 : f32
    %401 = vector.broadcast %cst_71 : f32 to vector<4x256xf32>
    %402 = arith.subf %401, %394 : vector<4x256xf32>
    %403 = arith.mulf %402, %351 : vector<4x256xf32>
    %404 = arith.addf %400, %403 : vector<4x256xf32>
    %405 = arith.truncf %404 : vector<4x256xf32> to vector<4x256xbf16>
    %cst_72 = arith.constant dense<0.000000e+00> : vector<4x1024xf32>
    %406 = tpu.matmul %405, %4, %cst_72 {dimension_numbers = #tpu.dot_dimension_numbers<[1], [0], [0], [1], [0, 0, 1, 1], [], []>} : vector<4x256xbf16>, vector<256x1024xbf16>, vector<4x1024xf32> -> vector<4x1024xf32>
    %407 = vector.extract_strided_slice %36 {offsets = [28, 0], sizes = [4, 768], strides = [1, 1]} : vector<32x768xf32> to vector<4x768xf32>
    %408 = vector.extract_strided_slice %407 {offsets = [0, 0], sizes = [4, 256], strides = [1, 1]} : vector<4x768xf32> to vector<4x256xf32>
    %409 = vector.extract_strided_slice %406 {offsets = [0, 0], sizes = [4, 256], strides = [1, 1]} : vector<4x1024xf32> to vector<4x256xf32>
    %410 = arith.addf %408, %409 : vector<4x256xf32>
    %411 = arith.negf %410 : vector<4x256xf32>
    %412 = math.exp %411 : vector<4x256xf32>
    %cst_73 = arith.constant 1.000000e+00 : f32
    %413 = vector.broadcast %cst_73 : f32 to vector<4x256xf32>
    %414 = arith.addf %413, %412 : vector<4x256xf32>
    %415 = arith.divf %413, %414 : vector<4x256xf32>
    %416 = vector.extract_strided_slice %407 {offsets = [0, 256], sizes = [4, 256], strides = [1, 1]} : vector<4x768xf32> to vector<4x256xf32>
    %417 = vector.extract_strided_slice %406 {offsets = [0, 256], sizes = [4, 256], strides = [1, 1]} : vector<4x1024xf32> to vector<4x256xf32>
    %418 = arith.addf %416, %417 : vector<4x256xf32>
    %419 = arith.negf %418 : vector<4x256xf32>
    %420 = math.exp %419 : vector<4x256xf32>
    %cst_74 = arith.constant 1.000000e+00 : f32
    %421 = vector.broadcast %cst_74 : f32 to vector<4x256xf32>
    %422 = arith.addf %421, %420 : vector<4x256xf32>
    %423 = arith.divf %421, %422 : vector<4x256xf32>
    %424 = vector.extract_strided_slice %407 {offsets = [0, 512], sizes = [4, 256], strides = [1, 1]} : vector<4x768xf32> to vector<4x256xf32>
    %425 = vector.extract_strided_slice %406 {offsets = [0, 512], sizes = [4, 256], strides = [1, 1]} : vector<4x1024xf32> to vector<4x256xf32>
    %426 = arith.addf %424, %425 : vector<4x256xf32>
    %427 = vector.extract_strided_slice %406 {offsets = [0, 768], sizes = [4, 256], strides = [1, 1]} : vector<4x1024xf32> to vector<4x256xf32>
    %428 = vector.broadcast %3 : vector<1x256xf32> to vector<4x256xf32>
    %429 = arith.addf %427, %428 : vector<4x256xf32>
    %430 = arith.mulf %415, %429 : vector<4x256xf32>
    %431 = arith.addf %426, %430 : vector<4x256xf32>
    %432 = math.tanh %431 : vector<4x256xf32>
    %cst_75 = arith.constant 7.000000e+00 : f32
    %433 = vector.broadcast %cst_75 : f32 to vector<4x1xf32>
    %434 = arith.cmpf ogt, %5, %433 : vector<4x1xf32>
    %435 = arith.extui %434 : vector<4x1xi1> to vector<4x1xi32>
    %436 = arith.sitofp %435 : vector<4x1xi32> to vector<4x1xf32>
    %cst_76 = arith.constant 6.000000e+00 : f32
    %437 = vector.broadcast %cst_76 : f32 to vector<4x1xf32>
    %438 = arith.cmpf ogt, %5, %437 : vector<4x1xf32>
    %439 = arith.extui %438 : vector<4x1xi1> to vector<4x1xi32>
    %440 = arith.sitofp %439 : vector<4x1xi32> to vector<4x1xf32>
    %441 = vector.shape_cast %8 : vector<1x256xi1> to vector<1x256xi1>
    %442 = vector.broadcast %441 : vector<1x256xi1> to vector<4x256xi1>
    %443 = vector.shape_cast %436 : vector<4x1xf32> to vector<4x1xf32>
    %444 = vector.broadcast %443 : vector<4x1xf32> to vector<4x256xf32>
    %445 = vector.shape_cast %440 : vector<4x1xf32> to vector<4x1xf32>
    %446 = vector.broadcast %445 : vector<4x1xf32> to vector<4x256xf32>
    %447 = arith.select %442, %444, %446 : vector<4x256xi1>, vector<4x256xf32>
    %cst_77 = arith.constant 1.000000e+00 : f32
    %448 = vector.broadcast %cst_77 : f32 to vector<4x256xf32>
    %449 = arith.subf %448, %423 : vector<4x256xf32>
    %450 = arith.mulf %449, %432 : vector<4x256xf32>
    %451 = arith.mulf %423, %404 : vector<4x256xf32>
    %452 = arith.addf %450, %451 : vector<4x256xf32>
    %453 = arith.mulf %447, %452 : vector<4x256xf32>
    %cst_78 = arith.constant 1.000000e+00 : f32
    %454 = vector.broadcast %cst_78 : f32 to vector<4x256xf32>
    %455 = arith.subf %454, %447 : vector<4x256xf32>
    %456 = arith.mulf %455, %404 : vector<4x256xf32>
    %457 = arith.addf %453, %456 : vector<4x256xf32>
    %458 = arith.truncf %457 : vector<4x256xf32> to vector<4x256xbf16>
    %cst_79 = arith.constant dense<0.000000e+00> : vector<4x1024xf32>
    %459 = tpu.matmul %458, %4, %cst_79 {dimension_numbers = #tpu.dot_dimension_numbers<[1], [0], [0], [1], [0, 0, 1, 1], [], []>} : vector<4x256xbf16>, vector<256x1024xbf16>, vector<4x1024xf32> -> vector<4x1024xf32>
    %460 = vector.extract_strided_slice %36 {offsets = [28, 0], sizes = [4, 768], strides = [1, 1]} : vector<32x768xf32> to vector<4x768xf32>
    %461 = vector.extract_strided_slice %460 {offsets = [0, 0], sizes = [4, 256], strides = [1, 1]} : vector<4x768xf32> to vector<4x256xf32>
    %462 = vector.extract_strided_slice %459 {offsets = [0, 0], sizes = [4, 256], strides = [1, 1]} : vector<4x1024xf32> to vector<4x256xf32>
    %463 = arith.addf %461, %462 : vector<4x256xf32>
    %464 = arith.negf %463 : vector<4x256xf32>
    %465 = math.exp %464 : vector<4x256xf32>
    %cst_80 = arith.constant 1.000000e+00 : f32
    %466 = vector.broadcast %cst_80 : f32 to vector<4x256xf32>
    %467 = arith.addf %466, %465 : vector<4x256xf32>
    %468 = arith.divf %466, %467 : vector<4x256xf32>
    %469 = vector.extract_strided_slice %460 {offsets = [0, 256], sizes = [4, 256], strides = [1, 1]} : vector<4x768xf32> to vector<4x256xf32>
    %470 = vector.extract_strided_slice %459 {offsets = [0, 256], sizes = [4, 256], strides = [1, 1]} : vector<4x1024xf32> to vector<4x256xf32>
    %471 = arith.addf %469, %470 : vector<4x256xf32>
    %472 = arith.negf %471 : vector<4x256xf32>
    %473 = math.exp %472 : vector<4x256xf32>
    %cst_81 = arith.constant 1.000000e+00 : f32
    %474 = vector.broadcast %cst_81 : f32 to vector<4x256xf32>
    %475 = arith.addf %474, %473 : vector<4x256xf32>
    %476 = arith.divf %474, %475 : vector<4x256xf32>
    %477 = vector.extract_strided_slice %460 {offsets = [0, 512], sizes = [4, 256], strides = [1, 1]} : vector<4x768xf32> to vector<4x256xf32>
    %478 = vector.extract_strided_slice %459 {offsets = [0, 512], sizes = [4, 256], strides = [1, 1]} : vector<4x1024xf32> to vector<4x256xf32>
    %479 = arith.addf %477, %478 : vector<4x256xf32>
    %480 = vector.extract_strided_slice %459 {offsets = [0, 768], sizes = [4, 256], strides = [1, 1]} : vector<4x1024xf32> to vector<4x256xf32>
    %481 = vector.broadcast %3 : vector<1x256xf32> to vector<4x256xf32>
    %482 = arith.addf %480, %481 : vector<4x256xf32>
    %483 = arith.mulf %468, %482 : vector<4x256xf32>
    %484 = arith.addf %479, %483 : vector<4x256xf32>
    %485 = math.tanh %484 : vector<4x256xf32>
    %cst_82 = arith.constant 8.000000e+00 : f32
    %486 = vector.broadcast %cst_82 : f32 to vector<4x1xf32>
    %487 = arith.cmpf ogt, %5, %486 : vector<4x1xf32>
    %488 = arith.extui %487 : vector<4x1xi1> to vector<4x1xi32>
    %489 = arith.sitofp %488 : vector<4x1xi32> to vector<4x1xf32>
    %cst_83 = arith.constant 7.000000e+00 : f32
    %490 = vector.broadcast %cst_83 : f32 to vector<4x1xf32>
    %491 = arith.cmpf ogt, %5, %490 : vector<4x1xf32>
    %492 = arith.extui %491 : vector<4x1xi1> to vector<4x1xi32>
    %493 = arith.sitofp %492 : vector<4x1xi32> to vector<4x1xf32>
    %494 = vector.shape_cast %8 : vector<1x256xi1> to vector<1x256xi1>
    %495 = vector.broadcast %494 : vector<1x256xi1> to vector<4x256xi1>
    %496 = vector.shape_cast %489 : vector<4x1xf32> to vector<4x1xf32>
    %497 = vector.broadcast %496 : vector<4x1xf32> to vector<4x256xf32>
    %498 = vector.shape_cast %493 : vector<4x1xf32> to vector<4x1xf32>
    %499 = vector.broadcast %498 : vector<4x1xf32> to vector<4x256xf32>
    %500 = arith.select %495, %497, %499 : vector<4x256xi1>, vector<4x256xf32>
    %cst_84 = arith.constant 1.000000e+00 : f32
    %501 = vector.broadcast %cst_84 : f32 to vector<4x256xf32>
    %502 = arith.subf %501, %476 : vector<4x256xf32>
    %503 = arith.mulf %502, %485 : vector<4x256xf32>
    %504 = arith.mulf %476, %457 : vector<4x256xf32>
    %505 = arith.addf %503, %504 : vector<4x256xf32>
    %506 = arith.mulf %500, %505 : vector<4x256xf32>
    %cst_85 = arith.constant 1.000000e+00 : f32
    %507 = vector.broadcast %cst_85 : f32 to vector<4x256xf32>
    %508 = arith.subf %507, %500 : vector<4x256xf32>
    %509 = arith.mulf %508, %457 : vector<4x256xf32>
    %510 = arith.addf %506, %509 : vector<4x256xf32>
    %511 = vector.extract_strided_slice %510 {offsets = [0, 128], sizes = [4, 128], strides = [1, 1]} : vector<4x256xf32> to vector<4x128xf32>
    %c0_86 = arith.constant 0 : index
    %c0_87 = arith.constant 0 : index
    %512 = vector.load %arg7[%c0_86, %c0_87] : memref<128x512xbf16, #tpu.memory_space<vmem>>, vector<128x512xbf16>
    %513 = arith.truncf %511 : vector<4x128xf32> to vector<4x128xbf16>
    %cst_88 = arith.constant dense<0.000000e+00> : vector<4x512xf32>
    %514 = tpu.matmul %513, %512, %cst_88 {dimension_numbers = #tpu.dot_dimension_numbers<[1], [0], [0], [1], [0, 0, 1, 1], [], []>} : vector<4x128xbf16>, vector<128x512xbf16>, vector<4x512xf32> -> vector<4x512xf32>
    %515 = vector.extract_strided_slice %0 {offsets = [3, 0], sizes = [1, 512], strides = [1, 1]} : vector<10x512xf32> to vector<1x512xf32>
    %516 = vector.broadcast %515 : vector<1x512xf32> to vector<4x512xf32>
    %517 = arith.addf %514, %516 : vector<4x512xf32>
    %cst_89 = arith.constant 0.000000e+00 : f32
    %518 = vector.broadcast %cst_89 : f32 to vector<4x512xf32>
    %519 = arith.maximumf %517, %518 : vector<4x512xf32>
    %c0_90 = arith.constant 0 : index
    %c0_91 = arith.constant 0 : index
    %520 = vector.load %arg8[%c0_90, %c0_91] : memref<512x128xbf16, #tpu.memory_space<vmem>>, vector<512x128xbf16>
    %521 = arith.truncf %519 : vector<4x512xf32> to vector<4x512xbf16>
    %cst_92 = arith.constant dense<0.000000e+00> : vector<4x128xf32>
    %522 = tpu.matmul %521, %520, %cst_92 {dimension_numbers = #tpu.dot_dimension_numbers<[1], [0], [0], [1], [0, 0, 1, 1], [], []>} : vector<4x512xbf16>, vector<512x128xbf16>, vector<4x128xf32> -> vector<4x128xf32>
    %523 = vector.extract_strided_slice %0 {offsets = [4, 0], sizes = [1, 128], strides = [1, 1]} : vector<10x512xf32> to vector<1x128xf32>
    %524 = vector.broadcast %523 : vector<1x128xf32> to vector<4x128xf32>
    %525 = arith.addf %522, %524 : vector<4x128xf32>
    %c0_93 = arith.constant 0 : index
    %c0_94 = arith.constant 0 : index
    %526 = vector.load %arg9[%c0_93, %c0_94] : memref<128x1024xbf16, #tpu.memory_space<vmem>>, vector<128x1024xbf16>
    %527 = arith.truncf %525 : vector<4x128xf32> to vector<4x128xbf16>
    %cst_95 = arith.constant dense<0.000000e+00> : vector<4x1024xf32>
    %528 = tpu.matmul %527, %526, %cst_95 {dimension_numbers = #tpu.dot_dimension_numbers<[1], [0], [0], [1], [0, 0, 1, 1], [], []>} : vector<4x128xbf16>, vector<128x1024xbf16>, vector<4x1024xf32> -> vector<4x1024xf32>
    %529 = vector.extract_strided_slice %528 {offsets = [0, 0], sizes = [2, 512], strides = [1, 1]} : vector<4x1024xf32> to vector<2x512xf32>
    %530 = vector.extract_strided_slice %528 {offsets = [2, 512], sizes = [2, 512], strides = [1, 1]} : vector<4x1024xf32> to vector<2x512xf32>
    %531 = arith.addf %529, %530 : vector<2x512xf32>
    %532 = vector.extract_strided_slice %0 {offsets = [5, 0], sizes = [1, 512], strides = [1, 1]} : vector<10x512xf32> to vector<1x512xf32>
    %533 = vector.broadcast %532 : vector<1x512xf32> to vector<2x512xf32>
    %534 = arith.addf %531, %533 : vector<2x512xf32>
    %535 = vector.extract_strided_slice %5 {offsets = [0, 0], sizes = [2, 1], strides = [1, 1]} : vector<4x1xf32> to vector<2x1xf32>
    %536 = vector.extract_strided_slice %0 {offsets = [8, 0], sizes = [1, 512], strides = [1, 1]} : vector<10x512xf32> to vector<1x512xf32>
    %537 = vector.broadcast %535 : vector<2x1xf32> to vector<2x512xf32>
    %538 = vector.broadcast %536 : vector<1x512xf32> to vector<2x512xf32>
    %539 = arith.mulf %537, %538 : vector<2x512xf32>
    %540 = arith.addf %534, %539 : vector<2x512xf32>
    %541 = vector.extract_strided_slice %5 {offsets = [2, 0], sizes = [2, 1], strides = [1, 1]} : vector<4x1xf32> to vector<2x1xf32>
    %542 = vector.extract_strided_slice %0 {offsets = [9, 0], sizes = [1, 512], strides = [1, 1]} : vector<10x512xf32> to vector<1x512xf32>
    %543 = vector.broadcast %541 : vector<2x1xf32> to vector<2x512xf32>
    %544 = vector.broadcast %542 : vector<1x512xf32> to vector<2x512xf32>
    %545 = arith.mulf %543, %544 : vector<2x512xf32>
    %546 = arith.addf %540, %545 : vector<2x512xf32>
    %cst_96 = arith.constant 0.000000e+00 : f32
    %547 = vector.broadcast %cst_96 : f32 to vector<2x512xf32>
    %548 = arith.maximumf %546, %547 : vector<2x512xf32>
    %c0_97 = arith.constant 0 : index
    %c0_98 = arith.constant 0 : index
    %549 = vector.load %arg10[%c0_97, %c0_98] : memref<512x512xbf16, #tpu.memory_space<vmem>>, vector<512x512xbf16>
    %550 = arith.truncf %548 : vector<2x512xf32> to vector<2x512xbf16>
    %cst_99 = arith.constant dense<0.000000e+00> : vector<2x512xf32>
    %551 = tpu.matmul %550, %549, %cst_99 {dimension_numbers = #tpu.dot_dimension_numbers<[1], [0], [0], [1], [0, 0, 1, 1], [], []>} : vector<2x512xbf16>, vector<512x512xbf16>, vector<2x512xf32> -> vector<2x512xf32>
    %552 = vector.extract_strided_slice %0 {offsets = [6, 0], sizes = [1, 512], strides = [1, 1]} : vector<10x512xf32> to vector<1x512xf32>
    %553 = vector.broadcast %552 : vector<1x512xf32> to vector<2x512xf32>
    %554 = arith.addf %551, %553 : vector<2x512xf32>
    %cst_100 = arith.constant 0.000000e+00 : f32
    %555 = vector.broadcast %cst_100 : f32 to vector<2x512xf32>
    %556 = arith.maximumf %554, %555 : vector<2x512xf32>
    %c0_101 = arith.constant 0 : index
    %c0_102 = arith.constant 0 : index
    %557 = vector.load %arg11[%c0_101, %c0_102] : memref<512x128xbf16, #tpu.memory_space<vmem>>, vector<512x128xbf16>
    %558 = arith.truncf %556 : vector<2x512xf32> to vector<2x512xbf16>
    %cst_103 = arith.constant dense<0.000000e+00> : vector<2x128xf32>
    %559 = tpu.matmul %558, %557, %cst_103 {dimension_numbers = #tpu.dot_dimension_numbers<[1], [0], [0], [1], [0, 0, 1, 1], [], []>} : vector<2x512xbf16>, vector<512x128xbf16>, vector<2x128xf32> -> vector<2x128xf32>
    %560 = vector.extract_strided_slice %0 {offsets = [7, 0], sizes = [1, 128], strides = [1, 1]} : vector<10x512xf32> to vector<1x128xf32>
    %561 = vector.broadcast %560 : vector<1x128xf32> to vector<2x128xf32>
    %562 = arith.addf %559, %561 : vector<2x128xf32>
    %563 = vector.extract_strided_slice %562 {offsets = [0, 0], sizes = [2, 2], strides = [1, 1]} : vector<2x128xf32> to vector<2x2xf32>
    %c0_104 = arith.constant 0 : index
    %c0_105 = arith.constant 0 : index
    %564 = vector.load %arg14[%c0_104, %c0_105] : memref<2x2xf32, #tpu.memory_space<vmem>>, vector<2x2xf32>
    tpu.vector_store %arg14[%c0_104, %c0_105], %563 {strides = array<i32>} : memref<2x2xf32, #tpu.memory_space<vmem>>, vector<2x2xf32>,
    return
  }
}

</mosaic_0001>

<bundles_post_ra>
// kernel: siamese_forward.1
= control target key start
LH: loop header
LB: loop body
LE: loop exit
PB: predicated region body
PF: predicated region fallthrough
CT: control target
= control target key end

     0   :  { %19 = vsyncpa [#allocation3], 0  ;;  %s11583_s0 = inlined_call_operand.vmem [shape: f32[32,16], index: 0, kind: input, shape index: {}]   ;;  %s11584_s1 = inlined_call_operand.vmem [shape: f32[4,1], index: 1, kind: input, shape index: {}]   ;;  %s11585_s2 = inlined_call_operand.vmem [shape: bf16[16,512], index: 2, kind: input, shape index: {}]   ;;  %s11586_s3 = inlined_call_operand.hbm [shape: bf16[512,512], index: 3, kind: input, shape index: {}]   ;;  %s11587_s4 = inlined_call_operand.hbm [shape: bf16[512,128], index: 4, kind: input, shape index: {}]   ;;  %s11588_s5 = inlined_call_operand.hbm [shape: bf16[128,768], index: 5, kind: input, shape index: {}]   ;;  %s11589_s6 = inlined_call_operand.hbm [shape: bf16[256,1024], index: 6, kind: input, shape index: {}]   ;;  %s11590_s7 = inlined_call_operand.hbm [shape: bf16[128,512], index: 7, kind: input, shape index: {}]   ;;  %s11591_s8 = inlined_call_operand.hbm [shape: bf16[512,128], index: 8, kind: input, shape index: {}]   ;;  %s11592_s9 = inlined_call_operand.hbm [shape: bf16[128,1024], index: 9, kind: input, shape index: {}]   ;;  %s11593_s10 = inlined_call_operand.hbm [shape: bf16[512,512], index: 10, kind: input, shape index: {}]   ;;  %s11594_s11 = inlined_call_operand.hbm [shape: bf16[512,128], index: 11, kind: input, shape index: {}]   ;;  %s11595_s12 = inlined_call_operand.vmem [shape: f32[10,512], index: 12, kind: input, shape index: {}]   ;;  %s11596_s13 = inlined_call_operand.vmem [shape: f32[2,768], index: 13, kind: input, shape index: {}]   ;;  %s11597_s14 = inlined_call_operand.hbm [shape: f32[2,2], index: 14, kind: output, shape index: {}]  }
   0x1   :  { %20 = vsyncpa [#allocation6], 0 }
   0x2   :  { %21 = vsyncpa [#allocation9], 0 }
   0x3   :  { %22 = vsyncpa [#allocation12], 0 }
   0x4   :  { %23 = vsyncpa [#allocation15], 0 }
   0x5   :  { %24 = vsyncpa [#allocation4], 0  ;;  %s9530_s29 = smov [#allocation5]  }
   0x6   :  { %s48_s30 = sshll.u32 %s9530_s29, 4  ;;  %s49_s30 = int_to_ptr.vmem [resolvable:$true] %s48_s30 }
   0x7   :  { %s9326_s15 = scalar_lea.vmem %s49_s30, 4096  ;;  %p9331_p1 = scmp.lt.s32.totalorder %s49_s30, %s49_s30 }
   0x8   :  { %p9327_p0 = scmp.ne.s32.totalorder %s49_s30, %s9326_s15  ;;  %p9332_p2 = scmp.lt.s32.totalorder %s9326_s15, %s9326_s15 }
   0xa   :  { %p9333_p3 = por %p9332_p2, %p9331_p1 }
   0xc   :  { %p9334_p4 = pnand %p9333_p3, %p9327_p0 }
   0xe   :  { %9337 = shalt.err (!%p9334_p4)
}
   0xf   :  { %s9531_s16 = smov 64   ;;  %s9532_s17 = smov 4  }
  0x10   :  { %54 = dma.hbm_to_vmem [thread:$0]  %s11587_s4, 4096, %s49_s30, [#allocation6], %s9531_s16, %s9531_s16, %s9532_s17  }
  0x11   :  { %s9533_s20 = smov [#allocation8]  }
  0x12   :  { %s72_s21 = sshll.u32 %s9533_s20, 4  ;;  %s73_s21 = int_to_ptr.vmem [resolvable:$true] %s72_s21 }
  0x13   :  { %s9346_s22 = scalar_lea.vmem %s73_s21, 16384  ;;  %p9351_p6 = scmp.lt.s32.totalorder %s73_s21, %s73_s21 }
  0x14   :  { %p9347_p5 = scmp.ne.s32.totalorder %s73_s21, %s9346_s22  ;;  %p9352_p7 = scmp.lt.s32.totalorder %s9346_s22, %s9346_s22 }
  0x16   :  { %p9353_p8 = por %p9352_p7, %p9351_p6 }
  0x18   :  { %p9354_p9 = pnand %p9353_p8, %p9347_p5 }
  0x1a   :  { %9357 = shalt.err (!%p9354_p9)
}
  0x1b   :  { %s9534_s23 = smov 512   ;;  %s9535_s24 = smov 32  }
  0x1c   :  { %78 = dma.hbm_to_vmem [thread:$0]  %s11589_s6, 16384, %s73_s21, [#allocation9], %s9534_s23, %s9534_s23, %s9535_s24  }
  0x1d   :  { %s9536_s4 = smov [#allocation11]  }
  0x1e   :  { %s96_s27 = sshll.u32 %s9536_s4, 4  ;;  %s97_s27 = int_to_ptr.vmem [resolvable:$true] %s96_s27 }
  0x1f   :  { %s9366_s28 = scalar_lea.vmem %s97_s27, 4096  ;;  %p9371_p11 = scmp.lt.s32.totalorder %s97_s27, %s97_s27 }
  0x20   :  { %p9367_p10 = scmp.ne.s32.totalorder %s97_s27, %s9366_s28  ;;  %p9372_p12 = scmp.lt.s32.totalorder %s9366_s28, %s9366_s28 }
  0x22   :  { %p9373_p13 = por %p9372_p12, %p9371_p11 }
  0x24   :  { %p9374_p0 = pnand %p9373_p13, %p9367_p10 }
  0x26   :  { %9377 = shalt.err (!%p9374_p0)
}
  0x27   :  { %102 = dma.hbm_to_vmem [thread:$0]  %s11591_s8, 4096, %s97_s27, [#allocation12], %s9531_s16, %s9531_s16, %s9532_s17  }
  0x28   :  { %s9537_s15 = smov [#allocation14]   ;;  %s9538_s6 = smov [#allocation2]  }
  0x29   :  { %s120_s18 = sshll.u32 %s9537_s15, 4  ;;  %s36_s19 = sshll.u32 %s9538_s6, 4  ;;  %s121_s18 = int_to_ptr.vmem [resolvable:$true] %s120_s18  ;;  %s37_s19 = int_to_ptr.vmem [resolvable:$true] %s36_s19 }
  0x2a   :  { %s9386_s20 = scalar_lea.vmem %s121_s18, 16384  ;;  %p9391_p2 = scmp.lt.s32.totalorder %s121_s18, %s121_s18 }
  0x2b   :  { %p9387_p1 = scmp.ne.s32.totalorder %s121_s18, %s9386_s20  ;;  %p9392_p3 = scmp.lt.s32.totalorder %s9386_s20, %s9386_s20 }
  0x2d   :  { %p9393_p4 = por %p9392_p3, %p9391_p2 }
  0x2f   :  { %p9394_p5 = pnand %p9393_p4, %p9387_p1 }
  0x31   :  { %9397 = shalt.err (!%p9394_p5)
}
  0x32   :  { %s9539_s21 = smov 256   ;;  %s9540_s22 = smov 16  }
  0x33   :  { %126 = dma.hbm_to_vmem [thread:$0]  %s11593_s10, 16384, %s121_s18, [#allocation15], %s9539_s21, %s9539_s21, %s9540_s22  }
  0x34   :  { %s9406_s8 = scalar_lea.vmem %s37_s19, 16384  ;;  %p9411_p7 = scmp.lt.s32.totalorder %s37_s19, %s37_s19 }
  0x35   :  { %p9407_p6 = scmp.ne.s32.totalorder %s37_s19, %s9406_s8  ;;  %p9412_p8 = scmp.lt.s32.totalorder %s9406_s8, %s9406_s8 }
  0x37   :  { %p9413_p9 = por %p9412_p8, %p9411_p7 }
  0x39   :  { %p9414_p10 = pnand %p9413_p9, %p9407_p6 }
  0x3b   :  { %9417 = shalt.err (!%p9414_p10)
}
  0x3c   :  { %42 = dma.hbm_to_vmem [thread:$0]  %s11586_s3, 16384, %s37_s19, [#allocation3], %s9539_s21, %s9539_s21, %s9540_s22  }
  0x3d   :  { %s9541_s28 = smov [#allocation7]  }
  0x3e   :  { %s60_s29 = sshll.u32 %s9541_s28, 4  ;;  %s61_s29 = int_to_ptr.vmem [resolvable:$true] %s60_s29 }
  0x3f   :  { %s9426_s30 = scalar_lea.vmem %s61_s29, 6144  ;;  %p9431_p12 = scmp.lt.s32.totalorder %s61_s29, %s61_s29 }
  0x40   :  { %p9427_p11 = scmp.ne.s32.totalorder %s61_s29, %s9426_s30  ;;  %p9432_p13 = scmp.lt.s32.totalorder %s9426_s30, %s9426_s30 }
  0x42   :  { %p9433_p0 = por %p9432_p13, %p9431_p12 }
  0x44   :  { %p9434_p1 = pnand %p9433_p0, %p9427_p11 }
  0x46   :  { %9437 = shalt.err (!%p9434_p1)
}
  0x47   :  { %s9542_s10 = smov 384   ;;  %s9543_s15 = smov 24  }
  0x48   :  { %66 = dma.hbm_to_vmem [thread:$0]  %s11588_s5, 6144, %s61_s29, [#allocation6], %s9542_s10, %s9542_s10, %s9543_s15  }
  0x49   :  { %s9544_s20 = smov [#allocation10]   ;;  %s9545_s26 = smov [#allocation13]  }
  0x4a   :  { %s84_s25 = sshll.u32 %s9544_s20, 4  ;;  %s108_s3 = sshll.u32 %s9545_s26, 4  ;;  %s85_s25 = int_to_ptr.vmem [resolvable:$true] %s84_s25  ;;  %s109_s3 = int_to_ptr.vmem [resolvable:$true] %s108_s3 }
  0x4b   :  { %s9446_s19 = scalar_lea.vmem %s85_s25, 4096  ;;  %p9451_p3 = scmp.lt.s32.totalorder %s85_s25, %s85_s25 }
  0x4c   :  { %p9447_p2 = scmp.ne.s32.totalorder %s85_s25, %s9446_s19  ;;  %p9452_p4 = scmp.lt.s32.totalorder %s9446_s19, %s9446_s19 }
  0x4e   :  { %p9453_p5 = por %p9452_p4, %p9451_p3 }
  0x50   :  { %p9454_p6 = pnand %p9453_p5, %p9447_p2 }
  0x52   :  { %9457 = shalt.err (!%p9454_p6)
}
  0x53   :  { %90 = dma.hbm_to_vmem [thread:$0]  %s11590_s7, 4096, %s85_s25, [#allocation9], %s9539_s21, %s9539_s21, %s9540_s22  }
  0x54   :  { %s9466_s5 = scalar_lea.vmem %s109_s3, 8192  ;;  %p9471_p8 = scmp.lt.s32.totalorder %s109_s3, %s109_s3 }
  0x55   :  { %p9467_p7 = scmp.ne.s32.totalorder %s109_s3, %s9466_s5  ;;  %p9472_p9 = scmp.lt.s32.totalorder %s9466_s5, %s9466_s5 }
  0x57   :  { %p9473_p10 = por %p9472_p9, %p9471_p8 }
  0x59   :  { %p9474_p11 = pnand %p9473_p10, %p9467_p7 }
  0x5b   :  { %9477 = shalt.err (!%p9474_p11)
}
  0x5c   :  { %114 = dma.hbm_to_vmem [thread:$0]  %s11592_s9, 8192, %s109_s3, [#allocation12], %s9534_s23, %s9534_s23, %s9535_s24  }
  0x5d   :  { %s9546_s29 = smov [#allocation16]  }
  0x5e   :  { %s132_s30 = sshll.u32 %s9546_s29, 4  ;;  %s133_s30 = int_to_ptr.vmem [resolvable:$true] %s132_s30 }
  0x5f   :  { %s9486_s10 = scalar_lea.vmem %s133_s30, 4096  ;;  %p9491_p13 = scmp.lt.s32.totalorder %s133_s30, %s133_s30 }
  0x60   :  { %p9487_p12 = scmp.ne.s32.totalorder %s133_s30, %s9486_s10  ;;  %p9492_p0 = scmp.lt.s32.totalorder %s9486_s10, %s9486_s10 }
  0x62   :  { %p9493_p1 = por %p9492_p0, %p9491_p13 }
  0x64   :  { %p9494_p2 = pnand %p9493_p1, %p9487_p12 }
  0x66   :  { %9497 = shalt.err (!%p9494_p2)
}
  0x67   :  { %138 = dma.hbm_to_vmem [thread:$0]  %s11594_s11, 4096, %s133_s30, [#allocation15], %s9531_s16, %s9531_s16, %s9532_s17  }
  0x68   :  { %9518 = dma.done.wait [#allocation3], 16384  }
  0x69   :  { %9519 = vsyncadd [#allocation3], 4294950912 }
  0x6a   :  { %9520 = dma.done.wait [#allocation6], 10240  }
  0x6b   :  { %9521 = vsyncadd [#allocation6], 4294957056 }
  0x6c   :  { %9522 = dma.done.wait [#allocation9], 20480  }
  0x6d   :  { %9523 = vsyncadd [#allocation9], 4294946816 }
  0x6e   :  { %9524 = dma.done.wait [#allocation12], 12288  }
  0x6f   :  { %9525 = vsyncadd [#allocation12], 4294955008 }
  0x70   :  { %9526 = dma.done.wait [#allocation15], 20480  }
  0x71   :  { %9527 = vsyncadd [#allocation15], 4294946816  ;;  %v11598_v0 = vmov 0   ;;  %v8532_v1 = vld [vmem:[%s11585_s2 + $0x4] ss:$16 sps:$4 sm:$0xff]   ;;  %v316_v4 = vld [vmem:[%s11583_s0 + $0x8] sm:$0xff] }
  0x72   :  { %400 = vmatprep.mubr.bf16.mxu1 %v11598_v0  ;;  %8530 = vset.pattern.permute.xlu0 %v11598_v0  ;;  %v8534_v2 = vld [vmem:[%s11585_s2] ss:$16 sps:$4 sm:$0xff]   ;;  %vm361_vm0 = vcmask 130048   ;;  %v8535_v6 = vld [vmem:[%s11585_s2 + $0x8] ss:$16 sps:$4 sm:$0xff]   ;;  %vm7670_vm9 = vcmask 9216  }
  0x73   :  { %8531 = vset.pattern.permute.xlu1 %v11598_v0  ;;  %v315_v3 = vld [vmem:[%s11583_s0] sm:$0xff]  ;;  %382 = vmatprep.subr.bf16.mxu1 %v8532_v1  ;;  %v8537_v7 = vld [vmem:[%s11585_s2 + $0xc] ss:$16 sps:$4 sm:$0xff]   ;;  %v317_v11 = vld [vmem:[%s11583_s0 + $0x10] sm:$0xff] }
  0x74   :  { %v323_v5 = vpack.c.bf16 %v316_v4, %v315_v3  ;;  %383 = vmatpush1.bf16.msra.mxu1 %v8534_v2  ;;  %v8538_v8 = vld [vmem:[#allocation2 + $0xe4] ss:$16 sps:$4 sm:$0xff]   ;;  %v8540_v9 = vld [vmem:[#allocation2 + $0xe0] ss:$16 sps:$4 sm:$0xff]   ;;  %v318_v12 = vld [vmem:[%s11583_s0 + $0x18] sm:$0xff] }
  0x75   :  { %435 = vmatprep.subr.bf16.mxu1 %v8537_v7  ;;  %1282 = vmatprep.subr.bf16.mxu0 %v8538_v8  ;;  %v8541_v10 = vld [vmem:[#allocation2 + $0xc4] ss:$16 sps:$4 sm:$0xff]   ;;  %v8543_v13 = vld [vmem:[#allocation2 + $0xc0] ss:$16 sps:$4 sm:$0xff]   ;;  %v324_v15 = vpack.c.bf16 %v318_v12, %v317_v11 }
  0x76   :  { %1283 = vmatpush1.bf16.msra.mxu0 %v8540_v9  ;;  %v8544_v14 = vld [vmem:[#allocation2 + $0xa4] ss:$16 sps:$4 sm:$0xff]   ;;  %v8546_v17 = vld [vmem:[#allocation2 + $0xa0] ss:$16 sps:$4 sm:$0xff]  }
  0x77   :  { %7695 = vmatmul.mubr.msk.bf16.vlgmr.msra.gmra.mxu1 %vm361_vm0, %v323_v5  ;;  %1284 = vmatprep.subr.bf16.mxu0 %v8541_v10  ;;  %v8554_v16 = vld [vmem:[#allocation2 + $0x2e4] ss:$16 sps:$4 sm:$0xff]   ;;  %v8549_v19 = vld [vmem:[#allocation2 + $0x80] ss:$16 sps:$4 sm:$0xff]  }
  0x78   :  { %436 = vmatpush1.bf16.msra.mxu1 %v8535_v6  ;;  %410 = vmatprep.mubr.bf16.mxu1 %v11598_v0  ;;  %v8547_v18 = vld [vmem:[#allocation2 + $0x84] ss:$16 sps:$4 sm:$0xff]   ;;  %v8552_v21 = vld [vmem:[#allocation2 + $0x2e0] ss:$16 sps:$4 sm:$0xff]  }
  0x79   :  { %1335 = vmatprep.subr.bf16.mxu1 %v8554_v16  ;;  %v8550_v20 = vld [vmem:[#allocation2 + $0x64] ss:$16 sps:$4 sm:$0xff]   ;;  %v8555_v22 = vld [vmem:[#allocation2 + $0x60] ss:$16 sps:$4 sm:$0xff]  }
  0x7a   :  { %1285 = vmatpush1.bf16.msra.mxu0 %v8543_v13  ;;  %v8560_v23 = vld [vmem:[#allocation2 + $0x2c4] ss:$16 sps:$4 sm:$0xff]   ;;  %v8558_v25 = vld [vmem:[#allocation2 + $0x2c0] ss:$16 sps:$4 sm:$0xff]   ;;  %v8651_v13 = vld [vmem:[#allocation2 + $0x2ec] ss:$16 sps:$4 sm:$0xff]  }
  0x7b   :  { %1286 = vmatprep.subr.bf16.mxu0 %v8544_v14  ;;  %v8556_v24 = vld [vmem:[#allocation2 + $0x44] ss:$16 sps:$4 sm:$0xff]   ;;  %v8561_v26 = vld [vmem:[#allocation2 + $0x40] ss:$16 sps:$4 sm:$0xff]   ;;  %v325_v14 = vlaneseq }
  0x7c   :  { %v8566_v27 = vld [vmem:[#allocation2 + $0x2a4] ss:$16 sps:$4 sm:$0xff]   ;;  %v8564_v29 = vld [vmem:[#allocation2 + $0x2a0] ss:$16 sps:$4 sm:$0xff]  }
  0x7d   :  { %v8562_v28 = vld [vmem:[#allocation2 + $0x24] ss:$16 sps:$4 sm:$0xff]   ;;  %v8567_v30 = vld [vmem:[#allocation2 + $0x20] ss:$16 sps:$4 sm:$0xff]  }
  0x7e   :  { %1287 = vmatpush1.bf16.msra.mxu0 %v8546_v17  ;;  %v8572_v31 = vld [vmem:[#allocation2 + $0x284] ss:$16 sps:$4 sm:$0xff]   ;;  %v8570_v33 = vld [vmem:[#allocation2 + $0x280] ss:$16 sps:$4 sm:$0xff]  }
  0x7f   :  { %7696 = vmatmul.mubr.msk.bf16.gmra.mxu1 %vm361_vm0, %v324_v15  ;;  %1288 = vmatprep.subr.bf16.mxu0 %v8547_v18  ;;  %v8568_v32 = vld [vmem:[#allocation2 + $0x4] ss:$16 sps:$4 sm:$0xff]   ;;  %v8573_v34 = vld [vmem:[#allocation2] ss:$16 sps:$4 sm:$0xff]   ;;  %v9723_v18 = vld [vmem:[%s11595_s12 + $0x8] sm:$0xff] }
  0x80   :  { %453 = vmatprep.mubr.bf16.mxu1 %v11598_v0  ;;  %v8578_v35 = vld [vmem:[#allocation2 + $0x264] ss:$16 sps:$4 sm:$0xff]   ;;  %v8576_v37 = vld [vmem:[#allocation2 + $0x260] ss:$16 sps:$4 sm:$0xff]  }
  0x81   :  { %v8574_v36 = vld [vmem:[#allocation2 + $0x1e4] ss:$16 sps:$4 sm:$0xff]   ;;  %v8579_v38 = vld [vmem:[#allocation2 + $0x1e0] ss:$16 sps:$4 sm:$0xff]  }
  0x82   :  { %1289 = vmatpush1.bf16.msra.mxu0 %v8549_v19  ;;  %v8584_v39 = vld [vmem:[#allocation2 + $0x244] ss:$16 sps:$4 sm:$0xff]   ;;  %v8582_v41 = vld [vmem:[#allocation2 + $0x240] ss:$16 sps:$4 sm:$0xff]  }
  0x83   :  { %1290 = vmatprep.subr.bf16.mxu0 %v8550_v20  ;;  %v8580_v40 = vld [vmem:[#allocation2 + $0x1c4] ss:$16 sps:$4 sm:$0xff]   ;;  %v8585_v42 = vld [vmem:[#allocation2 + $0x1c0] ss:$16 sps:$4 sm:$0xff]  }
  0x84   :  { %v8590_v43 = vld [vmem:[#allocation2 + $0x224] ss:$16 sps:$4 sm:$0xff]   ;;  %v8588_v45 = vld [vmem:[#allocation2 + $0x220] ss:$16 sps:$4 sm:$0xff]  }
  0x85   :  { %v8586_v44 = vld [vmem:[#allocation2 + $0x1a4] ss:$16 sps:$4 sm:$0xff]   ;;  %v8591_v46 = vld [vmem:[#allocation2 + $0x1a0] ss:$16 sps:$4 sm:$0xff]  }
  0x86   :  { %1291 = vmatpush1.bf16.msra.mxu0 %v8555_v22  ;;  %v8596_v47 = vld [vmem:[#allocation2 + $0x204] ss:$16 sps:$4 sm:$0xff]   ;;  %v8594_v49 = vld [vmem:[#allocation2 + $0x200] ss:$16 sps:$4 sm:$0xff]  }
  0x87   :  { %7697 = vmatmul.mubr.msk.bf16.vlgmr.msra.gmra.mxu1 %vm361_vm0, %v323_v5  ;;  %1292 = vmatprep.subr.bf16.mxu0 %v8556_v24  ;;  %v8592_v48 = vld [vmem:[#allocation2 + $0x184] ss:$16 sps:$4 sm:$0xff]   ;;  %v8597_v50 = vld [vmem:[#allocation2 + $0x180] ss:$16 sps:$4 sm:$0xff]   ;;  %v8627_v5 = vld [vmem:[#allocation2 + $0xec] ss:$16 sps:$4 sm:$0xff]  }
  0x88   :  { %463 = vmatprep.mubr.bf16.mxu1 %v11598_v0  ;;  %1336 = vmatpush1.bf16.msra.mxu1 %v8552_v21  ;;  %v8602_v51 = vld [vmem:[#allocation2 + $0x3e4] ss:$16 sps:$4 sm:$0xff]   ;;  %v8600_v53 = vld [vmem:[#allocation2 + $0x3e0] ss:$16 sps:$4 sm:$0xff]  }
  0x89   :  { %1337 = vmatprep.subr.bf16.mxu1 %v8560_v23  ;;  %v8598_v52 = vld [vmem:[#allocation2 + $0x164] ss:$16 sps:$4 sm:$0xff]   ;;  %v8603_v54 = vld [vmem:[#allocation2 + $0x160] ss:$16 sps:$4 sm:$0xff]  }
  0x8a   :  { %1293 = vmatpush1.bf16.msra.mxu0 %v8561_v26  ;;  %v8604_v55 = vld [vmem:[#allocation2 + $0x144] ss:$16 sps:$4 sm:$0xff]   ;;  %v8606_v57 = vld [vmem:[#allocation2 + $0x3c0] ss:$16 sps:$4 sm:$0xff]  }
  0x8b   :  { %1294 = vmatprep.subr.bf16.mxu0 %v8562_v28  ;;  %v8608_v56 = vld [vmem:[#allocation2 + $0x3c4] ss:$16 sps:$4 sm:$0xff]   ;;  %v8609_v58 = vld [vmem:[#allocation2 + $0x140] ss:$16 sps:$4 sm:$0xff]  }
  0x8c   :  { %1338 = vmatpush1.bf16.msra.mxu1 %v8558_v25  ;;  %v8610_v59 = vld [vmem:[#allocation2 + $0x124] ss:$16 sps:$4 sm:$0xff]   ;;  %v8612_v61 = vld [vmem:[#allocation2 + $0x3a0] ss:$16 sps:$4 sm:$0xff]  }
  0x8d   :  { %1339 = vmatprep.subr.bf16.mxu1 %v8566_v27  ;;  %v8614_v60 = vld [vmem:[#allocation2 + $0x3a4] ss:$16 sps:$4 sm:$0xff]   ;;  %v8615_v62 = vld [vmem:[#allocation2 + $0x120] ss:$16 sps:$4 sm:$0xff]  }
  0x8e   :  { %1295 = vmatpush1.bf16.msra.mxu0 %v8567_v30  ;;  %v8616_v63 = vld [vmem:[#allocation2 + $0x104] ss:$16 sps:$4 sm:$0xff]   ;;  %v8618_v2 = vld [vmem:[#allocation2 + $0x380] ss:$16 sps:$4 sm:$0xff]  }
  0x8f   :  { %7698 = vmatmul.mubr.msk.bf16.gmra.mxu1 %vm361_vm0, %v324_v15  ;;  %1296 = vmatprep.subr.bf16.mxu0 %v8568_v32  ;;  %v8620_v1 = vld [vmem:[#allocation2 + $0x384] ss:$16 sps:$4 sm:$0xff]   ;;  %v8621_v3 = vld [vmem:[#allocation2 + $0x100] ss:$16 sps:$4 sm:$0xff]   ;;  %v9710_v15 = vshrl.u32 %v325_v14, 7 }
  0x90   :  { %1340 = vmatpush1.bf16.msra.mxu1 %v8564_v29  ;;  %v8624_v4 = vld [vmem:[#allocation2 + $0x364] ss:$16 sps:$4 sm:$0xff]   ;;  %v8622_v6 = vld [vmem:[#allocation2 + $0x360] ss:$16 sps:$4 sm:$0xff]  }
  0x91   :  { %1341 = vmatprep.subr.bf16.mxu1 %v8572_v31  ;;  %v8630_v7 = vld [vmem:[#allocation2 + $0x344] ss:$16 sps:$4 sm:$0xff]   ;;  %v8628_v8 = vld [vmem:[#allocation2 + $0x340] ss:$16 sps:$4 sm:$0xff]   ;;  %11922 = vst [vmem:[#allocation24_spill] sm:$0xff] %v9710_v15  ;;  %v9718_v17 = vsub.s32 0, %v9710_v15 }
  0x92   :  { %1297 = vmatpush1.bf16.msra.mxu0 %v8573_v34  ;;  %v8636_v9 = vld [vmem:[#allocation2 + $0x324] ss:$16 sps:$4 sm:$0xff]   ;;  %v8634_v10 = vld [vmem:[#allocation2 + $0x320] ss:$16 sps:$4 sm:$0xff]   ;;  %v8625_v34 = vld [vmem:[#allocation2 + $0xe8] ss:$16 sps:$4 sm:$0xff]  }
  0x93   :  { %1298 = vmatprep.subr.bf16.mxu0 %v8574_v36  ;;  %v8642_v11 = vld [vmem:[#allocation2 + $0x304] ss:$16 sps:$4 sm:$0xff]   ;;  %v8640_v12 = vld [vmem:[#allocation2 + $0x300] ss:$16 sps:$4 sm:$0xff]   ;;  %11923 = vst [vmem:[#allocation25_spill] sm:$0xff] %v9718_v17  ;;  %v332_v21 = vrot.slane %v9723_v18, %v9718_v17 }
  0x94   :  { %1342 = vmatpush1.bf16.msra.mxu1 %v8570_v33  ;;  %v9715_v16 = vld [vmem:[%s11595_s12] sm:$0xff]  ;;  %v9732_v36 = vld [vmem:[%s11595_s12 + $0x10] sm:$0xff] }
  0x95   :  { %1343 = vmatprep.subr.bf16.mxu1 %v8578_v35  ;;  %v328_v19 = vrot.slane %v9715_v16, %v9718_v17 }
  0x96   :  { %1299 = vmatpush2.bf16.msra.mxu0 %v8579_v38 }
  0x97   :  { %1300 = vmatprep.subr.bf16.mxu0 %v8580_v40 }
  0x98   :  { %1344 = vmatpush1.bf16.msra.mxu1 %v8576_v37 }
  0x99   :  { %1345 = vmatprep.subr.bf16.mxu1 %v8584_v39  ;;  %v8633_v39 = vld [vmem:[#allocation2 + $0xcc] ss:$16 sps:$4 sm:$0xff]  }
  0x9a   :  { %1301 = vmatpush2.bf16.msra.mxu0 %v8585_v42 }
  0x9b   :  { %1302 = vmatprep.subr.bf16.mxu0 %v8586_v44  ;;  %v8631_v44 = vld [vmem:[#allocation2 + $0xc8] ss:$16 sps:$4 sm:$0xff]  }
  0x9c   :  { %1346 = vmatpush1.bf16.msra.mxu1 %v8582_v41 }
  0x9d   :  { %1347 = vmatprep.subr.bf16.mxu1 %v8590_v43 }
  0x9e   :  { %1303 = vmatpush2.bf16.msra.mxu0 %v8591_v46 }
  0x9f   :  { %1304 = vmatprep.subr.bf16.mxu0 %v8592_v48 }
  0xa0   :  { %1348 = vmatpush1.bf16.msra.mxu1 %v8588_v45  ;;  %v9739_v45 = vld [vmem:[%s11595_s12 + $0x18] sm:$0xff] }
  0xa1   :  { %1349 = vmatprep.subr.bf16.mxu1 %v8596_v47  ;;  %v8639_v47 = vld [vmem:[#allocation2 + $0xac] ss:$16 sps:$4 sm:$0xff]  }
  0xa2   :  { %1305 = vmatpush2.bf16.msra.mxu0 %v8597_v50 }
  0xa3   :  { %1306 = vmatprep.subr.bf16.mxu0 %v8598_v52 }
  0xa4   :  { %1350 = vmatpush1.bf16.msra.mxu1 %v8594_v49 }
  0xa5   :  { %1351 = vmatprep.subr.bf16.mxu1 %v8602_v51  ;;  %v336_v51 = vrot.slane %v9732_v36, %v9718_v17 }
  0xa6   :  { %1307 = vmatpush2.bf16.msra.mxu0 %v8603_v54 }
  0xa7   :  { %1308 = vmatprep.subr.bf16.mxu0 %v8604_v55  ;;  %v340_v55 = vrot.slane %v9739_v45, %v9718_v17 }
  0xa8   :  { %1352 = vmatpush2.bf16.msra.mxu1 %v8600_v53 }
  0xa9   :  { %1353 = vmatprep.subr.bf16.mxu1 %v8608_v56  ;;  %v8637_v56 = vld [vmem:[#allocation2 + $0xa8] ss:$16 sps:$4 sm:$0xff]  }
  0xaa   :  { %1309 = vmatpush2.bf16.msra.mxu0 %v8609_v58 }
  0xab   :  { %1310 = vmatprep.subr.bf16.mxu0 %v8610_v59 }
  0xac   :  { %1354 = vmatpush2.bf16.msra.mxu1 %v8606_v57 }
  0xad   :  { %1355 = vmatprep.subr.bf16.mxu1 %v8614_v60  ;;  %v8645_v60 = vld [vmem:[#allocation2 + $0x8c] ss:$16 sps:$4 sm:$0xff]  }
  0xae   :  { %1311 = vmatpush2.bf16.msra.mxu0 %v8615_v62 }
  0xaf   :  { %1312 = vmatprep.subr.bf16.mxu0 %v8616_v63 }
  0xb0   :  { %1356 = vmatpush2.bf16.msra.mxu1 %v8612_v61 }
  0xb1   :  { %1357 = vmatprep.subr.bf16.mxu1 %v8620_v1 }
  0xb2   :  { %1313 = vmatpush2.bf16.msra.mxu0 %v8621_v3 }
  0xb3   :  { %1388 = vmatprep.subr.bf16.mxu0 %v8627_v5 }
  0xb4   :  { %1358 = vmatpush2.bf16.msra.mxu1 %v8618_v2  ;;  %v8643_v2 = vld [vmem:[#allocation2 + $0x88] ss:$16 sps:$4 sm:$0xff]  }
  0xb5   :  { %1359 = vmatprep.subr.bf16.mxu1 %v8624_v4  ;;  %v8648_v4 = vld [vmem:[#allocation2 + $0x6c] ss:$16 sps:$4 sm:$0xff]  }
  0xb8   :  { %1360 = vmatpush2.bf16.msra.mxu1 %v8622_v6 }
  0xb9   :  { %1361 = vmatprep.subr.bf16.mxu1 %v8630_v7 }
  0xbc   :  { %1362 = vmatpush2.bf16.msra.mxu1 %v8628_v8 }
  0xbd   :  { %1363 = vmatprep.subr.bf16.mxu1 %v8636_v9 }
  0xc0   :  { %1364 = vmatpush2.bf16.msra.mxu1 %v8634_v10 }
  0xc1   :  { %1365 = vmatprep.subr.bf16.mxu1 %v8642_v11  ;;  %v8646_v11 = vld [vmem:[#allocation2 + $0x68] ss:$16 sps:$4 sm:$0xff]  }
  0xc4   :  { %1366 = vmatpush2.bf16.msra.mxu1 %v8640_v12  ;;  %v8649_v12 = vld [vmem:[#allocation2 + $0x2e8] ss:$16 sps:$4 sm:$0xff]  }
  0xc5   :  { %1441 = vmatprep.subr.bf16.mxu1 %v8651_v13 }
 0x137   :  { %v402_v20 = vpop.f32.mrf.mxu1 }
 0x138   :  { %v403_v23 = vadd.f32 %v402_v20, %v328_v19 }
 0x139   :  { %v404_v22 = vpop.f32.mrf.mxu1 }
 0x13a   :  { %v405_v25 = vadd.f32 %v404_v22, %v332_v21  ;;  %v474_v28 = vmax.f32 %v403_v23, 0.0  ;;  %v8657_v22 = vld [vmem:[#allocation2 + $0x2cc] ss:$16 sps:$4 sm:$0xff]  }
 0x13b   :  { %v406_v24 = vpop.f32.mrf.mxu1 }
 0x13c   :  { %v407_v26 = vadd.f32 %v406_v24, %v328_v19  ;;  %v475_v32 = vmax.f32 %v405_v25, 0.0 }
 0x13d   :  { %v408_v27 = vpop.f32.mrf.mxu1 }
 0x13e   :  { %v478_v29 = vmax.f32 %v407_v26, 0.0  ;;  %v409_v30 = vadd.f32 %v408_v27, %v332_v21 }
 0x13f   :  { %v412_v31 = vpop.f32.mrf.mxu1 }
 0x140   :  { %v479_v33 = vmax.f32 %v409_v30, 0.0  ;;  %v413_v37 = vadd.f32 %v412_v31, %v328_v19  ;;  %v9734_v40 = vpack.c.bf16 %v478_v29, %v474_v28  ;;  %v8652_v31 = vld [vmem:[#allocation2 + $0x48] ss:$16 sps:$4 sm:$0xff]  }
 0x141   :  { %v414_v35 = vpop.f32.mrf.mxu1 }
 0x142   :  { %v619_v38 = vpack.c.bf16 %v479_v33, %v475_v32  ;;  %v415_v42 = vadd.f32 %v414_v35, %v332_v21  ;;  %v482_v48 = vmax.f32 %v413_v37, 0.0  ;;  %v8655_v32 = vld [vmem:[#allocation2 + $0x2c8] ss:$16 sps:$4 sm:$0xff]   ;;  %v8660_v33 = vld [vmem:[#allocation2 + $0x2c] ss:$16 sps:$4 sm:$0xff]  }
 0x143   :  { %v416_v41 = vpop.f32.mrf.mxu1 }
 0x144   :  { %v417_v43 = vadd.f32 %v416_v41, %v328_v19  ;;  %1314 = vmatprep.mubr.bf16.mxu0 %v619_v38  ;;  %v483_v53 = vmax.f32 %v415_v42, 0.0  ;;  %v8654_v19 = vld [vmem:[#allocation2 + $0x4c] ss:$16 sps:$4 sm:$0xff]   ;;  %v8661_v41 = vld [vmem:[#allocation2 + $0x2a8] ss:$16 sps:$4 sm:$0xff]  }
 0x145   :  { %v418_v46 = vpop.f32.mrf.mxu1  ;;  %1315 = vmatmul.mubr.bf16.vlgmr.msra.gmra.mxu0 %v9734_v40  ;;  %v8666_v42 = vld [vmem:[#allocation2 + $0xc] ss:$16 sps:$4 sm:$0xff]  }
 0x146   :  { %v486_v49 = vmax.f32 %v417_v43, 0.0  ;;  %v419_v50 = vadd.f32 %v418_v46, %v332_v21  ;;  %1389 = vmatpush1.bf16.msra.mxu0 %v8625_v34  ;;  %v8663_v34 = vld [vmem:[#allocation2 + $0x2ac] ss:$16 sps:$4 sm:$0xff]   ;;  %v8667_v46 = vld [vmem:[#allocation2 + $0x288] ss:$16 sps:$4 sm:$0xff]  }
 0x147   :  { %v455_v52 = vpop.f32.mrf.mxu1  ;;  %1390 = vmatprep.subr.bf16.mxu0 %v8633_v39  ;;  %v8658_v39 = vld [vmem:[#allocation2 + $0x28] ss:$16 sps:$4 sm:$0xff]   ;;  %v8669_v43 = vld [vmem:[#allocation2 + $0x28c] ss:$16 sps:$4 sm:$0xff]  }
 0x148   :  { %v487_v54 = vmax.f32 %v419_v50, 0.0  ;;  %v456_v58 = vadd.f32 %v455_v52, %v336_v51  ;;  %v9748_v61 = vpack.c.bf16 %v486_v49, %v482_v48  ;;  %v8675_v48 = vld [vmem:[#allocation2 + $0x26c] ss:$16 sps:$4 sm:$0xff]   ;;  %v8670_v49 = vld [vmem:[#allocation2 + $0x1e8] ss:$16 sps:$4 sm:$0xff]  }
 0x149   :  { %v457_v57 = vpop.f32.mrf.mxu1  ;;  %v8673_v50 = vld [vmem:[#allocation2 + $0x268] ss:$16 sps:$4 sm:$0xff]   ;;  %v8681_v52 = vld [vmem:[#allocation2 + $0x24c] ss:$16 sps:$4 sm:$0xff]  }
 0x14a   :  { %1391 = vmatpush1.bf16.msra.mxu0 %v8631_v44  ;;  %v9746_v59 = vpack.c.bf16 %v487_v54, %v483_v53  ;;  %v458_v63 = vadd.f32 %v457_v57, %v340_v55  ;;  %v476_v5 = vmax.f32 %v456_v58, 0.0  ;;  %v8664_v44 = vld [vmem:[#allocation2 + $0x8] ss:$16 sps:$4 sm:$0xff]  }
 0x14b   :  { %v459_v62 = vpop.f32.mrf.mxu1  ;;  %1392 = vmatprep.subr.bf16.mxu0 %v8639_v47  ;;  %v8672_v47 = vld [vmem:[#allocation2 + $0x1ec] ss:$16 sps:$4 sm:$0xff]   ;;  %v8676_v53 = vld [vmem:[#allocation2 + $0x1c8] ss:$16 sps:$4 sm:$0xff]  }
 0x14c   :  { %v460_v1 = vadd.f32 %v459_v62, %v336_v51  ;;  %1324 = vmatprep.mubr.bf16.mxu0 %v9746_v59  ;;  %v477_v9 = vmax.f32 %v458_v63, 0.0  ;;  %v8679_v54 = vld [vmem:[#allocation2 + $0x248] ss:$16 sps:$4 sm:$0xff]   ;;  %v8693_v62 = vld [vmem:[#allocation2 + $0x20c] ss:$16 sps:$4 sm:$0xff]  }
 0x14d   :  { %v461_v3 = vpop.f32.mrf.mxu1  ;;  %1325 = vmatmul.mubr.bf16.gmra.mxu0 %v9748_v61  ;;  %v8682_v57 = vld [vmem:[#allocation2 + $0x1a8] ss:$16 sps:$4 sm:$0xff]  }
 0x14e   :  { %v480_v6 = vmax.f32 %v460_v1, 0.0  ;;  %v462_v7 = vadd.f32 %v461_v3, %v340_v55  ;;  %1393 = vmatpush1.bf16.msra.mxu0 %v8637_v56  ;;  %1420 = vmatprep.mubr.bf16.mxu0 %v619_v38  ;;  %v8687_v56 = vld [vmem:[#allocation2 + $0x22c] ss:$16 sps:$4 sm:$0xff]   ;;  %v8685_v58 = vld [vmem:[#allocation2 + $0x228] ss:$16 sps:$4 sm:$0xff]  }
 0x14f   :  { %v465_v8 = vpop.f32.mrf.mxu1  ;;  %1394 = vmatprep.subr.bf16.mxu0 %v8645_v60  ;;  %v8690_v60 = vld [vmem:[#allocation2 + $0x18c] ss:$16 sps:$4 sm:$0xff]   ;;  %v8688_v63 = vld [vmem:[#allocation2 + $0x188] ss:$16 sps:$4 sm:$0xff]  }
 0x150   :  { %v481_v10 = vmax.f32 %v462_v7, 0.0  ;;  %v466_v13 = vadd.f32 %v465_v8, %v336_v51  ;;  %v9752_v23 = vpack.c.bf16 %v480_v6, %v476_v5  ;;  %v8691_v1 = vld [vmem:[#allocation2 + $0x208] ss:$16 sps:$4 sm:$0xff]   ;;  %v8699_v3 = vld [vmem:[#allocation2 + $0x3ec] ss:$16 sps:$4 sm:$0xff]  }
 0x151   :  { %v467_v14 = vpop.f32.mrf.mxu1  ;;  %v8697_v5 = vld [vmem:[#allocation2 + $0x3e8] ss:$16 sps:$4 sm:$0xff]   ;;  %v8702_v6 = vld [vmem:[#allocation2 + $0x14c] ss:$16 sps:$4 sm:$0xff]  }
 0x152   :  { %v468_v20 = vadd.f32 %v467_v14, %v340_v55  ;;  %1395 = vmatpush1.bf16.msra.mxu0 %v8643_v2  ;;  %v621_v21 = vpack.c.bf16 %v481_v10, %v477_v9  ;;  %v484_v26 = vmax.f32 %v466_v13, 0.0  ;;  %v8696_v2 = vld [vmem:[#allocation2 + $0x16c] ss:$16 sps:$4 sm:$0xff]   ;;  %v8700_v8 = vld [vmem:[#allocation2 + $0x148] ss:$16 sps:$4 sm:$0xff]  }
 0x153   :  { %v469_v24 = vpop.f32.mrf.mxu1  ;;  %1396 = vmatprep.subr.bf16.mxu0 %v8648_v4  ;;  %v8694_v4 = vld [vmem:[#allocation2 + $0x168] ss:$16 sps:$4 sm:$0xff]   ;;  %v8705_v7 = vld [vmem:[#allocation2 + $0x3cc] ss:$16 sps:$4 sm:$0xff]  }
 0x154   :  { %v470_v25 = vadd.f32 %v469_v24, %v336_v51  ;;  %1367 = vmatprep.mubr.bf16.mxu1 %v621_v21  ;;  %v485_v28 = vmax.f32 %v468_v20, 0.0  ;;  %v8678_v51 = vld [vmem:[#allocation2 + $0x1cc] ss:$16 sps:$4 sm:$0xff]   ;;  %v8703_v9 = vld [vmem:[#allocation2 + $0x3c8] ss:$16 sps:$4 sm:$0xff]  }
 0x155   :  { %v471_v27 = vpop.f32.mrf.mxu1  ;;  %1368 = vmatmul.mubr.bf16.vlgmr.msra.gmra.mxu1 %v9752_v23  ;;  %v8708_v10 = vld [vmem:[#allocation2 + $0x12c] ss:$16 sps:$4 sm:$0xff]   ;;  %v8709_v13 = vld [vmem:[#allocation2 + $0x3a8] ss:$16 sps:$4 sm:$0xff]  }
 0x156   :  { %v488_v29 = vmax.f32 %v470_v25, 0.0  ;;  %v472_v30 = vadd.f32 %v471_v27, %v340_v55  ;;  %1397 = vmatpush1.bf16.msra.mxu0 %v8646_v11  ;;  %1442 = vmatpush1.bf16.msra.mxu1 %v8649_v12  ;;  %v8684_v55 = vld [vmem:[#allocation2 + $0x1ac] ss:$16 sps:$4 sm:$0xff]   ;;  %v8706_v12 = vld [vmem:[#allocation2 + $0x128] ss:$16 sps:$4 sm:$0xff]  }
 0x157   :  { %1398 = vmatprep.subr.bf16.mxu0 %v8654_v19  ;;  %1443 = vmatprep.subr.bf16.mxu1 %v8657_v22  ;;  %v8711_v11 = vld [vmem:[#allocation2 + $0x3ac] ss:$16 sps:$4 sm:$0xff]   ;;  %v8712_v20 = vld [vmem:[#allocation2 + $0x108] ss:$16 sps:$4 sm:$0xff]  }
 0x158   :  { %v489_v35 = vmax.f32 %v472_v30, 0.0  ;;  %v9755_v37 = vpack.c.bf16 %v488_v29, %v484_v26  ;;  %v8714_v14 = vld [vmem:[#allocation2 + $0x10c] ss:$16 sps:$4 sm:$0xff]   ;;  %v8718_v25 = vld [vmem:[#allocation2 + $0x368] ss:$16 sps:$4 sm:$0xff]   ;;  %v8732_v29 = vld [vmem:[#allocation5 + $0x70] sm:$0xff]  }
 0x159   :  { %v8717_v19 = vld [vmem:[#allocation2 + $0x38c] ss:$16 sps:$4 sm:$0xff]  }
 0x15a   :  { %1399 = vmatpush1.bf16.msra.mxu0 %v8652_v31  ;;  %1444 = vmatpush1.bf16.msra.mxu1 %v8655_v32  ;;  %v9757_v38 = vpack.c.bf16 %v489_v35, %v485_v28  ;;  %v8720_v22 = vld [vmem:[#allocation2 + $0x36c] ss:$16 sps:$4 sm:$0xff]   ;;  %v8721_v28 = vld [vmem:[#allocation2 + $0x348] ss:$16 sps:$4 sm:$0xff]   ;;  %v8733_v31 = vld [vmem:[#allocation5 + $0x30] sm:$0xff]  }
 0x15b   :  { %1400 = vmatprep.subr.bf16.mxu0 %v8660_v33  ;;  %1445 = vmatprep.subr.bf16.mxu1 %v8663_v34  ;;  %v8730_v24 = vld [vmem:[#allocation5 + $0x78] sm:$0xff]   ;;  %v8734_v33 = vld [vmem:[#allocation5 + $0x68] sm:$0xff]  }
 0x15c   :  { %1377 = vmatprep.mubr.bf16.mxu1 %v9757_v38  ;;  %v8723_v26 = vld [vmem:[#allocation2 + $0x34c] ss:$16 sps:$4 sm:$0xff]   ;;  %v8724_v32 = vld [vmem:[#allocation2 + $0x328] ss:$16 sps:$4 sm:$0xff]  }
 0x15d   :  { %1378 = vmatmul.mubr.bf16.gmra.mxu1 %v9755_v37  ;;  %v8731_v27 = vld [vmem:[#allocation5 + $0x38] sm:$0xff]   ;;  %v8735_v35 = vld [vmem:[#allocation5 + $0x28] sm:$0xff]  }
 0x15e   :  { %1401 = vmatpush1.bf16.msra.mxu0 %v8658_v39  ;;  %1446 = vmatpush1.bf16.msra.mxu1 %v8661_v41  ;;  %v8726_v30 = vld [vmem:[#allocation2 + $0x32c] ss:$16 sps:$4 sm:$0xff]   ;;  %v8737_v39 = vld [vmem:[#allocation5 + $0x20] sm:$0xff]  }
 0x15f   :  { %1473 = vmatprep.mubr.bf16.mxu1 %v621_v21  ;;  %1402 = vmatprep.subr.bf16.mxu0 %v8666_v42  ;;  %v8715_v21 = vld [vmem:[#allocation2 + $0x388] ss:$16 sps:$4 sm:$0xff]   ;;  %v8729_v34 = vld [vmem:[#allocation2 + $0x30c] ss:$16 sps:$4 sm:$0xff]  }
 0x160   :  { %1447 = vmatprep.subr.bf16.mxu1 %v8669_v43  ;;  %v8738_v41 = vld [vmem:[#allocation5 + $0x58] sm:$0xff]   ;;  %v8740_v43 = vld [vmem:[#allocation5 + $0x50] sm:$0xff]  }
 0x161   :  { %v8739_v42 = vld [vmem:[#allocation5 + $0x18] sm:$0xff]  }
 0x162   :  { %1403 = vmatpush1.bf16.msra.mxu0 %v8664_v44  ;;  %1448 = vmatpush1.bf16.msra.mxu1 %v8667_v46  ;;  %v8741_v44 = vld [vmem:[#allocation5 + $0x10] sm:$0xff]   ;;  %v8743_v46 = vld [vmem:[#allocation5 + $0x8] sm:$0xff]  }
 0x163   :  { %1404 = vmatprep.subr.bf16.mxu0 %v8672_v47  ;;  %1449 = vmatprep.subr.bf16.mxu1 %v8675_v48  ;;  %v8744_v47 = vld [vmem:[#allocation5 + $0x40] sm:$0xff]  }
 0x164   :  { %v8745_v48 = vld [vmem:[#allocation5] sm:$0xff]  }
 0x166   :  { %1405 = vmatpush2.bf16.msra.mxu0 %v8670_v49  ;;  %1450 = vmatpush1.bf16.msra.mxu1 %v8673_v50  ;;  %v8746_v49 = vld [vmem:[#allocation5 + $0xf8] sm:$0xff]  }
 0x167   :  { %1406 = vmatprep.subr.bf16.mxu0 %v8678_v51  ;;  %1451 = vmatprep.subr.bf16.mxu1 %v8681_v52  ;;  %v8747_v50 = vld [vmem:[#allocation5 + $0xb8] sm:$0xff]   ;;  %v8750_v51 = vld [vmem:[#allocation5 + $0xe8] sm:$0xff]  }
 0x168   :  { %v8751_v52 = vld [vmem:[#allocation5 + $0xa8] sm:$0xff]  }
 0x16a   :  { %1407 = vmatpush2.bf16.msra.mxu0 %v8676_v53  ;;  %1452 = vmatpush1.bf16.msra.mxu1 %v8679_v54  ;;  %v8752_v53 = vld [vmem:[#allocation5 + $0xe0] sm:$0xff]  }
 0x16b   :  { %1408 = vmatprep.subr.bf16.mxu0 %v8684_v55  ;;  %1453 = vmatprep.subr.bf16.mxu1 %v8687_v56  ;;  %v8753_v54 = vld [vmem:[#allocation5 + $0xa0] sm:$0xff]   ;;  %v8755_v55 = vld [vmem:[#allocation5 + $0x98] sm:$0xff]   ;;  %v8756_v56 = vld [vmem:[#allocation5 + $0xd0] sm:$0xff]  }
 0x16e   :  { %1409 = vmatpush2.bf16.msra.mxu0 %v8682_v57  ;;  %1454 = vmatpush1.bf16.msra.mxu1 %v8685_v58  ;;  %v8757_v57 = vld [vmem:[#allocation5 + $0x90] sm:$0xff]   ;;  %v8758_v58 = vld [vmem:[#allocation5 + $0xc8] sm:$0xff]  }
 0x16f   :  { %1410 = vmatprep.subr.bf16.mxu0 %v8690_v60  ;;  %1455 = vmatprep.subr.bf16.mxu1 %v8693_v62  ;;  %v8759_v60 = vld [vmem:[#allocation5 + $0x88] sm:$0xff]   ;;  %v8760_v62 = vld [vmem:[#allocation5 + $0xc0] sm:$0xff]  }
 0x172   :  { %1411 = vmatpush2.bf16.msra.mxu0 %v8688_v63  ;;  %1456 = vmatpush1.bf16.msra.mxu1 %v8691_v1  ;;  %v8761_v63 = vld [vmem:[#allocation5 + $0x80] sm:$0xff]  }
 0x173   :  { %1412 = vmatprep.subr.bf16.mxu0 %v8696_v2  ;;  %1457 = vmatprep.subr.bf16.mxu1 %v8699_v3 }
 0x176   :  { %1413 = vmatpush2.bf16.msra.mxu0 %v8694_v4  ;;  %1458 = vmatpush2.bf16.msra.mxu1 %v8697_v5  ;;  %v9768_v5 = vsub.s32 1, %v9710_v15 }
 0x177   :  { %1414 = vmatprep.subr.bf16.mxu0 %v8702_v6  ;;  %1459 = vmatprep.subr.bf16.mxu1 %v8705_v7 }
 0x178   :  { %11924 = vst [vmem:[#allocation26_spill] sm:$0xff] %v9768_v5  ;;  %v633_v7 = vrot.slane %v9723_v18, %v9768_v5 }
 0x17a   :  { %1415 = vmatpush2.bf16.msra.mxu0 %v8700_v8  ;;  %1460 = vmatpush2.bf16.msra.mxu1 %v8703_v9  ;;  %v629_v8 = vrot.slane %v9715_v16, %v9768_v5 }
 0x17b   :  { %1416 = vmatprep.subr.bf16.mxu0 %v8708_v10  ;;  %1461 = vmatprep.subr.bf16.mxu1 %v8711_v11 }
 0x17e   :  { %1417 = vmatpush2.bf16.msra.mxu0 %v8706_v12  ;;  %1462 = vmatpush2.bf16.msra.mxu1 %v8709_v13 }
 0x17f   :  { %1418 = vmatprep.subr.bf16.mxu0 %v8714_v14  ;;  %1463 = vmatprep.subr.bf16.mxu1 %v8717_v19 }
 0x182   :  { %1419 = vmatpush2.bf16.msra.mxu0 %v8712_v20  ;;  %1464 = vmatpush2.bf16.msra.mxu1 %v8715_v21 }
 0x183   :  { %1465 = vmatprep.subr.bf16.mxu1 %v8720_v22  ;;  %8366 = vmatprep.subr.bf16.mxu0 %v8730_v24 }
 0x185   :  { %1421 = vmatmul.mubr.bf16.vlgmr.msra.gmra.mxu0 %v9734_v40  ;;  %v8727_v40 = vld [vmem:[#allocation2 + $0x308] ss:$16 sps:$4 sm:$0xff]  }
 0x186   :  { %1430 = vmatprep.mubr.bf16.mxu0 %v9746_v59  ;;  %1466 = vmatpush2.bf16.msra.mxu1 %v8718_v25  ;;  %v8736_v59 = vld [vmem:[#allocation5 + $0x60] sm:$0xff]  }
 0x187   :  { %1467 = vmatprep.subr.bf16.mxu1 %v8723_v26  ;;  %8367 = vmatpush3.bf16.msra.mxu0 %v8731_v27 }
 0x188   :  { %8368 = vmatprep.subr.bf16.mxu0 %v8732_v29 }
 0x18a   :  { %1468 = vmatpush2.bf16.msra.mxu1 %v8721_v28 }
 0x18b   :  { %1469 = vmatprep.subr.bf16.mxu1 %v8726_v30  ;;  %8369 = vmatpush3.bf16.msra.mxu0 %v8733_v31 }
 0x18c   :  { %8370 = vmatprep.subr.bf16.mxu0 %v8734_v33 }
 0x18d   :  { %1431 = vmatmul.mubr.bf16.gmra.mxu0 %v9748_v61  ;;  %v8742_v61 = vld [vmem:[#allocation5 + $0x48] sm:$0xff]  }
 0x18e   :  { %1470 = vmatpush2.bf16.msra.mxu1 %v8724_v32 }
 0x18f   :  { %1471 = vmatprep.subr.bf16.mxu1 %v8729_v34  ;;  %8371 = vmatpush3.bf16.msra.mxu0 %v8735_v35 }
 0x190   :  { %8372 = vmatprep.subr.bf16.mxu0 %v8736_v59 }
 0x192   :  { %1472 = vmatpush2.bf16.msra.mxu1 %v8727_v40 }
 0x193   :  { %8373 = vmatpush3.bf16.msra.mxu0 %v8737_v39  ;;  %8394 = vmatprep.subr.bf16.mxu1 %v8746_v49 }
 0x194   :  { %8374 = vmatprep.subr.bf16.mxu0 %v8738_v41 }
 0x195   :  { %1474 = vmatmul.mubr.bf16.vlgmr.msra.gmra.mxu1 %v9752_v23  ;;  %v8748_v23 = vld [vmem:[#allocation5 + $0xf0] sm:$0xff]  }
 0x196   :  { %1483 = vmatprep.mubr.bf16.mxu1 %v9757_v38  ;;  %8395 = vmatpush3.bf16.msra.mxu1 %v8747_v50  ;;  %v8749_v38 = vld [vmem:[#allocation5 + $0xb0] sm:$0xff]  }
 0x197   :  { %8375 = vmatpush3.bf16.msra.mxu0 %v8739_v42  ;;  %8396 = vmatprep.subr.bf16.mxu1 %v8748_v23 }
 0x198   :  { %8376 = vmatprep.subr.bf16.mxu0 %v8740_v43 }
 0x19a   :  { %8397 = vmatpush3.bf16.msra.mxu1 %v8749_v38 }
 0x19b   :  { %8377 = vmatpush3.bf16.msra.mxu0 %v8741_v44  ;;  %8398 = vmatprep.subr.bf16.mxu1 %v8750_v51 }
 0x19c   :  { %8378 = vmatprep.subr.bf16.mxu0 %v8742_v61 }
 0x19d   :  { %1484 = vmatmul.mubr.bf16.gmra.mxu1 %v9755_v37  ;;  %v8754_v37 = vld [vmem:[#allocation5 + $0xd8] sm:$0xff]  }
 0x19e   :  { %8399 = vmatpush3.bf16.msra.mxu1 %v8751_v52 }
 0x19f   :  { %8379 = vmatpush3.bf16.msra.mxu0 %v8743_v46  ;;  %8400 = vmatprep.subr.bf16.mxu1 %v8752_v53 }
 0x1a0   :  { %8380 = vmatprep.subr.bf16.mxu0 %v8744_v47 }
 0x1a2   :  { %8401 = vmatpush3.bf16.msra.mxu1 %v8753_v54 }
 0x1a3   :  { %8381 = vmatpush3.bf16.msra.mxu0 %v8745_v48  ;;  %8402 = vmatprep.subr.bf16.mxu1 %v8754_v37 }
 0x1a6   :  { %8403 = vmatpush3.bf16.msra.mxu1 %v8755_v55  ;;  %v641_v55 = vrot.slane %v9739_v45, %v9768_v5 }
 0x1a7   :  { %8404 = vmatprep.subr.bf16.mxu1 %v8756_v56  ;;  %v637_v56 = vrot.slane %v9732_v36, %v9768_v5 }
 0x1aa   :  { %8405 = vmatpush3.bf16.msra.mxu1 %v8757_v57 }
 0x1ab   :  { %8406 = vmatprep.subr.bf16.mxu1 %v8758_v58 }
 0x1ae   :  { %8407 = vmatpush3.bf16.msra.mxu1 %v8759_v60 }
 0x1af   :  { %8408 = vmatprep.subr.bf16.mxu1 %v8760_v62 }
 0x1b2   :  { %8409 = vmatpush3.bf16.msra.mxu1 %v8761_v63 }
 0x205   :  { %v1316_v1 = vpop.f32.mrf.mxu0 }
 0x206   :  { %v1317_v14 = vadd.f32 %v1316_v1, %v629_v8 }
 0x207   :  { %v1318_v2 = vpop.f32.mrf.mxu0 }
 0x208   :  { %v1319_v12 = vadd.f32 %v1318_v2, %v633_v7 }
 0x209   :  { %v1320_v3 = vpop.f32.mrf.mxu0 }
 0x20a   :  { %v1321_v13 = vadd.f32 %v1320_v3, %v629_v8 }
 0x20b   :  { %v1322_v4 = vpop.f32.mrf.mxu0 }
 0x20c   :  { %v1323_v20 = vadd.f32 %v1322_v4, %v633_v7 }
 0x20d   :  { %v1326_v6 = vpop.f32.mrf.mxu0 }
 0x20e   :  { %v1327_v40 = vadd.f32 %v1326_v6, %v629_v8 }
 0x20f   :  { %v1328_v10 = vpop.f32.mrf.mxu0 }
 0x210   :  { %v1329_v33 = vadd.f32 %v1328_v10, %v633_v7 }
 0x211   :  { %v1330_v24 = vpop.f32.mrf.mxu0 }
 0x212   :  { %v1331_v34 = vadd.f32 %v1330_v24, %v629_v8 }
 0x213   :  { %v1332_v31 = vpop.f32.mrf.mxu0 }
 0x214   :  { %v1333_v41 = vadd.f32 %v1332_v31, %v633_v7 }
 0x215   :  { %v1369_v9 = vpop.f32.mrf.mxu1 }
 0x216   :  { %v1370_v25 = vadd.f32 %v1369_v9, %v1317_v14 }
 0x217   :  { %v1371_v11 = vpop.f32.mrf.mxu1 }
 0x218   :  { %v1372_v21 = vadd.f32 %v1371_v11, %v1319_v12  ;;  %v1494_v16 = vmax.f32 %v1370_v25, 0.0 }
 0x219   :  { %v1373_v19 = vpop.f32.mrf.mxu1 }
 0x21a   :  { %v1374_v22 = vadd.f32 %v1373_v19, %v1321_v13  ;;  %v1495_v18 = vmax.f32 %v1372_v21, 0.0 }
 0x21b   :  { %v1375_v26 = vpop.f32.mrf.mxu1 }
 0x21c   :  { %v1376_v27 = vadd.f32 %v1375_v26, %v1323_v20  ;;  %v1498_v28 = vmax.f32 %v1374_v22, 0.0 }
 0x21d   :  { %v1379_v29 = vpop.f32.mrf.mxu1 }
 0x21e   :  { %v1499_v30 = vmax.f32 %v1376_v27, 0.0  ;;  %v1574_v59 = vpack.c.bf16 %v1498_v28, %v1494_v16  ;;  %v1380_v44 = vadd.f32 %v1379_v29, %v1327_v40 }
 0x21f   :  { %v1381_v32 = vpop.f32.mrf.mxu1 }
 0x220   :  { %v1575_v35 = vpack.c.bf16 %v1499_v30, %v1495_v18  ;;  %v1382_v42 = vadd.f32 %v1381_v32, %v1329_v33  ;;  %v1502_v50 = vmax.f32 %v1380_v44, 0.0  ;;  %v8773_v44 = vld [vmem:[#allocation7 + $0x12c] ss:$24 sps:$4 sm:$0xff]  }
 0x221   :  { %v1383_v39 = vpop.f32.mrf.mxu1 }
 0x222   :  { %v1384_v43 = vadd.f32 %v1383_v39, %v1331_v34  ;;  %1810 = vmatprep.mubr.bf16.mxu0 %v1575_v35  ;;  %v1503_v48 = vmax.f32 %v1382_v42, 0.0  ;;  %v8764_v39 = vld [vmem:[#allocation7 + $0x154] ss:$24 sps:$4 sm:$0xff]  }
 0x223   :  { %v1385_v61 = vpop.f32.mrf.mxu1  ;;  %1811 = vmatmul.mubr.bf16.vlgmr.msra.gmra.mxu0 %v1574_v59  ;;  %v8762_v59 = vld [vmem:[#allocation7 + $0x150] ss:$24 sps:$4 sm:$0xff]   ;;  %v8767_v42 = vld [vmem:[#allocation7 + $0x15c] ss:$24 sps:$4 sm:$0xff]   ;;  %2222 = vmatprep.subr.bf16.mxu0 %v8764_v39 }
 0x224   :  { %v1386_v46 = vadd.f32 %v1385_v61, %v1333_v41  ;;  %v1506_v47 = vmax.f32 %v1384_v43, 0.0  ;;  %v8765_v41 = vld [vmem:[#allocation7 + $0x158] ss:$24 sps:$4 sm:$0xff]   ;;  %v8770_v43 = vld [vmem:[#allocation7 + $0x124] ss:$24 sps:$4 sm:$0xff]   ;;  %2223 = vmatpush1.bf16.msra.mxu0 %v8762_v59  ;;  %2275 = vmatprep.subr.bf16.mxu1 %v8767_v42 }
 0x225   :  { %v8768_v61 = vld [vmem:[#allocation7 + $0x120] ss:$24 sps:$4 sm:$0xff]   ;;  %2224 = vmatprep.subr.bf16.mxu0 %v8770_v43 }
 0x226   :  { %v1507_v49 = vmax.f32 %v1386_v46, 0.0  ;;  %v1578_v38 = vpack.c.bf16 %v1506_v47, %v1502_v50  ;;  %v8771_v46 = vld [vmem:[#allocation7 + $0x128] ss:$24 sps:$4 sm:$0xff]   ;;  %v8776_v47 = vld [vmem:[#allocation7 + $0xf4] ss:$24 sps:$4 sm:$0xff]  }
 0x227   :  { %v8777_v50 = vld [vmem:[#allocation7 + $0xf8] ss:$24 sps:$4 sm:$0xff]  }
 0x228   :  { %v1579_v23 = vpack.c.bf16 %v1507_v49, %v1503_v48  ;;  %v8779_v48 = vld [vmem:[#allocation7 + $0xfc] ss:$24 sps:$4 sm:$0xff]   ;;  %2225 = vmatpush1.bf16.msra.mxu0 %v8768_v61  ;;  %v8774_v49 = vld [vmem:[#allocation7 + $0xf0] ss:$24 sps:$4 sm:$0xff]  }
 0x229   :  { %2226 = vmatprep.subr.bf16.mxu0 %v8776_v47 }
 0x22a   :  { %1818 = vmatprep.mubr.bf16.mxu0 %v1579_v23  ;;  %v8782_v23 = vld [vmem:[#allocation7 + $0xc4] ss:$24 sps:$4 sm:$0xff]  }
 0x22b   :  { %1819 = vmatmul.mubr.bf16.gmra.mxu0 %v1578_v38  ;;  %v8785_v38 = vld [vmem:[#allocation7 + $0xcc] ss:$24 sps:$4 sm:$0xff]  }
 0x22c   :  { %2254 = vmatprep.mubr.bf16.mxu0 %v11598_v0  ;;  %2227 = vmatpush1.bf16.msra.mxu0 %v8774_v49 }
 0x22d   :  { %2228 = vmatprep.subr.bf16.mxu0 %v8782_v23 }
 0x245   :  { %v1422_v51 = vpop.f32.mrf.mxu0 }
 0x246   :  { %v1423_v1 = vadd.f32 %v1422_v51, %v637_v56  ;;  %v8780_v51 = vld [vmem:[#allocation7 + $0xc0] ss:$24 sps:$4 sm:$0xff]  }
 0x247   :  { %v1424_v52 = vpop.f32.mrf.mxu0  ;;  %2229 = vmatpush1.bf16.msra.mxu0 %v8780_v51 }
 0x248   :  { %v1425_v62 = vadd.f32 %v1424_v52, %v641_v55  ;;  %v8783_v52 = vld [vmem:[#allocation7 + $0xc8] ss:$24 sps:$4 sm:$0xff]  }
 0x249   :  { %v1426_v53 = vpop.f32.mrf.mxu0 }
 0x24a   :  { %v1427_v63 = vadd.f32 %v1426_v53, %v637_v56  ;;  %v8788_v53 = vld [vmem:[#allocation7 + $0x94] ss:$24 sps:$4 sm:$0xff]  }
 0x24b   :  { %v1428_v54 = vpop.f32.mrf.mxu0  ;;  %2230 = vmatprep.subr.bf16.mxu0 %v8788_v53 }
 0x24c   :  { %v1429_v3 = vadd.f32 %v1428_v54, %v641_v55  ;;  %v8791_v54 = vld [vmem:[#allocation7 + $0x9c] ss:$24 sps:$4 sm:$0xff]  }
 0x24d   :  { %v1432_v37 = vpop.f32.mrf.mxu0 }
 0x24e   :  { %v1433_v24 = vadd.f32 %v1432_v37, %v637_v56  ;;  %v8786_v37 = vld [vmem:[#allocation7 + $0x90] ss:$24 sps:$4 sm:$0xff]  }
 0x24f   :  { %v1434_v58 = vpop.f32.mrf.mxu0  ;;  %2231 = vmatpush1.bf16.msra.mxu0 %v8786_v37 }
 0x250   :  { %v1435_v20 = vadd.f32 %v1434_v58, %v641_v55  ;;  %v8797_v58 = vld [vmem:[#allocation7 + $0x6c] ss:$24 sps:$4 sm:$0xff]  }
 0x251   :  { %v1436_v7 = vpop.f32.mrf.mxu0 }
 0x252   :  { %v1437_v21 = vadd.f32 %v1436_v7, %v637_v56  ;;  %v8794_v56 = vld [vmem:[#allocation7 + $0x64] ss:$24 sps:$4 sm:$0xff]   ;;  %v8807_v7 = vld [vmem:[#allocation7 + $0x8] ss:$24 sps:$4 sm:$0xff]  }
 0x253   :  { %v1438_v14 = vpop.f32.mrf.mxu0  ;;  %2232 = vmatprep.subr.bf16.mxu0 %v8794_v56 }
 0x254   :  { %v1439_v27 = vadd.f32 %v1438_v14, %v641_v55  ;;  %v8789_v55 = vld [vmem:[#allocation7 + $0x98] ss:$24 sps:$4 sm:$0xff]  }
 0x255   :  { %v1475_v57 = vpop.f32.mrf.mxu1 }
 0x256   :  { %v1476_v8 = vadd.f32 %v1475_v57, %v1423_v1  ;;  %v8792_v57 = vld [vmem:[#allocation7 + $0x60] ss:$24 sps:$4 sm:$0xff]   ;;  %v8803_v1 = vld [vmem:[#allocation7 + $0x3c] ss:$24 sps:$4 sm:$0xff]  }
 0x257   :  { %v1477_v60 = vpop.f32.mrf.mxu1  ;;  %2233 = vmatpush1.bf16.msra.mxu0 %v8792_v57 }
 0x258   :  { %v1478_v4 = vadd.f32 %v1477_v60, %v1425_v62  ;;  %v1496_v36 = vmax.f32 %v1476_v8, 0.0  ;;  %v8795_v60 = vld [vmem:[#allocation7 + $0x68] ss:$24 sps:$4 sm:$0xff]   ;;  %v8800_v62 = vld [vmem:[#allocation7 + $0x34] ss:$24 sps:$4 sm:$0xff]  }
 0x259   :  { %v1479_v2 = vpop.f32.mrf.mxu1  ;;  %2234 = vmatprep.subr.bf16.mxu0 %v8800_v62  ;;  %v8812_v8 = vld [vmem:[#allocation7 + $0x164] ss:$24 sps:$4 sm:$0xff]   ;;  %v8821_v62 = vld [vmem:[#allocation7 + $0xd4] ss:$24 sps:$4 sm:$0xff]  }
 0x25a   :  { %v1480_v6 = vadd.f32 %v1479_v2, %v1427_v63  ;;  %v1497_v45 = vmax.f32 %v1478_v4, 0.0  ;;  %v8798_v63 = vld [vmem:[#allocation7 + $0x30] ss:$24 sps:$4 sm:$0xff]   ;;  %v8804_v4 = vld [vmem:[#allocation7] ss:$24 sps:$4 sm:$0xff]  }
 0x25b   :  { %v1481_v9 = vpop.f32.mrf.mxu1  ;;  %v8801_v2 = vld [vmem:[#allocation7 + $0x38] ss:$24 sps:$4 sm:$0xff]   ;;  %2235 = vmatpush1.bf16.msra.mxu0 %v8798_v63 }
 0x25c   :  { %v1482_v10 = vadd.f32 %v1481_v9, %v1429_v3  ;;  %v1500_v11 = vmax.f32 %v1480_v6, 0.0  ;;  %v8806_v3 = vld [vmem:[#allocation7 + $0x4] ss:$24 sps:$4 sm:$0xff]   ;;  %v9783_v9 = vld [vmem:[%s11584_s1] sm:$0xf] }
 0x25d   :  { %v1485_v12 = vpop.f32.mrf.mxu1  ;;  %v8809_v6 = vld [vmem:[#allocation7 + $0xc] ss:$24 sps:$4 sm:$0xff]   ;;  %2236 = vmatprep.subr.bf16.mxu0 %v8806_v3  ;;  %vm2437_vm1 = vcmp.gt.f32.partialorder %v9783_v9, 0.0  ;;  %vm3335_vm2 = vcmp.gt.f32.partialorder %v9783_v9, 1.0  ;;  %vm4073_vm3 = vcmp.gt.f32.partialorder %v9783_v9, 4.0  ;;  %vm4569_vm4 = vcmp.gt.f32.partialorder %v9783_v9, 6.0 }
 0x25e   :  { %v1501_v13 = vmax.f32 %v1482_v10, 0.0  ;;  %v1576_v25 = vpack.c.bf16 %v1500_v11, %v1496_v36  ;;  %v1486_v18 = vadd.f32 %v1485_v12, %v1433_v24  ;;  %v9785_v10 = vld [vmem:[#allocation8 + $0x1c0] sm:$0xff]  ;;  %v11600_v12 = vmov 0.0   ;;  %v8819_v63 = vld [vmem:[#allocation7 + $0xd0] ss:$24 sps:$4 sm:$0xff]  }
 0x25f   :  { %v1487_v19 = vpop.f32.mrf.mxu1  ;;  %2237 = vmatpush1.bf16.msra.mxu0 %v8804_v4  ;;  %v9787_v11 = vld [vmem:[#allocation8 + $0x1e0] sm:$0xff]  ;;  %v8044_v14 = vsel %vm3335_vm2, 1.0, %v11600_v12  ;;  %v8059_v36 = vsel %vm4073_vm3, 1.0, %v11600_v12  ;;  %v8827_v3 = vld [vmem:[#allocation7 + $0x74] ss:$24 sps:$4 sm:$0xff]   ;;  %vm3577_vm5 = vcmp.gt.f32.partialorder %v9783_v9, 2.0 }
 0x260   :  { %v1577_v22 = vpack.c.bf16 %v1501_v13, %v1497_v45  ;;  %v1488_v28 = vadd.f32 %v1487_v19, %v1435_v20  ;;  %v1504_v34 = vmax.f32 %v1486_v18, 0.0  ;;  %2328 = vmatprep.subr.bf16.mxu0 %v8812_v8  ;;  %v7911_v45 = vsel %vm2437_vm1, 1.0, %v11600_v12  ;;  %v9308_v18 = vld [vmem:[%s11595_s12] sm:$0xff]  ;;  %v8825_v4 = vld [vmem:[#allocation7 + $0x70] ss:$24 sps:$4 sm:$0xff]  }
 0x261   :  { %v1489_v26 = vpop.f32.mrf.mxu1  ;;  %2446 = vperm.xlu0 %8530, %v7911_v45   ;;  %v9794_v13 = vcombine.high %v9785_v10, %v9787_v11  ;;  %v8069_v19 = vsel %vm4569_vm4, 1.0, %v11600_v12  ;;  %v8833_v8 = vld [vmem:[#allocation7 + $0x14] ss:$24 sps:$4 sm:$0xff]  }
 0x262   :  { %v1490_v29 = vadd.f32 %v1489_v26, %v1437_v21  ;;  %1859 = vmatprep.mubr.bf16.mxu1 %v1577_v22  ;;  %v1505_v32 = vmax.f32 %v1488_v28, 0.0  ;;  %v9804_v26 = vsub.s32 2, %v9710_v15  ;;  %v238_v45 = vld [vmem:[#allocation8 + $0x1c8] sm:$0xff] }
 0x263   :  { %v1491_v30 = vpop.f32.mrf.mxu1  ;;  %1860 = vmatmul.mubr.bf16.vlgmr.msra.gmra.mxu1 %v1576_v25  ;;  %11925 = vst [vmem:[#allocation27_spill] sm:$0xff] %v9794_v13  ;;  %v262_v12 = vld [vmem:[#allocation8 + $0x288] sm:$0xff] }
 0x264   :  { %v1492_v31 = vadd.f32 %v1491_v30, %v1439_v27  ;;  %v1508_v16 = vmax.f32 %v1490_v29, 0.0  ;;  %2276 = vmatpush1.bf16.msra.mxu1 %v8765_v41  ;;  %v1585_v30 = vrot.slane %v9308_v18, %v9804_v26 }
 0x265   :  { %2277 = vmatprep.subr.bf16.mxu1 %v8773_v44  ;;  %3340 = vperm.xlu0 %8530, %v8044_v14   ;;  %v242_v14 = vld [vmem:[#allocation8 + $0x1e8] sm:$0xff] }
 0x266   :  { %v1509_v33 = vmax.f32 %v1492_v31, 0.0  ;;  %v1580_v40 = vpack.c.bf16 %v1508_v16, %v1504_v34 }
 0x268   :  { %v1581_v35 = vpack.c.bf16 %v1509_v33, %v1505_v32  ;;  %2278 = vmatpush1.bf16.msra.mxu1 %v8771_v46  ;;  %v8810_v46 = vld [vmem:[#allocation7 + $0x160] ss:$24 sps:$4 sm:$0xff]  }
 0x269   :  { %2279 = vmatprep.subr.bf16.mxu1 %v8779_v48  ;;  %4078 = vperm.xlu0 %8530, %v8059_v36   ;;  %v8831_v36 = vld [vmem:[#allocation7 + $0x10] ss:$24 sps:$4 sm:$0xff]  }
 0x26a   :  { %1867 = vmatprep.mubr.bf16.mxu1 %v1581_v35 }
 0x26b   :  { %1868 = vmatmul.mubr.bf16.gmra.mxu1 %v1580_v40 }
 0x26c   :  { %2307 = vmatprep.mubr.bf16.mxu1 %v11598_v0  ;;  %2280 = vmatpush1.bf16.msra.mxu1 %v8777_v50  ;;  %v8815_v50 = vld [vmem:[#allocation7 + $0x134] ss:$24 sps:$4 sm:$0xff]  }
 0x26d   :  { %2281 = vmatprep.subr.bf16.mxu1 %v8785_v38  ;;  %4574 = vperm.xlu0 %8530, %v8069_v19   ;;  %v9813_v19 = vcombine.high %v238_v45, %v242_v14 }
 0x26f   :  { %11926 = vst [vmem:[#allocation28_spill] sm:$0xff] %v9813_v19 }
 0x270   :  { %2282 = vmatpush1.bf16.msra.mxu1 %v8783_v52  ;;  %v8813_v52 = vld [vmem:[#allocation7 + $0x130] ss:$24 sps:$4 sm:$0xff]  }
 0x271   :  { %2283 = vmatprep.subr.bf16.mxu1 %v8791_v54  ;;  %6303 = vperm.xlu0 %8530, %v9783_v9  }
 0x274   :  { %2284 = vmatpush1.bf16.msra.mxu1 %v8789_v55  ;;  %v8818_v55 = vld [vmem:[#allocation7 + $0x104] ss:$24 sps:$4 sm:$0xff]  }
 0x275   :  { %2285 = vmatprep.subr.bf16.mxu1 %v8797_v58  ;;  %v8816_v58 = vld [vmem:[#allocation7 + $0x100] ss:$24 sps:$4 sm:$0xff]  }
 0x278   :  { %2286 = vmatpush1.bf16.msra.mxu1 %v8795_v60 }
 0x279   :  { %2287 = vmatprep.subr.bf16.mxu1 %v8803_v1  ;;  %v8824_v1 = vld [vmem:[#allocation7 + $0xa4] ss:$24 sps:$4 sm:$0xff]  }
 0x27c   :  { %2288 = vmatpush1.bf16.msra.mxu1 %v8801_v2  ;;  %v8822_v2 = vld [vmem:[#allocation7 + $0xa0] ss:$24 sps:$4 sm:$0xff]  }
 0x27d   :  { %2289 = vmatprep.subr.bf16.mxu1 %v8809_v6  ;;  %v8830_v6 = vld [vmem:[#allocation7 + $0x44] ss:$24 sps:$4 sm:$0xff]  }
 0x280   :  { %2290 = vmatpush1.bf16.msra.mxu1 %v8807_v7  ;;  %v8828_v7 = vld [vmem:[#allocation7 + $0x40] ss:$24 sps:$4 sm:$0xff]  }
 0x281   :  { %3109 = vmatprep.subr.bf16.mxu1 %v9794_v13 }
 0x2e3   :  { %v8382_v20 = vpop.f32.mrf.mxu0 }
 0x2e5   :  { %v8383_v21 = vpop.f32.mrf.mxu0 }
 0x2e6   :  { %v8384_v31 = vadd.f32 %v8383_v21, %v8382_v20  ;;  %v9819_v20 = vcombine.low %v9785_v10, %v9787_v11  ;;  %v9821_v21 = vcombine.low %v238_v45, %v242_v14  ;;  %v221_v10 = vld [vmem:[#allocation8 + $0x140] sm:$0xff]  ;;  %v182_v45 = vld [vmem:[#allocation8 + $0x8] sm:$0xff] }
 0x2e7   :  { %v8385_v22 = vpop.f32.mrf.mxu0  ;;  %v225_v11 = vld [vmem:[#allocation8 + $0x160] sm:$0xff] }
 0x2e8   :  { %v1813_v40 = vadd.f32 %v8384_v31, %v1585_v30  ;;  %11927 = vst [vmem:[#allocation29_spill] sm:$0xff] %v9819_v20  ;;  %11928 = vst [vmem:[#allocation30_spill] sm:$0xff] %v9821_v21  ;;  %v222_v31 = vld [vmem:[#allocation8 + $0x148] sm:$0xff] }
 0x2e9   :  { %v8386_v24 = vpop.f32.mrf.mxu0 }
 0x2ea   :  { %v8387_v16 = vadd.f32 %v8386_v24, %v8385_v22  ;;  %v229_v22 = vld [vmem:[#allocation8 + $0x180] sm:$0xff] }
 0x2eb   :  { %v8388_v25 = vpop.f32.mrf.mxu0  ;;  %v233_v24 = vld [vmem:[#allocation8 + $0x1a0] sm:$0xff] }
 0x2ec   :  { %v1816_v59 = vadd.f32 %v8387_v16, %v1585_v30  ;;  %v9829_v18 = vcombine.low %v229_v22, %v233_v24  ;;  %v9837_v16 = vcombine.high %v221_v10, %v225_v11 }
 0x2ed   :  { %v8389_v27 = vpop.f32.mrf.mxu0 }
 0x2ee   :  { %v8390_v47 = vadd.f32 %v8389_v27, %v8388_v25  ;;  %v230_v25 = vld [vmem:[#allocation8 + $0x188] sm:$0xff]  ;;  %v9825_v27 = vcombine.high %v229_v22, %v233_v24  ;;  %11931 = vst [vmem:[#allocation33_spill] sm:$0xff] %v9829_v18  ;;  %11933 = vst [vmem:[#allocation35_spill] sm:$0xff] %v9837_v16 }
 0x2ef   :  { %v8391_v32 = vpop.f32.mrf.mxu0 }
 0x2f0   :  { %v1821_v53 = vadd.f32 %v8390_v47, %v1585_v30  ;;  %11929 = vst [vmem:[#allocation31_spill] sm:$0xff] %v9825_v27  ;;  %v209_v47 = vld [vmem:[#allocation8 + $0xe0] sm:$0xff] }
 0x2f1   :  { %v8392_v41 = vpop.f32.mrf.mxu0 }
 0x2f2   :  { %v8393_v48 = vadd.f32 %v8392_v41, %v8391_v32  ;;  %v226_v32 = vld [vmem:[#allocation8 + $0x168] sm:$0xff] }
 0x2f4   :  { %v1824_v54 = vadd.f32 %v8393_v48, %v1585_v30  ;;  %v206_v48 = vld [vmem:[#allocation8 + $0xc8] sm:$0xff] }
 0x323   :  { %v8410_v28 = vpop.f32.mrf.mxu1 }
 0x325   :  { %v8411_v29 = vpop.f32.mrf.mxu1 }
 0x326   :  { %v8412_v34 = vadd.f32 %v8411_v29, %v8410_v28  ;;  %v234_v28 = vld [vmem:[#allocation8 + $0x1a8] sm:$0xff] }
 0x327   :  { %v8413_v33 = vpop.f32.mrf.mxu1  ;;  %v9827_v29 = vcombine.high %v230_v25, %v234_v28  ;;  %v9831_v30 = vcombine.low %v230_v25, %v234_v28  ;;  %v301_v28 = vld [vmem:[#allocation8 + $0x3c0] sm:$0xff] }
 0x328   :  { %v1862_v43 = vadd.f32 %v8412_v34, %v1813_v40  ;;  %v9841_v34 = vcombine.low %v221_v10, %v225_v11  ;;  %v213_v40 = vld [vmem:[#allocation8 + $0x100] sm:$0xff]  ;;  %v302_v11 = vld [vmem:[#allocation8 + $0x3c8] sm:$0xff] }
 0x329   :  { %v8414_v35 = vpop.f32.mrf.mxu1  ;;  %11930 = vst [vmem:[#allocation32_spill] sm:$0xff] %v9827_v29  ;;  %11932 = vst [vmem:[#allocation34_spill] sm:$0xff] %v9831_v30  ;;  %v305_v10 = vld [vmem:[#allocation8 + $0x3e0] sm:$0xff] }
 0x32a   :  { %v8415_v39 = vadd.f32 %v8414_v35, %v8413_v33  ;;  %v9839_v33 = vcombine.high %v222_v31, %v226_v32  ;;  %11935 = vst [vmem:[#allocation37_spill] sm:$0xff] %v9841_v34  ;;  %v9843_v35 = vcombine.low %v222_v31, %v226_v32  ;;  %v9909_v31 = vcombine.high %v301_v28, %v305_v10  ;;  %v306_v32 = vld [vmem:[#allocation8 + $0x3e8] sm:$0xff] }
 0x32b   :  { %v8416_v42 = vpop.f32.mrf.mxu1 }
 0x32c   :  { %v1865_v44 = vadd.f32 %v8415_v39, %v1816_v59  ;;  %11934 = vst [vmem:[#allocation36_spill] sm:$0xff] %v9839_v33  ;;  %11936 = vst [vmem:[#allocation38_spill] sm:$0xff] %v9843_v35  ;;  %v217_v59 = vld [vmem:[#allocation8 + $0x120] sm:$0xff]  ;;  %v214_v39 = vld [vmem:[#allocation8 + $0x108] sm:$0xff] }
 0x32d   :  { %v8417_v61 = vpop.f32.mrf.mxu1  ;;  %v9849_v41 = vcombine.high %v213_v40, %v217_v59  ;;  %11957 = vst [vmem:[#allocation59_spill] sm:$0xff] %v9909_v31 }
 0x32e   :  { %v1924_v49 = vpack.c.bf16 %v1865_v44, %v1862_v43  ;;  %v8418_v38 = vadd.f32 %v8417_v61, %v8416_v42  ;;  %v218_v42 = vld [vmem:[#allocation8 + $0x128] sm:$0xff]  ;;  %v9853_v44 = vcombine.low %v213_v40, %v217_v59  ;;  %v9911_v40 = vcombine.high %v302_v11, %v306_v32 }
 0x32f   :  { %v8419_v23 = vpop.f32.mrf.mxu1  ;;  %11937 = vst [vmem:[#allocation39_spill] sm:$0xff] %v9849_v41  ;;  %v9851_v43 = vcombine.high %v214_v39, %v218_v42  ;;  %v9855_v61 = vcombine.low %v214_v39, %v218_v42  ;;  %v9913_v59 = vcombine.low %v301_v28, %v305_v10  ;;  %v9915_v39 = vcombine.low %v302_v11, %v306_v32  ;;  %v293_v42 = vld [vmem:[#allocation8 + $0x380] sm:$0xff]  ;;  %v278_v10 = vld [vmem:[#allocation8 + $0x308] sm:$0xff] }
 0x330   :  { %2255 = vmatmul.mubr.bf16.vlgmr.msra.gmra.mxu0 %v1924_v49  ;;  %2308 = vmatmul.mubr.bf16.vlgmr.msra.gmra.mxu1 %v1924_v49  ;;  %v1870_v56 = vadd.f32 %v8418_v38, %v1821_v53  ;;  %11939 = vst [vmem:[#allocation41_spill] sm:$0xff] %v9853_v44  ;;  %v201_v53 = vld [vmem:[#allocation8 + $0xa0] sm:$0xff]  ;;  %11958 = vst [vmem:[#allocation60_spill] sm:$0xff] %v9911_v40  ;;  %v282_v32 = vld [vmem:[#allocation8 + $0x328] sm:$0xff] }
 0x331   :  { %2329 = vmatpush1.bf16.msra.mxu0 %v8810_v46  ;;  %v8420_v51 = vpop.f32.mrf.mxu1  ;;  %2264 = vmatprep.mubr.bf16.mxu0 %v11598_v0  ;;  %11938 = vst [vmem:[#allocation40_spill] sm:$0xff] %v9851_v43  ;;  %11940 = vst [vmem:[#allocation42_spill] sm:$0xff] %v9855_v61  ;;  %v205_v46 = vld [vmem:[#allocation8 + $0xc0] sm:$0xff] }
 0x332   :  { %v8421_v37 = vadd.f32 %v8420_v51, %v8419_v23  ;;  %2330 = vmatprep.subr.bf16.mxu0 %v8815_v50  ;;  %2317 = vmatprep.mubr.bf16.mxu1 %v11598_v0  ;;  %v210_v50 = vld [vmem:[#allocation8 + $0xe8] sm:$0xff]  ;;  %v9865_v38 = vcombine.low %v205_v46, %v209_v47  ;;  %11959 = vst [vmem:[#allocation61_spill] sm:$0xff] %v9913_v59  ;;  %11960 = vst [vmem:[#allocation62_spill] sm:$0xff] %v9915_v39  ;;  %v281_v28 = vld [vmem:[#allocation8 + $0x320] sm:$0xff] }
 0x333   :  { %3110 = vmatpush1.bf16.msra.mxu1 %v9819_v20  ;;  %v9863_v23 = vcombine.high %v206_v48, %v210_v50  ;;  %v9867_v51 = vcombine.low %v206_v48, %v210_v50  ;;  %v298_v50 = vld [vmem:[#allocation8 + $0x3a8] sm:$0xff] }
 0x334   :  { %v1873_v57 = vadd.f32 %v8421_v37, %v1824_v54  ;;  %3111 = vmatprep.subr.bf16.mxu1 %v9825_v27  ;;  %11943 = vst [vmem:[#allocation45_spill] sm:$0xff] %v9865_v38  ;;  %v198_v54 = vld [vmem:[#allocation8 + $0x88] sm:$0xff] }
 0x335   :  { %2331 = vmatpush1.bf16.msra.mxu0 %v8813_v52  ;;  %11942 = vst [vmem:[#allocation44_spill] sm:$0xff] %v9863_v23  ;;  %11944 = vst [vmem:[#allocation46_spill] sm:$0xff] %v9867_v51  ;;  %v197_v52 = vld [vmem:[#allocation8 + $0x80] sm:$0xff] }
 0x336   :  { %2332 = vmatprep.subr.bf16.mxu0 %v8818_v55  ;;  %v1925_v60 = vpack.c.bf16 %v1873_v57, %v1870_v56  ;;  %v9873_v37 = vcombine.high %v197_v52, %v201_v53  ;;  %v202_v55 = vld [vmem:[#allocation8 + $0xa8] sm:$0xff]  ;;  %v9877_v57 = vcombine.low %v197_v52, %v201_v53 }
 0x337   :  { %3112 = vmatpush1.bf16.msra.mxu1 %v9829_v18  ;;  %v9875_v56 = vcombine.high %v198_v54, %v202_v55 }
 0x338   :  { %2265 = vmatmul.mubr.bf16.gmra.mxu0 %v1925_v60  ;;  %2318 = vmatmul.mubr.bf16.gmra.mxu1 %v1925_v60  ;;  %11945 = vst [vmem:[#allocation47_spill] sm:$0xff] %v9873_v37  ;;  %11947 = vst [vmem:[#allocation49_spill] sm:$0xff] %v9877_v57 }
 0x339   :  { %2333 = vmatpush1.bf16.msra.mxu0 %v8816_v58  ;;  %2360 = vmatprep.mubr.bf16.mxu0 %v11598_v0  ;;  %11946 = vst [vmem:[#allocation48_spill] sm:$0xff] %v9875_v56  ;;  %v9879_v58 = vcombine.low %v198_v54, %v202_v55  ;;  %v285_v55 = vld [vmem:[#allocation8 + $0x340] sm:$0xff] }
 0x33a   :  { %2334 = vmatprep.subr.bf16.mxu0 %v8821_v62  ;;  %3113 = vmatprep.subr.bf16.mxu1 %v9837_v16  ;;  %v193_v62 = vld [vmem:[#allocation8 + $0x60] sm:$0xff] }
 0x33b   :  { %3114 = vmatpush1.bf16.msra.mxu1 %v9841_v34  ;;  %11948 = vst [vmem:[#allocation50_spill] sm:$0xff] %v9879_v58 }
 0x33c   :  { %3115 = vmatprep.subr.bf16.mxu1 %v9849_v41 }
 0x33d   :  { %2335 = vmatpush1.bf16.msra.mxu0 %v8819_v63  ;;  %v190_v63 = vld [vmem:[#allocation8 + $0x48] sm:$0xff] }
 0x33e   :  { %2336 = vmatprep.subr.bf16.mxu0 %v8824_v1 }
 0x33f   :  { %3116 = vmatpush1.bf16.msra.mxu1 %v9853_v44 }
 0x341   :  { %2337 = vmatpush1.bf16.msra.mxu0 %v8822_v2  ;;  %v194_v2 = vld [vmem:[#allocation8 + $0x68] sm:$0xff] }
 0x342   :  { %2338 = vmatprep.subr.bf16.mxu0 %v8827_v3  ;;  %v9887_v3 = vcombine.high %v190_v63, %v194_v2 }
 0x344   :  { %11950 = vst [vmem:[#allocation52_spill] sm:$0xff] %v9887_v3 }
 0x345   :  { %2339 = vmatpush1.bf16.msra.mxu0 %v8825_v4 }
 0x346   :  { %2340 = vmatprep.subr.bf16.mxu0 %v8830_v6  ;;  %v9892_v6 = vcombine.low %v190_v63, %v194_v2  ;;  %v290_v2 = vld [vmem:[#allocation8 + $0x368] sm:$0xff] }
 0x348   :  { %11952 = vst [vmem:[#allocation54_spill] sm:$0xff] %v9892_v6 }
 0x349   :  { %2341 = vmatpush1.bf16.msra.mxu0 %v8828_v7  ;;  %v181_v7 = vld [vmem:[#allocation8] sm:$0xff] }
 0x34a   :  { %2342 = vmatprep.subr.bf16.mxu0 %v8833_v8  ;;  %v185_v8 = vld [vmem:[#allocation8 + $0x20] sm:$0xff] }
 0x34b   :  { %v9896_v14 = vcombine.high %v181_v7, %v185_v8  ;;  %v9898_v22 = vcombine.low %v181_v7, %v185_v8 }
 0x34d   :  { %2343 = vmatpush1.bf16.msra.mxu0 %v8831_v36  ;;  %11953 = vst [vmem:[#allocation55_spill] sm:$0xff] %v9896_v14  ;;  %v186_v36 = vld [vmem:[#allocation8 + $0x28] sm:$0xff]  ;;  %11954 = vst [vmem:[#allocation56_spill] sm:$0xff] %v9898_v22 }
 0x34e   :  { %3150 = vmatprep.subr.bf16.mxu0 %v9813_v19  ;;  %v9901_v24 = vcombine.high %v182_v45, %v186_v36  ;;  %v9903_v25 = vcombine.low %v182_v45, %v186_v36  ;;  %v277_v36 = vld [vmem:[#allocation8 + $0x300] sm:$0xff] }
 0x34f   :  { %v9945_v11 = vcombine.high %v277_v36, %v281_v28 }
 0x350   :  { %2361 = vmatmul.mubr.bf16.vlgmr.msra.gmra.mxu0 %v1924_v49  ;;  %v9861_v49 = vcombine.high %v205_v46, %v209_v47  ;;  %11955 = vst [vmem:[#allocation57_spill] sm:$0xff] %v9901_v24  ;;  %11956 = vst [vmem:[#allocation58_spill] sm:$0xff] %v9903_v25  ;;  %v297_v46 = vld [vmem:[#allocation8 + $0x3a0] sm:$0xff]  ;;  %v294_v47 = vld [vmem:[#allocation8 + $0x388] sm:$0xff] }
 0x351   :  { %2370 = vmatprep.mubr.bf16.mxu0 %v11598_v0  ;;  %3151 = vmatpush1.bf16.msra.mxu0 %v9821_v21  ;;  %v9921_v48 = vcombine.high %v293_v42, %v297_v46  ;;  %v9923_v52 = vcombine.high %v294_v47, %v298_v50  ;;  %v9925_v53 = vcombine.low %v293_v42, %v297_v46 }
 0x352   :  { %3152 = vmatprep.subr.bf16.mxu0 %v9827_v29  ;;  %11941 = vst [vmem:[#allocation43_spill] sm:$0xff] %v9861_v49  ;;  %3117 = vmatprep.subr.bf16.mxu1 %v9861_v49  ;;  %v9927_v54 = vcombine.low %v294_v47, %v298_v50  ;;  %11969 = vst [vmem:[#allocation71_spill] sm:$0xff] %v9945_v11  ;;  %v9947_v42 = vcombine.high %v278_v10, %v282_v32  ;;  %v269_v50 = vld [vmem:[#allocation8 + $0x2c0] sm:$0xff] }
 0x353   :  { %3118 = vmatpush1.bf16.msra.mxu1 %v9865_v38  ;;  %11961 = vst [vmem:[#allocation63_spill] sm:$0xff] %v9921_v48  ;;  %11962 = vst [vmem:[#allocation64_spill] sm:$0xff] %v9923_v52  ;;  %v9949_v46 = vcombine.low %v277_v36, %v281_v28  ;;  %v9951_v47 = vcombine.low %v278_v10, %v282_v32  ;;  %v261_v10 = vld [vmem:[#allocation8 + $0x280] sm:$0xff] }
 0x354   :  { %3119 = vmatprep.subr.bf16.mxu1 %v9873_v37  ;;  %11963 = vst [vmem:[#allocation65_spill] sm:$0xff] %v9925_v53  ;;  %11964 = vst [vmem:[#allocation66_spill] sm:$0xff] %v9927_v54  ;;  %v265_v32 = vld [vmem:[#allocation8 + $0x2a0] sm:$0xff] }
 0x355   :  { %3153 = vmatpush1.bf16.msra.mxu0 %v9831_v30  ;;  %11970 = vst [vmem:[#allocation72_spill] sm:$0xff] %v9947_v42  ;;  %11971 = vst [vmem:[#allocation73_spill] sm:$0xff] %v9949_v46 }
 0x356   :  { %3154 = vmatprep.subr.bf16.mxu0 %v9839_v33  ;;  %11972 = vst [vmem:[#allocation74_spill] sm:$0xff] %v9951_v47 }
 0x357   :  { %3120 = vmatpush1.bf16.msra.mxu1 %v9877_v57 }
 0x358   :  { %2371 = vmatmul.mubr.bf16.gmra.mxu0 %v1925_v60  ;;  %v189_v60 = vld [vmem:[#allocation8 + $0x40] sm:$0xff] }
 0x359   :  { %3155 = vmatpush1.bf16.msra.mxu0 %v9843_v35  ;;  %v9885_v1 = vcombine.high %v189_v60, %v193_v62  ;;  %v9889_v4 = vcombine.low %v189_v60, %v193_v62  ;;  %v289_v60 = vld [vmem:[#allocation8 + $0x360] sm:$0xff]  ;;  %v286_v62 = vld [vmem:[#allocation8 + $0x348] sm:$0xff] }
 0x35a   :  { %3156 = vmatprep.subr.bf16.mxu0 %v9851_v43  ;;  %v9933_v63 = vcombine.high %v285_v55, %v289_v60  ;;  %v9935_v7 = vcombine.high %v286_v62, %v290_v2  ;;  %v9937_v8 = vcombine.low %v285_v55, %v289_v60  ;;  %v9939_v45 = vcombine.low %v286_v62, %v290_v2  ;;  %v273_v55 = vld [vmem:[#allocation8 + $0x2e0] sm:$0xff]  ;;  %v270_v60 = vld [vmem:[#allocation8 + $0x2c8] sm:$0xff] }
 0x35b   :  { %11949 = vst [vmem:[#allocation51_spill] sm:$0xff] %v9885_v1  ;;  %11951 = vst [vmem:[#allocation53_spill] sm:$0xff] %v9889_v4  ;;  %3121 = vmatprep.subr.bf16.mxu1 %v9885_v1  ;;  %v9957_v62 = vcombine.high %v269_v50, %v273_v55  ;;  %v274_v2 = vld [vmem:[#allocation8 + $0x2e8] sm:$0xff]  ;;  %v9961_v36 = vcombine.low %v269_v50, %v273_v55  ;;  %v9973_v50 = vcombine.low %v261_v10, %v265_v32 }
 0x35c   :  { %3122 = vmatpush1.bf16.msra.mxu1 %v9889_v4  ;;  %11965 = vst [vmem:[#allocation67_spill] sm:$0xff] %v9933_v63  ;;  %11966 = vst [vmem:[#allocation68_spill] sm:$0xff] %v9935_v7  ;;  %v9959_v0 = vcombine.high %v270_v60, %v274_v2  ;;  %v9963_v28 = vcombine.low %v270_v60, %v274_v2  ;;  %v253_v60 = vld [vmem:[#allocation8 + $0x240] sm:$0xff] }
 0x35d   :  { %3157 = vmatpush1.bf16.msra.mxu0 %v9855_v61  ;;  %3123 = vmatprep.subr.bf16.mxu1 %v9896_v14  ;;  %11967 = vst [vmem:[#allocation69_spill] sm:$0xff] %v9937_v8  ;;  %11968 = vst [vmem:[#allocation70_spill] sm:$0xff] %v9939_v45  ;;  %v257_v2 = vld [vmem:[#allocation8 + $0x260] sm:$0xff] }
 0x35e   :  { %3158 = vmatprep.subr.bf16.mxu0 %v9863_v23  ;;  %11973 = vst [vmem:[#allocation75_spill] sm:$0xff] %v9957_v62  ;;  %11974 = vst [vmem:[#allocation76_spill] sm:$0xff] %v9959_v0 }
 0x35f   :  { %11975 = vst [vmem:[#allocation77_spill] sm:$0xff] %v9961_v36  ;;  %11976 = vst [vmem:[#allocation78_spill] sm:$0xff] %v9963_v28 }
 0x360   :  { %3124 = vmatpush1.bf16.msra.mxu1 %v9898_v22  ;;  %11979 = vst [vmem:[#allocation81_spill] sm:$0xff] %v9973_v50 }
 0x361   :  { %3159 = vmatpush1.bf16.msra.mxu0 %v9867_v51  ;;  %3125 = vmatprep.subr.bf16.mxu1 %v9909_v31 }
 0x362   :  { %3160 = vmatprep.subr.bf16.mxu0 %v9875_v56 }
 0x364   :  { %3126 = vmatpush2.bf16.msra.mxu1 %v9913_v59 }
 0x365   :  { %3161 = vmatpush1.bf16.msra.mxu0 %v9879_v58  ;;  %3127 = vmatprep.subr.bf16.mxu1 %v9921_v48 }
 0x366   :  { %3162 = vmatprep.subr.bf16.mxu0 %v9887_v3 }
 0x368   :  { %3128 = vmatpush2.bf16.msra.mxu1 %v9925_v53 }
 0x369   :  { %3163 = vmatpush1.bf16.msra.mxu0 %v9892_v6  ;;  %3129 = vmatprep.subr.bf16.mxu1 %v9933_v63 }
 0x36a   :  { %3164 = vmatprep.subr.bf16.mxu0 %v9901_v24 }
 0x36c   :  { %3130 = vmatpush2.bf16.msra.mxu1 %v9937_v8  ;;  %v11995_v8 = vmov 0.0  }
 0x36d   :  { %3165 = vmatpush1.bf16.msra.mxu0 %v9903_v25  ;;  %3131 = vmatprep.subr.bf16.mxu1 %v9945_v11 }
 0x36e   :  { %3166 = vmatprep.subr.bf16.mxu0 %v9911_v40 }
 0x370   :  { %3132 = vmatpush2.bf16.msra.mxu1 %v9949_v46  ;;  %v266_v46 = vld [vmem:[#allocation8 + $0x2a8] sm:$0xff] }
 0x371   :  { %3167 = vmatpush2.bf16.msra.mxu0 %v9915_v39  ;;  %3133 = vmatprep.subr.bf16.mxu1 %v9957_v62  ;;  %v9975_v55 = vcombine.low %v262_v12, %v266_v46 }
 0x372   :  { %3168 = vmatprep.subr.bf16.mxu0 %v9923_v52 }
 0x373   :  { %11980 = vst [vmem:[#allocation82_spill] sm:$0xff] %v9975_v55 }
 0x374   :  { %3134 = vmatpush2.bf16.msra.mxu1 %v9961_v36  ;;  %v254_v36 = vld [vmem:[#allocation8 + $0x248] sm:$0xff] }
 0x375   :  { %3169 = vmatpush2.bf16.msra.mxu0 %v9927_v54 }
 0x376   :  { %3170 = vmatprep.subr.bf16.mxu0 %v9935_v7  ;;  %v8049_v7 = vsel %vm3577_vm5, 1.0, %v11995_v8 }
 0x377   :  { %3582 = vperm.xlu1 %8531, %v8049_v7  }
 0x379   :  { %3171 = vmatpush2.bf16.msra.mxu0 %v9939_v45 }
 0x37a   :  { %3172 = vmatprep.subr.bf16.mxu0 %v9947_v42  ;;  %v9971_v42 = vcombine.high %v262_v12, %v266_v46  ;;  %v245_v46 = vld [vmem:[#allocation8 + $0x200] sm:$0xff] }
 0x37c   :  { %11978 = vst [vmem:[#allocation80_spill] sm:$0xff] %v9971_v42 }
 0x37d   :  { %3173 = vmatpush2.bf16.msra.mxu0 %v9951_v47  ;;  %v9969_v47 = vcombine.high %v261_v10, %v265_v32  ;;  %v9985_v10 = vcombine.low %v253_v60, %v257_v2  ;;  %v249_v32 = vld [vmem:[#allocation8 + $0x220] sm:$0xff] }
 0x37e   :  { %3174 = vmatprep.subr.bf16.mxu0 %v9959_v0  ;;  %v258_v0 = vld [vmem:[#allocation8 + $0x268] sm:$0xff] }
 0x37f   :  { %11977 = vst [vmem:[#allocation79_spill] sm:$0xff] %v9969_v47  ;;  %3135 = vmatprep.subr.bf16.mxu1 %v9969_v47  ;;  %v9983_v62 = vcombine.high %v254_v36, %v258_v0  ;;  %11983 = vst [vmem:[#allocation85_spill] sm:$0xff] %v9985_v10  ;;  %v9987_v12 = vcombine.low %v254_v36, %v258_v0  ;;  %v239_v36 = vld [vmem:[#allocation8 + $0x1d0] sm:$0xff] }
 0x380   :  { %3136 = vmatpush2.bf16.msra.mxu1 %v9973_v50  ;;  %v246_v50 = vld [vmem:[#allocation8 + $0x208] sm:$0xff] }
 0x381   :  { %3175 = vmatpush2.bf16.msra.mxu0 %v9963_v28  ;;  %v9981_v28 = vcombine.high %v253_v60, %v257_v2  ;;  %11982 = vst [vmem:[#allocation84_spill] sm:$0xff] %v9983_v62  ;;  %11984 = vst [vmem:[#allocation86_spill] sm:$0xff] %v9987_v12  ;;  %v9997_v60 = vcombine.low %v245_v46, %v249_v32  ;;  %v243_v2 = vld [vmem:[#allocation8 + $0x1f0] sm:$0xff] }
 0x382   :  { %3176 = vmatprep.subr.bf16.mxu0 %v9971_v42  ;;  %v250_v42 = vld [vmem:[#allocation8 + $0x228] sm:$0xff] }
 0x383   :  { %11981 = vst [vmem:[#allocation83_spill] sm:$0xff] %v9981_v28  ;;  %3137 = vmatprep.subr.bf16.mxu1 %v9981_v28  ;;  %v9995_v47 = vcombine.high %v246_v50, %v250_v42  ;;  %11987 = vst [vmem:[#allocation89_spill] sm:$0xff] %v9997_v60  ;;  %v9999_v0 = vcombine.low %v246_v50, %v250_v42  ;;  %v10018_v50 = vld [vmem:[%s11596_s13] sm:$0xff] }
 0x384   :  { %3138 = vmatpush2.bf16.msra.mxu1 %v9985_v10  ;;  %v240_v10 = vld [vmem:[#allocation8 + $0x1d8] sm:$0xff] }
 0x385   :  { %3177 = vmatpush2.bf16.msra.mxu0 %v9975_v55  ;;  %v9993_v55 = vcombine.high %v245_v46, %v249_v32  ;;  %11986 = vst [vmem:[#allocation88_spill] sm:$0xff] %v9995_v47  ;;  %11988 = vst [vmem:[#allocation90_spill] sm:$0xff] %v9999_v0  ;;  %v10009_v46 = vcombine.low %v239_v36, %v243_v2  ;;  %v1931_v32 = vrot.slane %v10018_v50, %v9718_v17 }
 0x386   :  { %3178 = vmatprep.subr.bf16.mxu0 %v9983_v62  ;;  %v244_v62 = vld [vmem:[#allocation8 + $0x1f8] sm:$0xff] }
 0x387   :  { %11985 = vst [vmem:[#allocation87_spill] sm:$0xff] %v9993_v55  ;;  %3139 = vmatprep.subr.bf16.mxu1 %v9993_v55  ;;  %v10007_v28 = vcombine.high %v240_v10, %v244_v62  ;;  %11991 = vst [vmem:[#allocation93_spill] sm:$0xff] %v10009_v46  ;;  %v10012_v42 = vcombine.low %v240_v10, %v244_v62  ;;  %v1961_v62 = vrot.slane %v1931_v32, %v9718_v17 }
 0x388   :  { %3140 = vmatpush2.bf16.msra.mxu1 %v9997_v60 }
 0x389   :  { %3179 = vmatpush2.bf16.msra.mxu0 %v9987_v12  ;;  %v10005_v12 = vcombine.high %v239_v36, %v243_v2  ;;  %11990 = vst [vmem:[#allocation92_spill] sm:$0xff] %v10007_v28  ;;  %11992 = vst [vmem:[#allocation94_spill] sm:$0xff] %v10012_v42  ;;  %v1935_v36 = vrot.slane %v10018_v50, %v9804_v26  ;;  %v10026_v2 = vsub.s32 6, %v9710_v15 }
 0x38a   :  { %3180 = vmatprep.subr.bf16.mxu0 %v9995_v47 }
 0x38b   :  { %11989 = vst [vmem:[#allocation91_spill] sm:$0xff] %v10005_v12  ;;  %3191 = vmatprep.subr.bf16.mxu1 %v10005_v12  ;;  %11993 = vst [vmem:[#allocation95_spill] sm:$0xff] %v10026_v2  ;;  %v1943_v47 = vrot.slane %v10018_v50, %v10026_v2 }
 0x38d   :  { %3181 = vmatpush2.bf16.msra.mxu0 %v9999_v0  ;;  %v11654_v0 = vsub.s32 4, %v9710_v15 }
 0x38e   :  { %3232 = vmatprep.subr.bf16.mxu0 %v10007_v28  ;;  %v1965_v28 = vrot.slane %v1935_v36, %v9718_v17  ;;  %v10044_v36 = vrot.slane %v1943_v47, %v9718_v17 }
 0x38f   :  { %v1939_v10 = vrot.slane %v10018_v50, %v11654_v0 }
 0x390   :  { %11997 = vst [vmem:[#allocation98_spill] sm:$0xff] %v10044_v36 }
 0x391   :  { %v1969_v63 = vrot.slane %v1939_v10, %v9718_v17 }
 0x3f0   :  { %v2256_v12 = vpop.f32.mrf.mxu0  ;;  %v2309_v60 = vpop.f32.mrf.mxu1 }
 0x3f1   :  { %v10035_v55 = vadd.f32 %v2256_v12, %v1961_v62 }
 0x3f2   :  { %v2258_v11 = vpop.f32.mrf.mxu0  ;;  %v2311_v45 = vpop.f32.mrf.mxu1 }
 0x3f3   :  { %11994 = vst [vmem:[#allocation96_spill] sm:$0xff] %v10035_v55  ;;  %v7907_v32 = vmul.f32 -1.442695, %v10035_v55  ;;  %v10041_v0 = vadd.f32 %v2258_v11, %v1965_v28  ;;  %v10051_v55 = vadd.f32 %v2309_v60, %v1969_v63  ;;  %v10059_v47 = vadd.f32 %v2311_v45, %v10044_v36 }
 0x3f4   :  { %v2260_v54 = vpop.f32.mrf.mxu0  ;;  %v2313_v2 = vpop.f32.mrf.mxu1 }
 0x3f5   :  { %11996 = vst [vmem:[#allocation97_spill] sm:$0xff] %v10041_v0  ;;  %9138 = vpow2.f32 %v7907_v32  ;;  %v7908_v12 = vmul.f32 -1.442695, %v10041_v0  ;;  %v10047_v9 = vadd.f32 %v2260_v54, %v1961_v62  ;;  %v10049_v53 = vadd.f32 %v2313_v2, %v1969_v63 }
 0x3f6   :  { %v2262_v8 = vpop.f32.mrf.mxu0  ;;  %v2315_v52 = vpop.f32.mrf.mxu1  ;;  %v7909_v60 = vmul.f32 -1.442695, %v10051_v55 }
 0x3f7   :  { %11998 = vst [vmem:[#allocation99_spill] sm:$0xff] %v10047_v9  ;;  %11999 = vst [vmem:[#allocation100_spill] sm:$0xff] %v10049_v53  ;;  %9140 = vpow2.f32 %v7908_v12  ;;  %v10053_v11 = vadd.f32 %v2262_v8, %v1965_v28  ;;  %v10056_v7 = vadd.f32 %v2315_v52, %v10044_v36  ;;  %v7910_v52 = vmul.f32 -1.442695, %v10059_v47 }
 0x3f8   :  { %v2266_v10 = vpop.f32.mrf.mxu0  ;;  %v2319_v32 = vpop.f32.mrf.mxu1  ;;  %9142 = vpow2.f32 %v7909_v60 }
 0x3f9   :  { %12000 = vst [vmem:[#allocation101_spill] sm:$0xff] %v10053_v11  ;;  %12001 = vst [vmem:[#allocation102_spill] sm:$0xff] %v10056_v7  ;;  %v10061_v0 = vadd.f32 %v2266_v10, %v1961_v62  ;;  %v10063_v54 = vadd.f32 %v2319_v32, %v1969_v63  ;;  %9144 = vpow2.f32 %v7910_v52 }
 0x3fa   :  { %v2268_v2 = vpop.f32.mrf.mxu0  ;;  %v2321_v53 = vpop.f32.mrf.mxu1 }
 0x3fb   :  { %12002 = vst [vmem:[#allocation103_spill] sm:$0xff] %v10061_v0  ;;  %12003 = vst [vmem:[#allocation104_spill] sm:$0xff] %v10063_v54  ;;  %v10066_v9 = vadd.f32 %v2268_v2, %v1965_v28  ;;  %v10069_v8 = vadd.f32 %v2321_v53, %v10044_v36  ;;  %v180_v53 = vld [vmem:[%s11596_s13 + $0x8] sm:$0xf] }
 0x3fc   :  { %v2270_v12 = vpop.f32.mrf.mxu0  ;;  %v2323_v45 = vpop.f32.mrf.mxu1 }
 0x3fd   :  { %12004 = vst [vmem:[#allocation105_spill] sm:$0xff] %v10066_v9  ;;  %12005 = vst [vmem:[#allocation106_spill] sm:$0xff] %v10069_v8  ;;  %v10072_v7 = vadd.f32 %v2270_v12, %v1961_v62  ;;  %v10074_v11 = vadd.f32 %v2323_v45, %v1969_v63  ;;  %v10082_v62 = vsub.s32 3, %v9710_v15  ;;  %v2414_v63 = vrot.slane %v10018_v50, %v9768_v5 }
 0x3fe   :  { %v2272_v10 = vpop.f32.mrf.mxu0 }
 0x3ff   :  { %12006 = vst [vmem:[#allocation107_spill] sm:$0xff] %v10072_v7  ;;  %12007 = vst [vmem:[#allocation108_spill] sm:$0xff] %v10074_v11  ;;  %v10076_v32 = vadd.f32 %v2272_v10, %v1965_v28  ;;  %v1947_v28 = vrot.slane %v180_v53, %v9718_v17 }
 0x400   :  { %12009 = vst [vmem:[#allocation110_spill] sm:$0xff] %v10082_v62 }
 0x401   :  { %12008 = vst [vmem:[#allocation109_spill] sm:$0xff] %v10076_v32  ;;  %v1977_v45 = vrot.slane %v1947_v28, %v9718_v17 }
 0x402   :  { %v9139_v54 = vpop.eup %9138 }
 0x403   :  { %v2389_v0 = vadd.f32 1.0, %v9139_v54  ;;  %v2418_v54 = vrot.slane %v10018_v50, %v10082_v62  ;;  %v10121_v62 = vpop.permute.xlu0 %2446 }
 0x404   :  { %v9141_v2 = vpop.eup %9140  ;;  %12018 = vst [vmem:[#allocation119_spill] sm:$0xff] %v10121_v62 }
 0x405   :  { %9146 = vrcp.f32 %v2389_v0  ;;  %v2390_v9 = vadd.f32 1.0, %v9141_v2  ;;  %v9143_v60 = vpop.eup %9142  ;;  %v1951_v0 = vrot.slane %v180_v53, %v9804_v26  ;;  %v10095_v15 = vrot.slane %v2418_v54, %v9768_v5 }
 0x406   :  { %v9145_v52 = vpop.eup %9144  ;;  %v2403_v12 = vadd.f32 1.0, %v9143_v60 }
 0x407   :  { %9148 = vrcp.f32 %v2390_v9  ;;  %v10091_v9 = vrot.slane %v2414_v63, %v9768_v5  ;;  %v2404_v10 = vadd.f32 1.0, %v9145_v52  ;;  %v10098_v11 = vrot.slane %v1951_v0, %v9718_v17 }
 0x408   :  { %9150 = vrcp.f32 %v2403_v12 }
 0x409   :  { %12010 = vst [vmem:[#allocation111_spill] sm:$0xff] %v10091_v9  ;;  %12011 = vst [vmem:[#allocation112_spill] sm:$0xff] %v10098_v11  ;;  %9152 = vrcp.f32 %v2404_v10 }
 0x410   :  { %v2362_v2 = vpop.f32.mrf.mxu0 }
 0x411   :  { %v10100_v50 = vadd.f32 %v2362_v2, %v1977_v45 }
 0x412   :  { %v9147_v36 = vpop.eup %9146  ;;  %v2364_v32 = vpop.f32.mrf.mxu0 }
 0x413   :  { %v2431_v26 = vmul.f32 %v9147_v36, %v10091_v9  ;;  %v10105_v60 = vadd.f32 %v2364_v32, %v10098_v11 }
 0x414   :  { %v9149_v53 = vpop.eup %9148  ;;  %v2366_v63 = vpop.f32.mrf.mxu0 }
 0x415   :  { %v2433_v28 = vadd.f32 %v2431_v26, %v10100_v50  ;;  %12012 = vst [vmem:[#allocation113_spill] sm:$0xff] %v10105_v60  ;;  %v2432_v52 = vmul.f32 %v9149_v53, %v10095_v15  ;;  %v10108_v54 = vadd.f32 %v2366_v63, %v1977_v45  ;;  %v9151_v53 = vpop.eup %9150 }
 0x416   :  { %v2368_v0 = vpop.f32.mrf.mxu0  ;;  %v9153_v63 = vpop.eup %9152 }
 0x417   :  { %12013 = vst [vmem:[#allocation114_spill] sm:$0xff] %v10108_v54  ;;  %9154 = vtanh.f32 %v2433_v28  ;;  %v2434_v12 = vadd.f32 %v2432_v52, %v10105_v60  ;;  %v10112_v2 = vadd.f32 %v2368_v0, %v10098_v11  ;;  %v2451_v28 = vsub.f32 1.0, %v9151_v53 }
 0x418   :  { %v2372_v36 = vpop.f32.mrf.mxu0  ;;  %v11692_v52 = vsub.f32 1.0, %v10121_v62  ;;  %v2452_v7 = vsub.f32 1.0, %v9153_v63 }
 0x419   :  { %12014 = vst [vmem:[#allocation115_spill] sm:$0xff] %v10112_v2  ;;  %9156 = vtanh.f32 %v2434_v12  ;;  %v10114_v10 = vadd.f32 %v2372_v36, %v1977_v45  ;;  %v2455_v12 = vmul.f32 0.0, %v9151_v53  ;;  %v2456_v2 = vmul.f32 0.0, %v9153_v63  ;;  %v235_v53 = vld [vmem:[#allocation8 + $0x1b0] sm:$0xff] }
 0x41a   :  { %v2374_v17 = vpop.f32.mrf.mxu0  ;;  %v223_v63 = vld [vmem:[#allocation8 + $0x150] sm:$0xff] }
 0x41b   :  { %12015 = vst [vmem:[#allocation116_spill] sm:$0xff] %v10114_v10  ;;  %v10117_v26 = vadd.f32 %v2374_v17, %v10098_v11  ;;  %v2463_v17 = vmul.f32 0.0, %v11692_v52  ;;  %v215_v52 = vld [vmem:[#allocation8 + $0x110] sm:$0xff] }
 0x41c   :  { %v2376_v32 = vpop.f32.mrf.mxu0 }
 0x41d   :  { %12016 = vst [vmem:[#allocation117_spill] sm:$0xff] %v10117_v26  ;;  %v10119_v5 = vadd.f32 %v2376_v32, %v1977_v45  ;;  %v231_v26 = vld [vmem:[#allocation8 + $0x190] sm:$0xff] }
 0x41f   :  { %12017 = vst [vmem:[#allocation118_spill] sm:$0xff] %v10119_v5 }
 0x424   :  { %v9155_v0 = vpop.eup %9154 }
 0x425   :  { %v2453_v8 = vmul.f32 %v9155_v0, %v2451_v28  ;;  %v232_v28 = vld [vmem:[#allocation8 + $0x198] sm:$0xff] }
 0x426   :  { %v9157_v36 = vpop.eup %9156  ;;  %v224_v0 = vld [vmem:[#allocation8 + $0x158] sm:$0xff] }
 0x427   :  { %v2454_v10 = vmul.f32 %v9157_v36, %v2452_v7  ;;  %v2457_v54 = vadd.f32 %v2455_v12, %v2453_v8  ;;  %v236_v7 = vld [vmem:[#allocation8 + $0x1b8] sm:$0xff]  ;;  %v10145_v36 = vcombine.low %v231_v26, %v235_v53 }
 0x428   :  { %v228_v12 = vld [vmem:[#allocation8 + $0x178] sm:$0xff] }
 0x429   :  { %v2458_v45 = vadd.f32 %v2456_v2, %v2454_v10  ;;  %v2459_v32 = vmul.f32 %v2457_v54, %v10121_v62  ;;  %v10137_v2 = vcombine.high %v231_v26, %v235_v53  ;;  %v10139_v54 = vcombine.high %v232_v28, %v236_v7  ;;  %v227_v10 = vld [vmem:[#allocation8 + $0x170] sm:$0xff]  ;;  %12022 = vst [vmem:[#allocation123_spill] sm:$0xff] %v10145_v36 }
 0x42a   :  { %v219_v62 = vld [vmem:[#allocation8 + $0x130] sm:$0xff]  ;;  %v10157_v26 = vcombine.low %v223_v63, %v227_v10  ;;  %v10159_v53 = vcombine.low %v224_v0, %v228_v12 }
 0x42b   :  { %v10127_v5 = vmul.f32 0.0, %v2458_v45  ;;  %v10129_v11 = vadd.f32 %v2463_v17, %v2459_v32  ;;  %12020 = vst [vmem:[#allocation121_spill] sm:$0xff] %v10137_v2  ;;  %12021 = vst [vmem:[#allocation122_spill] sm:$0xff] %v10139_v54  ;;  %v10147_v17 = vcombine.low %v232_v28, %v236_v7  ;;  %v10149_v45 = vcombine.high %v223_v63, %v227_v10 }
 0x42c   :  { %v10151_v32 = vcombine.high %v224_v0, %v228_v12  ;;  %12026 = vst [vmem:[#allocation127_spill] sm:$0xff] %v10157_v26  ;;  %12027 = vst [vmem:[#allocation128_spill] sm:$0xff] %v10159_v53  ;;  %v10163_v28 = vcombine.high %v215_v52, %v219_v62  ;;  %v10169_v63 = vcombine.low %v215_v52, %v219_v62 }
 0x42d   :  { %12019 = vst [vmem:[#allocation120_spill] sm:$0xff] %v10127_v5  ;;  %v10133_v60 = vpack.c.bf16 %v10129_v11, %v10129_v11  ;;  %v2468_v8 = vpack.c.bf16 %v10127_v5, %v10127_v5  ;;  %12023 = vst [vmem:[#allocation124_spill] sm:$0xff] %v10147_v17  ;;  %v216_v5 = vld [vmem:[#allocation8 + $0x118] sm:$0xff] }
 0x42e   :  { %12024 = vst [vmem:[#allocation125_spill] sm:$0xff] %v10149_v45  ;;  %12025 = vst [vmem:[#allocation126_spill] sm:$0xff] %v10151_v32 }
 0x42f   :  { %3141 = vmatprep.mubr.bf16.mxu1 %v2468_v8  ;;  %3182 = vmatprep.mubr.bf16.mxu0 %v2468_v8  ;;  %12028 = vst [vmem:[#allocation129_spill] sm:$0xff] %v10163_v28  ;;  %12030 = vst [vmem:[#allocation131_spill] sm:$0xff] %v10169_v63 }
 0x430   :  { %3142 = vmatmul.mubr.bf16.vlgmr.msra.gmra.mxu1 %v10133_v60  ;;  %3183 = vmatmul.mubr.bf16.vlgmr.msra.gmra.mxu0 %v10133_v60 }
 0x431   :  { %3192 = vmatpush1.bf16.msra.mxu1 %v10009_v46  ;;  %3233 = vmatpush1.bf16.msra.mxu0 %v10012_v42  ;;  %v220_v46 = vld [vmem:[#allocation8 + $0x138] sm:$0xff] }
 0x432   :  { %3223 = vmatprep.mubr.bf16.mxu1 %v2468_v8  ;;  %3264 = vmatprep.mubr.bf16.mxu0 %v2468_v8  ;;  %v10165_v7 = vcombine.high %v216_v5, %v220_v46  ;;  %v207_v8 = vld [vmem:[#allocation8 + $0xd0] sm:$0xff]  ;;  %v212_v42 = vld [vmem:[#allocation8 + $0xf8] sm:$0xff]  ;;  %v10171_v10 = vcombine.low %v216_v5, %v220_v46 }
 0x433   :  { %3193 = vmatprep.subr.bf16.mxu1 %v10137_v2  ;;  %3234 = vmatprep.subr.bf16.mxu0 %v10139_v54  ;;  %v211_v54 = vld [vmem:[#allocation8 + $0xf0] sm:$0xff]  ;;  %v208_v2 = vld [vmem:[#allocation8 + $0xd8] sm:$0xff] }
 0x434   :  { %12029 = vst [vmem:[#allocation130_spill] sm:$0xff] %v10165_v7  ;;  %12031 = vst [vmem:[#allocation132_spill] sm:$0xff] %v10171_v10  ;;  %v10175_v0 = vcombine.high %v207_v8, %v211_v54  ;;  %v10177_v12 = vcombine.high %v208_v2, %v212_v42  ;;  %v10181_v62 = vcombine.low %v207_v8, %v211_v54 }
 0x435   :  { %3194 = vmatpush1.bf16.msra.mxu1 %v10145_v36  ;;  %3235 = vmatpush1.bf16.msra.mxu0 %v10147_v17  ;;  %v200_v17 = vld [vmem:[#allocation8 + $0x98] sm:$0xff]  ;;  %v10183_v5 = vcombine.low %v208_v2, %v212_v42 }
 0x436   :  { %3195 = vmatprep.subr.bf16.mxu1 %v10149_v45  ;;  %3236 = vmatprep.subr.bf16.mxu0 %v10151_v32  ;;  %12032 = vst [vmem:[#allocation133_spill] sm:$0xff] %v10175_v0  ;;  %12033 = vst [vmem:[#allocation134_spill] sm:$0xff] %v10177_v12  ;;  %v199_v32 = vld [vmem:[#allocation8 + $0x90] sm:$0xff]  ;;  %v204_v36 = vld [vmem:[#allocation8 + $0xb8] sm:$0xff] }
 0x437   :  { %v203_v45 = vld [vmem:[#allocation8 + $0xb0] sm:$0xff]  ;;  %12034 = vst [vmem:[#allocation135_spill] sm:$0xff] %v10181_v62  ;;  %12035 = vst [vmem:[#allocation136_spill] sm:$0xff] %v10183_v5  ;;  %v10189_v52 = vcombine.high %v200_v17, %v204_v36  ;;  %v10195_v42 = vcombine.low %v200_v17, %v204_v36 }
 0x438   :  { %v10187_v46 = vcombine.high %v199_v32, %v203_v45  ;;  %v10193_v54 = vcombine.low %v199_v32, %v203_v45 }
 0x439   :  { %3196 = vmatpush1.bf16.msra.mxu1 %v10157_v26  ;;  %3237 = vmatpush1.bf16.msra.mxu0 %v10159_v53  ;;  %12037 = vst [vmem:[#allocation138_spill] sm:$0xff] %v10189_v52  ;;  %v192_v53 = vld [vmem:[#allocation8 + $0x58] sm:$0xff]  ;;  %12039 = vst [vmem:[#allocation140_spill] sm:$0xff] %v10195_v42 }
 0x43a   :  { %3197 = vmatprep.subr.bf16.mxu1 %v10163_v28  ;;  %3238 = vmatprep.subr.bf16.mxu0 %v10165_v7  ;;  %12036 = vst [vmem:[#allocation137_spill] sm:$0xff] %v10187_v46  ;;  %v191_v7 = vld [vmem:[#allocation8 + $0x50] sm:$0xff]  ;;  %v196_v26 = vld [vmem:[#allocation8 + $0x78] sm:$0xff]  ;;  %12038 = vst [vmem:[#allocation139_spill] sm:$0xff] %v10193_v54 }
 0x43b   :  { %v195_v28 = vld [vmem:[#allocation8 + $0x70] sm:$0xff]  ;;  %v10201_v8 = vcombine.high %v192_v53, %v196_v26  ;;  %v10207_v36 = vcombine.low %v192_v53, %v196_v26 }
 0x43c   :  { %v10199_v2 = vcombine.high %v191_v7, %v195_v28  ;;  %v10205_v45 = vcombine.low %v191_v7, %v195_v28 }
 0x43d   :  { %3198 = vmatpush1.bf16.msra.mxu1 %v10169_v63  ;;  %3239 = vmatpush1.bf16.msra.mxu0 %v10171_v10  ;;  %12041 = vst [vmem:[#allocation142_spill] sm:$0xff] %v10201_v8  ;;  %v184_v10 = vld [vmem:[#allocation8 + $0x18] sm:$0xff]  ;;  %12043 = vst [vmem:[#allocation144_spill] sm:$0xff] %v10207_v36 }
 0x43e   :  { %3199 = vmatprep.subr.bf16.mxu1 %v10175_v0  ;;  %3240 = vmatprep.subr.bf16.mxu0 %v10177_v12  ;;  %12040 = vst [vmem:[#allocation141_spill] sm:$0xff] %v10199_v2  ;;  %v183_v12 = vld [vmem:[#allocation8 + $0x10] sm:$0xff]  ;;  %v188_v63 = vld [vmem:[#allocation8 + $0x38] sm:$0xff]  ;;  %12042 = vst [vmem:[#allocation143_spill] sm:$0xff] %v10205_v45 }
 0x43f   :  { %v187_v0 = vld [vmem:[#allocation8 + $0x30] sm:$0xff]  ;;  %v10213_v32 = vcombine.high %v184_v10, %v188_v63  ;;  %v10219_v26 = vcombine.low %v184_v10, %v188_v63 }
 0x440   :  { %v10211_v17 = vcombine.high %v183_v12, %v187_v0  ;;  %v10217_v28 = vcombine.low %v183_v12, %v187_v0 }
 0x441   :  { %3200 = vmatpush1.bf16.msra.mxu1 %v10181_v62  ;;  %3241 = vmatpush1.bf16.msra.mxu0 %v10183_v5  ;;  %12045 = vst [vmem:[#allocation146_spill] sm:$0xff] %v10213_v32  ;;  %v304_v5 = vld [vmem:[#allocation8 + $0x3d8] sm:$0xff]  ;;  %12047 = vst [vmem:[#allocation148_spill] sm:$0xff] %v10219_v26 }
 0x442   :  { %3201 = vmatprep.subr.bf16.mxu1 %v10187_v46  ;;  %3242 = vmatprep.subr.bf16.mxu0 %v10189_v52  ;;  %12044 = vst [vmem:[#allocation145_spill] sm:$0xff] %v10211_v17  ;;  %v303_v52 = vld [vmem:[#allocation8 + $0x3d0] sm:$0xff]  ;;  %v308_v62 = vld [vmem:[#allocation8 + $0x3f8] sm:$0xff]  ;;  %12046 = vst [vmem:[#allocation147_spill] sm:$0xff] %v10217_v28 }
 0x443   :  { %v307_v46 = vld [vmem:[#allocation8 + $0x3f0] sm:$0xff]  ;;  %v10225_v7 = vcombine.high %v304_v5, %v308_v62  ;;  %v10231_v63 = vcombine.low %v304_v5, %v308_v62 }
 0x444   :  { %v10223_v53 = vcombine.high %v303_v52, %v307_v46  ;;  %v10229_v0 = vcombine.low %v303_v52, %v307_v46 }
 0x445   :  { %3202 = vmatpush1.bf16.msra.mxu1 %v10193_v54  ;;  %3243 = vmatpush1.bf16.msra.mxu0 %v10195_v42  ;;  %12049 = vst [vmem:[#allocation150_spill] sm:$0xff] %v10225_v7  ;;  %v296_v42 = vld [vmem:[#allocation8 + $0x398] sm:$0xff]  ;;  %12051 = vst [vmem:[#allocation152_spill] sm:$0xff] %v10231_v63 }
 0x446   :  { %3203 = vmatprep.subr.bf16.mxu1 %v10199_v2  ;;  %3244 = vmatprep.subr.bf16.mxu0 %v10201_v8  ;;  %12048 = vst [vmem:[#allocation149_spill] sm:$0xff] %v10223_v53  ;;  %v295_v8 = vld [vmem:[#allocation8 + $0x390] sm:$0xff]  ;;  %v300_v54 = vld [vmem:[#allocation8 + $0x3b8] sm:$0xff]  ;;  %12050 = vst [vmem:[#allocation151_spill] sm:$0xff] %v10229_v0 }
 0x447   :  { %v299_v2 = vld [vmem:[#allocation8 + $0x3b0] sm:$0xff]  ;;  %v10237_v12 = vcombine.high %v296_v42, %v300_v54  ;;  %v10243_v62 = vcombine.low %v296_v42, %v300_v54 }
 0x448   :  { %v10235_v10 = vcombine.high %v295_v8, %v299_v2  ;;  %v10241_v46 = vcombine.low %v295_v8, %v299_v2 }
 0x449   :  { %3204 = vmatpush1.bf16.msra.mxu1 %v10205_v45  ;;  %3245 = vmatpush1.bf16.msra.mxu0 %v10207_v36  ;;  %12053 = vst [vmem:[#allocation154_spill] sm:$0xff] %v10237_v12  ;;  %v288_v36 = vld [vmem:[#allocation8 + $0x358] sm:$0xff]  ;;  %12055 = vst [vmem:[#allocation156_spill] sm:$0xff] %v10243_v62 }
 0x44a   :  { %3205 = vmatprep.subr.bf16.mxu1 %v10211_v17  ;;  %3246 = vmatprep.subr.bf16.mxu0 %v10213_v32  ;;  %12052 = vst [vmem:[#allocation153_spill] sm:$0xff] %v10235_v10  ;;  %v287_v32 = vld [vmem:[#allocation8 + $0x350] sm:$0xff]  ;;  %v292_v45 = vld [vmem:[#allocation8 + $0x378] sm:$0xff]  ;;  %12054 = vst [vmem:[#allocation155_spill] sm:$0xff] %v10241_v46 }
 0x44b   :  { %v291_v17 = vld [vmem:[#allocation8 + $0x370] sm:$0xff]  ;;  %v10249_v52 = vcombine.high %v288_v36, %v292_v45  ;;  %v10255_v54 = vcombine.low %v288_v36, %v292_v45 }
 0x44c   :  { %v10247_v5 = vcombine.high %v287_v32, %v291_v17  ;;  %v10253_v2 = vcombine.low %v287_v32, %v291_v17 }
 0x44d   :  { %3206 = vmatpush1.bf16.msra.mxu1 %v10217_v28  ;;  %3247 = vmatpush1.bf16.msra.mxu0 %v10219_v26  ;;  %12057 = vst [vmem:[#allocation158_spill] sm:$0xff] %v10249_v52  ;;  %v280_v26 = vld [vmem:[#allocation8 + $0x318] sm:$0xff]  ;;  %12059 = vst [vmem:[#allocation160_spill] sm:$0xff] %v10255_v54 }
 0x44e   :  { %3207 = vmatprep.subr.bf16.mxu1 %v10223_v53  ;;  %3248 = vmatprep.subr.bf16.mxu0 %v10225_v7  ;;  %12056 = vst [vmem:[#allocation157_spill] sm:$0xff] %v10247_v5  ;;  %v279_v7 = vld [vmem:[#allocation8 + $0x310] sm:$0xff]  ;;  %v284_v28 = vld [vmem:[#allocation8 + $0x338] sm:$0xff]  ;;  %12058 = vst [vmem:[#allocation159_spill] sm:$0xff] %v10253_v2 }
 0x44f   :  { %v283_v53 = vld [vmem:[#allocation8 + $0x330] sm:$0xff]  ;;  %v10261_v8 = vcombine.high %v280_v26, %v284_v28  ;;  %v10267_v45 = vcombine.low %v280_v26, %v284_v28 }
 0x450   :  { %v10259_v42 = vcombine.high %v279_v7, %v283_v53  ;;  %v10265_v17 = vcombine.low %v279_v7, %v283_v53 }
 0x451   :  { %3208 = vmatpush2.bf16.msra.mxu1 %v10229_v0  ;;  %3249 = vmatpush2.bf16.msra.mxu0 %v10231_v63  ;;  %12061 = vst [vmem:[#allocation162_spill] sm:$0xff] %v10261_v8  ;;  %v272_v63 = vld [vmem:[#allocation8 + $0x2d8] sm:$0xff]  ;;  %12063 = vst [vmem:[#allocation164_spill] sm:$0xff] %v10267_v45 }
 0x452   :  { %3209 = vmatprep.subr.bf16.mxu1 %v10235_v10  ;;  %3250 = vmatprep.subr.bf16.mxu0 %v10237_v12  ;;  %12060 = vst [vmem:[#allocation161_spill] sm:$0xff] %v10259_v42  ;;  %v271_v12 = vld [vmem:[#allocation8 + $0x2d0] sm:$0xff]  ;;  %v276_v0 = vld [vmem:[#allocation8 + $0x2f8] sm:$0xff]  ;;  %12062 = vst [vmem:[#allocation163_spill] sm:$0xff] %v10265_v17 }
 0x453   :  { %v275_v10 = vld [vmem:[#allocation8 + $0x2f0] sm:$0xff]  ;;  %v10273_v32 = vcombine.high %v272_v63, %v276_v0  ;;  %v10279_v28 = vcombine.low %v272_v63, %v276_v0 }
 0x454   :  { %v10271_v36 = vcombine.high %v271_v12, %v275_v10  ;;  %v10277_v53 = vcombine.low %v271_v12, %v275_v10 }
 0x455   :  { %3210 = vmatpush2.bf16.msra.mxu1 %v10241_v46  ;;  %3251 = vmatpush2.bf16.msra.mxu0 %v10243_v62  ;;  %12065 = vst [vmem:[#allocation166_spill] sm:$0xff] %v10273_v32  ;;  %v264_v62 = vld [vmem:[#allocation8 + $0x298] sm:$0xff]  ;;  %12067 = vst [vmem:[#allocation168_spill] sm:$0xff] %v10279_v28 }
 0x456   :  { %3211 = vmatprep.subr.bf16.mxu1 %v10247_v5  ;;  %3252 = vmatprep.subr.bf16.mxu0 %v10249_v52  ;;  %12064 = vst [vmem:[#allocation165_spill] sm:$0xff] %v10271_v36  ;;  %v263_v52 = vld [vmem:[#allocation8 + $0x290] sm:$0xff]  ;;  %v268_v46 = vld [vmem:[#allocation8 + $0x2b8] sm:$0xff]  ;;  %12066 = vst [vmem:[#allocation167_spill] sm:$0xff] %v10277_v53 }
 0x457   :  { %v267_v5 = vld [vmem:[#allocation8 + $0x2b0] sm:$0xff]  ;;  %v10285_v7 = vcombine.high %v264_v62, %v268_v46  ;;  %v10291_v0 = vcombine.low %v264_v62, %v268_v46 }
 0x458   :  { %v10283_v26 = vcombine.high %v263_v52, %v267_v5  ;;  %v10289_v10 = vcombine.low %v263_v52, %v267_v5 }
 0x459   :  { %3212 = vmatpush2.bf16.msra.mxu1 %v10253_v2  ;;  %3253 = vmatpush2.bf16.msra.mxu0 %v10255_v54  ;;  %12069 = vst [vmem:[#allocation170_spill] sm:$0xff] %v10285_v7  ;;  %v256_v54 = vld [vmem:[#allocation8 + $0x258] sm:$0xff]  ;;  %12071 = vst [vmem:[#allocation172_spill] sm:$0xff] %v10291_v0 }
 0x45a   :  { %3213 = vmatprep.subr.bf16.mxu1 %v10259_v42  ;;  %3254 = vmatprep.subr.bf16.mxu0 %v10261_v8  ;;  %12068 = vst [vmem:[#allocation169_spill] sm:$0xff] %v10283_v26  ;;  %v255_v8 = vld [vmem:[#allocation8 + $0x250] sm:$0xff]  ;;  %v260_v2 = vld [vmem:[#allocation8 + $0x278] sm:$0xff]  ;;  %12070 = vst [vmem:[#allocation171_spill] sm:$0xff] %v10289_v10 }
 0x45b   :  { %v259_v42 = vld [vmem:[#allocation8 + $0x270] sm:$0xff]  ;;  %v10297_v12 = vcombine.high %v256_v54, %v260_v2  ;;  %v10303_v46 = vcombine.low %v256_v54, %v260_v2 }
 0x45c   :  { %v10295_v63 = vcombine.high %v255_v8, %v259_v42  ;;  %v10301_v5 = vcombine.low %v255_v8, %v259_v42  ;;  %v12081_v2 = vld [vmem:[#allocation65_spill] sm:$0xff]  ;;  %v12082_v54 = vld [vmem:[#allocation66_spill] sm:$0xff]  ;;  %v12083_v42 = vld [vmem:[#allocation67_spill] sm:$0xff] }
 0x45d   :  { %3214 = vmatpush2.bf16.msra.mxu1 %v10265_v17  ;;  %3255 = vmatpush2.bf16.msra.mxu0 %v10267_v45  ;;  %12073 = vst [vmem:[#allocation174_spill] sm:$0xff] %v10297_v12  ;;  %v248_v45 = vld [vmem:[#allocation8 + $0x218] sm:$0xff]  ;;  %12075 = vst [vmem:[#allocation176_spill] sm:$0xff] %v10303_v46  ;;  %v12084_v8 = vld [vmem:[#allocation68_spill] sm:$0xff] }
 0x45e   :  { %3215 = vmatprep.subr.bf16.mxu1 %v10271_v36  ;;  %3256 = vmatprep.subr.bf16.mxu0 %v10273_v32  ;;  %12072 = vst [vmem:[#allocation173_spill] sm:$0xff] %v10295_v63  ;;  %v247_v32 = vld [vmem:[#allocation8 + $0x210] sm:$0xff]  ;;  %v252_v17 = vld [vmem:[#allocation8 + $0x238] sm:$0xff]  ;;  %12074 = vst [vmem:[#allocation175_spill] sm:$0xff] %v10301_v5 }
 0x45f   :  { %v251_v36 = vld [vmem:[#allocation8 + $0x230] sm:$0xff]  ;;  %v10309_v52 = vcombine.high %v248_v45, %v252_v17 }
 0x460   :  { %v10307_v62 = vcombine.high %v247_v32, %v251_v36 }
 0x461   :  { %3216 = vmatpush2.bf16.msra.mxu1 %v10277_v53  ;;  %3257 = vmatpush2.bf16.msra.mxu0 %v10279_v28  ;;  %12077 = vst [vmem:[#allocation178_spill] sm:$0xff] %v10309_v52 }
 0x462   :  { %3217 = vmatprep.subr.bf16.mxu1 %v10283_v26  ;;  %3258 = vmatprep.subr.bf16.mxu0 %v10285_v7  ;;  %12076 = vst [vmem:[#allocation177_spill] sm:$0xff] %v10307_v62  ;;  %v10313_v7 = vcombine.low %v247_v32, %v251_v36  ;;  %v12087_v36 = vld [vmem:[#allocation71_spill] sm:$0xff]  ;;  %v12088_v32 = vld [vmem:[#allocation72_spill] sm:$0xff] }
 0x464   :  { %12078 = vst [vmem:[#allocation179_spill] sm:$0xff] %v10313_v7 }
 0x465   :  { %3218 = vmatpush2.bf16.msra.mxu1 %v10289_v10  ;;  %3259 = vmatpush2.bf16.msra.mxu0 %v10291_v0  ;;  %v10315_v10 = vcombine.low %v248_v45, %v252_v17  ;;  %v12085_v17 = vld [vmem:[#allocation69_spill] sm:$0xff]  ;;  %v12086_v45 = vld [vmem:[#allocation70_spill] sm:$0xff] }
 0x466   :  { %3219 = vmatprep.subr.bf16.mxu1 %v10295_v63  ;;  %3260 = vmatprep.subr.bf16.mxu0 %v10297_v12 }
 0x467   :  { %12079 = vst [vmem:[#allocation180_spill] sm:$0xff] %v10315_v10 }
 0x469   :  { %3220 = vmatpush2.bf16.msra.mxu1 %v10301_v5  ;;  %3261 = vmatpush2.bf16.msra.mxu0 %v10303_v46 }
 0x46a   :  { %3221 = vmatprep.subr.bf16.mxu1 %v10307_v62  ;;  %3262 = vmatprep.subr.bf16.mxu0 %v10309_v52 }
 0x46d   :  { %3222 = vmatpush2.bf16.msra.mxu1 %v10313_v7  ;;  %3263 = vmatpush2.bf16.msra.mxu0 %v10315_v10 }
 0x46e   :  { %3375 = vmatprep.subr.bf16.mxu1 %v9794_v13  ;;  %3416 = vmatprep.subr.bf16.mxu0 %v9813_v19 }
 0x470   :  { %3224 = vmatmul.mubr.bf16.vlgmr.msra.gmra.mxu1 %v10133_v60  ;;  %3265 = vmatmul.mubr.bf16.vlgmr.msra.gmra.mxu0 %v10133_v60  ;;  %v12080_v60 = vld [vmem:[#allocation64_spill] sm:$0xff] }
 0x471   :  { %3376 = vmatpush1.bf16.msra.mxu1 %v9819_v20  ;;  %3417 = vmatpush1.bf16.msra.mxu0 %v9821_v21 }
 0x472   :  { %3377 = vmatprep.subr.bf16.mxu1 %v9825_v27  ;;  %3418 = vmatprep.subr.bf16.mxu0 %v9827_v29 }
 0x475   :  { %3378 = vmatpush1.bf16.msra.mxu1 %v9829_v18  ;;  %3419 = vmatpush1.bf16.msra.mxu0 %v9831_v30 }
 0x476   :  { %3379 = vmatprep.subr.bf16.mxu1 %v9837_v16  ;;  %3420 = vmatprep.subr.bf16.mxu0 %v9839_v33 }
 0x479   :  { %3380 = vmatpush1.bf16.msra.mxu1 %v9841_v34  ;;  %3421 = vmatpush1.bf16.msra.mxu0 %v9843_v35 }
 0x47a   :  { %3381 = vmatprep.subr.bf16.mxu1 %v9849_v41  ;;  %3422 = vmatprep.subr.bf16.mxu0 %v9851_v43 }
 0x47d   :  { %3382 = vmatpush1.bf16.msra.mxu1 %v9853_v44  ;;  %3423 = vmatpush1.bf16.msra.mxu0 %v9855_v61 }
 0x47e   :  { %3383 = vmatprep.subr.bf16.mxu1 %v9861_v49  ;;  %3424 = vmatprep.subr.bf16.mxu0 %v9863_v23 }
 0x481   :  { %3384 = vmatpush1.bf16.msra.mxu1 %v9865_v38  ;;  %3425 = vmatpush1.bf16.msra.mxu0 %v9867_v51 }
 0x482   :  { %3385 = vmatprep.subr.bf16.mxu1 %v9873_v37  ;;  %3426 = vmatprep.subr.bf16.mxu0 %v9875_v56 }
 0x485   :  { %3386 = vmatpush1.bf16.msra.mxu1 %v9877_v57  ;;  %3427 = vmatpush1.bf16.msra.mxu0 %v9879_v58 }
 0x486   :  { %3387 = vmatprep.subr.bf16.mxu1 %v9885_v1  ;;  %3428 = vmatprep.subr.bf16.mxu0 %v9887_v3 }
 0x489   :  { %3388 = vmatpush1.bf16.msra.mxu1 %v9889_v4  ;;  %3429 = vmatpush1.bf16.msra.mxu0 %v9892_v6 }
 0x48a   :  { %3389 = vmatprep.subr.bf16.mxu1 %v9896_v14  ;;  %3430 = vmatprep.subr.bf16.mxu0 %v9901_v24  ;;  %v12112_v24 = vld [vmem:[#allocation97_spill] sm:$0xff] }
 0x48d   :  { %3390 = vmatpush1.bf16.msra.mxu1 %v9898_v22  ;;  %3431 = vmatpush1.bf16.msra.mxu0 %v9903_v25  ;;  %v12111_v22 = vld [vmem:[#allocation96_spill] sm:$0xff] }
 0x48e   :  { %3391 = vmatprep.subr.bf16.mxu1 %v9909_v31  ;;  %3432 = vmatprep.subr.bf16.mxu0 %v9911_v40 }
 0x491   :  { %3392 = vmatpush2.bf16.msra.mxu1 %v9913_v59  ;;  %3433 = vmatpush2.bf16.msra.mxu0 %v9915_v39  ;;  %v12089_v39 = vld [vmem:[#allocation73_spill] sm:$0xff] }
 0x492   :  { %3393 = vmatprep.subr.bf16.mxu1 %v9921_v48  ;;  %3434 = vmatprep.subr.bf16.mxu0 %v12080_v60  ;;  %v12090_v48 = vld [vmem:[#allocation74_spill] sm:$0xff]  ;;  %v12091_v60 = vld [vmem:[#allocation75_spill] sm:$0xff] }
 0x495   :  { %3394 = vmatpush2.bf16.msra.mxu1 %v12081_v2  ;;  %3435 = vmatpush2.bf16.msra.mxu0 %v12082_v54  ;;  %v12092_v2 = vld [vmem:[#allocation76_spill] sm:$0xff]  ;;  %v12093_v54 = vld [vmem:[#allocation77_spill] sm:$0xff] }
 0x496   :  { %3395 = vmatprep.subr.bf16.mxu1 %v12083_v42  ;;  %3436 = vmatprep.subr.bf16.mxu0 %v12084_v8  ;;  %v12094_v42 = vld [vmem:[#allocation78_spill] sm:$0xff]  ;;  %v12095_v8 = vld [vmem:[#allocation79_spill] sm:$0xff] }
 0x499   :  { %3396 = vmatpush2.bf16.msra.mxu1 %v12085_v17  ;;  %3437 = vmatpush2.bf16.msra.mxu0 %v12086_v45  ;;  %v12096_v17 = vld [vmem:[#allocation80_spill] sm:$0xff]  ;;  %v12097_v45 = vld [vmem:[#allocation81_spill] sm:$0xff] }
 0x49a   :  { %3397 = vmatprep.subr.bf16.mxu1 %v12087_v36  ;;  %3438 = vmatprep.subr.bf16.mxu0 %v12088_v32  ;;  %v12098_v36 = vld [vmem:[#allocation82_spill] sm:$0xff]  ;;  %v12099_v32 = vld [vmem:[#allocation83_spill] sm:$0xff] }
 0x49d   :  { %3398 = vmatpush2.bf16.msra.mxu1 %v12089_v39  ;;  %3439 = vmatpush2.bf16.msra.mxu0 %v12090_v48  ;;  %v12100_v39 = vld [vmem:[#allocation84_spill] sm:$0xff]  ;;  %v12101_v48 = vld [vmem:[#allocation85_spill] sm:$0xff] }
 0x49e   :  { %3399 = vmatprep.subr.bf16.mxu1 %v12091_v60  ;;  %3440 = vmatprep.subr.bf16.mxu0 %v12092_v2  ;;  %v12102_v60 = vld [vmem:[#allocation86_spill] sm:$0xff]  ;;  %v12103_v2 = vld [vmem:[#allocation87_spill] sm:$0xff] }
 0x4a1   :  { %3400 = vmatpush2.bf16.msra.mxu1 %v12093_v54  ;;  %3441 = vmatpush2.bf16.msra.mxu0 %v12094_v42  ;;  %v12104_v54 = vld [vmem:[#allocation88_spill] sm:$0xff]  ;;  %v12105_v42 = vld [vmem:[#allocation89_spill] sm:$0xff] }
 0x4a2   :  { %3401 = vmatprep.subr.bf16.mxu1 %v12095_v8  ;;  %3442 = vmatprep.subr.bf16.mxu0 %v12096_v17  ;;  %v12106_v8 = vld [vmem:[#allocation90_spill] sm:$0xff]  ;;  %v12107_v17 = vld [vmem:[#allocation91_spill] sm:$0xff] }
 0x4a5   :  { %3402 = vmatpush2.bf16.msra.mxu1 %v12097_v45  ;;  %3443 = vmatpush2.bf16.msra.mxu0 %v12098_v36  ;;  %v12108_v45 = vld [vmem:[#allocation92_spill] sm:$0xff]  ;;  %v10389_v36 = vpop.f32.mrf.mxu1 }
 0x4a6   :  { %3403 = vmatprep.subr.bf16.mxu1 %v12099_v32  ;;  %3444 = vmatprep.subr.bf16.mxu0 %v12100_v39  ;;  %12109 = vst [vmem:[#allocation181_spill] sm:$0xff] %v10389_v36  ;;  %v10391_v32 = vpop.f32.mrf.mxu0 }
 0x4a7   :  { %12110 = vst [vmem:[#allocation182_spill] sm:$0xff] %v10391_v32  ;;  %v9309_v32 = vld [vmem:[%s11584_s1] sm:$0xf] }
 0x4a8   :  { %vm3831_vm6 = vcmp.gt.f32.partialorder %v9309_v32, 3.0  ;;  %vm4327_vm7 = vcmp.gt.f32.partialorder %v9309_v32, 5.0  ;;  %vm4823_vm8 = vcmp.gt.f32.partialorder %v9309_v32, 7.0 }
 0x4a9   :  { %3404 = vmatpush2.bf16.msra.mxu1 %v12101_v48  ;;  %3445 = vmatpush2.bf16.msra.mxu0 %v12102_v60 }
 0x4aa   :  { %3405 = vmatprep.subr.bf16.mxu1 %v12103_v2  ;;  %3446 = vmatprep.subr.bf16.mxu0 %v12104_v54 }
 0x4ad   :  { %3406 = vmatpush2.bf16.msra.mxu1 %v12105_v42  ;;  %3447 = vmatpush2.bf16.msra.mxu0 %v12106_v8 }
 0x4ae   :  { %3457 = vmatprep.subr.bf16.mxu1 %v12107_v17  ;;  %3498 = vmatprep.subr.bf16.mxu0 %v12108_v45 }
 0x4f0   :  { %v3143_v39 = vpop.f32.mrf.mxu1  ;;  %v3184_v48 = vpop.f32.mrf.mxu0 }
 0x4f1   :  { %v3275_v25 = vrot.slane %v3143_v39, 4  ;;  %v3295_v36 = vrot.slane %v3184_v48, 4 }
 0x4f2   :  { %v3145_v59 = vpop.f32.mrf.mxu1  ;;  %v3186_v60 = vpop.f32.mrf.mxu0 }
 0x4f3   :  { %v3276_v42 = vrot.slane %v3145_v59, 4  ;;  %v3279_v8 = vadd.f32 %v3275_v25, %v12111_v22  ;;  %v3299_v59 = vadd.f32 %v3295_v36, %v10051_v55 }
 0x4f4   :  { %v3147_v40 = vpop.f32.mrf.mxu1  ;;  %v3188_v2 = vpop.f32.mrf.mxu0 }
 0x4f5   :  { %v3280_v17 = vadd.f32 %v3276_v42, %v12112_v24  ;;  %v8040_v14 = vmul.f32 -1.442695, %v3279_v8  ;;  %v3296_v40 = vrot.slane %v3186_v60, 4 }
 0x4f6   :  { %v3148_v31 = vpop.f32.mrf.mxu1  ;;  %v3189_v54 = vpop.f32.mrf.mxu0 }
 0x4f7   :  { %v8041_v45 = vmul.f32 -1.442695, %v3280_v17  ;;  %9158 = vpow2.f32 %v8040_v14  ;;  %v12113_v31 = vmov 0.0   ;;  %v3300_v24 = vadd.f32 %v3296_v40, %v10059_v47 }
 0x4f8   :  { %v8054_v2 = vsel %vm3831_vm6, 1.0, %v12113_v31  ;;  %v8064_v22 = vsel %vm4327_vm7, 1.0, %v12113_v31  ;;  %v8042_v14 = vmul.f32 -1.442695, %v3299_v59  ;;  %v8074_v25 = vsel %vm4823_vm8, 1.0, %v12113_v31 }
 0x4f9   :  { %9160 = vpow2.f32 %v8041_v45  ;;  %3836 = vperm.xlu1 %8531, %v8054_v2   ;;  %v8043_v39 = vmul.f32 -1.442695, %v3300_v24 }
 0x4fa   :  { %9162 = vpow2.f32 %v8042_v14 }
 0x4fb   :  { %9164 = vpow2.f32 %v8043_v39 }
 0x4fd   :  { %4332 = vperm.xlu1 %8531, %v8064_v22  }
 0x501   :  { %4828 = vperm.xlu1 %8531, %v8074_v25  }
 0x504   :  { %v9159_v48 = vpop.eup %9158 }
 0x505   :  { %v3287_v60 = vadd.f32 1.0, %v9159_v48 }
 0x506   :  { %v9161_v54 = vpop.eup %9160 }
 0x507   :  { %v3288_v42 = vadd.f32 1.0, %v9161_v54  ;;  %9166 = vrcp.f32 %v3287_v60  ;;  %v9163_v55 = vpop.eup %9162 }
 0x508   :  { %v9165_v8 = vpop.eup %9164  ;;  %v3307_v36 = vadd.f32 1.0, %v9163_v55 }
 0x509   :  { %9168 = vrcp.f32 %v3288_v42  ;;  %v3308_v2 = vadd.f32 1.0, %v9165_v8 }
 0x50a   :  { %9170 = vrcp.f32 %v3307_v36 }
 0x50b   :  { %9172 = vrcp.f32 %v3308_v2 }
 0x514   :  { %v9167_v14 = vpop.eup %9166 }
 0x516   :  { %v9169_v42 = vpop.eup %9168 }
 0x530   :  { %v3225_v17 = vpop.f32.mrf.mxu1  ;;  %v3266_v45 = vpop.f32.mrf.mxu0 }
 0x531   :  { %v3315_v47 = vrot.slane %v3225_v17, 4  ;;  %v3321_v32 = vadd.f32 %v3266_v45, %v10091_v9  ;;  %v12114_v9 = vld [vmem:[#allocation113_spill] sm:$0xff] }
 0x532   :  { %v3227_v40 = vpop.f32.mrf.mxu1  ;;  %v3268_v31 = vpop.f32.mrf.mxu0 }
 0x533   :  { %v3325_v59 = vrot.slane %v3321_v32, 4  ;;  %v3316_v22 = vrot.slane %v3227_v40, 4  ;;  %v3322_v24 = vadd.f32 %v3268_v31, %v10095_v15  ;;  %v3319_v48 = vadd.f32 %v3315_v47, %v10100_v50  ;;  %v9171_v40 = vpop.eup %9170  ;;  %v12115_v50 = vld [vmem:[#allocation120_spill] sm:$0xff] }
 0x534   :  { %v3229_v25 = vpop.f32.mrf.mxu1  ;;  %v3270_v39 = vpop.f32.mrf.mxu0  ;;  %v3345_v36 = vsub.f32 1.0, %v9171_v40  ;;  %v3352_v47 = vrot.slane %v12115_v50, 4 }
 0x535   :  { %v3329_v54 = vmul.f32 %v9167_v14, %v3325_v59  ;;  %v3326_v60 = vrot.slane %v3322_v24, 4  ;;  %v3320_v6 = vadd.f32 %v3316_v22, %v12114_v9  ;;  %v9173_v31 = vpop.eup %9172  ;;  %v3351_v25 = vrot.slane %v10129_v11, 4  ;;  %v10409_v9 = vpop.permute.xlu0 %3340 }
 0x536   :  { %v3230_v55 = vpop.f32.mrf.mxu1  ;;  %v3271_v17 = vpop.f32.mrf.mxu0  ;;  %v3346_v14 = vsub.f32 1.0, %v9173_v31 }
 0x537   :  { %v3331_v45 = vadd.f32 %v3329_v54, %v3319_v48  ;;  %v3330_v8 = vmul.f32 %v9169_v42, %v3326_v60  ;;  %v3355_v24 = vmul.f32 %v9171_v40, %v3351_v25  ;;  %v3356_v54 = vmul.f32 %v9173_v31, %v3352_v47 }
 0x538   :  { %v11819_v60 = vsub.f32 1.0, %v10409_v9 }
 0x539   :  { %9174 = vtanh.f32 %v3331_v45  ;;  %v3332_v32 = vadd.f32 %v3330_v8, %v3320_v6  ;;  %v12116_v8 = vld [vmem:[#allocation119_spill] sm:$0xff] }
 0x53a   :  { %v3369_v45 = vmul.f32 %v11819_v60, %v10129_v11  ;;  %v12118_v11 = vld [vmem:[#allocation93_spill] sm:$0xff]  ;;  %v12137_v60 = vld [vmem:[#allocation138_spill] sm:$0xff] }
 0x53b   :  { %9176 = vtanh.f32 %v3332_v32  ;;  %v12117_v32 = vsub.f32 1.0, %v12116_v8 }
 0x53d   :  { %v3370_v40 = vmul.f32 %v12117_v32, %v12115_v50  ;;  %v12119_v50 = vld [vmem:[#allocation94_spill] sm:$0xff] }
 0x53e   :  { %v12133_v32 = vld [vmem:[#allocation134_spill] sm:$0xff] }
 0x546   :  { %v9175_v39 = vpop.eup %9174 }
 0x547   :  { %v3347_v59 = vmul.f32 %v9175_v39, %v3345_v36 }
 0x548   :  { %v9177_v55 = vpop.eup %9176 }
 0x549   :  { %v3357_v2 = vadd.f32 %v3355_v24, %v3347_v59  ;;  %v3348_v48 = vmul.f32 %v9177_v55, %v3346_v14  ;;  %v12120_v59 = vld [vmem:[#allocation121_spill] sm:$0xff]  ;;  %v12121_v24 = vld [vmem:[#allocation122_spill] sm:$0xff]  ;;  %v12122_v14 = vld [vmem:[#allocation123_spill] sm:$0xff] }
 0x54a   :  { %v12123_v55 = vld [vmem:[#allocation124_spill] sm:$0xff] }
 0x54b   :  { %v3361_v22 = vrot.slane %v3357_v2, 4  ;;  %v3358_v6 = vadd.f32 %v3356_v54, %v3348_v48  ;;  %v12124_v2 = vld [vmem:[#allocation125_spill] sm:$0xff]  ;;  %v12125_v48 = vld [vmem:[#allocation126_spill] sm:$0xff]  ;;  %v12126_v54 = vld [vmem:[#allocation127_spill] sm:$0xff] }
 0x54d   :  { %v3365_v42 = vmul.f32 %v3361_v22, %v10409_v9  ;;  %v3362_v17 = vrot.slane %v3358_v6, 4  ;;  %v12127_v22 = vld [vmem:[#allocation128_spill] sm:$0xff]  ;;  %v12128_v6 = vld [vmem:[#allocation129_spill] sm:$0xff] }
 0x54f   :  { %v3366_v25 = vmul.f32 %v3362_v17, %v12116_v8  ;;  %v10420_v31 = vadd.f32 %v3369_v45, %v3365_v42  ;;  %v12129_v42 = vld [vmem:[#allocation130_spill] sm:$0xff]  ;;  %v12130_v17 = vld [vmem:[#allocation131_spill] sm:$0xff]  ;;  %v12131_v45 = vld [vmem:[#allocation132_spill] sm:$0xff] }
 0x550   :  { %v12132_v8 = vld [vmem:[#allocation133_spill] sm:$0xff] }
 0x551   :  { %v10422_v36 = vadd.f32 %v3370_v40, %v3366_v25  ;;  %v10428_v47 = vpack.c.bf16 %v10420_v31, %v10420_v31  ;;  %v12134_v40 = vld [vmem:[#allocation135_spill] sm:$0xff]  ;;  %v12135_v25 = vld [vmem:[#allocation136_spill] sm:$0xff] }
 0x553   :  { %v3374_v39 = vpack.c.bf16 %v10422_v36, %v10422_v36 }
 0x555   :  { %3407 = vmatprep.mubr.bf16.mxu1 %v3374_v39  ;;  %3448 = vmatprep.mubr.bf16.mxu0 %v3374_v39 }
 0x556   :  { %3408 = vmatmul.mubr.bf16.vlgmr.msra.gmra.mxu1 %v10428_v47  ;;  %3449 = vmatmul.mubr.bf16.vlgmr.msra.gmra.mxu0 %v10428_v47 }
 0x557   :  { %3458 = vmatpush1.bf16.msra.mxu1 %v12118_v11  ;;  %3499 = vmatpush1.bf16.msra.mxu0 %v12119_v50 }
 0x558   :  { %3489 = vmatprep.mubr.bf16.mxu1 %v3374_v39  ;;  %3530 = vmatprep.mubr.bf16.mxu0 %v3374_v39  ;;  %v12136_v39 = vld [vmem:[#allocation137_spill] sm:$0xff] }
 0x559   :  { %3459 = vmatprep.subr.bf16.mxu1 %v12120_v59  ;;  %3500 = vmatprep.subr.bf16.mxu0 %v12121_v24 }
 0x55b   :  { %3460 = vmatpush1.bf16.msra.mxu1 %v12122_v14  ;;  %3501 = vmatpush1.bf16.msra.mxu0 %v12123_v55 }
 0x55c   :  { %3461 = vmatprep.subr.bf16.mxu1 %v12124_v2  ;;  %3502 = vmatprep.subr.bf16.mxu0 %v12125_v48 }
 0x55f   :  { %3462 = vmatpush1.bf16.msra.mxu1 %v12126_v54  ;;  %3503 = vmatpush1.bf16.msra.mxu0 %v12127_v22  ;;  %v12138_v22 = vld [vmem:[#allocation139_spill] sm:$0xff] }
 0x560   :  { %3463 = vmatprep.subr.bf16.mxu1 %v12128_v6  ;;  %3504 = vmatprep.subr.bf16.mxu0 %v12129_v42  ;;  %v12139_v6 = vld [vmem:[#allocation140_spill] sm:$0xff]  ;;  %v12140_v42 = vld [vmem:[#allocation141_spill] sm:$0xff] }
 0x563   :  { %3464 = vmatpush1.bf16.msra.mxu1 %v12130_v17  ;;  %3505 = vmatpush1.bf16.msra.mxu0 %v12131_v45  ;;  %v12141_v17 = vld [vmem:[#allocation142_spill] sm:$0xff]  ;;  %v12142_v45 = vld [vmem:[#allocation143_spill] sm:$0xff] }
 0x564   :  { %3465 = vmatprep.subr.bf16.mxu1 %v12132_v8  ;;  %3506 = vmatprep.subr.bf16.mxu0 %v12133_v32  ;;  %v12143_v8 = vld [vmem:[#allocation144_spill] sm:$0xff]  ;;  %v12144_v32 = vld [vmem:[#allocation145_spill] sm:$0xff] }
 0x567   :  { %3466 = vmatpush1.bf16.msra.mxu1 %v12134_v40  ;;  %3507 = vmatpush1.bf16.msra.mxu0 %v12135_v25  ;;  %v12145_v40 = vld [vmem:[#allocation146_spill] sm:$0xff]  ;;  %v12146_v25 = vld [vmem:[#allocation147_spill] sm:$0xff] }
 0x568   :  { %3467 = vmatprep.subr.bf16.mxu1 %v12136_v39  ;;  %3508 = vmatprep.subr.bf16.mxu0 %v12137_v60  ;;  %v12147_v39 = vld [vmem:[#allocation148_spill] sm:$0xff]  ;;  %v12148_v60 = vld [vmem:[#allocation149_spill] sm:$0xff] }
 0x56b   :  { %3468 = vmatpush1.bf16.msra.mxu1 %v12138_v22  ;;  %3509 = vmatpush1.bf16.msra.mxu0 %v12139_v6  ;;  %v12149_v22 = vld [vmem:[#allocation150_spill] sm:$0xff]  ;;  %v12150_v6 = vld [vmem:[#allocation151_spill] sm:$0xff] }
 0x56c   :  { %3469 = vmatprep.subr.bf16.mxu1 %v12140_v42  ;;  %3510 = vmatprep.subr.bf16.mxu0 %v12141_v17  ;;  %v12151_v42 = vld [vmem:[#allocation152_spill] sm:$0xff]  ;;  %v12152_v17 = vld [vmem:[#allocation153_spill] sm:$0xff] }
 0x56f   :  { %3470 = vmatpush1.bf16.msra.mxu1 %v12142_v45  ;;  %3511 = vmatpush1.bf16.msra.mxu0 %v12143_v8  ;;  %v12153_v45 = vld [vmem:[#allocation154_spill] sm:$0xff]  ;;  %v12154_v8 = vld [vmem:[#allocation155_spill] sm:$0xff] }
 0x570   :  { %3471 = vmatprep.subr.bf16.mxu1 %v12144_v32  ;;  %3512 = vmatprep.subr.bf16.mxu0 %v12145_v40  ;;  %v12155_v32 = vld [vmem:[#allocation156_spill] sm:$0xff]  ;;  %v12156_v40 = vld [vmem:[#allocation157_spill] sm:$0xff] }
 0x573   :  { %3472 = vmatpush1.bf16.msra.mxu1 %v12146_v25  ;;  %3513 = vmatpush1.bf16.msra.mxu0 %v12147_v39  ;;  %v12157_v25 = vld [vmem:[#allocation158_spill] sm:$0xff]  ;;  %v12158_v39 = vld [vmem:[#allocation159_spill] sm:$0xff] }
 0x574   :  { %3473 = vmatprep.subr.bf16.mxu1 %v12148_v60  ;;  %3514 = vmatprep.subr.bf16.mxu0 %v12149_v22  ;;  %v12159_v60 = vld [vmem:[#allocation160_spill] sm:$0xff]  ;;  %v12160_v22 = vld [vmem:[#allocation161_spill] sm:$0xff] }
 0x577   :  { %3474 = vmatpush2.bf16.msra.mxu1 %v12150_v6  ;;  %3515 = vmatpush2.bf16.msra.mxu0 %v12151_v42  ;;  %v12161_v6 = vld [vmem:[#allocation162_spill] sm:$0xff]  ;;  %v12162_v42 = vld [vmem:[#allocation163_spill] sm:$0xff] }
 0x578   :  { %3475 = vmatprep.subr.bf16.mxu1 %v12152_v17  ;;  %3516 = vmatprep.subr.bf16.mxu0 %v12153_v45  ;;  %v12163_v17 = vld [vmem:[#allocation164_spill] sm:$0xff]  ;;  %v12164_v45 = vld [vmem:[#allocation165_spill] sm:$0xff] }
 0x57b   :  { %3476 = vmatpush2.bf16.msra.mxu1 %v12154_v8  ;;  %3517 = vmatpush2.bf16.msra.mxu0 %v12155_v32  ;;  %v12165_v8 = vld [vmem:[#allocation166_spill] sm:$0xff] }
 0x57c   :  { %3477 = vmatprep.subr.bf16.mxu1 %v12156_v40  ;;  %3518 = vmatprep.subr.bf16.mxu0 %v12157_v25 }
 0x57f   :  { %3478 = vmatpush2.bf16.msra.mxu1 %v12158_v39  ;;  %3519 = vmatpush2.bf16.msra.mxu0 %v12159_v60  ;;  %v12166_v39 = vld [vmem:[#allocation170_spill] sm:$0xff]  ;;  %v12167_v60 = vld [vmem:[#allocation171_spill] sm:$0xff] }
 0x580   :  { %3479 = vmatprep.subr.bf16.mxu1 %v12160_v22  ;;  %3520 = vmatprep.subr.bf16.mxu0 %v12161_v6 }
 0x583   :  { %3480 = vmatpush2.bf16.msra.mxu1 %v12162_v42  ;;  %3521 = vmatpush2.bf16.msra.mxu0 %v12163_v17 }
 0x584   :  { %3481 = vmatprep.subr.bf16.mxu1 %v12164_v45  ;;  %3522 = vmatprep.subr.bf16.mxu0 %v12165_v8 }
 0x587   :  { %3482 = vmatpush2.bf16.msra.mxu1 %v10277_v53  ;;  %3523 = vmatpush2.bf16.msra.mxu0 %v10279_v28 }
 0x588   :  { %3483 = vmatprep.subr.bf16.mxu1 %v10283_v26  ;;  %3524 = vmatprep.subr.bf16.mxu0 %v12166_v39 }
 0x58b   :  { %3484 = vmatpush2.bf16.msra.mxu1 %v12167_v60  ;;  %3525 = vmatpush2.bf16.msra.mxu0 %v10291_v0 }
 0x58c   :  { %3485 = vmatprep.subr.bf16.mxu1 %v10295_v63  ;;  %3526 = vmatprep.subr.bf16.mxu0 %v10297_v12 }
 0x58f   :  { %3486 = vmatpush2.bf16.msra.mxu1 %v10301_v5  ;;  %3527 = vmatpush2.bf16.msra.mxu0 %v10303_v46 }
 0x590   :  { %3487 = vmatprep.subr.bf16.mxu1 %v10307_v62  ;;  %3528 = vmatprep.subr.bf16.mxu0 %v10309_v52 }
 0x593   :  { %3488 = vmatpush2.bf16.msra.mxu1 %v10313_v7  ;;  %3529 = vmatpush2.bf16.msra.mxu0 %v10315_v10 }
 0x594   :  { %3605 = vmatprep.subr.bf16.mxu1 %v9794_v13  ;;  %3646 = vmatprep.subr.bf16.mxu0 %v9813_v19 }
 0x596   :  { %3490 = vmatmul.mubr.bf16.vlgmr.msra.gmra.mxu1 %v10428_v47  ;;  %3531 = vmatmul.mubr.bf16.vlgmr.msra.gmra.mxu0 %v10428_v47  ;;  %v12168_v47 = vld [vmem:[#allocation54_spill] sm:$0xff] }
 0x597   :  { %3606 = vmatpush1.bf16.msra.mxu1 %v9819_v20  ;;  %3647 = vmatpush1.bf16.msra.mxu0 %v9821_v21 }
 0x598   :  { %3607 = vmatprep.subr.bf16.mxu1 %v9825_v27  ;;  %3648 = vmatprep.subr.bf16.mxu0 %v9827_v29  ;;  %v10570_v29 = vpop.permute.xlu1 %3582 }
 0x59b   :  { %3608 = vmatpush1.bf16.msra.mxu1 %v9829_v18  ;;  %3649 = vmatpush1.bf16.msra.mxu0 %v9831_v30 }
 0x59c   :  { %3609 = vmatprep.subr.bf16.mxu1 %v9837_v16  ;;  %3650 = vmatprep.subr.bf16.mxu0 %v9839_v33 }
 0x59f   :  { %3610 = vmatpush1.bf16.msra.mxu1 %v9841_v34  ;;  %3651 = vmatpush1.bf16.msra.mxu0 %v9843_v35  ;;  %v12210_v34 = vld [vmem:[#allocation102_spill] sm:$0xff] }
 0x5a0   :  { %3611 = vmatprep.subr.bf16.mxu1 %v9849_v41  ;;  %3652 = vmatprep.subr.bf16.mxu0 %v9851_v43  ;;  %v12207_v43 = vld [vmem:[#allocation99_spill] sm:$0xff]  ;;  %v12208_v41 = vld [vmem:[#allocation101_spill] sm:$0xff] }
 0x5a3   :  { %3612 = vmatpush1.bf16.msra.mxu1 %v9853_v44  ;;  %3653 = vmatpush1.bf16.msra.mxu0 %v9855_v61 }
 0x5a4   :  { %3613 = vmatprep.subr.bf16.mxu1 %v9861_v49  ;;  %3654 = vmatprep.subr.bf16.mxu0 %v9863_v23  ;;  %v12169_v23 = vld [vmem:[#allocation55_spill] sm:$0xff] }
 0x5a7   :  { %3614 = vmatpush1.bf16.msra.mxu1 %v9865_v38  ;;  %3655 = vmatpush1.bf16.msra.mxu0 %v9867_v51  ;;  %v12170_v38 = vld [vmem:[#allocation57_spill] sm:$0xff]  ;;  %v12171_v51 = vld [vmem:[#allocation56_spill] sm:$0xff] }
 0x5a8   :  { %3615 = vmatprep.subr.bf16.mxu1 %v9873_v37  ;;  %3656 = vmatprep.subr.bf16.mxu0 %v9875_v56  ;;  %v12172_v37 = vld [vmem:[#allocation58_spill] sm:$0xff]  ;;  %v12173_v56 = vld [vmem:[#allocation59_spill] sm:$0xff] }
 0x5ab   :  { %3616 = vmatpush1.bf16.msra.mxu1 %v9877_v57  ;;  %3657 = vmatpush1.bf16.msra.mxu0 %v9879_v58  ;;  %v12174_v57 = vld [vmem:[#allocation60_spill] sm:$0xff]  ;;  %v12175_v58 = vld [vmem:[#allocation61_spill] sm:$0xff] }
 0x5ac   :  { %3617 = vmatprep.subr.bf16.mxu1 %v9885_v1  ;;  %3658 = vmatprep.subr.bf16.mxu0 %v9887_v3  ;;  %v12176_v1 = vld [vmem:[#allocation62_spill] sm:$0xff]  ;;  %v12177_v3 = vld [vmem:[#allocation63_spill] sm:$0xff] }
 0x5af   :  { %3618 = vmatpush1.bf16.msra.mxu1 %v9889_v4  ;;  %3659 = vmatpush1.bf16.msra.mxu0 %v12168_v47  ;;  %v12178_v4 = vld [vmem:[#allocation64_spill] sm:$0xff]  ;;  %v12179_v47 = vld [vmem:[#allocation65_spill] sm:$0xff] }
 0x5b0   :  { %3619 = vmatprep.subr.bf16.mxu1 %v12169_v23  ;;  %3660 = vmatprep.subr.bf16.mxu0 %v12170_v38  ;;  %v12180_v23 = vld [vmem:[#allocation66_spill] sm:$0xff]  ;;  %v12181_v38 = vld [vmem:[#allocation67_spill] sm:$0xff] }
 0x5b3   :  { %3620 = vmatpush1.bf16.msra.mxu1 %v12171_v51  ;;  %3661 = vmatpush1.bf16.msra.mxu0 %v12172_v37  ;;  %v12182_v51 = vld [vmem:[#allocation68_spill] sm:$0xff]  ;;  %v12183_v37 = vld [vmem:[#allocation69_spill] sm:$0xff] }
 0x5b4   :  { %3621 = vmatprep.subr.bf16.mxu1 %v12173_v56  ;;  %3662 = vmatprep.subr.bf16.mxu0 %v12174_v57  ;;  %v12184_v56 = vld [vmem:[#allocation70_spill] sm:$0xff]  ;;  %v12185_v57 = vld [vmem:[#allocation71_spill] sm:$0xff] }
 0x5b7   :  { %3622 = vmatpush2.bf16.msra.mxu1 %v12175_v58  ;;  %3663 = vmatpush2.bf16.msra.mxu0 %v12176_v1  ;;  %v12186_v58 = vld [vmem:[#allocation72_spill] sm:$0xff]  ;;  %v12187_v1 = vld [vmem:[#allocation73_spill] sm:$0xff] }
 0x5b8   :  { %3623 = vmatprep.subr.bf16.mxu1 %v12177_v3  ;;  %3664 = vmatprep.subr.bf16.mxu0 %v12178_v4  ;;  %v12188_v3 = vld [vmem:[#allocation74_spill] sm:$0xff]  ;;  %v12189_v4 = vld [vmem:[#allocation75_spill] sm:$0xff] }
 0x5bb   :  { %3624 = vmatpush2.bf16.msra.mxu1 %v12179_v47  ;;  %3665 = vmatpush2.bf16.msra.mxu0 %v12180_v23  ;;  %v12190_v47 = vld [vmem:[#allocation76_spill] sm:$0xff]  ;;  %v12191_v23 = vld [vmem:[#allocation77_spill] sm:$0xff] }
 0x5bc   :  { %3625 = vmatprep.subr.bf16.mxu1 %v12181_v38  ;;  %3666 = vmatprep.subr.bf16.mxu0 %v12182_v51  ;;  %v12192_v38 = vld [vmem:[#allocation78_spill] sm:$0xff]  ;;  %v12193_v51 = vld [vmem:[#allocation79_spill] sm:$0xff] }
 0x5bf   :  { %3626 = vmatpush2.bf16.msra.mxu1 %v12183_v37  ;;  %3667 = vmatpush2.bf16.msra.mxu0 %v12184_v56  ;;  %v12194_v37 = vld [vmem:[#allocation80_spill] sm:$0xff]  ;;  %v12195_v56 = vld [vmem:[#allocation81_spill] sm:$0xff] }
 0x5c0   :  { %3627 = vmatprep.subr.bf16.mxu1 %v12185_v57  ;;  %3668 = vmatprep.subr.bf16.mxu0 %v12186_v58  ;;  %v12196_v57 = vld [vmem:[#allocation82_spill] sm:$0xff]  ;;  %v12197_v58 = vld [vmem:[#allocation83_spill] sm:$0xff] }
 0x5c3   :  { %3628 = vmatpush2.bf16.msra.mxu1 %v12187_v1  ;;  %3669 = vmatpush2.bf16.msra.mxu0 %v12188_v3  ;;  %v12198_v1 = vld [vmem:[#allocation84_spill] sm:$0xff]  ;;  %v12199_v3 = vld [vmem:[#allocation85_spill] sm:$0xff] }
 0x5c4   :  { %3629 = vmatprep.subr.bf16.mxu1 %v12189_v4  ;;  %3670 = vmatprep.subr.bf16.mxu0 %v12190_v47  ;;  %v12200_v4 = vld [vmem:[#allocation86_spill] sm:$0xff]  ;;  %v12201_v47 = vld [vmem:[#allocation87_spill] sm:$0xff] }
 0x5c7   :  { %3630 = vmatpush2.bf16.msra.mxu1 %v12191_v23  ;;  %3671 = vmatpush2.bf16.msra.mxu0 %v12192_v38  ;;  %v12202_v23 = vld [vmem:[#allocation88_spill] sm:$0xff]  ;;  %v12203_v38 = vld [vmem:[#allocation89_spill] sm:$0xff] }
 0x5c8   :  { %3631 = vmatprep.subr.bf16.mxu1 %v12193_v51  ;;  %3672 = vmatprep.subr.bf16.mxu0 %v12194_v37  ;;  %v12204_v51 = vld [vmem:[#allocation90_spill] sm:$0xff]  ;;  %v12205_v37 = vld [vmem:[#allocation91_spill] sm:$0xff] }
 0x5cb   :  { %3632 = vmatpush2.bf16.msra.mxu1 %v12195_v56  ;;  %3673 = vmatpush2.bf16.msra.mxu0 %v12196_v57  ;;  %v12206_v56 = vld [vmem:[#allocation92_spill] sm:$0xff] }
 0x5cc   :  { %3633 = vmatprep.subr.bf16.mxu1 %v12197_v58  ;;  %3674 = vmatprep.subr.bf16.mxu0 %v12198_v1 }
 0x5cf   :  { %3634 = vmatpush2.bf16.msra.mxu1 %v12199_v3  ;;  %3675 = vmatpush2.bf16.msra.mxu0 %v12200_v4 }
 0x5d0   :  { %3635 = vmatprep.subr.bf16.mxu1 %v12201_v47  ;;  %3676 = vmatprep.subr.bf16.mxu0 %v12202_v23 }
 0x5d3   :  { %3636 = vmatpush2.bf16.msra.mxu1 %v12203_v38  ;;  %3677 = vmatpush2.bf16.msra.mxu0 %v12204_v51  ;;  %v12209_v51 = vld [vmem:[#allocation100_spill] sm:$0xff] }
 0x5d4   :  { %3687 = vmatprep.subr.bf16.mxu1 %v12205_v37  ;;  %3728 = vmatprep.subr.bf16.mxu0 %v12206_v56 }
 0x616   :  { %v3409_v57 = vpop.f32.mrf.mxu1  ;;  %v3450_v58 = vpop.f32.mrf.mxu0 }
 0x617   :  { %v3539_v47 = vadd.f32 %v3409_v57, %v12207_v43  ;;  %v3553_v37 = vadd.f32 %v3450_v58, %v12209_v51 }
 0x618   :  { %v3411_v49 = vpop.f32.mrf.mxu1  ;;  %v3452_v1 = vpop.f32.mrf.mxu0 }
 0x619   :  { %v3540_v23 = vadd.f32 %v3411_v49, %v12208_v41  ;;  %v8045_v35 = vmul.f32 -1.442695, %v3539_v47  ;;  %v3554_v56 = vadd.f32 %v3452_v1, %v12210_v34  ;;  %v8047_v33 = vmul.f32 -1.442695, %v3553_v37  ;;  %v12211_v47 = vld [vmem:[#allocation111_spill] sm:$0xff] }
 0x61a   :  { %v3413_v61 = vpop.f32.mrf.mxu1  ;;  %v3454_v3 = vpop.f32.mrf.mxu0 }
 0x61b   :  { %v8046_v38 = vmul.f32 -1.442695, %v3540_v23  ;;  %9178 = vpow2.f32 %v8045_v35  ;;  %v8048_v16 = vmul.f32 -1.442695, %v3554_v56  ;;  %v12212_v56 = vld [vmem:[#allocation114_spill] sm:$0xff] }
 0x61c   :  { %v3414_v44 = vpop.f32.mrf.mxu1  ;;  %v3455_v4 = vpop.f32.mrf.mxu0 }
 0x61d   :  { %9180 = vpow2.f32 %v8046_v38 }
 0x61e   :  { %9182 = vpow2.f32 %v8047_v33 }
 0x61f   :  { %9184 = vpow2.f32 %v8048_v16 }
 0x628   :  { %v9179_v30 = vpop.eup %9178 }
 0x629   :  { %v3547_v3 = vadd.f32 1.0, %v9179_v30 }
 0x62a   :  { %v9181_v61 = vpop.eup %9180 }
 0x62b   :  { %v3548_v44 = vadd.f32 1.0, %v9181_v61  ;;  %9186 = vrcp.f32 %v3547_v3  ;;  %v9183_v57 = vpop.eup %9182 }
 0x62c   :  { %v9185_v49 = vpop.eup %9184  ;;  %v3561_v4 = vadd.f32 1.0, %v9183_v57  ;;  %v12213_v57 = vld [vmem:[#allocation115_spill] sm:$0xff] }
 0x62d   :  { %9188 = vrcp.f32 %v3548_v44  ;;  %v3562_v38 = vadd.f32 1.0, %v9185_v49 }
 0x62e   :  { %9190 = vrcp.f32 %v3561_v4 }
 0x62f   :  { %9192 = vrcp.f32 %v3562_v38 }
 0x638   :  { %v9187_v51 = vpop.eup %9186 }
 0x63a   :  { %v9189_v16 = vpop.eup %9188 }
 0x656   :  { %v3491_v23 = vpop.f32.mrf.mxu1  ;;  %v3532_v35 = vpop.f32.mrf.mxu0 }
 0x657   :  { %v3569_v58 = vadd.f32 %v3532_v35, %v12211_v47  ;;  %v3567_v33 = vadd.f32 %v3491_v23, %v12212_v56  ;;  %v9191_v47 = vpop.eup %9190 }
 0x658   :  { %v3493_v1 = vpop.f32.mrf.mxu1  ;;  %v3534_v37 = vpop.f32.mrf.mxu0 }
 0x659   :  { %v3571_v34 = vmul.f32 %v9187_v51, %v3569_v58  ;;  %v3570_v30 = vadd.f32 %v3534_v37, %v10095_v15  ;;  %v3568_v41 = vadd.f32 %v3493_v1, %v12213_v57  ;;  %v9193_v4 = vpop.eup %9192  ;;  %v3587_v51 = vsub.f32 1.0, %v9191_v47 }
 0x65a   :  { %v3495_v61 = vpop.f32.mrf.mxu1  ;;  %v3536_v3 = vpop.f32.mrf.mxu0  ;;  %v3588_v58 = vsub.f32 1.0, %v9193_v4 }
 0x65b   :  { %v3573_v44 = vadd.f32 %v3571_v34, %v3567_v33  ;;  %v3572_v43 = vmul.f32 %v9189_v16, %v3570_v30  ;;  %v3591_v61 = vmul.f32 %v9191_v47, %v10420_v31  ;;  %v11864_v34 = vsub.f32 1.0, %v10570_v29 }
 0x65c   :  { %v3496_v49 = vpop.f32.mrf.mxu1  ;;  %v3537_v18 = vpop.f32.mrf.mxu0  ;;  %v12214_v3 = vsub.f32 1.0, %v10409_v9 }
 0x65d   :  { %9194 = vtanh.f32 %v3573_v44  ;;  %v3574_v35 = vadd.f32 %v3572_v43, %v3568_v41  ;;  %v3592_v18 = vmul.f32 %v9193_v4, %v10422_v36  ;;  %v3599_v30 = vmul.f32 %v11864_v34, %v10420_v31  ;;  %v12216_v31 = vld [vmem:[#allocation129_spill] sm:$0xff]  ;;  %v12234_v34 = vld [vmem:[#allocation147_spill] sm:$0xff] }
 0x65e   :  { %v3600_v47 = vmul.f32 %v10422_v36, %v12214_v3  ;;  %v12217_v36 = vld [vmem:[#allocation130_spill] sm:$0xff]  ;;  %v12231_v3 = vld [vmem:[#allocation144_spill] sm:$0xff] }
 0x65f   :  { %9196 = vtanh.f32 %v3574_v35 }
 0x66a   :  { %v9195_v23 = vpop.eup %9194 }
 0x66b   :  { %v3589_v37 = vmul.f32 %v9195_v23, %v3587_v51  ;;  %v12218_v51 = vld [vmem:[#allocation131_spill] sm:$0xff]  ;;  %v12219_v23 = vld [vmem:[#allocation132_spill] sm:$0xff] }
 0x66c   :  { %v9197_v38 = vpop.eup %9196 }
 0x66d   :  { %v3593_v1 = vadd.f32 %v3591_v61, %v3589_v37  ;;  %v3590_v33 = vmul.f32 %v9197_v38, %v3588_v58  ;;  %v12220_v58 = vld [vmem:[#allocation133_spill] sm:$0xff]  ;;  %v12221_v37 = vld [vmem:[#allocation134_spill] sm:$0xff]  ;;  %v12222_v61 = vld [vmem:[#allocation135_spill] sm:$0xff] }
 0x66e   :  { %v12223_v38 = vld [vmem:[#allocation136_spill] sm:$0xff] }
 0x66f   :  { %v3595_v41 = vmul.f32 %v3593_v1, %v10570_v29  ;;  %v3594_v43 = vadd.f32 %v3592_v18, %v3590_v33  ;;  %v12224_v1 = vld [vmem:[#allocation137_spill] sm:$0xff]  ;;  %v12225_v33 = vld [vmem:[#allocation138_spill] sm:$0xff]  ;;  %v12226_v18 = vld [vmem:[#allocation139_spill] sm:$0xff] }
 0x671   :  { %v3596_v16 = vmul.f32 %v3594_v43, %v10409_v9  ;;  %v10583_v44 = vadd.f32 %v3599_v30, %v3595_v41  ;;  %v12215_v9 = vld [vmem:[#allocation128_spill] sm:$0xff]  ;;  %v12228_v43 = vld [vmem:[#allocation141_spill] sm:$0xff]  ;;  %v12229_v30 = vld [vmem:[#allocation142_spill] sm:$0xff] }
 0x672   :  { %v12227_v41 = vld [vmem:[#allocation140_spill] sm:$0xff] }
 0x673   :  { %v10585_v49 = vadd.f32 %v3600_v47, %v3596_v16  ;;  %v10591_v4 = vpack.c.bf16 %v10583_v44, %v10583_v44  ;;  %v12230_v16 = vld [vmem:[#allocation143_spill] sm:$0xff]  ;;  %v12232_v47 = vld [vmem:[#allocation145_spill] sm:$0xff] }
 0x675   :  { %v3604_v35 = vpack.c.bf16 %v10585_v49, %v10585_v49 }
 0x677   :  { %3637 = vmatprep.mubr.bf16.mxu1 %v3604_v35  ;;  %3678 = vmatprep.mubr.bf16.mxu0 %v3604_v35 }
 0x678   :  { %3638 = vmatmul.mubr.bf16.vlgmr.msra.gmra.mxu1 %v10591_v4  ;;  %3679 = vmatmul.mubr.bf16.vlgmr.msra.gmra.mxu0 %v10591_v4 }
 0x679   :  { %3688 = vmatpush1.bf16.msra.mxu1 %v12118_v11  ;;  %3729 = vmatpush1.bf16.msra.mxu0 %v12119_v50 }
 0x67a   :  { %3719 = vmatprep.mubr.bf16.mxu1 %v3604_v35  ;;  %3760 = vmatprep.mubr.bf16.mxu0 %v3604_v35  ;;  %v12233_v35 = vld [vmem:[#allocation146_spill] sm:$0xff] }
 0x67b   :  { %3689 = vmatprep.subr.bf16.mxu1 %v12120_v59  ;;  %3730 = vmatprep.subr.bf16.mxu0 %v12121_v24 }
 0x67d   :  { %3690 = vmatpush1.bf16.msra.mxu1 %v12122_v14  ;;  %3731 = vmatpush1.bf16.msra.mxu0 %v12123_v55 }
 0x67e   :  { %3691 = vmatprep.subr.bf16.mxu1 %v12124_v2  ;;  %3732 = vmatprep.subr.bf16.mxu0 %v12125_v48 }
 0x681   :  { %3692 = vmatpush1.bf16.msra.mxu1 %v12126_v54  ;;  %3733 = vmatpush1.bf16.msra.mxu0 %v12215_v9 }
 0x682   :  { %3693 = vmatprep.subr.bf16.mxu1 %v12216_v31  ;;  %3734 = vmatprep.subr.bf16.mxu0 %v12217_v36 }
 0x685   :  { %3694 = vmatpush1.bf16.msra.mxu1 %v12218_v51  ;;  %3735 = vmatpush1.bf16.msra.mxu0 %v12219_v23 }
 0x686   :  { %3695 = vmatprep.subr.bf16.mxu1 %v12220_v58  ;;  %3736 = vmatprep.subr.bf16.mxu0 %v12221_v37 }
 0x689   :  { %3696 = vmatpush1.bf16.msra.mxu1 %v12222_v61  ;;  %3737 = vmatpush1.bf16.msra.mxu0 %v12223_v38 }
 0x68a   :  { %3697 = vmatprep.subr.bf16.mxu1 %v12224_v1  ;;  %3738 = vmatprep.subr.bf16.mxu0 %v12225_v33  ;;  %v12235_v1 = vld [vmem:[#allocation148_spill] sm:$0xff]  ;;  %v12236_v33 = vld [vmem:[#allocation149_spill] sm:$0xff] }
 0x68d   :  { %3698 = vmatpush1.bf16.msra.mxu1 %v12226_v18  ;;  %3739 = vmatpush1.bf16.msra.mxu0 %v12227_v41  ;;  %v12237_v18 = vld [vmem:[#allocation150_spill] sm:$0xff]  ;;  %v12238_v41 = vld [vmem:[#allocation151_spill] sm:$0xff] }
 0x68e   :  { %3699 = vmatprep.subr.bf16.mxu1 %v12228_v43  ;;  %3740 = vmatprep.subr.bf16.mxu0 %v12229_v30  ;;  %v12239_v43 = vld [vmem:[#allocation152_spill] sm:$0xff]  ;;  %v12240_v30 = vld [vmem:[#allocation153_spill] sm:$0xff] }
 0x691   :  { %3700 = vmatpush1.bf16.msra.mxu1 %v12230_v16  ;;  %3741 = vmatpush1.bf16.msra.mxu0 %v12231_v3  ;;  %v12241_v16 = vld [vmem:[#allocation154_spill] sm:$0xff]  ;;  %v12242_v3 = vld [vmem:[#allocation155_spill] sm:$0xff] }
 0x692   :  { %3701 = vmatprep.subr.bf16.mxu1 %v12232_v47  ;;  %3742 = vmatprep.subr.bf16.mxu0 %v12233_v35 }
 0x695   :  { %3702 = vmatpush1.bf16.msra.mxu1 %v12234_v34  ;;  %3743 = vmatpush1.bf16.msra.mxu0 %v12235_v1  ;;  %v12243_v1 = vld [vmem:[#allocation159_spill] sm:$0xff] }
 0x696   :  { %3703 = vmatprep.subr.bf16.mxu1 %v12236_v33  ;;  %3744 = vmatprep.subr.bf16.mxu0 %v12237_v18  ;;  %v12244_v33 = vld [vmem:[#allocation160_spill] sm:$0xff] }
 0x699   :  { %3704 = vmatpush2.bf16.msra.mxu1 %v12238_v41  ;;  %3745 = vmatpush2.bf16.msra.mxu0 %v12239_v43 }
 0x69a   :  { %3705 = vmatprep.subr.bf16.mxu1 %v12240_v30  ;;  %3746 = vmatprep.subr.bf16.mxu0 %v12241_v16 }
 0x69d   :  { %3706 = vmatpush2.bf16.msra.mxu1 %v12242_v3  ;;  %3747 = vmatpush2.bf16.msra.mxu0 %v12155_v32 }
 0x69e   :  { %3707 = vmatprep.subr.bf16.mxu1 %v12156_v40  ;;  %3748 = vmatprep.subr.bf16.mxu0 %v12157_v25 }
 0x6a1   :  { %3708 = vmatpush2.bf16.msra.mxu1 %v12243_v1  ;;  %3749 = vmatpush2.bf16.msra.mxu0 %v12244_v33 }
 0x6a2   :  { %3709 = vmatprep.subr.bf16.mxu1 %v12160_v22  ;;  %3750 = vmatprep.subr.bf16.mxu0 %v12161_v6 }
 0x6a5   :  { %3710 = vmatpush2.bf16.msra.mxu1 %v12162_v42  ;;  %3751 = vmatpush2.bf16.msra.mxu0 %v12163_v17 }
 0x6a6   :  { %3711 = vmatprep.subr.bf16.mxu1 %v12164_v45  ;;  %3752 = vmatprep.subr.bf16.mxu0 %v12165_v8  ;;  %v12309_v8 = vld [vmem:[#allocation102_spill] sm:$0xff] }
 0x6a9   :  { %3712 = vmatpush2.bf16.msra.mxu1 %v10277_v53  ;;  %3753 = vmatpush2.bf16.msra.mxu0 %v10279_v28  ;;  %v12308_v28 = vld [vmem:[#allocation100_spill] sm:$0xff] }
 0x6aa   :  { %3713 = vmatprep.subr.bf16.mxu1 %v10283_v26  ;;  %3754 = vmatprep.subr.bf16.mxu0 %v12166_v39  ;;  %v12307_v39 = vld [vmem:[#allocation101_spill] sm:$0xff] }
 0x6ad   :  { %3714 = vmatpush2.bf16.msra.mxu1 %v12167_v60  ;;  %3755 = vmatpush2.bf16.msra.mxu0 %v10291_v0  ;;  %v12306_v60 = vld [vmem:[#allocation99_spill] sm:$0xff] }
 0x6ae   :  { %3715 = vmatprep.subr.bf16.mxu1 %v10295_v63  ;;  %3756 = vmatprep.subr.bf16.mxu0 %v10297_v12 }
 0x6b1   :  { %3716 = vmatpush2.bf16.msra.mxu1 %v10301_v5  ;;  %3757 = vmatpush2.bf16.msra.mxu0 %v10303_v46  ;;  %v12251_v46 = vld [vmem:[#allocation38_spill] sm:$0xff] }
 0x6b2   :  { %3717 = vmatprep.subr.bf16.mxu1 %v10307_v62  ;;  %3758 = vmatprep.subr.bf16.mxu0 %v10309_v52  ;;  %v12245_v62 = vld [vmem:[#allocation32_spill] sm:$0xff]  ;;  %v12246_v52 = vld [vmem:[#allocation33_spill] sm:$0xff] }
 0x6b5   :  { %3718 = vmatpush2.bf16.msra.mxu1 %v10313_v7  ;;  %3759 = vmatpush2.bf16.msra.mxu0 %v10315_v10  ;;  %v12247_v7 = vld [vmem:[#allocation34_spill] sm:$0xff]  ;;  %v12248_v10 = vld [vmem:[#allocation35_spill] sm:$0xff] }
 0x6b6   :  { %3871 = vmatprep.subr.bf16.mxu1 %v9794_v13  ;;  %3912 = vmatprep.subr.bf16.mxu0 %v9813_v19  ;;  %v12249_v13 = vld [vmem:[#allocation36_spill] sm:$0xff]  ;;  %v12250_v19 = vld [vmem:[#allocation37_spill] sm:$0xff] }
 0x6b8   :  { %3720 = vmatmul.mubr.bf16.vlgmr.msra.gmra.mxu1 %v10591_v4  ;;  %3761 = vmatmul.mubr.bf16.vlgmr.msra.gmra.mxu0 %v10591_v4  ;;  %v12252_v4 = vld [vmem:[#allocation39_spill] sm:$0xff] }
 0x6b9   :  { %3872 = vmatpush1.bf16.msra.mxu1 %v9819_v20  ;;  %3913 = vmatpush1.bf16.msra.mxu0 %v9821_v21  ;;  %v12253_v20 = vld [vmem:[#allocation40_spill] sm:$0xff]  ;;  %v12254_v21 = vld [vmem:[#allocation41_spill] sm:$0xff] }
 0x6ba   :  { %3873 = vmatprep.subr.bf16.mxu1 %v9825_v27  ;;  %3914 = vmatprep.subr.bf16.mxu0 %v12245_v62  ;;  %v12255_v27 = vld [vmem:[#allocation42_spill] sm:$0xff]  ;;  %v12256_v62 = vld [vmem:[#allocation43_spill] sm:$0xff] }
 0x6bd   :  { %3874 = vmatpush1.bf16.msra.mxu1 %v12246_v52  ;;  %3915 = vmatpush1.bf16.msra.mxu0 %v12247_v7  ;;  %v12257_v52 = vld [vmem:[#allocation44_spill] sm:$0xff]  ;;  %v12258_v7 = vld [vmem:[#allocation45_spill] sm:$0xff] }
 0x6be   :  { %3875 = vmatprep.subr.bf16.mxu1 %v12248_v10  ;;  %3916 = vmatprep.subr.bf16.mxu0 %v12249_v13  ;;  %v12259_v10 = vld [vmem:[#allocation46_spill] sm:$0xff]  ;;  %v12260_v13 = vld [vmem:[#allocation47_spill] sm:$0xff] }
 0x6c1   :  { %3876 = vmatpush1.bf16.msra.mxu1 %v12250_v19  ;;  %3917 = vmatpush1.bf16.msra.mxu0 %v12251_v46  ;;  %v12261_v19 = vld [vmem:[#allocation48_spill] sm:$0xff]  ;;  %v12262_v46 = vld [vmem:[#allocation49_spill] sm:$0xff] }
 0x6c2   :  { %3877 = vmatprep.subr.bf16.mxu1 %v12252_v4  ;;  %3918 = vmatprep.subr.bf16.mxu0 %v12253_v20  ;;  %v12263_v4 = vld [vmem:[#allocation50_spill] sm:$0xff]  ;;  %v12264_v20 = vld [vmem:[#allocation51_spill] sm:$0xff] }
 0x6c5   :  { %3878 = vmatpush1.bf16.msra.mxu1 %v12254_v21  ;;  %3919 = vmatpush1.bf16.msra.mxu0 %v12255_v27  ;;  %v12265_v21 = vld [vmem:[#allocation52_spill] sm:$0xff]  ;;  %v12266_v27 = vld [vmem:[#allocation53_spill] sm:$0xff] }
 0x6c6   :  { %3879 = vmatprep.subr.bf16.mxu1 %v12256_v62  ;;  %3920 = vmatprep.subr.bf16.mxu0 %v12257_v52  ;;  %v12267_v62 = vld [vmem:[#allocation54_spill] sm:$0xff]  ;;  %v12268_v52 = vld [vmem:[#allocation55_spill] sm:$0xff] }
 0x6c9   :  { %3880 = vmatpush1.bf16.msra.mxu1 %v12258_v7  ;;  %3921 = vmatpush1.bf16.msra.mxu0 %v12259_v10  ;;  %v12269_v7 = vld [vmem:[#allocation57_spill] sm:$0xff]  ;;  %v12270_v10 = vld [vmem:[#allocation56_spill] sm:$0xff] }
 0x6ca   :  { %3881 = vmatprep.subr.bf16.mxu1 %v12260_v13  ;;  %3922 = vmatprep.subr.bf16.mxu0 %v12261_v19  ;;  %v12271_v13 = vld [vmem:[#allocation58_spill] sm:$0xff]  ;;  %v12272_v19 = vld [vmem:[#allocation59_spill] sm:$0xff] }
 0x6cd   :  { %3882 = vmatpush1.bf16.msra.mxu1 %v12262_v46  ;;  %3923 = vmatpush1.bf16.msra.mxu0 %v12263_v4  ;;  %v12273_v46 = vld [vmem:[#allocation60_spill] sm:$0xff]  ;;  %v12274_v4 = vld [vmem:[#allocation61_spill] sm:$0xff] }
 0x6ce   :  { %3883 = vmatprep.subr.bf16.mxu1 %v12264_v20  ;;  %3924 = vmatprep.subr.bf16.mxu0 %v12265_v21  ;;  %v12275_v20 = vld [vmem:[#allocation62_spill] sm:$0xff]  ;;  %v12276_v21 = vld [vmem:[#allocation63_spill] sm:$0xff] }
 0x6d1   :  { %3884 = vmatpush1.bf16.msra.mxu1 %v12266_v27  ;;  %3925 = vmatpush1.bf16.msra.mxu0 %v12267_v62  ;;  %v12277_v27 = vld [vmem:[#allocation64_spill] sm:$0xff]  ;;  %v12278_v62 = vld [vmem:[#allocation65_spill] sm:$0xff] }
 0x6d2   :  { %3885 = vmatprep.subr.bf16.mxu1 %v12268_v52  ;;  %3926 = vmatprep.subr.bf16.mxu0 %v12269_v7  ;;  %v12279_v52 = vld [vmem:[#allocation66_spill] sm:$0xff]  ;;  %v12280_v7 = vld [vmem:[#allocation67_spill] sm:$0xff] }
 0x6d5   :  { %3886 = vmatpush1.bf16.msra.mxu1 %v12270_v10  ;;  %3927 = vmatpush1.bf16.msra.mxu0 %v12271_v13  ;;  %v12281_v10 = vld [vmem:[#allocation68_spill] sm:$0xff]  ;;  %v12282_v13 = vld [vmem:[#allocation69_spill] sm:$0xff] }
 0x6d6   :  { %3887 = vmatprep.subr.bf16.mxu1 %v12272_v19  ;;  %3928 = vmatprep.subr.bf16.mxu0 %v12273_v46  ;;  %v12283_v19 = vld [vmem:[#allocation70_spill] sm:$0xff]  ;;  %v12284_v46 = vld [vmem:[#allocation71_spill] sm:$0xff] }
 0x6d9   :  { %3888 = vmatpush2.bf16.msra.mxu1 %v12274_v4  ;;  %3929 = vmatpush2.bf16.msra.mxu0 %v12275_v20  ;;  %v12285_v4 = vld [vmem:[#allocation72_spill] sm:$0xff]  ;;  %v12286_v20 = vld [vmem:[#allocation73_spill] sm:$0xff] }
 0x6da   :  { %3889 = vmatprep.subr.bf16.mxu1 %v12276_v21  ;;  %3930 = vmatprep.subr.bf16.mxu0 %v12277_v27  ;;  %v12287_v21 = vld [vmem:[#allocation74_spill] sm:$0xff]  ;;  %v12288_v27 = vld [vmem:[#allocation75_spill] sm:$0xff] }
 0x6dd   :  { %3890 = vmatpush2.bf16.msra.mxu1 %v12278_v62  ;;  %3931 = vmatpush2.bf16.msra.mxu0 %v12279_v52  ;;  %v12289_v62 = vld [vmem:[#allocation76_spill] sm:$0xff]  ;;  %v12290_v52 = vld [vmem:[#allocation77_spill] sm:$0xff] }
 0x6de   :  { %3891 = vmatprep.subr.bf16.mxu1 %v12280_v7  ;;  %3932 = vmatprep.subr.bf16.mxu0 %v12281_v10  ;;  %v12291_v7 = vld [vmem:[#allocation78_spill] sm:$0xff]  ;;  %v12292_v10 = vld [vmem:[#allocation79_spill] sm:$0xff] }
 0x6e1   :  { %3892 = vmatpush2.bf16.msra.mxu1 %v12282_v13  ;;  %3933 = vmatpush2.bf16.msra.mxu0 %v12283_v19  ;;  %v12293_v13 = vld [vmem:[#allocation80_spill] sm:$0xff]  ;;  %v12294_v19 = vld [vmem:[#allocation81_spill] sm:$0xff] }
 0x6e2   :  { %3893 = vmatprep.subr.bf16.mxu1 %v12284_v46  ;;  %3934 = vmatprep.subr.bf16.mxu0 %v12285_v4  ;;  %v12295_v46 = vld [vmem:[#allocation82_spill] sm:$0xff]  ;;  %v12296_v4 = vld [vmem:[#allocation83_spill] sm:$0xff] }
 0x6e5   :  { %3894 = vmatpush2.bf16.msra.mxu1 %v12286_v20  ;;  %3935 = vmatpush2.bf16.msra.mxu0 %v12287_v21  ;;  %v12297_v20 = vld [vmem:[#allocation84_spill] sm:$0xff]  ;;  %v12298_v21 = vld [vmem:[#allocation85_spill] sm:$0xff] }
 0x6e6   :  { %3895 = vmatprep.subr.bf16.mxu1 %v12288_v27  ;;  %3936 = vmatprep.subr.bf16.mxu0 %v12289_v62  ;;  %v12299_v27 = vld [vmem:[#allocation86_spill] sm:$0xff]  ;;  %v12300_v62 = vld [vmem:[#allocation87_spill] sm:$0xff] }
 0x6e9   :  { %3896 = vmatpush2.bf16.msra.mxu1 %v12290_v52  ;;  %3937 = vmatpush2.bf16.msra.mxu0 %v12291_v7  ;;  %v12301_v52 = vld [vmem:[#allocation88_spill] sm:$0xff]  ;;  %v12302_v7 = vld [vmem:[#allocation89_spill] sm:$0xff] }
 0x6ea   :  { %3897 = vmatprep.subr.bf16.mxu1 %v12292_v10  ;;  %3938 = vmatprep.subr.bf16.mxu0 %v12293_v13  ;;  %v12303_v10 = vld [vmem:[#allocation90_spill] sm:$0xff]  ;;  %v12304_v13 = vld [vmem:[#allocation91_spill] sm:$0xff] }
 0x6ed   :  { %3898 = vmatpush2.bf16.msra.mxu1 %v12294_v19  ;;  %3939 = vmatpush2.bf16.msra.mxu0 %v12295_v46  ;;  %v12305_v19 = vld [vmem:[#allocation92_spill] sm:$0xff] }
 0x6ee   :  { %3899 = vmatprep.subr.bf16.mxu1 %v12296_v4  ;;  %3940 = vmatprep.subr.bf16.mxu0 %v12297_v20 }
 0x6f1   :  { %3900 = vmatpush2.bf16.msra.mxu1 %v12298_v21  ;;  %3941 = vmatpush2.bf16.msra.mxu0 %v12299_v27 }
 0x6f2   :  { %3901 = vmatprep.subr.bf16.mxu1 %v12300_v62  ;;  %3942 = vmatprep.subr.bf16.mxu0 %v12301_v52 }
 0x6f5   :  { %3902 = vmatpush2.bf16.msra.mxu1 %v12302_v7  ;;  %3943 = vmatpush2.bf16.msra.mxu0 %v12303_v10 }
 0x6f6   :  { %3953 = vmatprep.subr.bf16.mxu1 %v12304_v13  ;;  %3994 = vmatprep.subr.bf16.mxu0 %v12305_v19 }
 0x738   :  { %v3639_v46 = vpop.f32.mrf.mxu1  ;;  %v3680_v4 = vpop.f32.mrf.mxu0 }
 0x739   :  { %v3771_v0 = vrot.slane %v3639_v46, 4  ;;  %v3791_v13 = vrot.slane %v3680_v4, 4 }
 0x73a   :  { %v3641_v5 = vpop.f32.mrf.mxu1  ;;  %v3682_v20 = vpop.f32.mrf.mxu0 }
 0x73b   :  { %v3772_v62 = vrot.slane %v3641_v5, 4  ;;  %v3775_v52 = vadd.f32 %v3771_v0, %v12306_v60  ;;  %v3792_v19 = vrot.slane %v3682_v20, 4  ;;  %v3795_v53 = vadd.f32 %v3791_v13, %v12308_v28 }
 0x73c   :  { %v3643_v12 = vpop.f32.mrf.mxu1  ;;  %v3684_v21 = vpop.f32.mrf.mxu0 }
 0x73d   :  { %v3776_v7 = vadd.f32 %v3772_v62, %v12307_v39  ;;  %v8050_v26 = vmul.f32 -1.442695, %v3775_v52  ;;  %v3796_v45 = vadd.f32 %v3792_v19, %v12309_v8  ;;  %v8052_v12 = vmul.f32 -1.442695, %v3795_v53  ;;  %v12310_v52 = vld [vmem:[#allocation111_spill] sm:$0xff] }
 0x73e   :  { %v3644_v63 = vpop.f32.mrf.mxu1  ;;  %v3685_v27 = vpop.f32.mrf.mxu0 }
 0x73f   :  { %v8051_v10 = vmul.f32 -1.442695, %v3776_v7  ;;  %9198 = vpow2.f32 %v8050_v26  ;;  %v8053_v21 = vmul.f32 -1.442695, %v3796_v45 }
 0x741   :  { %9200 = vpow2.f32 %v8051_v10 }
 0x742   :  { %9202 = vpow2.f32 %v8052_v12 }
 0x743   :  { %9204 = vpow2.f32 %v8053_v21 }
 0x74c   :  { %v9199_v63 = vpop.eup %9198 }
 0x74d   :  { %v3783_v5 = vadd.f32 1.0, %v9199_v63 }
 0x74e   :  { %v9201_v27 = vpop.eup %9200 }
 0x74f   :  { %v3784_v0 = vadd.f32 1.0, %v9201_v27  ;;  %9206 = vrcp.f32 %v3783_v5  ;;  %v9203_v46 = vpop.eup %9202 }
 0x750   :  { %v9205_v7 = vpop.eup %9204  ;;  %v3803_v10 = vadd.f32 1.0, %v9203_v46 }
 0x751   :  { %9208 = vrcp.f32 %v3784_v0  ;;  %v3804_v53 = vadd.f32 1.0, %v9205_v7 }
 0x752   :  { %9210 = vrcp.f32 %v3803_v10 }
 0x753   :  { %9212 = vrcp.f32 %v3804_v53  ;;  %v10735_v53 = vpop.permute.xlu1 %3836 }
 0x75c   :  { %v9207_v39 = vpop.eup %9206 }
 0x75e   :  { %v9209_v5 = vpop.eup %9208 }
 0x778   :  { %v3721_v26 = vpop.f32.mrf.mxu1  ;;  %v3762_v62 = vpop.f32.mrf.mxu0 }
 0x779   :  { %v3811_v20 = vrot.slane %v3721_v26, 4  ;;  %v3817_v13 = vadd.f32 %v3762_v62, %v12310_v52 }
 0x77a   :  { %v3723_v28 = vpop.f32.mrf.mxu1  ;;  %v3764_v19 = vpop.f32.mrf.mxu0 }
 0x77b   :  { %v3821_v60 = vrot.slane %v3817_v13, 4  ;;  %v3812_v45 = vrot.slane %v3723_v28, 4  ;;  %v3818_v8 = vadd.f32 %v3764_v19, %v10095_v15  ;;  %v3815_v21 = vadd.f32 %v3811_v20, %v12212_v56  ;;  %v9211_v28 = vpop.eup %9210 }
 0x77c   :  { %v3725_v4 = vpop.f32.mrf.mxu1  ;;  %v3766_v12 = vpop.f32.mrf.mxu0  ;;  %v3841_v10 = vsub.f32 1.0, %v9211_v28  ;;  %v3848_v56 = vrot.slane %v10585_v49, 4 }
 0x77d   :  { %v3825_v63 = vmul.f32 %v9207_v39, %v3821_v60  ;;  %v3822_v27 = vrot.slane %v3818_v8, 4  ;;  %v3816_v62 = vadd.f32 %v3812_v45, %v12213_v57  ;;  %v9213_v19 = vpop.eup %9212  ;;  %v3847_v4 = vrot.slane %v10583_v44, 4 }
 0x77e   :  { %v3726_v0 = vpop.f32.mrf.mxu1  ;;  %v3767_v46 = vpop.f32.mrf.mxu0  ;;  %v3842_v20 = vsub.f32 1.0, %v9213_v19  ;;  %v3852_v57 = vmul.f32 %v9213_v19, %v3848_v56  ;;  %v12316_v56 = vld [vmem:[#allocation141_spill] sm:$0xff] }
 0x77f   :  { %v3827_v26 = vadd.f32 %v3825_v63, %v3815_v21  ;;  %v3826_v7 = vmul.f32 %v9209_v5, %v3822_v27  ;;  %v3851_v8 = vmul.f32 %v9211_v28, %v3847_v4  ;;  %v11903_v63 = vsub.f32 1.0, %v10735_v53 }
 0x781   :  { %9214 = vtanh.f32 %v3827_v26  ;;  %v3828_v13 = vadd.f32 %v3826_v7, %v3816_v62  ;;  %v3865_v26 = vmul.f32 %v11903_v63, %v10583_v44  ;;  %v12311_v7 = vsub.f32 1.0, %v10570_v29  ;;  %v12313_v44 = vld [vmem:[#allocation138_spill] sm:$0xff]  ;;  %v12333_v63 = vld [vmem:[#allocation176_spill] sm:$0xff] }
 0x783   :  { %9216 = vtanh.f32 %v3828_v13  ;;  %v3866_v13 = vmul.f32 %v10585_v49, %v12311_v7  ;;  %v12314_v49 = vld [vmem:[#allocation139_spill] sm:$0xff]  ;;  %v12330_v7 = vld [vmem:[#allocation173_spill] sm:$0xff] }
 0x78e   :  { %v9215_v12 = vpop.eup %9214 }
 0x78f   :  { %v3843_v60 = vmul.f32 %v9215_v12, %v3841_v10  ;;  %v12315_v12 = vld [vmem:[#allocation140_spill] sm:$0xff] }
 0x790   :  { %v9217_v39 = vpop.eup %9216 }
 0x791   :  { %v3844_v21 = vmul.f32 %v9217_v39, %v3842_v20  ;;  %v3853_v45 = vadd.f32 %v3851_v8, %v3843_v60  ;;  %v12317_v20 = vld [vmem:[#allocation142_spill] sm:$0xff]  ;;  %v12318_v60 = vld [vmem:[#allocation143_spill] sm:$0xff]  ;;  %v12319_v8 = vld [vmem:[#allocation144_spill] sm:$0xff] }
 0x792   :  { %v12320_v39 = vld [vmem:[#allocation148_spill] sm:$0xff] }
 0x793   :  { %v3854_v27 = vadd.f32 %v3852_v57, %v3844_v21  ;;  %v3857_v5 = vrot.slane %v3853_v45, 4  ;;  %v12321_v21 = vld [vmem:[#allocation149_spill] sm:$0xff]  ;;  %v12323_v45 = vld [vmem:[#allocation166_spill] sm:$0xff] }
 0x794   :  { %v12322_v57 = vld [vmem:[#allocation165_spill] sm:$0xff] }
 0x795   :  { %v3858_v0 = vrot.slane %v3854_v27, 4  ;;  %v3861_v46 = vmul.f32 %v3857_v5, %v10735_v53  ;;  %v12324_v27 = vld [vmem:[#allocation167_spill] sm:$0xff]  ;;  %v12325_v5 = vld [vmem:[#allocation168_spill] sm:$0xff] }
 0x797   :  { %v3862_v62 = vmul.f32 %v3858_v0, %v10570_v29  ;;  %v10746_v28 = vadd.f32 %v3865_v26, %v3861_v46  ;;  %v12312_v29 = vld [vmem:[#allocation137_spill] sm:$0xff]  ;;  %v12327_v46 = vld [vmem:[#allocation170_spill] sm:$0xff]  ;;  %v12328_v26 = vld [vmem:[#allocation171_spill] sm:$0xff] }
 0x798   :  { %v12326_v0 = vld [vmem:[#allocation169_spill] sm:$0xff] }
 0x799   :  { %v10748_v19 = vadd.f32 %v3866_v13, %v3862_v62  ;;  %v10754_v10 = vpack.c.bf16 %v10746_v28, %v10746_v28  ;;  %v12329_v62 = vld [vmem:[#allocation172_spill] sm:$0xff]  ;;  %v12331_v13 = vld [vmem:[#allocation174_spill] sm:$0xff] }
 0x79b   :  { %v3870_v4 = vpack.c.bf16 %v10748_v19, %v10748_v19 }
 0x79d   :  { %3903 = vmatprep.mubr.bf16.mxu1 %v3870_v4  ;;  %3944 = vmatprep.mubr.bf16.mxu0 %v3870_v4 }
 0x79e   :  { %3904 = vmatmul.mubr.bf16.vlgmr.msra.gmra.mxu1 %v10754_v10  ;;  %3945 = vmatmul.mubr.bf16.vlgmr.msra.gmra.mxu0 %v10754_v10 }
 0x79f   :  { %3954 = vmatpush1.bf16.msra.mxu1 %v12118_v11  ;;  %3995 = vmatpush1.bf16.msra.mxu0 %v12119_v50 }
 0x7a0   :  { %3985 = vmatprep.mubr.bf16.mxu1 %v3870_v4  ;;  %4026 = vmatprep.mubr.bf16.mxu0 %v3870_v4  ;;  %v12332_v4 = vld [vmem:[#allocation175_spill] sm:$0xff] }
 0x7a1   :  { %3955 = vmatprep.subr.bf16.mxu1 %v12120_v59  ;;  %3996 = vmatprep.subr.bf16.mxu0 %v12121_v24 }
 0x7a3   :  { %3956 = vmatpush1.bf16.msra.mxu1 %v12122_v14  ;;  %3997 = vmatpush1.bf16.msra.mxu0 %v12123_v55 }
 0x7a4   :  { %3957 = vmatprep.subr.bf16.mxu1 %v12124_v2  ;;  %3998 = vmatprep.subr.bf16.mxu0 %v12125_v48 }
 0x7a7   :  { %3958 = vmatpush1.bf16.msra.mxu1 %v12126_v54  ;;  %3999 = vmatpush1.bf16.msra.mxu0 %v12215_v9 }
 0x7a8   :  { %3959 = vmatprep.subr.bf16.mxu1 %v12216_v31  ;;  %4000 = vmatprep.subr.bf16.mxu0 %v12217_v36 }
 0x7ab   :  { %3960 = vmatpush1.bf16.msra.mxu1 %v12218_v51  ;;  %4001 = vmatpush1.bf16.msra.mxu0 %v12219_v23 }
 0x7ac   :  { %3961 = vmatprep.subr.bf16.mxu1 %v12220_v58  ;;  %4002 = vmatprep.subr.bf16.mxu0 %v12221_v37 }
 0x7af   :  { %3962 = vmatpush1.bf16.msra.mxu1 %v12222_v61  ;;  %4003 = vmatpush1.bf16.msra.mxu0 %v12223_v38 }
 0x7b0   :  { %3963 = vmatprep.subr.bf16.mxu1 %v12312_v29  ;;  %4004 = vmatprep.subr.bf16.mxu0 %v12313_v44 }
 0x7b3   :  { %3964 = vmatpush1.bf16.msra.mxu1 %v12314_v49  ;;  %4005 = vmatpush1.bf16.msra.mxu0 %v12315_v12 }
 0x7b4   :  { %3965 = vmatprep.subr.bf16.mxu1 %v12316_v56  ;;  %4006 = vmatprep.subr.bf16.mxu0 %v12317_v20 }
 0x7b7   :  { %3966 = vmatpush1.bf16.msra.mxu1 %v12318_v60  ;;  %4007 = vmatpush1.bf16.msra.mxu0 %v12319_v8 }
 0x7b8   :  { %3967 = vmatprep.subr.bf16.mxu1 %v12232_v47  ;;  %4008 = vmatprep.subr.bf16.mxu0 %v12233_v35 }
 0x7bb   :  { %3968 = vmatpush1.bf16.msra.mxu1 %v12234_v34  ;;  %4009 = vmatpush1.bf16.msra.mxu0 %v12320_v39 }
 0x7bc   :  { %3969 = vmatprep.subr.bf16.mxu1 %v12321_v21  ;;  %4010 = vmatprep.subr.bf16.mxu0 %v12237_v18 }
 0x7bf   :  { %3970 = vmatpush2.bf16.msra.mxu1 %v12238_v41  ;;  %4011 = vmatpush2.bf16.msra.mxu0 %v12239_v43 }
 0x7c0   :  { %3971 = vmatprep.subr.bf16.mxu1 %v12240_v30  ;;  %4012 = vmatprep.subr.bf16.mxu0 %v12241_v16 }
 0x7c3   :  { %3972 = vmatpush2.bf16.msra.mxu1 %v12242_v3  ;;  %4013 = vmatpush2.bf16.msra.mxu0 %v12155_v32 }
 0x7c4   :  { %3973 = vmatprep.subr.bf16.mxu1 %v12156_v40  ;;  %4014 = vmatprep.subr.bf16.mxu0 %v12157_v25 }
 0x7c7   :  { %3974 = vmatpush2.bf16.msra.mxu1 %v12243_v1  ;;  %4015 = vmatpush2.bf16.msra.mxu0 %v12244_v33  ;;  %v12407_v33 = vld [vmem:[#allocation106_spill] sm:$0xff] }
 0x7c8   :  { %3975 = vmatprep.subr.bf16.mxu1 %v12160_v22  ;;  %4016 = vmatprep.subr.bf16.mxu0 %v12161_v6  ;;  %v12405_v6 = vld [vmem:[#allocation105_spill] sm:$0xff] }
 0x7cb   :  { %3976 = vmatpush2.bf16.msra.mxu1 %v12162_v42  ;;  %4017 = vmatpush2.bf16.msra.mxu0 %v12163_v17  ;;  %v12404_v42 = vld [vmem:[#allocation103_spill] sm:$0xff] }
 0x7cc   :  { %3977 = vmatprep.subr.bf16.mxu1 %v12322_v57  ;;  %4018 = vmatprep.subr.bf16.mxu0 %v12323_v45  ;;  %v12334_v45 = vld [vmem:[#allocation177_spill] sm:$0xff] }
 0x7cf   :  { %3978 = vmatpush2.bf16.msra.mxu1 %v12324_v27  ;;  %4019 = vmatpush2.bf16.msra.mxu0 %v12325_v5  ;;  %v12335_v27 = vld [vmem:[#allocation178_spill] sm:$0xff]  ;;  %v12336_v5 = vld [vmem:[#allocation179_spill] sm:$0xff] }
 0x7d0   :  { %3979 = vmatprep.subr.bf16.mxu1 %v12326_v0  ;;  %4020 = vmatprep.subr.bf16.mxu0 %v12327_v46  ;;  %v12337_v0 = vld [vmem:[#allocation180_spill] sm:$0xff]  ;;  %v12338_v46 = vld [vmem:[#allocation27_spill] sm:$0xff] }
 0x7d3   :  { %3980 = vmatpush2.bf16.msra.mxu1 %v12328_v26  ;;  %4021 = vmatpush2.bf16.msra.mxu0 %v12329_v62  ;;  %v12339_v26 = vld [vmem:[#allocation28_spill] sm:$0xff] }
 0x7d4   :  { %3981 = vmatprep.subr.bf16.mxu1 %v12330_v7  ;;  %4022 = vmatprep.subr.bf16.mxu0 %v12331_v13  ;;  %v12340_v13 = vld [vmem:[#allocation29_spill] sm:$0xff]  ;;  %v12349_v7 = vld [vmem:[#allocation38_spill] sm:$0xff] }
 0x7d7   :  { %3982 = vmatpush2.bf16.msra.mxu1 %v12332_v4  ;;  %4023 = vmatpush2.bf16.msra.mxu0 %v12333_v63  ;;  %v12341_v4 = vld [vmem:[#allocation30_spill] sm:$0xff]  ;;  %v12342_v63 = vld [vmem:[#allocation31_spill] sm:$0xff] }
 0x7d8   :  { %3983 = vmatprep.subr.bf16.mxu1 %v12334_v45  ;;  %4024 = vmatprep.subr.bf16.mxu0 %v12335_v27  ;;  %v12343_v45 = vld [vmem:[#allocation32_spill] sm:$0xff]  ;;  %v12344_v27 = vld [vmem:[#allocation33_spill] sm:$0xff] }
 0x7db   :  { %3984 = vmatpush2.bf16.msra.mxu1 %v12336_v5  ;;  %4025 = vmatpush2.bf16.msra.mxu0 %v12337_v0  ;;  %v12345_v5 = vld [vmem:[#allocation34_spill] sm:$0xff]  ;;  %v12346_v0 = vld [vmem:[#allocation35_spill] sm:$0xff] }
 0x7dc   :  { %4101 = vmatprep.subr.bf16.mxu1 %v12338_v46  ;;  %4142 = vmatprep.subr.bf16.mxu0 %v12339_v26  ;;  %v12347_v46 = vld [vmem:[#allocation36_spill] sm:$0xff]  ;;  %v12348_v26 = vld [vmem:[#allocation37_spill] sm:$0xff] }
 0x7de   :  { %3986 = vmatmul.mubr.bf16.vlgmr.msra.gmra.mxu1 %v10754_v10  ;;  %4027 = vmatmul.mubr.bf16.vlgmr.msra.gmra.mxu0 %v10754_v10  ;;  %v12350_v10 = vld [vmem:[#allocation39_spill] sm:$0xff] }
 0x7df   :  { %4102 = vmatpush1.bf16.msra.mxu1 %v12340_v13  ;;  %4143 = vmatpush1.bf16.msra.mxu0 %v12341_v4  ;;  %v12351_v13 = vld [vmem:[#allocation40_spill] sm:$0xff]  ;;  %v12352_v4 = vld [vmem:[#allocation41_spill] sm:$0xff] }
 0x7e0   :  { %4103 = vmatprep.subr.bf16.mxu1 %v12342_v63  ;;  %4144 = vmatprep.subr.bf16.mxu0 %v12343_v45  ;;  %v12353_v63 = vld [vmem:[#allocation42_spill] sm:$0xff]  ;;  %v12354_v45 = vld [vmem:[#allocation43_spill] sm:$0xff] }
 0x7e3   :  { %4104 = vmatpush1.bf16.msra.mxu1 %v12344_v27  ;;  %4145 = vmatpush1.bf16.msra.mxu0 %v12345_v5  ;;  %v12355_v27 = vld [vmem:[#allocation44_spill] sm:$0xff]  ;;  %v12356_v5 = vld [vmem:[#allocation45_spill] sm:$0xff] }
 0x7e4   :  { %4105 = vmatprep.subr.bf16.mxu1 %v12346_v0  ;;  %4146 = vmatprep.subr.bf16.mxu0 %v12347_v46  ;;  %v12357_v0 = vld [vmem:[#allocation46_spill] sm:$0xff]  ;;  %v12358_v46 = vld [vmem:[#allocation47_spill] sm:$0xff] }
 0x7e7   :  { %4106 = vmatpush1.bf16.msra.mxu1 %v12348_v26  ;;  %4147 = vmatpush1.bf16.msra.mxu0 %v12349_v7  ;;  %v12359_v26 = vld [vmem:[#allocation48_spill] sm:$0xff]  ;;  %v12360_v7 = vld [vmem:[#allocation49_spill] sm:$0xff] }
 0x7e8   :  { %4107 = vmatprep.subr.bf16.mxu1 %v12350_v10  ;;  %4148 = vmatprep.subr.bf16.mxu0 %v12351_v13  ;;  %v12361_v10 = vld [vmem:[#allocation50_spill] sm:$0xff]  ;;  %v12362_v13 = vld [vmem:[#allocation51_spill] sm:$0xff] }
 0x7eb   :  { %4108 = vmatpush1.bf16.msra.mxu1 %v12352_v4  ;;  %4149 = vmatpush1.bf16.msra.mxu0 %v12353_v63  ;;  %v12363_v4 = vld [vmem:[#allocation52_spill] sm:$0xff]  ;;  %v12364_v63 = vld [vmem:[#allocation53_spill] sm:$0xff] }
 0x7ec   :  { %4109 = vmatprep.subr.bf16.mxu1 %v12354_v45  ;;  %4150 = vmatprep.subr.bf16.mxu0 %v12355_v27  ;;  %v12365_v45 = vld [vmem:[#allocation54_spill] sm:$0xff]  ;;  %v12366_v27 = vld [vmem:[#allocation55_spill] sm:$0xff] }
 0x7ef   :  { %4110 = vmatpush1.bf16.msra.mxu1 %v12356_v5  ;;  %4151 = vmatpush1.bf16.msra.mxu0 %v12357_v0  ;;  %v12367_v5 = vld [vmem:[#allocation57_spill] sm:$0xff]  ;;  %v12368_v0 = vld [vmem:[#allocation56_spill] sm:$0xff] }
 0x7f0   :  { %4111 = vmatprep.subr.bf16.mxu1 %v12358_v46  ;;  %4152 = vmatprep.subr.bf16.mxu0 %v12359_v26  ;;  %v12369_v46 = vld [vmem:[#allocation58_spill] sm:$0xff]  ;;  %v12370_v26 = vld [vmem:[#allocation59_spill] sm:$0xff] }
 0x7f3   :  { %4112 = vmatpush1.bf16.msra.mxu1 %v12360_v7  ;;  %4153 = vmatpush1.bf16.msra.mxu0 %v12361_v10  ;;  %v12371_v7 = vld [vmem:[#allocation60_spill] sm:$0xff]  ;;  %v12372_v10 = vld [vmem:[#allocation61_spill] sm:$0xff] }
 0x7f4   :  { %4113 = vmatprep.subr.bf16.mxu1 %v12362_v13  ;;  %4154 = vmatprep.subr.bf16.mxu0 %v12363_v4  ;;  %v12373_v13 = vld [vmem:[#allocation62_spill] sm:$0xff]  ;;  %v12374_v4 = vld [vmem:[#allocation63_spill] sm:$0xff] }
 0x7f7   :  { %4114 = vmatpush1.bf16.msra.mxu1 %v12364_v63  ;;  %4155 = vmatpush1.bf16.msra.mxu0 %v12365_v45  ;;  %v12375_v63 = vld [vmem:[#allocation64_spill] sm:$0xff]  ;;  %v12376_v45 = vld [vmem:[#allocation65_spill] sm:$0xff] }
 0x7f8   :  { %4115 = vmatprep.subr.bf16.mxu1 %v12366_v27  ;;  %4156 = vmatprep.subr.bf16.mxu0 %v12367_v5  ;;  %v12377_v27 = vld [vmem:[#allocation66_spill] sm:$0xff]  ;;  %v12378_v5 = vld [vmem:[#allocation67_spill] sm:$0xff] }
 0x7fb   :  { %4116 = vmatpush1.bf16.msra.mxu1 %v12368_v0  ;;  %4157 = vmatpush1.bf16.msra.mxu0 %v12369_v46  ;;  %v12379_v0 = vld [vmem:[#allocation68_spill] sm:$0xff]  ;;  %v12380_v46 = vld [vmem:[#allocation69_spill] sm:$0xff] }
 0x7fc   :  { %4117 = vmatprep.subr.bf16.mxu1 %v12370_v26  ;;  %4158 = vmatprep.subr.bf16.mxu0 %v12371_v7  ;;  %v12381_v26 = vld [vmem:[#allocation70_spill] sm:$0xff]  ;;  %v12382_v7 = vld [vmem:[#allocation71_spill] sm:$0xff] }
 0x7ff   :  { %4118 = vmatpush2.bf16.msra.mxu1 %v12372_v10  ;;  %4159 = vmatpush2.bf16.msra.mxu0 %v12373_v13  ;;  %v12383_v10 = vld [vmem:[#allocation72_spill] sm:$0xff]  ;;  %v12384_v13 = vld [vmem:[#allocation73_spill] sm:$0xff] }
 0x800   :  { %4119 = vmatprep.subr.bf16.mxu1 %v12374_v4  ;;  %4160 = vmatprep.subr.bf16.mxu0 %v12375_v63  ;;  %v12385_v4 = vld [vmem:[#allocation74_spill] sm:$0xff]  ;;  %v12386_v63 = vld [vmem:[#allocation75_spill] sm:$0xff] }
 0x803   :  { %4120 = vmatpush2.bf16.msra.mxu1 %v12376_v45  ;;  %4161 = vmatpush2.bf16.msra.mxu0 %v12377_v27  ;;  %v12387_v45 = vld [vmem:[#allocation76_spill] sm:$0xff]  ;;  %v12388_v27 = vld [vmem:[#allocation77_spill] sm:$0xff] }
 0x804   :  { %4121 = vmatprep.subr.bf16.mxu1 %v12378_v5  ;;  %4162 = vmatprep.subr.bf16.mxu0 %v12379_v0  ;;  %v12389_v5 = vld [vmem:[#allocation78_spill] sm:$0xff]  ;;  %v12390_v0 = vld [vmem:[#allocation79_spill] sm:$0xff] }
 0x807   :  { %4122 = vmatpush2.bf16.msra.mxu1 %v12380_v46  ;;  %4163 = vmatpush2.bf16.msra.mxu0 %v12381_v26  ;;  %v12391_v46 = vld [vmem:[#allocation80_spill] sm:$0xff]  ;;  %v12392_v26 = vld [vmem:[#allocation81_spill] sm:$0xff] }
 0x808   :  { %4123 = vmatprep.subr.bf16.mxu1 %v12382_v7  ;;  %4164 = vmatprep.subr.bf16.mxu0 %v12383_v10  ;;  %v12393_v7 = vld [vmem:[#allocation82_spill] sm:$0xff]  ;;  %v12394_v10 = vld [vmem:[#allocation83_spill] sm:$0xff] }
 0x80b   :  { %4124 = vmatpush2.bf16.msra.mxu1 %v12384_v13  ;;  %4165 = vmatpush2.bf16.msra.mxu0 %v12385_v4  ;;  %v12395_v13 = vld [vmem:[#allocation84_spill] sm:$0xff]  ;;  %v12396_v4 = vld [vmem:[#allocation85_spill] sm:$0xff] }
 0x80c   :  { %4125 = vmatprep.subr.bf16.mxu1 %v12386_v63  ;;  %4166 = vmatprep.subr.bf16.mxu0 %v12387_v45  ;;  %v12397_v63 = vld [vmem:[#allocation86_spill] sm:$0xff]  ;;  %v12398_v45 = vld [vmem:[#allocation87_spill] sm:$0xff] }
 0x80f   :  { %4126 = vmatpush2.bf16.msra.mxu1 %v12388_v27  ;;  %4167 = vmatpush2.bf16.msra.mxu0 %v12389_v5  ;;  %v12399_v27 = vld [vmem:[#allocation88_spill] sm:$0xff]  ;;  %v12400_v5 = vld [vmem:[#allocation89_spill] sm:$0xff] }
 0x810   :  { %4127 = vmatprep.subr.bf16.mxu1 %v12390_v0  ;;  %4168 = vmatprep.subr.bf16.mxu0 %v12391_v46  ;;  %v12401_v0 = vld [vmem:[#allocation90_spill] sm:$0xff]  ;;  %v12402_v46 = vld [vmem:[#allocation91_spill] sm:$0xff] }
 0x813   :  { %4128 = vmatpush2.bf16.msra.mxu1 %v12392_v26  ;;  %4169 = vmatpush2.bf16.msra.mxu0 %v12393_v7  ;;  %v12403_v26 = vld [vmem:[#allocation92_spill] sm:$0xff] }
 0x814   :  { %4129 = vmatprep.subr.bf16.mxu1 %v12394_v10  ;;  %4170 = vmatprep.subr.bf16.mxu0 %v12395_v13 }
 0x817   :  { %4130 = vmatpush2.bf16.msra.mxu1 %v12396_v4  ;;  %4171 = vmatpush2.bf16.msra.mxu0 %v12397_v63 }
 0x818   :  { %4131 = vmatprep.subr.bf16.mxu1 %v12398_v45  ;;  %4172 = vmatprep.subr.bf16.mxu0 %v12399_v27 }
 0x81b   :  { %4132 = vmatpush2.bf16.msra.mxu1 %v12400_v5  ;;  %4173 = vmatpush2.bf16.msra.mxu0 %v12401_v0  ;;  %v12406_v0 = vld [vmem:[#allocation104_spill] sm:$0xff] }
 0x81c   :  { %4183 = vmatprep.subr.bf16.mxu1 %v12402_v46  ;;  %4224 = vmatprep.subr.bf16.mxu0 %v12403_v26 }
 0x85e   :  { %v3905_v7 = vpop.f32.mrf.mxu1  ;;  %v3946_v10 = vpop.f32.mrf.mxu0 }
 0x85f   :  { %v4035_v45 = vadd.f32 %v3905_v7, %v12404_v42  ;;  %v4049_v46 = vadd.f32 %v3946_v10, %v12406_v0 }
 0x860   :  { %v3907_v62 = vpop.f32.mrf.mxu1  ;;  %v3948_v13 = vpop.f32.mrf.mxu0 }
 0x861   :  { %v4036_v27 = vadd.f32 %v3907_v62, %v12405_v6  ;;  %v8055_v22 = vmul.f32 -1.442695, %v4035_v45  ;;  %v4050_v26 = vadd.f32 %v3948_v13, %v12407_v33  ;;  %v8057_v1 = vmul.f32 -1.442695, %v4049_v46 }
 0x862   :  { %v3909_v57 = vpop.f32.mrf.mxu1  ;;  %v3950_v4 = vpop.f32.mrf.mxu0 }
 0x863   :  { %v8056_v5 = vmul.f32 -1.442695, %v4036_v27  ;;  %9218 = vpow2.f32 %v8055_v22  ;;  %v8058_v25 = vmul.f32 -1.442695, %v4050_v26  ;;  %v12408_v26 = vld [vmem:[#allocation116_spill] sm:$0xff] }
 0x864   :  { %v3910_v17 = vpop.f32.mrf.mxu1  ;;  %v3951_v63 = vpop.f32.mrf.mxu0 }
 0x865   :  { %9220 = vpow2.f32 %v8056_v5 }
 0x866   :  { %9222 = vpow2.f32 %v8057_v1 }
 0x867   :  { %9224 = vpow2.f32 %v8058_v25 }
 0x870   :  { %v9219_v40 = vpop.eup %9218 }
 0x871   :  { %v4043_v4 = vadd.f32 1.0, %v9219_v40 }
 0x872   :  { %v9221_v57 = vpop.eup %9220 }
 0x873   :  { %v4044_v17 = vadd.f32 1.0, %v9221_v57  ;;  %9226 = vrcp.f32 %v4043_v4  ;;  %v9223_v63 = vpop.eup %9222 }
 0x874   :  { %v9225_v62 = vpop.eup %9224  ;;  %v4057_v45 = vadd.f32 1.0, %v9223_v63  ;;  %v12409_v63 = vld [vmem:[#allocation117_spill] sm:$0xff] }
 0x875   :  { %9228 = vrcp.f32 %v4044_v17  ;;  %v4058_v5 = vadd.f32 1.0, %v9225_v62 }
 0x876   :  { %9230 = vrcp.f32 %v4057_v45 }
 0x877   :  { %9232 = vrcp.f32 %v4058_v5 }
 0x880   :  { %v9227_v10 = vpop.eup %9226 }
 0x882   :  { %v9229_v25 = vpop.eup %9228 }
 0x89e   :  { %v3987_v27 = vpop.f32.mrf.mxu1  ;;  %v4028_v22 = vpop.f32.mrf.mxu0 }
 0x89f   :  { %v4065_v7 = vadd.f32 %v4028_v22, %v12310_v52  ;;  %v4063_v1 = vadd.f32 %v3987_v27, %v12408_v26  ;;  %v9231_v52 = vpop.eup %9230 }
 0x8a0   :  { %v3989_v13 = vpop.f32.mrf.mxu1  ;;  %v4030_v46 = vpop.f32.mrf.mxu0  ;;  %v4083_v32 = vsub.f32 1.0, %v9231_v52 }
 0x8a1   :  { %v4067_v33 = vmul.f32 %v9227_v10, %v4065_v7  ;;  %v4066_v40 = vadd.f32 %v4030_v46, %v10095_v15  ;;  %v4064_v0 = vadd.f32 %v3989_v13, %v12409_v63  ;;  %v9233_v45 = vpop.eup %9232  ;;  %v4087_v46 = vmul.f32 %v9231_v52, %v10746_v28 }
 0x8a2   :  { %v3991_v57 = vpop.f32.mrf.mxu1  ;;  %v4032_v4 = vpop.f32.mrf.mxu0  ;;  %v4084_v7 = vsub.f32 1.0, %v9233_v45  ;;  %v4088_v5 = vmul.f32 %v9233_v45, %v10748_v19  ;;  %v12410_v52 = vsub.f32 1.0, %v10735_v53  ;;  %v12414_v45 = vld [vmem:[#allocation159_spill] sm:$0xff] }
 0x8a3   :  { %v4069_v17 = vadd.f32 %v4067_v33, %v4063_v1  ;;  %v4068_v6 = vmul.f32 %v9229_v25, %v4066_v40  ;;  %v10897_v4 = vpop.permute.xlu0 %4078 }
 0x8a4   :  { %v3992_v62 = vpop.f32.mrf.mxu1  ;;  %v4033_v42 = vpop.f32.mrf.mxu0  ;;  %v4096_v40 = vmul.f32 %v10748_v19, %v12410_v52  ;;  %v12413_v19 = vld [vmem:[#allocation158_spill] sm:$0xff]  ;;  %v12427_v52 = vld [vmem:[#allocation172_spill] sm:$0xff] }
 0x8a5   :  { %9234 = vtanh.f32 %v4069_v17  ;;  %v4070_v22 = vadd.f32 %v4068_v6, %v4064_v0  ;;  %v11914_v42 = vsub.f32 1.0, %v10897_v4 }
 0x8a7   :  { %9236 = vtanh.f32 %v4070_v22  ;;  %v4095_v0 = vmul.f32 %v11914_v42, %v10746_v28  ;;  %v12412_v28 = vld [vmem:[#allocation157_spill] sm:$0xff]  ;;  %v12430_v42 = vld [vmem:[#allocation175_spill] sm:$0xff] }
 0x8b2   :  { %v9235_v27 = vpop.eup %9234 }
 0x8b3   :  { %v4085_v10 = vmul.f32 %v9235_v27, %v4083_v32  ;;  %v12415_v27 = vld [vmem:[#allocation160_spill] sm:$0xff] }
 0x8b4   :  { %v9237_v57 = vpop.eup %9236 }
 0x8b5   :  { %v4086_v33 = vmul.f32 %v9237_v57, %v4084_v7  ;;  %v4089_v13 = vadd.f32 %v4087_v46, %v4085_v10  ;;  %v12416_v7 = vld [vmem:[#allocation161_spill] sm:$0xff]  ;;  %v12417_v10 = vld [vmem:[#allocation162_spill] sm:$0xff]  ;;  %v12418_v46 = vld [vmem:[#allocation163_spill] sm:$0xff] }
 0x8b6   :  { %v12419_v57 = vld [vmem:[#allocation164_spill] sm:$0xff] }
 0x8b7   :  { %v4090_v1 = vadd.f32 %v4088_v5, %v4086_v33  ;;  %v4091_v6 = vmul.f32 %v4089_v13, %v10897_v4  ;;  %v12420_v33 = vld [vmem:[#allocation165_spill] sm:$0xff]  ;;  %v12421_v5 = vld [vmem:[#allocation166_spill] sm:$0xff]  ;;  %v12422_v13 = vld [vmem:[#allocation167_spill] sm:$0xff] }
 0x8b9   :  { %v4092_v32 = vmul.f32 %v4090_v1, %v10735_v53  ;;  %v10909_v25 = vadd.f32 %v4095_v0, %v4091_v6  ;;  %v12411_v53 = vld [vmem:[#allocation156_spill] sm:$0xff]  ;;  %v12424_v6 = vld [vmem:[#allocation169_spill] sm:$0xff]  ;;  %v12425_v0 = vld [vmem:[#allocation170_spill] sm:$0xff] }
 0x8ba   :  { %v12423_v1 = vld [vmem:[#allocation168_spill] sm:$0xff] }
 0x8bb   :  { %v10911_v17 = vadd.f32 %v4096_v40, %v4092_v32  ;;  %v10917_v22 = vpack.c.bf16 %v10909_v25, %v10909_v25  ;;  %v12426_v32 = vld [vmem:[#allocation171_spill] sm:$0xff]  ;;  %v12428_v40 = vld [vmem:[#allocation173_spill] sm:$0xff] }
 0x8bd   :  { %v4100_v62 = vpack.c.bf16 %v10911_v17, %v10911_v17 }
 0x8bf   :  { %4133 = vmatprep.mubr.bf16.mxu1 %v4100_v62  ;;  %4174 = vmatprep.mubr.bf16.mxu0 %v4100_v62 }
 0x8c0   :  { %4134 = vmatmul.mubr.bf16.vlgmr.msra.gmra.mxu1 %v10917_v22  ;;  %4175 = vmatmul.mubr.bf16.vlgmr.msra.gmra.mxu0 %v10917_v22 }
 0x8c1   :  { %4184 = vmatpush1.bf16.msra.mxu1 %v12118_v11  ;;  %4225 = vmatpush1.bf16.msra.mxu0 %v12119_v50 }
 0x8c2   :  { %4215 = vmatprep.mubr.bf16.mxu1 %v4100_v62  ;;  %4256 = vmatprep.mubr.bf16.mxu0 %v4100_v62  ;;  %v12429_v62 = vld [vmem:[#allocation174_spill] sm:$0xff] }
 0x8c3   :  { %4185 = vmatprep.subr.bf16.mxu1 %v12120_v59  ;;  %4226 = vmatprep.subr.bf16.mxu0 %v12121_v24 }
 0x8c5   :  { %4186 = vmatpush1.bf16.msra.mxu1 %v12122_v14  ;;  %4227 = vmatpush1.bf16.msra.mxu0 %v12123_v55 }
 0x8c6   :  { %4187 = vmatprep.subr.bf16.mxu1 %v12124_v2  ;;  %4228 = vmatprep.subr.bf16.mxu0 %v12125_v48 }
 0x8c9   :  { %4188 = vmatpush1.bf16.msra.mxu1 %v12126_v54  ;;  %4229 = vmatpush1.bf16.msra.mxu0 %v12215_v9 }
 0x8ca   :  { %4189 = vmatprep.subr.bf16.mxu1 %v12216_v31  ;;  %4230 = vmatprep.subr.bf16.mxu0 %v12217_v36 }
 0x8cd   :  { %4190 = vmatpush1.bf16.msra.mxu1 %v12218_v51  ;;  %4231 = vmatpush1.bf16.msra.mxu0 %v12219_v23 }
 0x8ce   :  { %4191 = vmatprep.subr.bf16.mxu1 %v12220_v58  ;;  %4232 = vmatprep.subr.bf16.mxu0 %v12221_v37 }
 0x8d1   :  { %4192 = vmatpush1.bf16.msra.mxu1 %v12222_v61  ;;  %4233 = vmatpush1.bf16.msra.mxu0 %v12223_v38 }
 0x8d2   :  { %4193 = vmatprep.subr.bf16.mxu1 %v12312_v29  ;;  %4234 = vmatprep.subr.bf16.mxu0 %v12313_v44 }
 0x8d5   :  { %4194 = vmatpush1.bf16.msra.mxu1 %v12314_v49  ;;  %4235 = vmatpush1.bf16.msra.mxu0 %v12315_v12 }
 0x8d6   :  { %4195 = vmatprep.subr.bf16.mxu1 %v12316_v56  ;;  %4236 = vmatprep.subr.bf16.mxu0 %v12317_v20 }
 0x8d9   :  { %4196 = vmatpush1.bf16.msra.mxu1 %v12318_v60  ;;  %4237 = vmatpush1.bf16.msra.mxu0 %v12319_v8 }
 0x8da   :  { %4197 = vmatprep.subr.bf16.mxu1 %v12232_v47  ;;  %4238 = vmatprep.subr.bf16.mxu0 %v12233_v35 }
 0x8dd   :  { %4198 = vmatpush1.bf16.msra.mxu1 %v12234_v34  ;;  %4239 = vmatpush1.bf16.msra.mxu0 %v12320_v39 }
 0x8de   :  { %4199 = vmatprep.subr.bf16.mxu1 %v12321_v21  ;;  %4240 = vmatprep.subr.bf16.mxu0 %v12237_v18 }
 0x8e1   :  { %4200 = vmatpush2.bf16.msra.mxu1 %v12238_v41  ;;  %4241 = vmatpush2.bf16.msra.mxu0 %v12239_v43 }
 0x8e2   :  { %4201 = vmatprep.subr.bf16.mxu1 %v12240_v30  ;;  %4242 = vmatprep.subr.bf16.mxu0 %v12241_v16 }
 0x8e5   :  { %4202 = vmatpush2.bf16.msra.mxu1 %v12242_v3  ;;  %4243 = vmatpush2.bf16.msra.mxu0 %v12411_v53  ;;  %v12505_v53 = vld [vmem:[#allocation106_spill] sm:$0xff] }
 0x8e6   :  { %4203 = vmatprep.subr.bf16.mxu1 %v12412_v28  ;;  %4244 = vmatprep.subr.bf16.mxu0 %v12413_v19  ;;  %v12504_v19 = vld [vmem:[#allocation104_spill] sm:$0xff] }
 0x8e9   :  { %4204 = vmatpush2.bf16.msra.mxu1 %v12414_v45  ;;  %4245 = vmatpush2.bf16.msra.mxu0 %v12415_v27  ;;  %v12503_v27 = vld [vmem:[#allocation105_spill] sm:$0xff] }
 0x8ea   :  { %4205 = vmatprep.subr.bf16.mxu1 %v12416_v7  ;;  %4246 = vmatprep.subr.bf16.mxu0 %v12417_v10  ;;  %v12502_v7 = vld [vmem:[#allocation103_spill] sm:$0xff] }
 0x8ed   :  { %4206 = vmatpush2.bf16.msra.mxu1 %v12418_v46  ;;  %4247 = vmatpush2.bf16.msra.mxu0 %v12419_v57 }
 0x8ee   :  { %4207 = vmatprep.subr.bf16.mxu1 %v12420_v33  ;;  %4248 = vmatprep.subr.bf16.mxu0 %v12421_v5  ;;  %v12431_v33 = vld [vmem:[#allocation176_spill] sm:$0xff]  ;;  %v12432_v5 = vld [vmem:[#allocation177_spill] sm:$0xff] }
 0x8f1   :  { %4208 = vmatpush2.bf16.msra.mxu1 %v12422_v13  ;;  %4249 = vmatpush2.bf16.msra.mxu0 %v12423_v1  ;;  %v12433_v13 = vld [vmem:[#allocation178_spill] sm:$0xff]  ;;  %v12434_v1 = vld [vmem:[#allocation179_spill] sm:$0xff] }
 0x8f2   :  { %4209 = vmatprep.subr.bf16.mxu1 %v12424_v6  ;;  %4250 = vmatprep.subr.bf16.mxu0 %v12425_v0  ;;  %v12435_v6 = vld [vmem:[#allocation180_spill] sm:$0xff]  ;;  %v12436_v0 = vld [vmem:[#allocation27_spill] sm:$0xff] }
 0x8f5   :  { %4210 = vmatpush2.bf16.msra.mxu1 %v12426_v32  ;;  %4251 = vmatpush2.bf16.msra.mxu0 %v12427_v52  ;;  %v12437_v32 = vld [vmem:[#allocation28_spill] sm:$0xff] }
 0x8f6   :  { %4211 = vmatprep.subr.bf16.mxu1 %v12428_v40  ;;  %4252 = vmatprep.subr.bf16.mxu0 %v12429_v62  ;;  %v12438_v62 = vld [vmem:[#allocation29_spill] sm:$0xff]  ;;  %v12447_v40 = vld [vmem:[#allocation38_spill] sm:$0xff] }
 0x8f9   :  { %4212 = vmatpush2.bf16.msra.mxu1 %v12430_v42  ;;  %4253 = vmatpush2.bf16.msra.mxu0 %v12431_v33  ;;  %v12439_v42 = vld [vmem:[#allocation30_spill] sm:$0xff]  ;;  %v12440_v33 = vld [vmem:[#allocation31_spill] sm:$0xff] }
 0x8fa   :  { %4213 = vmatprep.subr.bf16.mxu1 %v12432_v5  ;;  %4254 = vmatprep.subr.bf16.mxu0 %v12433_v13  ;;  %v12441_v5 = vld [vmem:[#allocation32_spill] sm:$0xff]  ;;  %v12442_v13 = vld [vmem:[#allocation33_spill] sm:$0xff] }
 0x8fd   :  { %4214 = vmatpush2.bf16.msra.mxu1 %v12434_v1  ;;  %4255 = vmatpush2.bf16.msra.mxu0 %v12435_v6  ;;  %v12443_v1 = vld [vmem:[#allocation34_spill] sm:$0xff]  ;;  %v12444_v6 = vld [vmem:[#allocation35_spill] sm:$0xff] }
 0x8fe   :  { %4367 = vmatprep.subr.bf16.mxu1 %v12436_v0  ;;  %4408 = vmatprep.subr.bf16.mxu0 %v12437_v32  ;;  %v12445_v0 = vld [vmem:[#allocation36_spill] sm:$0xff]  ;;  %v12446_v32 = vld [vmem:[#allocation37_spill] sm:$0xff] }
 0x900   :  { %4216 = vmatmul.mubr.bf16.vlgmr.msra.gmra.mxu1 %v10917_v22  ;;  %4257 = vmatmul.mubr.bf16.vlgmr.msra.gmra.mxu0 %v10917_v22  ;;  %v12448_v22 = vld [vmem:[#allocation39_spill] sm:$0xff] }
 0x901   :  { %4368 = vmatpush1.bf16.msra.mxu1 %v12438_v62  ;;  %4409 = vmatpush1.bf16.msra.mxu0 %v12439_v42  ;;  %v12449_v62 = vld [vmem:[#allocation40_spill] sm:$0xff]  ;;  %v12450_v42 = vld [vmem:[#allocation41_spill] sm:$0xff] }
 0x902   :  { %4369 = vmatprep.subr.bf16.mxu1 %v12440_v33  ;;  %4410 = vmatprep.subr.bf16.mxu0 %v12441_v5  ;;  %v12451_v33 = vld [vmem:[#allocation42_spill] sm:$0xff]  ;;  %v12452_v5 = vld [vmem:[#allocation43_spill] sm:$0xff] }
 0x905   :  { %4370 = vmatpush1.bf16.msra.mxu1 %v12442_v13  ;;  %4411 = vmatpush1.bf16.msra.mxu0 %v12443_v1  ;;  %v12453_v13 = vld [vmem:[#allocation44_spill] sm:$0xff]  ;;  %v12454_v1 = vld [vmem:[#allocation45_spill] sm:$0xff] }
 0x906   :  { %4371 = vmatprep.subr.bf16.mxu1 %v12444_v6  ;;  %4412 = vmatprep.subr.bf16.mxu0 %v12445_v0  ;;  %v12455_v6 = vld [vmem:[#allocation46_spill] sm:$0xff]  ;;  %v12456_v0 = vld [vmem:[#allocation47_spill] sm:$0xff] }
 0x909   :  { %4372 = vmatpush1.bf16.msra.mxu1 %v12446_v32  ;;  %4413 = vmatpush1.bf16.msra.mxu0 %v12447_v40  ;;  %v12457_v32 = vld [vmem:[#allocation48_spill] sm:$0xff]  ;;  %v12458_v40 = vld [vmem:[#allocation49_spill] sm:$0xff] }
 0x90a   :  { %4373 = vmatprep.subr.bf16.mxu1 %v12448_v22  ;;  %4414 = vmatprep.subr.bf16.mxu0 %v12449_v62  ;;  %v12459_v22 = vld [vmem:[#allocation50_spill] sm:$0xff]  ;;  %v12460_v62 = vld [vmem:[#allocation51_spill] sm:$0xff] }
 0x90d   :  { %4374 = vmatpush1.bf16.msra.mxu1 %v12450_v42  ;;  %4415 = vmatpush1.bf16.msra.mxu0 %v12451_v33  ;;  %v12461_v42 = vld [vmem:[#allocation52_spill] sm:$0xff]  ;;  %v12462_v33 = vld [vmem:[#allocation53_spill] sm:$0xff] }
 0x90e   :  { %4375 = vmatprep.subr.bf16.mxu1 %v12452_v5  ;;  %4416 = vmatprep.subr.bf16.mxu0 %v12453_v13  ;;  %v12463_v5 = vld [vmem:[#allocation54_spill] sm:$0xff]  ;;  %v12464_v13 = vld [vmem:[#allocation55_spill] sm:$0xff] }
 0x911   :  { %4376 = vmatpush1.bf16.msra.mxu1 %v12454_v1  ;;  %4417 = vmatpush1.bf16.msra.mxu0 %v12455_v6  ;;  %v12465_v1 = vld [vmem:[#allocation57_spill] sm:$0xff]  ;;  %v12466_v6 = vld [vmem:[#allocation56_spill] sm:$0xff] }
 0x912   :  { %4377 = vmatprep.subr.bf16.mxu1 %v12456_v0  ;;  %4418 = vmatprep.subr.bf16.mxu0 %v12457_v32  ;;  %v12467_v0 = vld [vmem:[#allocation58_spill] sm:$0xff]  ;;  %v12468_v32 = vld [vmem:[#allocation59_spill] sm:$0xff] }
 0x915   :  { %4378 = vmatpush1.bf16.msra.mxu1 %v12458_v40  ;;  %4419 = vmatpush1.bf16.msra.mxu0 %v12459_v22  ;;  %v12469_v40 = vld [vmem:[#allocation60_spill] sm:$0xff]  ;;  %v12470_v22 = vld [vmem:[#allocation61_spill] sm:$0xff] }
 0x916   :  { %4379 = vmatprep.subr.bf16.mxu1 %v12460_v62  ;;  %4420 = vmatprep.subr.bf16.mxu0 %v12461_v42  ;;  %v12471_v62 = vld [vmem:[#allocation62_spill] sm:$0xff]  ;;  %v12472_v42 = vld [vmem:[#allocation63_spill] sm:$0xff] }
 0x919   :  { %4380 = vmatpush1.bf16.msra.mxu1 %v12462_v33  ;;  %4421 = vmatpush1.bf16.msra.mxu0 %v12463_v5  ;;  %v12473_v33 = vld [vmem:[#allocation64_spill] sm:$0xff]  ;;  %v12474_v5 = vld [vmem:[#allocation65_spill] sm:$0xff] }
 0x91a   :  { %4381 = vmatprep.subr.bf16.mxu1 %v12464_v13  ;;  %4422 = vmatprep.subr.bf16.mxu0 %v12465_v1  ;;  %v12475_v13 = vld [vmem:[#allocation66_spill] sm:$0xff]  ;;  %v12476_v1 = vld [vmem:[#allocation67_spill] sm:$0xff] }
 0x91d   :  { %4382 = vmatpush1.bf16.msra.mxu1 %v12466_v6  ;;  %4423 = vmatpush1.bf16.msra.mxu0 %v12467_v0  ;;  %v12477_v6 = vld [vmem:[#allocation68_spill] sm:$0xff]  ;;  %v12478_v0 = vld [vmem:[#allocation69_spill] sm:$0xff] }
 0x91e   :  { %4383 = vmatprep.subr.bf16.mxu1 %v12468_v32  ;;  %4424 = vmatprep.subr.bf16.mxu0 %v12469_v40  ;;  %v12479_v32 = vld [vmem:[#allocation70_spill] sm:$0xff]  ;;  %v12480_v40 = vld [vmem:[#allocation71_spill] sm:$0xff] }
 0x921   :  { %4384 = vmatpush2.bf16.msra.mxu1 %v12470_v22  ;;  %4425 = vmatpush2.bf16.msra.mxu0 %v12471_v62  ;;  %v12481_v22 = vld [vmem:[#allocation72_spill] sm:$0xff]  ;;  %v12482_v62 = vld [vmem:[#allocation73_spill] sm:$0xff] }
 0x922   :  { %4385 = vmatprep.subr.bf16.mxu1 %v12472_v42  ;;  %4426 = vmatprep.subr.bf16.mxu0 %v12473_v33  ;;  %v12483_v42 = vld [vmem:[#allocation74_spill] sm:$0xff]  ;;  %v12484_v33 = vld [vmem:[#allocation75_spill] sm:$0xff] }
 0x925   :  { %4386 = vmatpush2.bf16.msra.mxu1 %v12474_v5  ;;  %4427 = vmatpush2.bf16.msra.mxu0 %v12475_v13  ;;  %v12485_v5 = vld [vmem:[#allocation76_spill] sm:$0xff]  ;;  %v12486_v13 = vld [vmem:[#allocation77_spill] sm:$0xff] }
 0x926   :  { %4387 = vmatprep.subr.bf16.mxu1 %v12476_v1  ;;  %4428 = vmatprep.subr.bf16.mxu0 %v12477_v6  ;;  %v12487_v1 = vld [vmem:[#allocation78_spill] sm:$0xff]  ;;  %v12488_v6 = vld [vmem:[#allocation79_spill] sm:$0xff] }
 0x929   :  { %4388 = vmatpush2.bf16.msra.mxu1 %v12478_v0  ;;  %4429 = vmatpush2.bf16.msra.mxu0 %v12479_v32  ;;  %v12489_v0 = vld [vmem:[#allocation80_spill] sm:$0xff]  ;;  %v12490_v32 = vld [vmem:[#allocation81_spill] sm:$0xff] }
 0x92a   :  { %4389 = vmatprep.subr.bf16.mxu1 %v12480_v40  ;;  %4430 = vmatprep.subr.bf16.mxu0 %v12481_v22  ;;  %v12491_v40 = vld [vmem:[#allocation82_spill] sm:$0xff]  ;;  %v12492_v22 = vld [vmem:[#allocation83_spill] sm:$0xff] }
 0x92d   :  { %4390 = vmatpush2.bf16.msra.mxu1 %v12482_v62  ;;  %4431 = vmatpush2.bf16.msra.mxu0 %v12483_v42  ;;  %v12493_v62 = vld [vmem:[#allocation84_spill] sm:$0xff]  ;;  %v12494_v42 = vld [vmem:[#allocation85_spill] sm:$0xff] }
 0x92e   :  { %4391 = vmatprep.subr.bf16.mxu1 %v12484_v33  ;;  %4432 = vmatprep.subr.bf16.mxu0 %v12485_v5  ;;  %v12495_v33 = vld [vmem:[#allocation86_spill] sm:$0xff]  ;;  %v12496_v5 = vld [vmem:[#allocation87_spill] sm:$0xff] }
 0x931   :  { %4392 = vmatpush2.bf16.msra.mxu1 %v12486_v13  ;;  %4433 = vmatpush2.bf16.msra.mxu0 %v12487_v1  ;;  %v12497_v13 = vld [vmem:[#allocation88_spill] sm:$0xff]  ;;  %v12498_v1 = vld [vmem:[#allocation89_spill] sm:$0xff] }
 0x932   :  { %4393 = vmatprep.subr.bf16.mxu1 %v12488_v6  ;;  %4434 = vmatprep.subr.bf16.mxu0 %v12489_v0  ;;  %v12499_v6 = vld [vmem:[#allocation90_spill] sm:$0xff]  ;;  %v12500_v0 = vld [vmem:[#allocation91_spill] sm:$0xff] }
 0x935   :  { %4394 = vmatpush2.bf16.msra.mxu1 %v12490_v32  ;;  %4435 = vmatpush2.bf16.msra.mxu0 %v12491_v40  ;;  %v12501_v32 = vld [vmem:[#allocation92_spill] sm:$0xff] }
 0x936   :  { %4395 = vmatprep.subr.bf16.mxu1 %v12492_v22  ;;  %4436 = vmatprep.subr.bf16.mxu0 %v12493_v62 }
 0x939   :  { %4396 = vmatpush2.bf16.msra.mxu1 %v12494_v42  ;;  %4437 = vmatpush2.bf16.msra.mxu0 %v12495_v33 }
 0x93a   :  { %4397 = vmatprep.subr.bf16.mxu1 %v12496_v5  ;;  %4438 = vmatprep.subr.bf16.mxu0 %v12497_v13 }
 0x93d   :  { %4398 = vmatpush2.bf16.msra.mxu1 %v12498_v1  ;;  %4439 = vmatpush2.bf16.msra.mxu0 %v12499_v6 }
 0x93e   :  { %4449 = vmatprep.subr.bf16.mxu1 %v12500_v0  ;;  %4490 = vmatprep.subr.bf16.mxu0 %v12501_v32 }
 0x980   :  { %v4135_v40 = vpop.f32.mrf.mxu1  ;;  %v4176_v22 = vpop.f32.mrf.mxu0 }
 0x981   :  { %v4267_v10 = vrot.slane %v4135_v40, 4  ;;  %v4287_v0 = vrot.slane %v4176_v22, 4 }
 0x982   :  { %v4137_v52 = vpop.f32.mrf.mxu1  ;;  %v4178_v62 = vpop.f32.mrf.mxu0 }
 0x983   :  { %v4268_v5 = vrot.slane %v4137_v52, 4  ;;  %v4271_v13 = vadd.f32 %v4267_v10, %v12502_v7  ;;  %v4288_v32 = vrot.slane %v4178_v62, 4  ;;  %v4291_v28 = vadd.f32 %v4287_v0, %v12504_v19 }
 0x984   :  { %v4139_v57 = vpop.f32.mrf.mxu1  ;;  %v4180_v42 = vpop.f32.mrf.mxu0 }
 0x985   :  { %v4272_v1 = vadd.f32 %v4268_v5, %v12503_v27  ;;  %v8060_v45 = vmul.f32 -1.442695, %v4271_v13  ;;  %v4292_v3 = vadd.f32 %v4288_v32, %v12505_v53  ;;  %v8062_v57 = vmul.f32 -1.442695, %v4291_v28 }
 0x986   :  { %v4140_v46 = vpop.f32.mrf.mxu1  ;;  %v4181_v33 = vpop.f32.mrf.mxu0 }
 0x987   :  { %v8061_v6 = vmul.f32 -1.442695, %v4272_v1  ;;  %9238 = vpow2.f32 %v8060_v45  ;;  %v8063_v42 = vmul.f32 -1.442695, %v4292_v3 }
 0x989   :  { %9240 = vpow2.f32 %v8061_v6  ;;  %v12506_v6 = vld [vmem:[#allocation111_spill] sm:$0xff] }
 0x98a   :  { %9242 = vpow2.f32 %v8062_v57 }
 0x98b   :  { %9244 = vpow2.f32 %v8063_v42 }
 0x994   :  { %v9239_v46 = vpop.eup %9238 }
 0x995   :  { %v4279_v52 = vadd.f32 1.0, %v9239_v46 }
 0x996   :  { %v9241_v33 = vpop.eup %9240 }
 0x997   :  { %v4280_v7 = vadd.f32 1.0, %v9241_v33  ;;  %9246 = vrcp.f32 %v4279_v52  ;;  %v9243_v27 = vpop.eup %9242 }
 0x998   :  { %v9245_v10 = vpop.eup %9244  ;;  %v4299_v13 = vadd.f32 1.0, %v9243_v27 }
 0x999   :  { %9248 = vrcp.f32 %v4280_v7  ;;  %v4300_v28 = vadd.f32 1.0, %v9245_v10 }
 0x99a   :  { %9250 = vrcp.f32 %v4299_v13 }
 0x99b   :  { %9252 = vrcp.f32 %v4300_v28 }
 0x9a4   :  { %v9247_v62 = vpop.eup %9246 }
 0x9a6   :  { %v9249_v52 = vpop.eup %9248 }
 0x9c0   :  { %v4217_v45 = vpop.f32.mrf.mxu1  ;;  %v4258_v5 = vpop.f32.mrf.mxu0 }
 0x9c1   :  { %v4307_v1 = vrot.slane %v4217_v45, 4  ;;  %v4313_v19 = vadd.f32 %v4258_v5, %v12506_v6 }
 0x9c2   :  { %v4219_v0 = vpop.f32.mrf.mxu1  ;;  %v4260_v53 = vpop.f32.mrf.mxu0 }
 0x9c3   :  { %v4317_v3 = vrot.slane %v4313_v19, 4  ;;  %v4308_v32 = vrot.slane %v4219_v0, 4  ;;  %v4314_v40 = vadd.f32 %v4260_v53, %v10095_v15  ;;  %v4311_v42 = vadd.f32 %v4307_v1, %v12408_v26  ;;  %v9251_v0 = vpop.eup %9250 }
 0x9c4   :  { %v4221_v22 = vpop.f32.mrf.mxu1  ;;  %v4262_v57 = vpop.f32.mrf.mxu0  ;;  %v4337_v13 = vsub.f32 1.0, %v9251_v0  ;;  %v4344_v26 = vrot.slane %v10911_v17, 4 }
 0x9c5   :  { %v4321_v46 = vmul.f32 %v9247_v62, %v4317_v3  ;;  %v4318_v33 = vrot.slane %v4314_v40, 4  ;;  %v4312_v5 = vadd.f32 %v4308_v32, %v12409_v63  ;;  %v9253_v53 = vpop.eup %9252  ;;  %v4343_v22 = vrot.slane %v10909_v25, 4  ;;  %v11061_v63 = vpop.permute.xlu1 %4332 }
 0x9c6   :  { %v4222_v7 = vpop.f32.mrf.mxu1  ;;  %v4263_v27 = vpop.f32.mrf.mxu0  ;;  %v4338_v1 = vsub.f32 1.0, %v9253_v53 }
 0x9c7   :  { %v4323_v45 = vadd.f32 %v4321_v46, %v4311_v42  ;;  %v4322_v10 = vmul.f32 %v9249_v52, %v4318_v33  ;;  %v4347_v40 = vmul.f32 %v9251_v0, %v4343_v22  ;;  %v4348_v42 = vmul.f32 %v9253_v53, %v4344_v26  ;;  %v12512_v26 = vld [vmem:[#allocation159_spill] sm:$0xff] }
 0x9c8   :  { %v11916_v52 = vsub.f32 1.0, %v11061_v63 }
 0x9c9   :  { %9254 = vtanh.f32 %v4323_v45  ;;  %v4324_v19 = vadd.f32 %v4322_v10, %v4312_v5  ;;  %v12507_v10 = vsub.f32 1.0, %v10897_v4 }
 0x9ca   :  { %v4361_v45 = vmul.f32 %v11916_v52, %v10909_v25  ;;  %v12509_v25 = vld [vmem:[#allocation156_spill] sm:$0xff] }
 0x9cb   :  { %9256 = vtanh.f32 %v4324_v19  ;;  %v4362_v19 = vmul.f32 %v10911_v17, %v12507_v10  ;;  %v12510_v17 = vld [vmem:[#allocation157_spill] sm:$0xff]  ;;  %v12529_v52 = vld [vmem:[#allocation176_spill] sm:$0xff] }
 0x9cc   :  { %v12526_v10 = vld [vmem:[#allocation173_spill] sm:$0xff] }
 0x9d6   :  { %v9255_v57 = vpop.eup %9254 }
 0x9d7   :  { %v4339_v3 = vmul.f32 %v9255_v57, %v4337_v13  ;;  %v12511_v57 = vld [vmem:[#allocation158_spill] sm:$0xff] }
 0x9d8   :  { %v9257_v62 = vpop.eup %9256 }
 0x9d9   :  { %v4340_v28 = vmul.f32 %v9257_v62, %v4338_v1  ;;  %v4349_v46 = vadd.f32 %v4347_v40, %v4339_v3  ;;  %v12513_v1 = vld [vmem:[#allocation160_spill] sm:$0xff]  ;;  %v12514_v3 = vld [vmem:[#allocation161_spill] sm:$0xff]  ;;  %v12515_v40 = vld [vmem:[#allocation162_spill] sm:$0xff] }
 0x9da   :  { %v12516_v62 = vld [vmem:[#allocation163_spill] sm:$0xff] }
 0x9db   :  { %v4350_v32 = vadd.f32 %v4348_v42, %v4340_v28  ;;  %v4353_v33 = vrot.slane %v4349_v46, 4  ;;  %v12517_v28 = vld [vmem:[#allocation164_spill] sm:$0xff]  ;;  %v12518_v42 = vld [vmem:[#allocation165_spill] sm:$0xff]  ;;  %v12519_v46 = vld [vmem:[#allocation166_spill] sm:$0xff] }
 0x9dd   :  { %v4354_v7 = vrot.slane %v4350_v32, 4  ;;  %v4357_v27 = vmul.f32 %v4353_v33, %v11061_v63  ;;  %v12520_v32 = vld [vmem:[#allocation167_spill] sm:$0xff]  ;;  %v12521_v33 = vld [vmem:[#allocation168_spill] sm:$0xff] }
 0x9df   :  { %v4358_v5 = vmul.f32 %v4354_v7, %v10897_v4  ;;  %v11072_v0 = vadd.f32 %v4361_v45, %v4357_v27  ;;  %v12508_v4 = vld [vmem:[#allocation155_spill] sm:$0xff]  ;;  %v12522_v7 = vld [vmem:[#allocation169_spill] sm:$0xff]  ;;  %v12523_v27 = vld [vmem:[#allocation170_spill] sm:$0xff] }
 0x9e0   :  { %v12524_v45 = vld [vmem:[#allocation171_spill] sm:$0xff] }
 0x9e1   :  { %v11074_v53 = vadd.f32 %v4362_v19, %v4358_v5  ;;  %v11080_v13 = vpack.c.bf16 %v11072_v0, %v11072_v0  ;;  %v12525_v5 = vld [vmem:[#allocation172_spill] sm:$0xff]  ;;  %v12527_v19 = vld [vmem:[#allocation174_spill] sm:$0xff] }
 0x9e3   :  { %v4366_v22 = vpack.c.bf16 %v11074_v53, %v11074_v53 }
 0x9e5   :  { %4399 = vmatprep.mubr.bf16.mxu1 %v4366_v22  ;;  %4440 = vmatprep.mubr.bf16.mxu0 %v4366_v22 }
 0x9e6   :  { %4400 = vmatmul.mubr.bf16.vlgmr.msra.gmra.mxu1 %v11080_v13  ;;  %4441 = vmatmul.mubr.bf16.vlgmr.msra.gmra.mxu0 %v11080_v13 }
 0x9e7   :  { %4450 = vmatpush1.bf16.msra.mxu1 %v12118_v11  ;;  %4491 = vmatpush1.bf16.msra.mxu0 %v12119_v50 }
 0x9e8   :  { %4481 = vmatprep.mubr.bf16.mxu1 %v4366_v22  ;;  %4522 = vmatprep.mubr.bf16.mxu0 %v4366_v22  ;;  %v12528_v22 = vld [vmem:[#allocation175_spill] sm:$0xff] }
 0x9e9   :  { %4451 = vmatprep.subr.bf16.mxu1 %v12120_v59  ;;  %4492 = vmatprep.subr.bf16.mxu0 %v12121_v24 }
 0x9eb   :  { %4452 = vmatpush1.bf16.msra.mxu1 %v12122_v14  ;;  %4493 = vmatpush1.bf16.msra.mxu0 %v12123_v55 }
 0x9ec   :  { %4453 = vmatprep.subr.bf16.mxu1 %v12124_v2  ;;  %4494 = vmatprep.subr.bf16.mxu0 %v12125_v48 }
 0x9ef   :  { %4454 = vmatpush1.bf16.msra.mxu1 %v12126_v54  ;;  %4495 = vmatpush1.bf16.msra.mxu0 %v12215_v9 }
 0x9f0   :  { %4455 = vmatprep.subr.bf16.mxu1 %v12216_v31  ;;  %4496 = vmatprep.subr.bf16.mxu0 %v12217_v36 }
 0x9f3   :  { %4456 = vmatpush1.bf16.msra.mxu1 %v12218_v51  ;;  %4497 = vmatpush1.bf16.msra.mxu0 %v12219_v23 }
 0x9f4   :  { %4457 = vmatprep.subr.bf16.mxu1 %v12220_v58  ;;  %4498 = vmatprep.subr.bf16.mxu0 %v12221_v37 }
 0x9f7   :  { %4458 = vmatpush1.bf16.msra.mxu1 %v12222_v61  ;;  %4499 = vmatpush1.bf16.msra.mxu0 %v12223_v38 }
 0x9f8   :  { %4459 = vmatprep.subr.bf16.mxu1 %v12312_v29  ;;  %4500 = vmatprep.subr.bf16.mxu0 %v12313_v44 }
 0x9fb   :  { %4460 = vmatpush1.bf16.msra.mxu1 %v12314_v49  ;;  %4501 = vmatpush1.bf16.msra.mxu0 %v12315_v12 }
 0x9fc   :  { %4461 = vmatprep.subr.bf16.mxu1 %v12316_v56  ;;  %4502 = vmatprep.subr.bf16.mxu0 %v12317_v20 }
 0x9ff   :  { %4462 = vmatpush1.bf16.msra.mxu1 %v12318_v60  ;;  %4503 = vmatpush1.bf16.msra.mxu0 %v12319_v8 }
 0xa00   :  { %4463 = vmatprep.subr.bf16.mxu1 %v12232_v47  ;;  %4504 = vmatprep.subr.bf16.mxu0 %v12233_v35 }
 0xa03   :  { %4464 = vmatpush1.bf16.msra.mxu1 %v12234_v34  ;;  %4505 = vmatpush1.bf16.msra.mxu0 %v12320_v39 }
 0xa04   :  { %4465 = vmatprep.subr.bf16.mxu1 %v12321_v21  ;;  %4506 = vmatprep.subr.bf16.mxu0 %v12237_v18 }
 0xa07   :  { %4466 = vmatpush2.bf16.msra.mxu1 %v12238_v41  ;;  %4507 = vmatpush2.bf16.msra.mxu0 %v12239_v43 }
 0xa08   :  { %4467 = vmatprep.subr.bf16.mxu1 %v12240_v30  ;;  %4508 = vmatprep.subr.bf16.mxu0 %v12241_v16 }
 0xa0b   :  { %4468 = vmatpush2.bf16.msra.mxu1 %v12508_v4  ;;  %4509 = vmatpush2.bf16.msra.mxu0 %v12509_v25 }
 0xa0c   :  { %4469 = vmatprep.subr.bf16.mxu1 %v12510_v17  ;;  %4510 = vmatprep.subr.bf16.mxu0 %v12511_v57 }
 0xa0f   :  { %4470 = vmatpush2.bf16.msra.mxu1 %v12512_v26  ;;  %4511 = vmatpush2.bf16.msra.mxu0 %v12513_v1 }
 0xa10   :  { %4471 = vmatprep.subr.bf16.mxu1 %v12514_v3  ;;  %4512 = vmatprep.subr.bf16.mxu0 %v12515_v40  ;;  %v12601_v40 = vld [vmem:[#allocation109_spill] sm:$0xff] }
 0xa13   :  { %4472 = vmatpush2.bf16.msra.mxu1 %v12516_v62  ;;  %4513 = vmatpush2.bf16.msra.mxu0 %v12517_v28  ;;  %v12600_v62 = vld [vmem:[#allocation107_spill] sm:$0xff] }
 0xa14   :  { %4473 = vmatprep.subr.bf16.mxu1 %v12518_v42  ;;  %4514 = vmatprep.subr.bf16.mxu0 %v12519_v46  ;;  %v12530_v46 = vld [vmem:[#allocation177_spill] sm:$0xff] }
 0xa17   :  { %4474 = vmatpush2.bf16.msra.mxu1 %v12520_v32  ;;  %4515 = vmatpush2.bf16.msra.mxu0 %v12521_v33  ;;  %v12531_v32 = vld [vmem:[#allocation178_spill] sm:$0xff]  ;;  %v12532_v33 = vld [vmem:[#allocation179_spill] sm:$0xff] }
 0xa18   :  { %4475 = vmatprep.subr.bf16.mxu1 %v12522_v7  ;;  %4516 = vmatprep.subr.bf16.mxu0 %v12523_v27  ;;  %v12533_v7 = vld [vmem:[#allocation180_spill] sm:$0xff]  ;;  %v12534_v27 = vld [vmem:[#allocation27_spill] sm:$0xff] }
 0xa1b   :  { %4476 = vmatpush2.bf16.msra.mxu1 %v12524_v45  ;;  %4517 = vmatpush2.bf16.msra.mxu0 %v12525_v5  ;;  %v12535_v45 = vld [vmem:[#allocation28_spill] sm:$0xff] }
 0xa1c   :  { %4477 = vmatprep.subr.bf16.mxu1 %v12526_v10  ;;  %4518 = vmatprep.subr.bf16.mxu0 %v12527_v19  ;;  %v12536_v19 = vld [vmem:[#allocation29_spill] sm:$0xff]  ;;  %v12545_v10 = vld [vmem:[#allocation38_spill] sm:$0xff] }
 0xa1f   :  { %4478 = vmatpush2.bf16.msra.mxu1 %v12528_v22  ;;  %4519 = vmatpush2.bf16.msra.mxu0 %v12529_v52  ;;  %v12537_v22 = vld [vmem:[#allocation30_spill] sm:$0xff]  ;;  %v12538_v52 = vld [vmem:[#allocation31_spill] sm:$0xff] }
 0xa20   :  { %4479 = vmatprep.subr.bf16.mxu1 %v12530_v46  ;;  %4520 = vmatprep.subr.bf16.mxu0 %v12531_v32  ;;  %v12539_v46 = vld [vmem:[#allocation32_spill] sm:$0xff]  ;;  %v12540_v32 = vld [vmem:[#allocation33_spill] sm:$0xff] }
 0xa23   :  { %4480 = vmatpush2.bf16.msra.mxu1 %v12532_v33  ;;  %4521 = vmatpush2.bf16.msra.mxu0 %v12533_v7  ;;  %v12541_v33 = vld [vmem:[#allocation34_spill] sm:$0xff]  ;;  %v12542_v7 = vld [vmem:[#allocation35_spill] sm:$0xff] }
 0xa24   :  { %4597 = vmatprep.subr.bf16.mxu1 %v12534_v27  ;;  %4638 = vmatprep.subr.bf16.mxu0 %v12535_v45  ;;  %v12543_v27 = vld [vmem:[#allocation36_spill] sm:$0xff]  ;;  %v12544_v45 = vld [vmem:[#allocation37_spill] sm:$0xff] }
 0xa26   :  { %4482 = vmatmul.mubr.bf16.vlgmr.msra.gmra.mxu1 %v11080_v13  ;;  %4523 = vmatmul.mubr.bf16.vlgmr.msra.gmra.mxu0 %v11080_v13  ;;  %v12546_v13 = vld [vmem:[#allocation39_spill] sm:$0xff] }
 0xa27   :  { %4598 = vmatpush1.bf16.msra.mxu1 %v12536_v19  ;;  %4639 = vmatpush1.bf16.msra.mxu0 %v12537_v22  ;;  %v12547_v19 = vld [vmem:[#allocation40_spill] sm:$0xff]  ;;  %v12548_v22 = vld [vmem:[#allocation41_spill] sm:$0xff] }
 0xa28   :  { %4599 = vmatprep.subr.bf16.mxu1 %v12538_v52  ;;  %4640 = vmatprep.subr.bf16.mxu0 %v12539_v46  ;;  %v12549_v52 = vld [vmem:[#allocation42_spill] sm:$0xff]  ;;  %v12550_v46 = vld [vmem:[#allocation43_spill] sm:$0xff] }
 0xa2b   :  { %4600 = vmatpush1.bf16.msra.mxu1 %v12540_v32  ;;  %4641 = vmatpush1.bf16.msra.mxu0 %v12541_v33  ;;  %v12551_v32 = vld [vmem:[#allocation44_spill] sm:$0xff]  ;;  %v12552_v33 = vld [vmem:[#allocation45_spill] sm:$0xff] }
 0xa2c   :  { %4601 = vmatprep.subr.bf16.mxu1 %v12542_v7  ;;  %4642 = vmatprep.subr.bf16.mxu0 %v12543_v27  ;;  %v12553_v7 = vld [vmem:[#allocation46_spill] sm:$0xff]  ;;  %v12554_v27 = vld [vmem:[#allocation47_spill] sm:$0xff] }
 0xa2f   :  { %4602 = vmatpush1.bf16.msra.mxu1 %v12544_v45  ;;  %4643 = vmatpush1.bf16.msra.mxu0 %v12545_v10  ;;  %v12555_v45 = vld [vmem:[#allocation48_spill] sm:$0xff]  ;;  %v12556_v10 = vld [vmem:[#allocation49_spill] sm:$0xff] }
 0xa30   :  { %4603 = vmatprep.subr.bf16.mxu1 %v12546_v13  ;;  %4644 = vmatprep.subr.bf16.mxu0 %v12547_v19  ;;  %v12557_v13 = vld [vmem:[#allocation50_spill] sm:$0xff]  ;;  %v12558_v19 = vld [vmem:[#allocation51_spill] sm:$0xff] }
 0xa33   :  { %4604 = vmatpush1.bf16.msra.mxu1 %v12548_v22  ;;  %4645 = vmatpush1.bf16.msra.mxu0 %v12549_v52  ;;  %v12559_v22 = vld [vmem:[#allocation52_spill] sm:$0xff]  ;;  %v12560_v52 = vld [vmem:[#allocation53_spill] sm:$0xff] }
 0xa34   :  { %4605 = vmatprep.subr.bf16.mxu1 %v12550_v46  ;;  %4646 = vmatprep.subr.bf16.mxu0 %v12551_v32  ;;  %v12561_v46 = vld [vmem:[#allocation54_spill] sm:$0xff]  ;;  %v12562_v32 = vld [vmem:[#allocation55_spill] sm:$0xff] }
 0xa37   :  { %4606 = vmatpush1.bf16.msra.mxu1 %v12552_v33  ;;  %4647 = vmatpush1.bf16.msra.mxu0 %v12553_v7  ;;  %v12563_v33 = vld [vmem:[#allocation57_spill] sm:$0xff]  ;;  %v12564_v7 = vld [vmem:[#allocation56_spill] sm:$0xff] }
 0xa38   :  { %4607 = vmatprep.subr.bf16.mxu1 %v12554_v27  ;;  %4648 = vmatprep.subr.bf16.mxu0 %v12555_v45  ;;  %v12565_v27 = vld [vmem:[#allocation58_spill] sm:$0xff]  ;;  %v12566_v45 = vld [vmem:[#allocation59_spill] sm:$0xff] }
 0xa3b   :  { %4608 = vmatpush1.bf16.msra.mxu1 %v12556_v10  ;;  %4649 = vmatpush1.bf16.msra.mxu0 %v12557_v13  ;;  %v12567_v10 = vld [vmem:[#allocation60_spill] sm:$0xff]  ;;  %v12568_v13 = vld [vmem:[#allocation61_spill] sm:$0xff] }
 0xa3c   :  { %4609 = vmatprep.subr.bf16.mxu1 %v12558_v19  ;;  %4650 = vmatprep.subr.bf16.mxu0 %v12559_v22  ;;  %v12569_v19 = vld [vmem:[#allocation62_spill] sm:$0xff]  ;;  %v12570_v22 = vld [vmem:[#allocation63_spill] sm:$0xff] }
 0xa3f   :  { %4610 = vmatpush1.bf16.msra.mxu1 %v12560_v52  ;;  %4651 = vmatpush1.bf16.msra.mxu0 %v12561_v46  ;;  %v12571_v52 = vld [vmem:[#allocation64_spill] sm:$0xff]  ;;  %v12572_v46 = vld [vmem:[#allocation65_spill] sm:$0xff] }
 0xa40   :  { %4611 = vmatprep.subr.bf16.mxu1 %v12562_v32  ;;  %4652 = vmatprep.subr.bf16.mxu0 %v12563_v33  ;;  %v12573_v32 = vld [vmem:[#allocation66_spill] sm:$0xff]  ;;  %v12574_v33 = vld [vmem:[#allocation67_spill] sm:$0xff] }
 0xa43   :  { %4612 = vmatpush1.bf16.msra.mxu1 %v12564_v7  ;;  %4653 = vmatpush1.bf16.msra.mxu0 %v12565_v27  ;;  %v12575_v7 = vld [vmem:[#allocation68_spill] sm:$0xff]  ;;  %v12576_v27 = vld [vmem:[#allocation69_spill] sm:$0xff] }
 0xa44   :  { %4613 = vmatprep.subr.bf16.mxu1 %v12566_v45  ;;  %4654 = vmatprep.subr.bf16.mxu0 %v12567_v10  ;;  %v12577_v45 = vld [vmem:[#allocation70_spill] sm:$0xff]  ;;  %v12578_v10 = vld [vmem:[#allocation71_spill] sm:$0xff] }
 0xa47   :  { %4614 = vmatpush2.bf16.msra.mxu1 %v12568_v13  ;;  %4655 = vmatpush2.bf16.msra.mxu0 %v12569_v19  ;;  %v12579_v13 = vld [vmem:[#allocation72_spill] sm:$0xff]  ;;  %v12580_v19 = vld [vmem:[#allocation73_spill] sm:$0xff] }
 0xa48   :  { %4615 = vmatprep.subr.bf16.mxu1 %v12570_v22  ;;  %4656 = vmatprep.subr.bf16.mxu0 %v12571_v52  ;;  %v12581_v22 = vld [vmem:[#allocation74_spill] sm:$0xff]  ;;  %v12582_v52 = vld [vmem:[#allocation75_spill] sm:$0xff] }
 0xa4b   :  { %4616 = vmatpush2.bf16.msra.mxu1 %v12572_v46  ;;  %4657 = vmatpush2.bf16.msra.mxu0 %v12573_v32  ;;  %v12583_v46 = vld [vmem:[#allocation76_spill] sm:$0xff]  ;;  %v12584_v32 = vld [vmem:[#allocation77_spill] sm:$0xff] }
 0xa4c   :  { %4617 = vmatprep.subr.bf16.mxu1 %v12574_v33  ;;  %4658 = vmatprep.subr.bf16.mxu0 %v12575_v7  ;;  %v12585_v33 = vld [vmem:[#allocation78_spill] sm:$0xff]  ;;  %v12586_v7 = vld [vmem:[#allocation79_spill] sm:$0xff] }
 0xa4f   :  { %4618 = vmatpush2.bf16.msra.mxu1 %v12576_v27  ;;  %4659 = vmatpush2.bf16.msra.mxu0 %v12577_v45  ;;  %v12587_v27 = vld [vmem:[#allocation80_spill] sm:$0xff]  ;;  %v12588_v45 = vld [vmem:[#allocation81_spill] sm:$0xff] }
 0xa50   :  { %4619 = vmatprep.subr.bf16.mxu1 %v12578_v10  ;;  %4660 = vmatprep.subr.bf16.mxu0 %v12579_v13  ;;  %v12589_v10 = vld [vmem:[#allocation82_spill] sm:$0xff]  ;;  %v12590_v13 = vld [vmem:[#allocation83_spill] sm:$0xff] }
 0xa53   :  { %4620 = vmatpush2.bf16.msra.mxu1 %v12580_v19  ;;  %4661 = vmatpush2.bf16.msra.mxu0 %v12581_v22  ;;  %v12591_v19 = vld [vmem:[#allocation84_spill] sm:$0xff]  ;;  %v12592_v22 = vld [vmem:[#allocation85_spill] sm:$0xff] }
 0xa54   :  { %4621 = vmatprep.subr.bf16.mxu1 %v12582_v52  ;;  %4662 = vmatprep.subr.bf16.mxu0 %v12583_v46  ;;  %v12593_v52 = vld [vmem:[#allocation86_spill] sm:$0xff]  ;;  %v12594_v46 = vld [vmem:[#allocation87_spill] sm:$0xff] }
 0xa57   :  { %4622 = vmatpush2.bf16.msra.mxu1 %v12584_v32  ;;  %4663 = vmatpush2.bf16.msra.mxu0 %v12585_v33  ;;  %v12595_v32 = vld [vmem:[#allocation88_spill] sm:$0xff]  ;;  %v12596_v33 = vld [vmem:[#allocation89_spill] sm:$0xff] }
 0xa58   :  { %4623 = vmatprep.subr.bf16.mxu1 %v12586_v7  ;;  %4664 = vmatprep.subr.bf16.mxu0 %v12587_v27  ;;  %v12597_v7 = vld [vmem:[#allocation90_spill] sm:$0xff]  ;;  %v12598_v27 = vld [vmem:[#allocation91_spill] sm:$0xff] }
 0xa5b   :  { %4624 = vmatpush2.bf16.msra.mxu1 %v12588_v45  ;;  %4665 = vmatpush2.bf16.msra.mxu0 %v12589_v10  ;;  %v12599_v45 = vld [vmem:[#allocation92_spill] sm:$0xff] }
 0xa5c   :  { %4625 = vmatprep.subr.bf16.mxu1 %v12590_v13  ;;  %4666 = vmatprep.subr.bf16.mxu0 %v12591_v19 }
 0xa5f   :  { %4626 = vmatpush2.bf16.msra.mxu1 %v12592_v22  ;;  %4667 = vmatpush2.bf16.msra.mxu0 %v12593_v52 }
 0xa60   :  { %4627 = vmatprep.subr.bf16.mxu1 %v12594_v46  ;;  %4668 = vmatprep.subr.bf16.mxu0 %v12595_v32 }
 0xa63   :  { %4628 = vmatpush2.bf16.msra.mxu1 %v12596_v33  ;;  %4669 = vmatpush2.bf16.msra.mxu0 %v12597_v7  ;;  %v12602_v7 = vld [vmem:[#allocation98_spill] sm:$0xff] }
 0xa64   :  { %4679 = vmatprep.subr.bf16.mxu1 %v12598_v27  ;;  %4720 = vmatprep.subr.bf16.mxu0 %v12599_v45  ;;  %v12603_v27 = vld [vmem:[#allocation181_spill] sm:$0xff]  ;;  %v12605_v45 = vld [vmem:[#allocation108_spill] sm:$0xff] }
 0xa65   :  { %v11218_v1 = vadd.f32 %v12603_v27, %v12602_v7 }
 0xa67   :  { %12604 = vst [vmem:[#allocation96_spill] sm:$0xff] %v11218_v1 }
 0xaa6   :  { %v4401_v10 = vpop.f32.mrf.mxu1  ;;  %v4442_v13 = vpop.f32.mrf.mxu0 }
 0xaa7   :  { %v4531_v46 = vadd.f32 %v4401_v10, %v12600_v62  ;;  %v4545_v26 = vadd.f32 %v4442_v13, %v12605_v45 }
 0xaa8   :  { %v4403_v5 = vpop.f32.mrf.mxu1  ;;  %v4444_v19 = vpop.f32.mrf.mxu0 }
 0xaa9   :  { %v4532_v32 = vadd.f32 %v4403_v5, %v12601_v40  ;;  %v8065_v3 = vmul.f32 -1.442695, %v4531_v46  ;;  %v4546_v57 = vadd.f32 %v4444_v19, %v11218_v1  ;;  %v12606_v19 = vld [vmem:[#allocation112_spill] sm:$0xff] }
 0xaaa   :  { %v4405_v42 = vpop.f32.mrf.mxu1  ;;  %v4446_v22 = vpop.f32.mrf.mxu0 }
 0xaab   :  { %v8066_v33 = vmul.f32 -1.442695, %v4532_v32  ;;  %9258 = vpow2.f32 %v8065_v3  ;;  %v8067_v42 = vmul.f32 -1.442695, %v4545_v26  ;;  %v8068_v22 = vmul.f32 -1.442695, %v4546_v57 }
 0xaac   :  { %v4406_v28 = vpop.f32.mrf.mxu1  ;;  %v4447_v52 = vpop.f32.mrf.mxu0  ;;  %v12607_v26 = vld [vmem:[#allocation182_spill] sm:$0xff] }
 0xaad   :  { %9260 = vpow2.f32 %v8066_v33  ;;  %v11225_v57 = vadd.f32 %v12607_v26, %v12606_v19 }
 0xaae   :  { %9262 = vpow2.f32 %v8067_v42 }
 0xaaf   :  { %9264 = vpow2.f32 %v8068_v22  ;;  %v12608_v22 = vld [vmem:[#allocation118_spill] sm:$0xff] }
 0xab8   :  { %v9259_v28 = vpop.eup %9258 }
 0xab9   :  { %v4539_v10 = vadd.f32 1.0, %v9259_v28 }
 0xaba   :  { %v9261_v52 = vpop.eup %9260 }
 0xabb   :  { %v4540_v5 = vadd.f32 1.0, %v9261_v52  ;;  %9266 = vrcp.f32 %v4539_v10  ;;  %v9263_v3 = vpop.eup %9262 }
 0xabc   :  { %v9265_v46 = vpop.eup %9264  ;;  %v4553_v32 = vadd.f32 1.0, %v9263_v3 }
 0xabd   :  { %9268 = vrcp.f32 %v4540_v5  ;;  %v4554_v27 = vadd.f32 1.0, %v9265_v46 }
 0xabe   :  { %9270 = vrcp.f32 %v4553_v32 }
 0xabf   :  { %9272 = vrcp.f32 %v4554_v27 }
 0xac8   :  { %v9267_v45 = vpop.eup %9266 }
 0xaca   :  { %v9269_v5 = vpop.eup %9268 }
 0xacb   :  { %v9271_v26 = vpop.eup %9270 }
 0xacc   :  { %v9273_v32 = vpop.eup %9272  ;;  %v4579_v25 = vsub.f32 1.0, %v9271_v26 }
 0xae6   :  { %v4483_v33 = vpop.f32.mrf.mxu1  ;;  %v4524_v7 = vpop.f32.mrf.mxu0 }
 0xae7   :  { %v4561_v13 = vadd.f32 %v4524_v7, %v12506_v6  ;;  %v4559_v28 = vadd.f32 %v4483_v33, %v12608_v22 }
 0xae8   :  { %v4485_v42 = vpop.f32.mrf.mxu1  ;;  %v4526_v1 = vpop.f32.mrf.mxu0 }
 0xae9   :  { %v4563_v52 = vmul.f32 %v9267_v45, %v4561_v13  ;;  %v4562_v10 = vadd.f32 %v4526_v1, %v10095_v15  ;;  %v4560_v7 = vadd.f32 %v4485_v42, %v11225_v57  ;;  %v4580_v45 = vsub.f32 1.0, %v9273_v32 }
 0xaea   :  { %v4487_v3 = vpop.f32.mrf.mxu1  ;;  %v4528_v40 = vpop.f32.mrf.mxu0  ;;  %v4583_v1 = vmul.f32 %v9271_v26, %v11072_v0  ;;  %v4584_v42 = vmul.f32 %v9273_v32, %v11074_v53  ;;  %v12613_v32 = vld [vmem:[#allocation159_spill] sm:$0xff] }
 0xaeb   :  { %v4565_v46 = vadd.f32 %v4563_v52, %v4559_v28  ;;  %v4564_v6 = vmul.f32 %v9269_v5, %v4562_v10  ;;  %v11231_v40 = vpop.permute.xlu0 %4574  ;;  %v12609_v10 = vsub.f32 1.0, %v11061_v63 }
 0xaec   :  { %v4488_v62 = vpop.f32.mrf.mxu1  ;;  %v4529_v17 = vpop.f32.mrf.mxu0 }
 0xaed   :  { %9274 = vtanh.f32 %v4565_v46  ;;  %v4566_v19 = vadd.f32 %v4564_v6, %v4560_v7  ;;  %v11920_v17 = vsub.f32 1.0, %v11231_v40  ;;  %v4592_v5 = vmul.f32 %v11074_v53, %v12609_v10  ;;  %v12612_v53 = vld [vmem:[#allocation158_spill] sm:$0xff]  ;;  %v12626_v10 = vld [vmem:[#allocation172_spill] sm:$0xff] }
 0xaef   :  { %9276 = vtanh.f32 %v4566_v19  ;;  %v4591_v52 = vmul.f32 %v11920_v17, %v11072_v0  ;;  %v12611_v0 = vld [vmem:[#allocation157_spill] sm:$0xff]  ;;  %v12629_v17 = vld [vmem:[#allocation175_spill] sm:$0xff] }
 0xafa   :  { %v9275_v33 = vpop.eup %9274 }
 0xafb   :  { %v4581_v13 = vmul.f32 %v9275_v33, %v4579_v25  ;;  %v12614_v33 = vld [vmem:[#allocation160_spill] sm:$0xff] }
 0xafc   :  { %v9277_v3 = vpop.eup %9276 }
 0xafd   :  { %v4582_v27 = vmul.f32 %v9277_v3, %v4580_v45  ;;  %v4585_v28 = vadd.f32 %v4583_v1, %v4581_v13  ;;  %v12615_v45 = vld [vmem:[#allocation161_spill] sm:$0xff]  ;;  %v12616_v13 = vld [vmem:[#allocation162_spill] sm:$0xff]  ;;  %v12617_v1 = vld [vmem:[#allocation163_spill] sm:$0xff] }
 0xafe   :  { %v12618_v3 = vld [vmem:[#allocation164_spill] sm:$0xff] }
 0xaff   :  { %v4586_v62 = vadd.f32 %v4584_v42, %v4582_v27  ;;  %v4587_v6 = vmul.f32 %v4585_v28, %v11231_v40  ;;  %v12619_v27 = vld [vmem:[#allocation165_spill] sm:$0xff]  ;;  %v12620_v42 = vld [vmem:[#allocation166_spill] sm:$0xff]  ;;  %v12621_v28 = vld [vmem:[#allocation167_spill] sm:$0xff] }
 0xb01   :  { %v4588_v25 = vmul.f32 %v4586_v62, %v11061_v63  ;;  %v11243_v46 = vadd.f32 %v4591_v52, %v4587_v6  ;;  %v12610_v63 = vld [vmem:[#allocation156_spill] sm:$0xff]  ;;  %v12623_v6 = vld [vmem:[#allocation169_spill] sm:$0xff]  ;;  %v12624_v52 = vld [vmem:[#allocation170_spill] sm:$0xff] }
 0xb02   :  { %v12622_v62 = vld [vmem:[#allocation168_spill] sm:$0xff] }
 0xb03   :  { %v11245_v7 = vadd.f32 %v4592_v5, %v4588_v25  ;;  %v11251_v26 = vpack.c.bf16 %v11243_v46, %v11243_v46  ;;  %v12625_v25 = vld [vmem:[#allocation171_spill] sm:$0xff]  ;;  %v12627_v5 = vld [vmem:[#allocation173_spill] sm:$0xff] }
 0xb05   :  { %v4596_v19 = vpack.c.bf16 %v11245_v7, %v11245_v7 }
 0xb07   :  { %4629 = vmatprep.mubr.bf16.mxu1 %v4596_v19  ;;  %4670 = vmatprep.mubr.bf16.mxu0 %v4596_v19 }
 0xb08   :  { %4630 = vmatmul.mubr.bf16.vlgmr.msra.gmra.mxu1 %v11251_v26  ;;  %4671 = vmatmul.mubr.bf16.vlgmr.msra.gmra.mxu0 %v11251_v26 }
 0xb09   :  { %4680 = vmatpush1.bf16.msra.mxu1 %v12118_v11  ;;  %4721 = vmatpush1.bf16.msra.mxu0 %v12119_v50 }
 0xb0a   :  { %4711 = vmatprep.mubr.bf16.mxu1 %v4596_v19  ;;  %4752 = vmatprep.mubr.bf16.mxu0 %v4596_v19  ;;  %v12628_v19 = vld [vmem:[#allocation174_spill] sm:$0xff] }
 0xb0b   :  { %4681 = vmatprep.subr.bf16.mxu1 %v12120_v59  ;;  %4722 = vmatprep.subr.bf16.mxu0 %v12121_v24 }
 0xb0d   :  { %4682 = vmatpush1.bf16.msra.mxu1 %v12122_v14  ;;  %4723 = vmatpush1.bf16.msra.mxu0 %v12123_v55 }
 0xb0e   :  { %4683 = vmatprep.subr.bf16.mxu1 %v12124_v2  ;;  %4724 = vmatprep.subr.bf16.mxu0 %v12125_v48 }
 0xb11   :  { %4684 = vmatpush1.bf16.msra.mxu1 %v12126_v54  ;;  %4725 = vmatpush1.bf16.msra.mxu0 %v12215_v9 }
 0xb12   :  { %4685 = vmatprep.subr.bf16.mxu1 %v12216_v31  ;;  %4726 = vmatprep.subr.bf16.mxu0 %v12217_v36 }
 0xb15   :  { %4686 = vmatpush1.bf16.msra.mxu1 %v12218_v51  ;;  %4727 = vmatpush1.bf16.msra.mxu0 %v12219_v23 }
 0xb16   :  { %4687 = vmatprep.subr.bf16.mxu1 %v12220_v58  ;;  %4728 = vmatprep.subr.bf16.mxu0 %v12221_v37 }
 0xb19   :  { %4688 = vmatpush1.bf16.msra.mxu1 %v12222_v61  ;;  %4729 = vmatpush1.bf16.msra.mxu0 %v12223_v38 }
 0xb1a   :  { %4689 = vmatprep.subr.bf16.mxu1 %v12312_v29  ;;  %4730 = vmatprep.subr.bf16.mxu0 %v12313_v44 }
 0xb1d   :  { %4690 = vmatpush1.bf16.msra.mxu1 %v12314_v49  ;;  %4731 = vmatpush1.bf16.msra.mxu0 %v12315_v12 }
 0xb1e   :  { %4691 = vmatprep.subr.bf16.mxu1 %v12316_v56  ;;  %4732 = vmatprep.subr.bf16.mxu0 %v12317_v20 }
 0xb21   :  { %4692 = vmatpush1.bf16.msra.mxu1 %v12318_v60  ;;  %4733 = vmatpush1.bf16.msra.mxu0 %v12319_v8 }
 0xb22   :  { %4693 = vmatprep.subr.bf16.mxu1 %v12232_v47  ;;  %4734 = vmatprep.subr.bf16.mxu0 %v12233_v35 }
 0xb25   :  { %4694 = vmatpush1.bf16.msra.mxu1 %v12234_v34  ;;  %4735 = vmatpush1.bf16.msra.mxu0 %v12320_v39 }
 0xb26   :  { %4695 = vmatprep.subr.bf16.mxu1 %v12321_v21  ;;  %4736 = vmatprep.subr.bf16.mxu0 %v12237_v18 }
 0xb29   :  { %4696 = vmatpush2.bf16.msra.mxu1 %v12238_v41  ;;  %4737 = vmatpush2.bf16.msra.mxu0 %v12239_v43 }
 0xb2a   :  { %4697 = vmatprep.subr.bf16.mxu1 %v12240_v30  ;;  %4738 = vmatprep.subr.bf16.mxu0 %v12241_v16 }
 0xb2d   :  { %4698 = vmatpush2.bf16.msra.mxu1 %v12508_v4  ;;  %4739 = vmatpush2.bf16.msra.mxu0 %v12610_v63  ;;  %v12704_v63 = vld [vmem:[#allocation96_spill] sm:$0xff] }
 0xb2e   :  { %4699 = vmatprep.subr.bf16.mxu1 %v12611_v0  ;;  %4740 = vmatprep.subr.bf16.mxu0 %v12612_v53  ;;  %v12703_v53 = vld [vmem:[#allocation108_spill] sm:$0xff] }
 0xb31   :  { %4700 = vmatpush2.bf16.msra.mxu1 %v12613_v32  ;;  %4741 = vmatpush2.bf16.msra.mxu0 %v12614_v33  ;;  %v12702_v33 = vld [vmem:[#allocation109_spill] sm:$0xff] }
 0xb32   :  { %4701 = vmatprep.subr.bf16.mxu1 %v12615_v45  ;;  %4742 = vmatprep.subr.bf16.mxu0 %v12616_v13  ;;  %v12701_v45 = vld [vmem:[#allocation107_spill] sm:$0xff] }
 0xb35   :  { %4702 = vmatpush2.bf16.msra.mxu1 %v12617_v1  ;;  %4743 = vmatpush2.bf16.msra.mxu0 %v12618_v3 }
 0xb36   :  { %4703 = vmatprep.subr.bf16.mxu1 %v12619_v27  ;;  %4744 = vmatprep.subr.bf16.mxu0 %v12620_v42  ;;  %v12630_v27 = vld [vmem:[#allocation176_spill] sm:$0xff]  ;;  %v12631_v42 = vld [vmem:[#allocation177_spill] sm:$0xff] }
 0xb39   :  { %4704 = vmatpush2.bf16.msra.mxu1 %v12621_v28  ;;  %4745 = vmatpush2.bf16.msra.mxu0 %v12622_v62  ;;  %v12632_v28 = vld [vmem:[#allocation178_spill] sm:$0xff]  ;;  %v12633_v62 = vld [vmem:[#allocation179_spill] sm:$0xff] }
 0xb3a   :  { %4705 = vmatprep.subr.bf16.mxu1 %v12623_v6  ;;  %4746 = vmatprep.subr.bf16.mxu0 %v12624_v52  ;;  %v12634_v6 = vld [vmem:[#allocation180_spill] sm:$0xff]  ;;  %v12635_v52 = vld [vmem:[#allocation27_spill] sm:$0xff] }
 0xb3d   :  { %4706 = vmatpush2.bf16.msra.mxu1 %v12625_v25  ;;  %4747 = vmatpush2.bf16.msra.mxu0 %v12626_v10  ;;  %v12636_v25 = vld [vmem:[#allocation28_spill] sm:$0xff] }
 0xb3e   :  { %4707 = vmatprep.subr.bf16.mxu1 %v12627_v5  ;;  %4748 = vmatprep.subr.bf16.mxu0 %v12628_v19  ;;  %v12637_v19 = vld [vmem:[#allocation29_spill] sm:$0xff]  ;;  %v12646_v5 = vld [vmem:[#allocation38_spill] sm:$0xff] }
 0xb41   :  { %4708 = vmatpush2.bf16.msra.mxu1 %v12629_v17  ;;  %4749 = vmatpush2.bf16.msra.mxu0 %v12630_v27  ;;  %v12638_v17 = vld [vmem:[#allocation30_spill] sm:$0xff]  ;;  %v12639_v27 = vld [vmem:[#allocation31_spill] sm:$0xff] }
 0xb42   :  { %4709 = vmatprep.subr.bf16.mxu1 %v12631_v42  ;;  %4750 = vmatprep.subr.bf16.mxu0 %v12632_v28  ;;  %v12640_v42 = vld [vmem:[#allocation32_spill] sm:$0xff]  ;;  %v12641_v28 = vld [vmem:[#allocation33_spill] sm:$0xff] }
 0xb45   :  { %4710 = vmatpush2.bf16.msra.mxu1 %v12633_v62  ;;  %4751 = vmatpush2.bf16.msra.mxu0 %v12634_v6  ;;  %v12642_v62 = vld [vmem:[#allocation34_spill] sm:$0xff]  ;;  %v12643_v6 = vld [vmem:[#allocation35_spill] sm:$0xff] }
 0xb46   :  { %4863 = vmatprep.subr.bf16.mxu1 %v12635_v52  ;;  %4903 = vmatprep.subr.bf16.mxu0 %v12636_v25  ;;  %v12644_v52 = vld [vmem:[#allocation36_spill] sm:$0xff]  ;;  %v12645_v25 = vld [vmem:[#allocation37_spill] sm:$0xff] }
 0xb48   :  { %4712 = vmatmul.mubr.bf16.vlgmr.msra.gmra.mxu1 %v11251_v26  ;;  %4753 = vmatmul.mubr.bf16.vlgmr.msra.gmra.mxu0 %v11251_v26  ;;  %v12647_v26 = vld [vmem:[#allocation39_spill] sm:$0xff] }
 0xb49   :  { %4864 = vmatpush1.bf16.msra.mxu1 %v12637_v19  ;;  %4904 = vmatpush1.bf16.msra.mxu0 %v12638_v17  ;;  %v12648_v19 = vld [vmem:[#allocation40_spill] sm:$0xff]  ;;  %v12649_v17 = vld [vmem:[#allocation41_spill] sm:$0xff] }
 0xb4a   :  { %4865 = vmatprep.subr.bf16.mxu1 %v12639_v27  ;;  %4905 = vmatprep.subr.bf16.mxu0 %v12640_v42  ;;  %v12650_v27 = vld [vmem:[#allocation42_spill] sm:$0xff]  ;;  %v12651_v42 = vld [vmem:[#allocation43_spill] sm:$0xff] }
 0xb4d   :  { %4866 = vmatpush1.bf16.msra.mxu1 %v12641_v28  ;;  %4906 = vmatpush1.bf16.msra.mxu0 %v12642_v62  ;;  %v12652_v28 = vld [vmem:[#allocation44_spill] sm:$0xff]  ;;  %v12653_v62 = vld [vmem:[#allocation45_spill] sm:$0xff] }
 0xb4e   :  { %4867 = vmatprep.subr.bf16.mxu1 %v12643_v6  ;;  %4907 = vmatprep.subr.bf16.mxu0 %v12644_v52  ;;  %v12654_v6 = vld [vmem:[#allocation46_spill] sm:$0xff]  ;;  %v12655_v52 = vld [vmem:[#allocation47_spill] sm:$0xff] }
 0xb51   :  { %4868 = vmatpush1.bf16.msra.mxu1 %v12645_v25  ;;  %4908 = vmatpush1.bf16.msra.mxu0 %v12646_v5  ;;  %v12656_v25 = vld [vmem:[#allocation48_spill] sm:$0xff]  ;;  %v12657_v5 = vld [vmem:[#allocation49_spill] sm:$0xff] }
 0xb52   :  { %4869 = vmatprep.subr.bf16.mxu1 %v12647_v26  ;;  %4909 = vmatprep.subr.bf16.mxu0 %v12648_v19  ;;  %v12658_v26 = vld [vmem:[#allocation50_spill] sm:$0xff]  ;;  %v12659_v19 = vld [vmem:[#allocation51_spill] sm:$0xff] }
 0xb55   :  { %4870 = vmatpush1.bf16.msra.mxu1 %v12649_v17  ;;  %4910 = vmatpush1.bf16.msra.mxu0 %v12650_v27  ;;  %v12660_v17 = vld [vmem:[#allocation52_spill] sm:$0xff]  ;;  %v12661_v27 = vld [vmem:[#allocation53_spill] sm:$0xff] }
 0xb56   :  { %4871 = vmatprep.subr.bf16.mxu1 %v12651_v42  ;;  %4911 = vmatprep.subr.bf16.mxu0 %v12652_v28  ;;  %v12662_v42 = vld [vmem:[#allocation54_spill] sm:$0xff]  ;;  %v12663_v28 = vld [vmem:[#allocation55_spill] sm:$0xff] }
 0xb59   :  { %4872 = vmatpush1.bf16.msra.mxu1 %v12653_v62  ;;  %4912 = vmatpush1.bf16.msra.mxu0 %v12654_v6  ;;  %v12664_v62 = vld [vmem:[#allocation57_spill] sm:$0xff]  ;;  %v12665_v6 = vld [vmem:[#allocation56_spill] sm:$0xff] }
 0xb5a   :  { %4873 = vmatprep.subr.bf16.mxu1 %v12655_v52  ;;  %4913 = vmatprep.subr.bf16.mxu0 %v12656_v25  ;;  %v12666_v52 = vld [vmem:[#allocation58_spill] sm:$0xff]  ;;  %v12667_v25 = vld [vmem:[#allocation59_spill] sm:$0xff] }
 0xb5d   :  { %4874 = vmatpush1.bf16.msra.mxu1 %v12657_v5  ;;  %4914 = vmatpush1.bf16.msra.mxu0 %v12658_v26  ;;  %v12668_v5 = vld [vmem:[#allocation60_spill] sm:$0xff]  ;;  %v12669_v26 = vld [vmem:[#allocation61_spill] sm:$0xff] }
 0xb5e   :  { %4875 = vmatprep.subr.bf16.mxu1 %v12659_v19  ;;  %4915 = vmatprep.subr.bf16.mxu0 %v12660_v17  ;;  %v12670_v19 = vld [vmem:[#allocation62_spill] sm:$0xff]  ;;  %v12671_v17 = vld [vmem:[#allocation63_spill] sm:$0xff] }
 0xb61   :  { %4876 = vmatpush1.bf16.msra.mxu1 %v12661_v27  ;;  %4916 = vmatpush1.bf16.msra.mxu0 %v12662_v42  ;;  %v12672_v27 = vld [vmem:[#allocation64_spill] sm:$0xff]  ;;  %v12673_v42 = vld [vmem:[#allocation65_spill] sm:$0xff] }
 0xb62   :  { %4877 = vmatprep.subr.bf16.mxu1 %v12663_v28  ;;  %4917 = vmatprep.subr.bf16.mxu0 %v12664_v62  ;;  %v12674_v28 = vld [vmem:[#allocation66_spill] sm:$0xff]  ;;  %v12675_v62 = vld [vmem:[#allocation67_spill] sm:$0xff] }
 0xb65   :  { %4878 = vmatpush1.bf16.msra.mxu1 %v12665_v6  ;;  %4918 = vmatpush1.bf16.msra.mxu0 %v12666_v52  ;;  %v12676_v6 = vld [vmem:[#allocation68_spill] sm:$0xff]  ;;  %v12677_v52 = vld [vmem:[#allocation69_spill] sm:$0xff] }
 0xb66   :  { %4879 = vmatprep.subr.bf16.mxu1 %v12667_v25  ;;  %4919 = vmatprep.subr.bf16.mxu0 %v12668_v5  ;;  %v12678_v25 = vld [vmem:[#allocation70_spill] sm:$0xff]  ;;  %v12679_v5 = vld [vmem:[#allocation71_spill] sm:$0xff] }
 0xb69   :  { %4880 = vmatpush2.bf16.msra.mxu1 %v12669_v26  ;;  %4920 = vmatpush2.bf16.msra.mxu0 %v12670_v19  ;;  %v12680_v26 = vld [vmem:[#allocation72_spill] sm:$0xff]  ;;  %v12681_v19 = vld [vmem:[#allocation73_spill] sm:$0xff] }
 0xb6a   :  { %4881 = vmatprep.subr.bf16.mxu1 %v12671_v17  ;;  %4921 = vmatprep.subr.bf16.mxu0 %v12672_v27  ;;  %v12682_v17 = vld [vmem:[#allocation74_spill] sm:$0xff]  ;;  %v12683_v27 = vld [vmem:[#allocation75_spill] sm:$0xff] }
 0xb6d   :  { %4882 = vmatpush2.bf16.msra.mxu1 %v12673_v42  ;;  %4922 = vmatpush2.bf16.msra.mxu0 %v12674_v28  ;;  %v12684_v42 = vld [vmem:[#allocation76_spill] sm:$0xff]  ;;  %v12685_v28 = vld [vmem:[#allocation77_spill] sm:$0xff] }
 0xb6e   :  { %4883 = vmatprep.subr.bf16.mxu1 %v12675_v62  ;;  %4923 = vmatprep.subr.bf16.mxu0 %v12676_v6  ;;  %v12686_v62 = vld [vmem:[#allocation78_spill] sm:$0xff]  ;;  %v12687_v6 = vld [vmem:[#allocation79_spill] sm:$0xff] }
 0xb71   :  { %4884 = vmatpush2.bf16.msra.mxu1 %v12677_v52  ;;  %4924 = vmatpush2.bf16.msra.mxu0 %v12678_v25  ;;  %v12688_v52 = vld [vmem:[#allocation80_spill] sm:$0xff]  ;;  %v12689_v25 = vld [vmem:[#allocation81_spill] sm:$0xff] }
 0xb72   :  { %4885 = vmatprep.subr.bf16.mxu1 %v12679_v5  ;;  %4925 = vmatprep.subr.bf16.mxu0 %v12680_v26  ;;  %v12690_v5 = vld [vmem:[#allocation82_spill] sm:$0xff]  ;;  %v12691_v26 = vld [vmem:[#allocation83_spill] sm:$0xff] }
 0xb75   :  { %4886 = vmatpush2.bf16.msra.mxu1 %v12681_v19  ;;  %4926 = vmatpush2.bf16.msra.mxu0 %v12682_v17  ;;  %v12692_v19 = vld [vmem:[#allocation84_spill] sm:$0xff]  ;;  %v12693_v17 = vld [vmem:[#allocation85_spill] sm:$0xff] }
 0xb76   :  { %4887 = vmatprep.subr.bf16.mxu1 %v12683_v27  ;;  %4927 = vmatprep.subr.bf16.mxu0 %v12684_v42  ;;  %v12694_v27 = vld [vmem:[#allocation86_spill] sm:$0xff]  ;;  %v12695_v42 = vld [vmem:[#allocation87_spill] sm:$0xff] }
 0xb79   :  { %4888 = vmatpush2.bf16.msra.mxu1 %v12685_v28  ;;  %4928 = vmatpush2.bf16.msra.mxu0 %v12686_v62  ;;  %v12696_v28 = vld [vmem:[#allocation88_spill] sm:$0xff]  ;;  %v12697_v62 = vld [vmem:[#allocation89_spill] sm:$0xff] }
 0xb7a   :  { %4889 = vmatprep.subr.bf16.mxu1 %v12687_v6  ;;  %4929 = vmatprep.subr.bf16.mxu0 %v12688_v52  ;;  %v12698_v6 = vld [vmem:[#allocation90_spill] sm:$0xff]  ;;  %v12699_v52 = vld [vmem:[#allocation91_spill] sm:$0xff] }
 0xb7d   :  { %4890 = vmatpush2.bf16.msra.mxu1 %v12689_v25  ;;  %4930 = vmatpush2.bf16.msra.mxu0 %v12690_v5  ;;  %v12700_v25 = vld [vmem:[#allocation92_spill] sm:$0xff] }
 0xb7e   :  { %4891 = vmatprep.subr.bf16.mxu1 %v12691_v26  ;;  %4931 = vmatprep.subr.bf16.mxu0 %v12692_v19 }
 0xb81   :  { %4892 = vmatpush2.bf16.msra.mxu1 %v12693_v17  ;;  %4932 = vmatpush2.bf16.msra.mxu0 %v12694_v27 }
 0xb82   :  { %4893 = vmatprep.subr.bf16.mxu1 %v12695_v42  ;;  %4933 = vmatprep.subr.bf16.mxu0 %v12696_v28 }
 0xb85   :  { %4894 = vmatpush2.bf16.msra.mxu1 %v12697_v62  ;;  %4934 = vmatpush2.bf16.msra.mxu0 %v12698_v6 }
 0xb86   :  { %4943 = vmatprep.subr.bf16.mxu1 %v12699_v52  ;;  %4983 = vmatprep.subr.bf16.mxu0 %v12700_v25 }
 0xbc8   :  { %v4631_v5 = vpop.f32.mrf.mxu1  ;;  %v4672_v26 = vpop.f32.mrf.mxu0 }
 0xbc9   :  { %v4763_v13 = vrot.slane %v4631_v5, 4  ;;  %v4783_v52 = vrot.slane %v4672_v26, 4 }
 0xbca   :  { %v4633_v10 = vpop.f32.mrf.mxu1  ;;  %v4674_v19 = vpop.f32.mrf.mxu0 }
 0xbcb   :  { %v4764_v42 = vrot.slane %v4633_v10, 4  ;;  %v4767_v28 = vadd.f32 %v4763_v13, %v12701_v45  ;;  %v4784_v25 = vrot.slane %v4674_v19, 4  ;;  %v4787_v0 = vadd.f32 %v4783_v52, %v12703_v53 }
 0xbcc   :  { %v4635_v3 = vpop.f32.mrf.mxu1  ;;  %v4676_v17 = vpop.f32.mrf.mxu0 }
 0xbcd   :  { %v4768_v62 = vadd.f32 %v4764_v42, %v12702_v33  ;;  %v8070_v32 = vmul.f32 -1.442695, %v4767_v28  ;;  %v4788_v4 = vadd.f32 %v4784_v25, %v12704_v63  ;;  %v8072_v3 = vmul.f32 -1.442695, %v4787_v0  ;;  %v12705_v28 = vld [vmem:[#allocation111_spill] sm:$0xff] }
 0xbce   :  { %v4636_v1 = vpop.f32.mrf.mxu1  ;;  %v4677_v27 = vpop.f32.mrf.mxu0 }
 0xbcf   :  { %v8071_v6 = vmul.f32 -1.442695, %v4768_v62  ;;  %9278 = vpow2.f32 %v8070_v32  ;;  %v8073_v17 = vmul.f32 -1.442695, %v4788_v4 }
 0xbd1   :  { %9280 = vpow2.f32 %v8071_v6 }
 0xbd2   :  { %9282 = vpow2.f32 %v8072_v3 }
 0xbd3   :  { %9284 = vpow2.f32 %v8073_v17 }
 0xbdc   :  { %v9279_v1 = vpop.eup %9278 }
 0xbdd   :  { %v4775_v10 = vadd.f32 1.0, %v9279_v1 }
 0xbde   :  { %v9281_v5 = vpop.eup %9280 }
 0xbdf   :  { %v4776_v45 = vadd.f32 1.0, %v9281_v5  ;;  %9286 = vrcp.f32 %v4775_v10  ;;  %v9283_v13 = vpop.eup %9282 }
 0xbe0   :  { %v9285_v27 = vpop.eup %9284  ;;  %v4795_v42 = vadd.f32 1.0, %v9283_v13 }
 0xbe1   :  { %9288 = vrcp.f32 %v4776_v45  ;;  %v4796_v0 = vadd.f32 1.0, %v9285_v27 }
 0xbe2   :  { %9290 = vrcp.f32 %v4795_v42  ;;  %v4839_v42 = vrot.slane %v11243_v46, 4 }
 0xbe3   :  { %9292 = vrcp.f32 %v4796_v0  ;;  %v11395_v0 = vpop.permute.xlu1 %4828 }
 0xbec   :  { %v9287_v3 = vpop.eup %9286 }
 0xbee   :  { %v9289_v63 = vpop.eup %9288 }
 0xc08   :  { %v4713_v32 = vpop.f32.mrf.mxu1  ;;  %v4754_v26 = vpop.f32.mrf.mxu0 }
 0xc09   :  { %v4803_v19 = vrot.slane %v4713_v32, 4  ;;  %v4809_v53 = vadd.f32 %v4754_v26, %v12705_v28 }
 0xc0a   :  { %v4715_v62 = vpop.f32.mrf.mxu1  ;;  %v4756_v6 = vpop.f32.mrf.mxu0 }
 0xc0b   :  { %v4813_v4 = vrot.slane %v4809_v53, 4  ;;  %v4804_v52 = vrot.slane %v4715_v62, 4  ;;  %v4810_v25 = vadd.f32 %v4756_v6, %v10095_v15  ;;  %v4807_v5 = vadd.f32 %v4803_v19, %v12608_v22  ;;  %v9291_v62 = vpop.eup %9290 }
 0xc0c   :  { %v4717_v17 = vpop.f32.mrf.mxu1  ;;  %v4758_v1 = vpop.f32.mrf.mxu0  ;;  %v4840_v22 = vrot.slane %v11245_v7, 4 }
 0xc0d   :  { %v4817_v10 = vmul.f32 %v9287_v3, %v4813_v4  ;;  %v4814_v45 = vrot.slane %v4810_v25, 4  ;;  %v4808_v28 = vadd.f32 %v4804_v52, %v11225_v57  ;;  %v9293_v6 = vpop.eup %9292  ;;  %v4833_v17 = vsub.f32 1.0, %v9291_v62 }
 0xc0e   :  { %v4718_v13 = vpop.f32.mrf.mxu1  ;;  %v4759_v32 = vpop.f32.mrf.mxu0  ;;  %v4834_v19 = vsub.f32 1.0, %v9293_v6  ;;  %v4843_v25 = vmul.f32 %v9291_v62, %v4839_v42  ;;  %v4844_v52 = vmul.f32 %v9293_v6, %v4840_v22  ;;  %v8854_v22 = vld [vmem:[#allocation10 + $0x84] ss:$16 sps:$4 sm:$0xff]  }
 0xc0f   :  { %v4819_v26 = vadd.f32 %v4817_v10, %v4807_v5  ;;  %v4818_v27 = vmul.f32 %v9289_v63, %v4814_v45  ;;  %v4855_v13 = vsub.f32 1.0, %v11395_v0 }
 0xc11   :  { %9294 = vtanh.f32 %v4819_v26  ;;  %v4820_v53 = vadd.f32 %v4818_v27, %v4808_v28  ;;  %v4857_v28 = vmul.f32 %v4855_v13, %v11243_v46  ;;  %v8849_v46 = vld [vmem:[#allocation10 + $0xa8] ss:$16 sps:$4 sm:$0xff]  }
 0xc13   :  { %9296 = vtanh.f32 %v4820_v53  ;;  %v12706_v53 = vsub.f32 1.0, %v11231_v40 }
 0xc15   :  { %v4858_v62 = vmul.f32 %v11245_v7, %v12706_v53  ;;  %v8851_v7 = vld [vmem:[#allocation10 + $0xac] ss:$16 sps:$4 sm:$0xff]   ;;  %v8870_v53 = vld [vmem:[#allocation10 + $0x20] ss:$16 sps:$4 sm:$0xff]  }
 0xc1e   :  { %v9295_v1 = vpop.eup %9294 }
 0xc1f   :  { %v4835_v4 = vmul.f32 %v9295_v1, %v4833_v17 }
 0xc20   :  { %v9297_v3 = vpop.eup %9296 }
 0xc21   :  { %v4836_v5 = vmul.f32 %v9297_v3, %v4834_v19  ;;  %v4845_v63 = vadd.f32 %v4843_v25, %v4835_v4  ;;  %v8857_v19 = vld [vmem:[#allocation10 + $0x8c] ss:$16 sps:$4 sm:$0xff]   ;;  %v8852_v4 = vld [vmem:[#allocation10 + $0x80] ss:$16 sps:$4 sm:$0xff]   ;;  %v8855_v25 = vld [vmem:[#allocation10 + $0x88] ss:$16 sps:$4 sm:$0xff]  }
 0xc22   :  { %v8860_v3 = vld [vmem:[#allocation10 + $0x64] ss:$16 sps:$4 sm:$0xff]  }
 0xc23   :  { %v4846_v10 = vadd.f32 %v4844_v52, %v4836_v5  ;;  %v4849_v45 = vrot.slane %v4845_v63, 4  ;;  %v8863_v5 = vld [vmem:[#allocation10 + $0x6c] ss:$16 sps:$4 sm:$0xff]   ;;  %v8858_v52 = vld [vmem:[#allocation10 + $0x60] ss:$16 sps:$4 sm:$0xff]  }
 0xc24   :  { %v8861_v63 = vld [vmem:[#allocation10 + $0x68] ss:$16 sps:$4 sm:$0xff]  }
 0xc25   :  { %v4850_v32 = vrot.slane %v4846_v10, 4  ;;  %v4853_v26 = vmul.f32 %v4849_v45, %v11395_v0  ;;  %v8866_v10 = vld [vmem:[#allocation10 + $0x44] ss:$16 sps:$4 sm:$0xff]   ;;  %v8869_v45 = vld [vmem:[#allocation10 + $0x4c] ss:$16 sps:$4 sm:$0xff]  }
 0xc27   :  { %v4854_v27 = vmul.f32 %v4850_v32, %v11231_v40  ;;  %v4859_v17 = vadd.f32 %v4857_v28, %v4853_v26  ;;  %v8848_v40 = vld [vmem:[#allocation10 + $0xa4] ss:$16 sps:$4 sm:$0xff]   ;;  %v8864_v32 = vld [vmem:[#allocation10 + $0x40] ss:$16 sps:$4 sm:$0xff]   ;;  %v8867_v26 = vld [vmem:[#allocation10 + $0x48] ss:$16 sps:$4 sm:$0xff]  }
 0xc28   :  { %v8872_v28 = vld [vmem:[#allocation10 + $0x24] ss:$16 sps:$4 sm:$0xff]  }
 0xc29   :  { %v11406_v6 = vadd.f32 %v4858_v62, %v4854_v27  ;;  %v11410_v1 = vpack.c.bf16 %v4859_v17, %v4859_v17  ;;  %v8875_v27 = vld [vmem:[#allocation10 + $0x2c] ss:$16 sps:$4 sm:$0xff]   ;;  %v8873_v62 = vld [vmem:[#allocation10 + $0x28] ss:$16 sps:$4 sm:$0xff]   ;;  %v8878_v17 = vld [vmem:[#allocation10 + $0x4] ss:$16 sps:$4 sm:$0xff]  }
 0xc2b   :  { %v4862_v42 = vpack.c.bf16 %v11406_v6, %v11406_v6 }
 0xc2d   :  { %4895 = vmatprep.mubr.bf16.mxu1 %v4862_v42  ;;  %4935 = vmatprep.mubr.bf16.mxu0 %v4862_v42 }
 0xc2e   :  { %4896 = vmatmul.mubr.bf16.vlgmr.msra.gmra.mxu1 %v11410_v1  ;;  %4936 = vmatmul.mubr.bf16.vlgmr.msra.gmra.mxu0 %v11410_v1 }
 0xc2f   :  { %4944 = vmatpush1.bf16.msra.mxu1 %v12118_v11  ;;  %4984 = vmatpush1.bf16.msra.mxu0 %v12119_v50  ;;  %v12707_v11 = vld [vmem:[#allocation155_spill] sm:$0xff]  ;;  %v12708_v50 = vld [vmem:[#allocation156_spill] sm:$0xff] }
 0xc30   :  { %4975 = vmatprep.mubr.bf16.mxu1 %v4862_v42  ;;  %5015 = vmatprep.mubr.bf16.mxu0 %v4862_v42  ;;  %v8881_v42 = vld [vmem:[#allocation10 + $0xc] ss:$16 sps:$4 sm:$0xff]  }
 0xc31   :  { %4945 = vmatprep.subr.bf16.mxu1 %v12120_v59  ;;  %4985 = vmatprep.subr.bf16.mxu0 %v12121_v24  ;;  %v12709_v59 = vld [vmem:[#allocation157_spill] sm:$0xff]  ;;  %v12710_v24 = vld [vmem:[#allocation158_spill] sm:$0xff] }
 0xc33   :  { %4946 = vmatpush1.bf16.msra.mxu1 %v12122_v14  ;;  %4986 = vmatpush1.bf16.msra.mxu0 %v12123_v55  ;;  %v12711_v14 = vld [vmem:[#allocation159_spill] sm:$0xff]  ;;  %v12712_v55 = vld [vmem:[#allocation160_spill] sm:$0xff] }
 0xc34   :  { %4947 = vmatprep.subr.bf16.mxu1 %v12124_v2  ;;  %4987 = vmatprep.subr.bf16.mxu0 %v12125_v48  ;;  %v12713_v2 = vld [vmem:[#allocation161_spill] sm:$0xff]  ;;  %v12714_v48 = vld [vmem:[#allocation162_spill] sm:$0xff] }
 0xc37   :  { %4948 = vmatpush1.bf16.msra.mxu1 %v12126_v54  ;;  %4988 = vmatpush1.bf16.msra.mxu0 %v12215_v9  ;;  %v12715_v54 = vld [vmem:[#allocation163_spill] sm:$0xff]  ;;  %v12717_v9 = vld [vmem:[#allocation165_spill] sm:$0xff] }
 0xc38   :  { %4949 = vmatprep.subr.bf16.mxu1 %v12216_v31  ;;  %4989 = vmatprep.subr.bf16.mxu0 %v12217_v36  ;;  %v12718_v31 = vld [vmem:[#allocation166_spill] sm:$0xff]  ;;  %v12719_v36 = vld [vmem:[#allocation167_spill] sm:$0xff] }
 0xc3b   :  { %4950 = vmatpush1.bf16.msra.mxu1 %v12218_v51  ;;  %4990 = vmatpush1.bf16.msra.mxu0 %v12219_v23  ;;  %v12720_v51 = vld [vmem:[#allocation168_spill] sm:$0xff]  ;;  %v12721_v23 = vld [vmem:[#allocation169_spill] sm:$0xff] }
 0xc3c   :  { %4951 = vmatprep.subr.bf16.mxu1 %v12220_v58  ;;  %4991 = vmatprep.subr.bf16.mxu0 %v12221_v37  ;;  %v12722_v58 = vld [vmem:[#allocation170_spill] sm:$0xff]  ;;  %v12723_v37 = vld [vmem:[#allocation171_spill] sm:$0xff] }
 0xc3f   :  { %4952 = vmatpush1.bf16.msra.mxu1 %v12222_v61  ;;  %4992 = vmatpush1.bf16.msra.mxu0 %v12223_v38  ;;  %v12724_v61 = vld [vmem:[#allocation172_spill] sm:$0xff]  ;;  %v12725_v38 = vld [vmem:[#allocation173_spill] sm:$0xff] }
 0xc40   :  { %4953 = vmatprep.subr.bf16.mxu1 %v12312_v29  ;;  %4993 = vmatprep.subr.bf16.mxu0 %v12313_v44  ;;  %v12733_v29 = vmov 0   ;;  %v8836_v44 = vld [vmem:[#allocation10 + $0xe4] ss:$16 sps:$4 sm:$0xff]  }
 0xc43   :  { %4954 = vmatpush1.bf16.msra.mxu1 %v12314_v49  ;;  %4994 = vmatpush1.bf16.msra.mxu0 %v12315_v12  ;;  %v8839_v49 = vld [vmem:[#allocation10 + $0xec] ss:$16 sps:$4 sm:$0xff]   ;;  %v8834_v12 = vld [vmem:[#allocation10 + $0xe0] ss:$16 sps:$4 sm:$0xff]  }
 0xc44   :  { %4955 = vmatprep.subr.bf16.mxu1 %v12316_v56  ;;  %4995 = vmatprep.subr.bf16.mxu0 %v12317_v20  ;;  %v8837_v56 = vld [vmem:[#allocation10 + $0xe8] ss:$16 sps:$4 sm:$0xff]   ;;  %v8842_v20 = vld [vmem:[#allocation10 + $0xc4] ss:$16 sps:$4 sm:$0xff]  }
 0xc47   :  { %4956 = vmatpush1.bf16.msra.mxu1 %v12318_v60  ;;  %4996 = vmatpush1.bf16.msra.mxu0 %v12319_v8  ;;  %v8845_v60 = vld [vmem:[#allocation10 + $0xcc] ss:$16 sps:$4 sm:$0xff]   ;;  %v8840_v8 = vld [vmem:[#allocation10 + $0xc0] ss:$16 sps:$4 sm:$0xff]  }
 0xc48   :  { %4957 = vmatprep.subr.bf16.mxu1 %v12232_v47  ;;  %4997 = vmatprep.subr.bf16.mxu0 %v12233_v35  ;;  %v12731_v47 = vld [vmem:[#allocation179_spill] sm:$0xff]  ;;  %v12732_v35 = vld [vmem:[#allocation180_spill] sm:$0xff] }
 0xc4b   :  { %4958 = vmatpush1.bf16.msra.mxu1 %v12234_v34  ;;  %4998 = vmatpush1.bf16.msra.mxu0 %v12320_v39  ;;  %v12716_v34 = vld [vmem:[#allocation164_spill] sm:$0xff] }
 0xc4c   :  { %4959 = vmatprep.subr.bf16.mxu1 %v12321_v21  ;;  %4999 = vmatprep.subr.bf16.mxu0 %v12237_v18  ;;  %v12726_v18 = vld [vmem:[#allocation174_spill] sm:$0xff] }
 0xc4d   :  { %v8843_v39 = vld [vmem:[#allocation10 + $0xc8] ss:$16 sps:$4 sm:$0xff]   ;;  %v8846_v21 = vld [vmem:[#allocation10 + $0xa0] ss:$16 sps:$4 sm:$0xff]  }
 0xc4f   :  { %4960 = vmatpush2.bf16.msra.mxu1 %v12238_v41  ;;  %5000 = vmatpush2.bf16.msra.mxu0 %v12239_v43  ;;  %v12727_v41 = vld [vmem:[#allocation175_spill] sm:$0xff]  ;;  %v12728_v43 = vld [vmem:[#allocation176_spill] sm:$0xff] }
 0xc50   :  { %4961 = vmatprep.subr.bf16.mxu1 %v12240_v30  ;;  %5001 = vmatprep.subr.bf16.mxu0 %v12241_v16  ;;  %v12729_v30 = vld [vmem:[#allocation177_spill] sm:$0xff]  ;;  %v12730_v16 = vld [vmem:[#allocation178_spill] sm:$0xff] }
 0xc53   :  { %4962 = vmatpush2.bf16.msra.mxu1 %v12707_v11  ;;  %5002 = vmatpush2.bf16.msra.mxu0 %v12708_v50  ;;  %v8879_v11 = vld [vmem:[#allocation10 + $0x8] ss:$16 sps:$4 sm:$0xff]  }
 0xc54   :  { %4963 = vmatprep.subr.bf16.mxu1 %v12709_v59  ;;  %5003 = vmatprep.subr.bf16.mxu0 %v12710_v24  ;;  %v8882_v50 = vld [vmem:[#allocation11 + $0x78] sm:$0xff]  }
 0xc55   :  { %v8883_v59 = vld [vmem:[#allocation11 + $0xf8] sm:$0xff]  }
 0xc57   :  { %4964 = vmatpush2.bf16.msra.mxu1 %v12711_v14  ;;  %5004 = vmatpush2.bf16.msra.mxu0 %v12712_v55 }
 0xc58   :  { %4965 = vmatprep.subr.bf16.mxu1 %v12713_v2  ;;  %5005 = vmatprep.subr.bf16.mxu0 %v12714_v48 }
 0xc5b   :  { %4966 = vmatpush2.bf16.msra.mxu1 %v12715_v54  ;;  %5006 = vmatpush2.bf16.msra.mxu0 %v12716_v34 }
 0xc5c   :  { %4967 = vmatprep.subr.bf16.mxu1 %v12717_v9  ;;  %5007 = vmatprep.subr.bf16.mxu0 %v12718_v31 }
 0xc5f   :  { %4968 = vmatpush2.bf16.msra.mxu1 %v12719_v36  ;;  %5008 = vmatpush2.bf16.msra.mxu0 %v12720_v51 }
 0xc60   :  { %4969 = vmatprep.subr.bf16.mxu1 %v12721_v23  ;;  %5009 = vmatprep.subr.bf16.mxu0 %v12722_v58  ;;  %v12734_v58 = vld [vmem:[#allocation96_spill] sm:$0xff] }
 0xc63   :  { %4970 = vmatpush2.bf16.msra.mxu1 %v12723_v37  ;;  %5010 = vmatpush2.bf16.msra.mxu0 %v12724_v61 }
 0xc64   :  { %4971 = vmatprep.subr.bf16.mxu1 %v12725_v38  ;;  %5011 = vmatprep.subr.bf16.mxu0 %v12726_v18 }
 0xc67   :  { %4972 = vmatpush2.bf16.msra.mxu1 %v12727_v41  ;;  %5012 = vmatpush2.bf16.msra.mxu0 %v12728_v43 }
 0xc68   :  { %4973 = vmatprep.subr.bf16.mxu1 %v12729_v30  ;;  %5013 = vmatprep.subr.bf16.mxu0 %v12730_v16 }
 0xc6b   :  { %4974 = vmatpush2.bf16.msra.mxu1 %v12731_v47  ;;  %5014 = vmatpush2.bf16.msra.mxu0 %v12732_v35 }
 0xc6c   :  { %5286 = vmatprep.subr.bf16.mxu1 %v8836_v44  ;;  %5327 = vmatprep.subr.bf16.mxu0 %v8839_v49 }
 0xc6e   :  { %4976 = vmatmul.mubr.bf16.vlgmr.msra.gmra.mxu1 %v11410_v1  ;;  %5016 = vmatmul.mubr.bf16.vlgmr.msra.gmra.mxu0 %v11410_v1  ;;  %v8876_v1 = vld [vmem:[#allocation10] ss:$16 sps:$4 sm:$0xff]  }
 0xc6f   :  { %5318 = vmatprep.mubr.bf16.mxu1 %v12733_v29  ;;  %5359 = vmatprep.mubr.bf16.mxu0 %v12733_v29 }
 0xc70   :  { %5287 = vmatpush1.bf16.msra.mxu1 %v8834_v12  ;;  %5328 = vmatpush1.bf16.msra.mxu0 %v8837_v56 }
 0xc71   :  { %5288 = vmatprep.subr.bf16.mxu1 %v8842_v20  ;;  %5329 = vmatprep.subr.bf16.mxu0 %v8845_v60 }
 0xc74   :  { %5289 = vmatpush1.bf16.msra.mxu1 %v8840_v8  ;;  %5330 = vmatpush1.bf16.msra.mxu0 %v8843_v39 }
 0xc75   :  { %5290 = vmatprep.subr.bf16.mxu1 %v8848_v40  ;;  %5331 = vmatprep.subr.bf16.mxu0 %v8851_v7  ;;  %v5066_v7 = vrot.slane %v11406_v6, 4 }
 0xc78   :  { %5291 = vmatpush1.bf16.msra.mxu1 %v8846_v21  ;;  %5332 = vmatpush1.bf16.msra.mxu0 %v8849_v46 }
 0xc79   :  { %5292 = vmatprep.subr.bf16.mxu1 %v8854_v22  ;;  %5333 = vmatprep.subr.bf16.mxu0 %v8857_v19 }
 0xc7c   :  { %5293 = vmatpush1.bf16.msra.mxu1 %v8852_v4  ;;  %5334 = vmatpush1.bf16.msra.mxu0 %v8855_v25 }
 0xc7d   :  { %5294 = vmatprep.subr.bf16.mxu1 %v8860_v3  ;;  %5335 = vmatprep.subr.bf16.mxu0 %v8863_v5 }
 0xc80   :  { %5295 = vmatpush1.bf16.msra.mxu1 %v8858_v52  ;;  %5336 = vmatpush1.bf16.msra.mxu0 %v8861_v63  ;;  %v5075_v52 = vmul.f32 %v11406_v6, %v4855_v13  ;;  %v8893_v13 = vld [vmem:[#allocation11 + $0xa8] sm:$0xff]   ;;  %v8894_v6 = vld [vmem:[#allocation11 + $0x60] sm:$0xff]  }
 0xc81   :  { %5296 = vmatprep.subr.bf16.mxu1 %v8866_v10  ;;  %5337 = vmatprep.subr.bf16.mxu0 %v8869_v45  ;;  %v8885_v10 = vld [vmem:[#allocation11 + $0xb8] sm:$0xff]  }
 0xc84   :  { %5297 = vmatpush1.bf16.msra.mxu1 %v8864_v32  ;;  %5338 = vmatpush1.bf16.msra.mxu0 %v8867_v26  ;;  %v8886_v32 = vld [vmem:[#allocation11 + $0x70] sm:$0xff]  }
 0xc85   :  { %5298 = vmatprep.subr.bf16.mxu1 %v8872_v28  ;;  %5339 = vmatprep.subr.bf16.mxu0 %v8875_v27  ;;  %v8887_v26 = vld [vmem:[#allocation11 + $0xf0] sm:$0xff]  }
 0xc86   :  { %v8888_v28 = vld [vmem:[#allocation11 + $0x30] sm:$0xff]  }
 0xc87   :  { %v8889_v27 = vld [vmem:[#allocation11 + $0xb0] sm:$0xff]  }
 0xc88   :  { %5299 = vmatpush1.bf16.msra.mxu1 %v8870_v53  ;;  %5340 = vmatpush1.bf16.msra.mxu0 %v8873_v62  ;;  %v8890_v53 = vld [vmem:[#allocation11 + $0x68] sm:$0xff]  }
 0xc89   :  { %5300 = vmatprep.subr.bf16.mxu1 %v8878_v17  ;;  %5341 = vmatprep.subr.bf16.mxu0 %v8881_v42  ;;  %v8891_v62 = vld [vmem:[#allocation11 + $0xe8] sm:$0xff]   ;;  %v8895_v17 = vld [vmem:[#allocation11 + $0xe0] sm:$0xff]  }
 0xc8a   :  { %v8896_v42 = vld [vmem:[#allocation11 + $0x20] sm:$0xff]  }
 0xc8c   :  { %5301 = vmatpush1.bf16.msra.mxu1 %v8876_v1  ;;  %5342 = vmatpush1.bf16.msra.mxu0 %v8879_v11  ;;  %v8897_v1 = vld [vmem:[#allocation11 + $0xa0] sm:$0xff]   ;;  %v8898_v11 = vld [vmem:[#allocation11 + $0x58] sm:$0xff]  }
 0xc8d   :  { %8422 = vmatprep.subr.bf16.mxu1 %v8882_v50  ;;  %8444 = vmatprep.subr.bf16.mxu0 %v8883_v59  ;;  %v8899_v50 = vld [vmem:[#allocation11 + $0xd8] sm:$0xff]  }
 0xc8e   :  { %v8900_v59 = vld [vmem:[#allocation11 + $0x18] sm:$0xff]  }
 0xcee   :  { %v4897_v24 = vpop.f32.mrf.mxu1  ;;  %v4937_v14 = vpop.f32.mrf.mxu0 }
 0xcef   :  { %v8901_v24 = vld [vmem:[#allocation11 + $0x98] sm:$0xff]   ;;  %v8902_v14 = vld [vmem:[#allocation11 + $0x50] sm:$0xff]  }
 0xcf0   :  { %v4898_v55 = vpop.f32.mrf.mxu1  ;;  %v4938_v2 = vpop.f32.mrf.mxu0 }
 0xcf1   :  { %v5024_v31 = vrot.slane %v4898_v55, 4  ;;  %v5034_v23 = vrot.slane %v4938_v2, 4  ;;  %v8903_v55 = vld [vmem:[#allocation11 + $0xd0] sm:$0xff]  }
 0xcf2   :  { %v4900_v48 = vpop.f32.mrf.mxu1  ;;  %v4940_v54 = vpop.f32.mrf.mxu0  ;;  %v8904_v2 = vld [vmem:[#allocation11 + $0x10] sm:$0xff]  }
 0xcf3   :  { %v5026_v36 = vadd.f32 %v5024_v31, %v12702_v33  ;;  %v5036_v37 = vadd.f32 %v5034_v23, %v12734_v58  ;;  %v8905_v48 = vld [vmem:[#allocation11 + $0x90] sm:$0xff]   ;;  %v8906_v54 = vld [vmem:[#allocation11 + $0x48] sm:$0xff]   ;;  %v8912_v23 = vld [vmem:[#allocation11] sm:$0xff]  }
 0xcf4   :  { %v4901_v34 = vpop.f32.mrf.mxu1  ;;  %v4941_v9 = vpop.f32.mrf.mxu0  ;;  %v8909_v31 = vld [vmem:[#allocation11 + $0x88] sm:$0xff]   ;;  %v8913_v58 = vld [vmem:[#allocation11 + $0x80] sm:$0xff]  }
 0xcf5   :  { %v8075_v51 = vmul.f32 -1.442695, %v5026_v36  ;;  %v8076_v61 = vmul.f32 -1.442695, %v5036_v37  ;;  %v8907_v34 = vld [vmem:[#allocation11 + $0xc8] sm:$0xff]   ;;  %v8910_v36 = vld [vmem:[#allocation11 + $0x40] sm:$0xff]  }
 0xcf6   :  { %v8908_v9 = vld [vmem:[#allocation11 + $0x8] sm:$0xff]   ;;  %v5772_v37 = vld [vmem:[#allocation13 + $0x1c0] sm:$0xff] }
 0xcf7   :  { %9298 = vpow2.f32 %v8075_v51  ;;  %v8911_v51 = vld [vmem:[#allocation11 + $0xc0] sm:$0xff]  }
 0xcf8   :  { %9300 = vpow2.f32 %v8076_v61  ;;  %v5776_v61 = vld [vmem:[#allocation13 + $0x1e0] sm:$0xff] }
 0xd04   :  { %v9299_v38 = vpop.eup %9298 }
 0xd05   :  { %v5030_v18 = vadd.f32 1.0, %v9299_v38  ;;  %v9301_v41 = vpop.eup %9300  ;;  %v5773_v38 = vld [vmem:[#allocation13 + $0x1c8] sm:$0xff] }
 0xd06   :  { %v5040_v35 = vadd.f32 1.0, %v9301_v41  ;;  %v8199_v41 = vcombine.high %v5772_v37, %v5776_v61 }
 0xd07   :  { %9302 = vrcp.f32 %v5030_v18  ;;  %v8198_v18 = vcombine.low %v5772_v37, %v5776_v61 }
 0xd08   :  { %9304 = vrcp.f32 %v5040_v35  ;;  %v12735_v35 = vld [vmem:[#allocation110_spill] sm:$0xff] }
 0xd14   :  { %v9303_v20 = vpop.eup %9302 }
 0xd15   :  { %v9305_v46 = vpop.eup %9304 }
 0xd16   :  { %v5063_v22 = vsub.f32 1.0, %v9305_v46  ;;  %v5068_v25 = vmul.f32 %v9305_v46, %v5066_v7 }
 0xd2e   :  { %v4977_v43 = vpop.f32.mrf.mxu1  ;;  %v5017_v30 = vpop.f32.mrf.mxu0 }
 0xd2f   :  { %v5777_v43 = vld [vmem:[#allocation13 + $0x1e8] sm:$0xff] }
 0xd30   :  { %v4978_v16 = vpop.f32.mrf.mxu1  ;;  %v5018_v47 = vpop.f32.mrf.mxu0  ;;  %v8200_v30 = vcombine.low %v5773_v38, %v5777_v43 }
 0xd31   :  { %v5044_v44 = vrot.slane %v4978_v16, 4  ;;  %v5047_v49 = vadd.f32 %v5018_v47, %v10095_v15  ;;  %v8201_v16 = vcombine.high %v5773_v38, %v5777_v43  ;;  %v11492_v47 = vld [vmem:[%s11595_s12] sm:$0xff] }
 0xd32   :  { %v4980_v33 = vpop.f32.mrf.mxu1  ;;  %v5020_v12 = vpop.f32.mrf.mxu0  ;;  %v5736_v43 = vld [vmem:[#allocation13 + $0xa0] sm:$0xff] }
 0xd33   :  { %v5049_v56 = vrot.slane %v5047_v49, 4  ;;  %v5046_v39 = vadd.f32 %v5044_v44, %v11225_v57  ;;  %v8884_v57 = vld [vmem:[#allocation11 + $0x38] sm:$0xff]   ;;  %v5113_v44 = vrot.slane %v11492_v47, %v12735_v35  ;;  %v11499_v49 = vld [vmem:[%s11595_s12 + $0x10] sm:$0xff]  ;;  %v11506_v12 = vld [vmem:[%s11595_s12 + $0x8] sm:$0xff] }
 0xd34   :  { %v4981_v60 = vpop.f32.mrf.mxu1  ;;  %v5021_v8 = vpop.f32.mrf.mxu0  ;;  %v5121_v33 = vrot.slane %v11499_v49, %v12735_v35 }
 0xd35   :  { %v5051_v21 = vmul.f32 %v9303_v20, %v5049_v56  ;;  %v5117_v56 = vrot.slane %v11506_v12, %v12735_v35  ;;  %v11513_v20 = vld [vmem:[%s11595_s12 + $0x18] sm:$0xff] }
 0xd36   :  { %v5125_v60 = vrot.slane %v11513_v20, %v12735_v35 }
 0xd37   :  { %v5052_v40 = vadd.f32 %v5051_v21, %v5046_v39 }
 0xd39   :  { %9306 = vtanh.f32 %v5052_v40 }
 0xd46   :  { %v9307_v19 = vpop.eup %9306 }
 0xd47   :  { %v5064_v4 = vmul.f32 %v9307_v19, %v5063_v22 }
 0xd49   :  { %v5069_v15 = vadd.f32 %v5068_v25, %v5064_v4 }
 0xd4b   :  { %v5071_v3 = vrot.slane %v5069_v15, 4 }
 0xd4d   :  { %v5073_v5 = vmul.f32 %v5071_v3, %v11395_v0  ;;  %v8892_v0 = vld [vmem:[#allocation11 + $0x28] sm:$0xff]  }
 0xd4f   :  { %v5076_v63 = vadd.f32 %v5075_v52, %v5073_v5  ;;  %v5764_v5 = vld [vmem:[#allocation13 + $0x180] sm:$0xff] }
 0xd51   :  { %v5109_v45 = vpack.c.bf16 %v5076_v63, %v5076_v63 }
 0xd53   :  { %5319 = vmatmul.mubr.bf16.vlgmr.msra.gmra.mxu1 %v5109_v45  ;;  %5360 = vmatmul.mubr.bf16.vlgmr.msra.gmra.mxu0 %v5109_v45  ;;  %v5769_v45 = vld [vmem:[#allocation13 + $0x1a8] sm:$0xff] }
 0xd54   :  { %8423 = vmatpush3.bf16.msra.mxu1 %v8884_v57  ;;  %8445 = vmatpush3.bf16.msra.mxu0 %v8885_v10  ;;  %v5768_v57 = vld [vmem:[#allocation13 + $0x1a0] sm:$0xff]  ;;  %v5765_v10 = vld [vmem:[#allocation13 + $0x188] sm:$0xff] }
 0xd55   :  { %8424 = vmatprep.subr.bf16.mxu1 %v8886_v32  ;;  %8446 = vmatprep.subr.bf16.mxu0 %v8887_v26 }
 0xd58   :  { %8425 = vmatpush3.bf16.msra.mxu1 %v8888_v28  ;;  %8447 = vmatpush3.bf16.msra.mxu0 %v8889_v27 }
 0xd59   :  { %8426 = vmatprep.subr.bf16.mxu1 %v8890_v53  ;;  %8448 = vmatprep.subr.bf16.mxu0 %v8891_v62 }
 0xd5c   :  { %8427 = vmatpush3.bf16.msra.mxu1 %v8892_v0  ;;  %8449 = vmatpush3.bf16.msra.mxu0 %v8893_v13  ;;  %v8191_v0 = vcombine.high %v5764_v5, %v5768_v57  ;;  %v8193_v13 = vcombine.high %v5765_v10, %v5769_v45 }
 0xd5d   :  { %8428 = vmatprep.subr.bf16.mxu1 %v8894_v6  ;;  %8450 = vmatprep.subr.bf16.mxu0 %v8895_v17  ;;  %v5756_v6 = vld [vmem:[#allocation13 + $0x140] sm:$0xff] }
 0xd5e   :  { %v5760_v17 = vld [vmem:[#allocation13 + $0x160] sm:$0xff] }
 0xd60   :  { %8429 = vmatpush3.bf16.msra.mxu1 %v8896_v42  ;;  %8451 = vmatpush3.bf16.msra.mxu0 %v8897_v1  ;;  %v5757_v42 = vld [vmem:[#allocation13 + $0x148] sm:$0xff] }
 0xd61   :  { %8430 = vmatprep.subr.bf16.mxu1 %v8898_v11  ;;  %8452 = vmatprep.subr.bf16.mxu0 %v8899_v50  ;;  %v5761_v1 = vld [vmem:[#allocation13 + $0x168] sm:$0xff]  ;;  %v8190_v11 = vcombine.low %v5764_v5, %v5768_v57  ;;  %v8192_v50 = vcombine.low %v5765_v10, %v5769_v45  ;;  %v5774_v45 = vld [vmem:[#allocation13 + $0x1d0] sm:$0xff] }
 0xd64   :  { %8431 = vmatpush3.bf16.msra.mxu1 %v8900_v59  ;;  %8453 = vmatpush3.bf16.msra.mxu0 %v8901_v24  ;;  %v8183_v59 = vcombine.high %v5756_v6, %v5760_v17  ;;  %v8185_v24 = vcombine.high %v5757_v42, %v5761_v1 }
 0xd65   :  { %8432 = vmatprep.subr.bf16.mxu1 %v8902_v14  ;;  %8454 = vmatprep.subr.bf16.mxu0 %v8903_v55  ;;  %v5748_v14 = vld [vmem:[#allocation13 + $0x100] sm:$0xff] }
 0xd66   :  { %v5752_v55 = vld [vmem:[#allocation13 + $0x120] sm:$0xff] }
 0xd67   :  { %v8174_v37 = vcombine.low %v5748_v14, %v5752_v55 }
 0xd68   :  { %8433 = vmatpush3.bf16.msra.mxu1 %v8904_v2  ;;  %8455 = vmatpush3.bf16.msra.mxu0 %v8905_v48  ;;  %v5749_v2 = vld [vmem:[#allocation13 + $0x108] sm:$0xff] }
 0xd69   :  { %8434 = vmatprep.subr.bf16.mxu1 %v8906_v54  ;;  %8456 = vmatprep.subr.bf16.mxu0 %v8907_v34  ;;  %v5753_v48 = vld [vmem:[#allocation13 + $0x128] sm:$0xff]  ;;  %v8182_v54 = vcombine.low %v5756_v6, %v5760_v17  ;;  %v8184_v34 = vcombine.low %v5757_v42, %v5761_v1 }
 0xd6a   :  { %v8176_v61 = vcombine.low %v5749_v2, %v5753_v48  ;;  %v12736_v17 = vld [vmem:[#allocation24_spill] sm:$0xff] }
 0xd6b   :  { %v12737_v42 = vsub.s32 4, %v12736_v17 }
 0xd6c   :  { %8435 = vmatpush3.bf16.msra.mxu1 %v8908_v9  ;;  %8457 = vmatpush3.bf16.msra.mxu0 %v8909_v31  ;;  %v8175_v9 = vcombine.high %v5748_v14, %v5752_v55  ;;  %v8177_v31 = vcombine.high %v5749_v2, %v5753_v48  ;;  %v5766_v48 = vld [vmem:[#allocation13 + $0x190] sm:$0xff] }
 0xd6d   :  { %8436 = vmatprep.subr.bf16.mxu1 %v8910_v36  ;;  %8458 = vmatprep.subr.bf16.mxu0 %v8911_v51  ;;  %v5740_v36 = vld [vmem:[#allocation13 + $0xc0] sm:$0xff]  ;;  %v5443_v1 = vrot.slane %v11492_v47, %v12737_v42  ;;  %v5718_v42 = vld [vmem:[#allocation13 + $0x10] sm:$0xff] }
 0xd6e   :  { %v5744_v51 = vld [vmem:[#allocation13 + $0xe0] sm:$0xff] }
 0xd6f   :  { %v8167_v38 = vcombine.high %v5740_v36, %v5744_v51  ;;  %v8166_v35 = vcombine.low %v5740_v36, %v5744_v51  ;;  %v5771_v36 = vld [vmem:[#allocation13 + $0x1b8] sm:$0xff] }
 0xd70   :  { %8437 = vmatpush3.bf16.msra.mxu1 %v8912_v23  ;;  %8459 = vmatpush3.bf16.msra.mxu0 %v8913_v58  ;;  %v5741_v23 = vld [vmem:[#allocation13 + $0xc8] sm:$0xff] }
 0xd71   :  { %6101 = vmatprep.subr.bf16.mxu1 %v8199_v41  ;;  %6142 = vmatprep.subr.bf16.mxu0 %v8201_v16  ;;  %v5745_v58 = vld [vmem:[#allocation13 + $0xe8] sm:$0xff]  ;;  %v5732_v41 = vld [vmem:[#allocation13 + $0x80] sm:$0xff] }
 0xd72   :  { %v5737_v16 = vld [vmem:[#allocation13 + $0xa8] sm:$0xff] }
 0xe13   :  { %v5320_v8 = vpop.f32.mrf.mxu1  ;;  %v5361_v39 = vpop.f32.mrf.mxu0 }
 0xe14   :  { %v5321_v21 = vadd.f32 %v5320_v8, %v5113_v44  ;;  %v5362_v40 = vadd.f32 %v5361_v39, %v5121_v33  ;;  %v8168_v44 = vcombine.low %v5741_v23, %v5745_v58  ;;  %v8159_v33 = vcombine.high %v5732_v41, %v5736_v43  ;;  %v5724_v39 = vld [vmem:[#allocation13 + $0x40] sm:$0xff] }
 0xe15   :  { %v5322_v46 = vpop.f32.mrf.mxu1  ;;  %v5363_v7 = vpop.f32.mrf.mxu0 }
 0xe16   :  { %v5323_v22 = vadd.f32 %v5322_v46, %v5117_v56  ;;  %v5364_v19 = vadd.f32 %v5363_v7, %v5125_v60  ;;  %v5368_v4 = vmax.f32 %v5321_v21, 0.0  ;;  %v5370_v25 = vmax.f32 %v5362_v40, 0.0  ;;  %v5728_v21 = vld [vmem:[#allocation13 + $0x60] sm:$0xff]  ;;  %v5725_v40 = vld [vmem:[#allocation13 + $0x48] sm:$0xff] }
 0xe17   :  { %v5324_v15 = vpop.f32.mrf.mxu1  ;;  %v5365_v3 = vpop.f32.mrf.mxu0  ;;  %v8158_v60 = vcombine.low %v5732_v41, %v5736_v43  ;;  %v8151_v46 = vcombine.high %v5724_v39, %v5728_v21  ;;  %v5729_v7 = vld [vmem:[#allocation13 + $0x68] sm:$0xff]  ;;  %v5763_v41 = vld [vmem:[#allocation13 + $0x178] sm:$0xff] }
 0xe18   :  { %v5369_v52 = vmax.f32 %v5323_v22, 0.0  ;;  %v5371_v63 = vmax.f32 %v5364_v19, 0.0  ;;  %v5436_v53 = vpack.c.bf16 %v5368_v4, %v5368_v4  ;;  %v5438_v62 = vpack.c.bf16 %v5370_v25, %v5370_v25  ;;  %v5716_v25 = vld [vmem:[#allocation13] sm:$0xff]  ;;  %v5717_v3 = vld [vmem:[#allocation13 + $0x8] sm:$0xff] }
 0xe19   :  { %v5325_v32 = vpop.f32.mrf.mxu1  ;;  %v5366_v26 = vpop.f32.mrf.mxu0  ;;  %v8150_v22 = vcombine.low %v5724_v39, %v5728_v21  ;;  %v8152_v19 = vcombine.low %v5725_v40, %v5729_v7  ;;  %v8153_v4 = vcombine.high %v5725_v40, %v5729_v7  ;;  %v5720_v15 = vld [vmem:[#allocation13 + $0x20] sm:$0xff]  ;;  %v5746_v7 = vld [vmem:[#allocation13 + $0xf0] sm:$0xff] }
 0xe1a   :  { %v5437_v28 = vpack.c.bf16 %v5369_v52, %v5369_v52  ;;  %v5439_v27 = vpack.c.bf16 %v5371_v63, %v5371_v63  ;;  %v8143_v5 = vcombine.high %v5716_v25, %v5720_v15  ;;  %v5721_v52 = vld [vmem:[#allocation13 + $0x28] sm:$0xff]  ;;  %v8142_v63 = vcombine.low %v5716_v25, %v5720_v15  ;;  %v5778_v32 = vld [vmem:[#allocation13 + $0x1f0] sm:$0xff]  ;;  %v5775_v26 = vld [vmem:[#allocation13 + $0x1d8] sm:$0xff] }
 0xe1b   :  { %v8144_v57 = vcombine.low %v5717_v3, %v5721_v52  ;;  %v8145_v10 = vcombine.high %v5717_v3, %v5721_v52  ;;  %v5734_v3 = vld [vmem:[#allocation13 + $0x90] sm:$0xff]  ;;  %v5735_v52 = vld [vmem:[#allocation13 + $0x98] sm:$0xff] }
 0xe1c   :  { %5668 = vmatprep.mubr.bf16.mxu1 %v5437_v28  ;;  %5708 = vmatprep.mubr.bf16.mxu0 %v5439_v27  ;;  %v8203_v28 = vcombine.high %v5774_v45, %v5778_v32  ;;  %v5779_v27 = vld [vmem:[#allocation13 + $0x1f8] sm:$0xff] }
 0xe1d   :  { %5669 = vmatmul.mubr.bf16.vlgmr.msra.gmra.mxu1 %v5436_v53  ;;  %5709 = vmatmul.mubr.bf16.vlgmr.msra.gmra.mxu0 %v5438_v62  ;;  %v8202_v53 = vcombine.low %v5774_v45, %v5778_v32  ;;  %v8204_v62 = vcombine.low %v5775_v26, %v5779_v27 }
 0xe1e   :  { %6102 = vmatpush1.bf16.msra.mxu1 %v8198_v18  ;;  %6143 = vmatpush1.bf16.msra.mxu0 %v8200_v30  ;;  %v8169_v18 = vcombine.high %v5741_v23, %v5745_v58  ;;  %v5733_v30 = vld [vmem:[#allocation13 + $0x88] sm:$0xff] }
 0xe1f   :  { %6103 = vmatprep.subr.bf16.mxu1 %v8191_v0  ;;  %6144 = vmatprep.subr.bf16.mxu0 %v8193_v13  ;;  %v8161_v56 = vcombine.high %v5733_v30, %v5737_v16  ;;  %v8160_v8 = vcombine.low %v5733_v30, %v5737_v16  ;;  %v8205_v0 = vcombine.high %v5775_v26, %v5779_v27  ;;  %v5726_v26 = vld [vmem:[#allocation13 + $0x50] sm:$0xff]  ;;  %v5727_v27 = vld [vmem:[#allocation13 + $0x58] sm:$0xff] }
 0xe20   :  { %6133 = vmatprep.mubr.bf16.mxu1 %v12733_v29  ;;  %6174 = vmatprep.mubr.bf16.mxu0 %v12733_v29 }
 0xe22   :  { %6104 = vmatpush1.bf16.msra.mxu1 %v8190_v11  ;;  %6145 = vmatpush1.bf16.msra.mxu0 %v8192_v50 }
 0xe23   :  { %6105 = vmatprep.subr.bf16.mxu1 %v8183_v59  ;;  %6146 = vmatprep.subr.bf16.mxu0 %v8185_v24 }
 0xe26   :  { %6106 = vmatpush1.bf16.msra.mxu1 %v8182_v54  ;;  %6147 = vmatpush1.bf16.msra.mxu0 %v8184_v34 }
 0xe27   :  { %6107 = vmatprep.subr.bf16.mxu1 %v8175_v9  ;;  %6148 = vmatprep.subr.bf16.mxu0 %v8177_v31  ;;  %v5770_v9 = vld [vmem:[#allocation13 + $0x1b0] sm:$0xff]  ;;  %v5767_v31 = vld [vmem:[#allocation13 + $0x198] sm:$0xff] }
 0xe28   :  { %v8195_v58 = vcombine.high %v5766_v48, %v5770_v9  ;;  %v8194_v43 = vcombine.low %v5766_v48, %v5770_v9  ;;  %v8196_v30 = vcombine.low %v5767_v31, %v5771_v36  ;;  %v8914_v9 = vld [vmem:[#allocation14 + $0xe0] ss:$16 sps:$4 sm:$0xff]  }
 0xe2a   :  { %6108 = vmatpush1.bf16.msra.mxu1 %v8174_v37  ;;  %6149 = vmatpush1.bf16.msra.mxu0 %v8176_v61  ;;  %v8197_v37 = vcombine.high %v5767_v31, %v5771_v36  ;;  %v5758_v61 = vld [vmem:[#allocation13 + $0x150] sm:$0xff] }
 0xe2b   :  { %6109 = vmatprep.subr.bf16.mxu1 %v8167_v38  ;;  %6150 = vmatprep.subr.bf16.mxu0 %v8169_v18  ;;  %v5762_v38 = vld [vmem:[#allocation13 + $0x170] sm:$0xff]  ;;  %v5759_v18 = vld [vmem:[#allocation13 + $0x158] sm:$0xff] }
 0xe2c   :  { %v8187_v16 = vcombine.high %v5758_v61, %v5762_v38  ;;  %v8188_v39 = vcombine.low %v5759_v18, %v5763_v41  ;;  %v8917_v31 = vld [vmem:[#allocation14 + $0x2e0] ss:$16 sps:$4 sm:$0xff]   ;;  %v8922_v36 = vld [vmem:[#allocation14 + $0xc4] ss:$16 sps:$4 sm:$0xff]  }
 0xe2e   :  { %6110 = vmatpush1.bf16.msra.mxu1 %v8166_v35  ;;  %6151 = vmatpush1.bf16.msra.mxu0 %v8168_v44  ;;  %v8189_v35 = vcombine.high %v5759_v18, %v5763_v41  ;;  %v5750_v44 = vld [vmem:[#allocation13 + $0x110] sm:$0xff] }
 0xe2f   :  { %6111 = vmatprep.subr.bf16.mxu1 %v8159_v33  ;;  %6152 = vmatprep.subr.bf16.mxu0 %v8161_v56  ;;  %v5754_v33 = vld [vmem:[#allocation13 + $0x130] sm:$0xff]  ;;  %v5751_v56 = vld [vmem:[#allocation13 + $0x118] sm:$0xff] }
 0xe30   :  { %v8179_v21 = vcombine.high %v5750_v44, %v5754_v33  ;;  %v8926_v18 = vld [vmem:[#allocation14 + $0xa0] ss:$16 sps:$4 sm:$0xff]  }
 0xe31   :  { %v8929_v41 = vld [vmem:[#allocation14 + $0x2a0] ss:$16 sps:$4 sm:$0xff]  }
 0xe32   :  { %6112 = vmatpush1.bf16.msra.mxu1 %v8158_v60  ;;  %6153 = vmatpush1.bf16.msra.mxu0 %v8160_v8  ;;  %v5755_v60 = vld [vmem:[#allocation13 + $0x138] sm:$0xff]  ;;  %v8186_v8 = vcombine.low %v5758_v61, %v5762_v38  ;;  %v8928_v61 = vld [vmem:[#allocation14 + $0xa4] ss:$16 sps:$4 sm:$0xff]  }
 0xe33   :  { %6113 = vmatprep.subr.bf16.mxu1 %v8151_v46  ;;  %6154 = vmatprep.subr.bf16.mxu0 %v8153_v4  ;;  %v8181_v40 = vcombine.high %v5751_v56, %v5755_v60  ;;  %v5742_v46 = vld [vmem:[#allocation13 + $0xd0] sm:$0xff]  ;;  %v8178_v4 = vcombine.low %v5750_v44, %v5754_v33  ;;  %v8180_v25 = vcombine.low %v5751_v56, %v5755_v60 }
 0xe34   :  { %v8171_v15 = vcombine.high %v5742_v46, %v5746_v7  ;;  %v8931_v38 = vld [vmem:[#allocation14 + $0x2a4] ss:$16 sps:$4 sm:$0xff]   ;;  %v8938_v33 = vld [vmem:[#allocation14 + $0x60] ss:$16 sps:$4 sm:$0xff]  }
 0xe35   :  { %v8943_v44 = vld [vmem:[#allocation14 + $0x264] ss:$16 sps:$4 sm:$0xff]   ;;  %v8941_v56 = vld [vmem:[#allocation14 + $0x260] ss:$16 sps:$4 sm:$0xff]  }
 0xe36   :  { %6114 = vmatpush1.bf16.msra.mxu1 %v8150_v22  ;;  %6155 = vmatpush1.bf16.msra.mxu0 %v8152_v19  ;;  %v5743_v22 = vld [vmem:[#allocation13 + $0xd8] sm:$0xff]  ;;  %v8946_v60 = vld [vmem:[#allocation14 + $0x44] ss:$16 sps:$4 sm:$0xff]  }
 0xe37   :  { %6115 = vmatprep.subr.bf16.mxu1 %v8143_v5  ;;  %6156 = vmatprep.subr.bf16.mxu0 %v8145_v10  ;;  %v5747_v19 = vld [vmem:[#allocation13 + $0xf8] sm:$0xff]  ;;  %v5738_v5 = vld [vmem:[#allocation13 + $0xb0] sm:$0xff] }
 0xe38   :  { %v8172_v10 = vcombine.low %v5743_v22, %v5747_v19  ;;  %v8163_v45 = vcombine.high %v5734_v3, %v5738_v5 }
 0xe3a   :  { %6116 = vmatpush1.bf16.msra.mxu1 %v8142_v63  ;;  %6157 = vmatpush1.bf16.msra.mxu0 %v8144_v57  ;;  %v5739_v63 = vld [vmem:[#allocation13 + $0xb8] sm:$0xff]  ;;  %v8170_v57 = vcombine.low %v5742_v46, %v5746_v7  ;;  %v8952_v46 = vld [vmem:[#allocation14 + $0x24] ss:$16 sps:$4 sm:$0xff]   ;;  %v8953_v7 = vld [vmem:[#allocation14 + $0x220] ss:$16 sps:$4 sm:$0xff]  }
 0xe3b   :  { %6183 = vmatprep.subr.bf16.mxu1 %v8203_v28  ;;  %6224 = vmatprep.subr.bf16.mxu0 %v8205_v0  ;;  %v8165_v32 = vcombine.high %v5735_v52, %v5739_v63  ;;  %v5730_v28 = vld [vmem:[#allocation13 + $0x70] sm:$0xff]  ;;  %v8164_v0 = vcombine.low %v5735_v52, %v5739_v63 }
 0xe3c   :  { %v8965_v52 = vld [vmem:[#allocation14 + $0x3e0] ss:$16 sps:$4 sm:$0xff]   ;;  %v8970_v63 = vld [vmem:[#allocation14 + $0x1c4] ss:$16 sps:$4 sm:$0xff]  }
 0xedd   :  { %v8438_v13 = vpop.f32.mrf.mxu1  ;;  %v8460_v6 = vpop.f32.mrf.mxu0 }
 0xedf   :  { %v8439_v11 = vpop.f32.mrf.mxu1  ;;  %v8461_v50 = vpop.f32.mrf.mxu0 }
 0xee0   :  { %v8440_v59 = vadd.f32 %v8439_v11, %v8438_v13  ;;  %v8462_v2 = vadd.f32 %v8461_v50, %v8460_v6  ;;  %v8155_v13 = vcombine.high %v5726_v26, %v5730_v28  ;;  %v5719_v11 = vld [vmem:[#allocation13 + $0x18] sm:$0xff] }
 0xee1   :  { %v8441_v24 = vpop.f32.mrf.mxu1  ;;  %v8463_v14 = vpop.f32.mrf.mxu0  ;;  %v5723_v50 = vld [vmem:[#allocation13 + $0x38] sm:$0xff] }
 0xee2   :  { %v5671_v55 = vadd.f32 %v8440_v59, %v5443_v1  ;;  %v5722_v1 = vld [vmem:[#allocation13 + $0x30] sm:$0xff]  ;;  %v8154_v59 = vcombine.low %v5726_v26, %v5730_v28  ;;  %v8148_v48 = vcombine.low %v5719_v11, %v5723_v50 }
 0xee3   :  { %v8442_v54 = vpop.f32.mrf.mxu1  ;;  %v8464_v34 = vpop.f32.mrf.mxu0  ;;  %v8147_v14 = vcombine.high %v5718_v42, %v5722_v1  ;;  %v8979_v26 = vld [vmem:[#allocation14 + $0x3a4] ss:$16 sps:$4 sm:$0xff]   ;;  %v8974_v28 = vld [vmem:[#allocation14 + $0x1a0] ss:$16 sps:$4 sm:$0xff]  }
 0xee4   :  { %v5711_v51 = vadd.f32 %v8462_v2, %v5671_v55  ;;  %v8149_v55 = vcombine.high %v5719_v11, %v5723_v50  ;;  %v8146_v2 = vcombine.low %v5718_v42, %v5722_v1  ;;  %v8916_v54 = vld [vmem:[#allocation14 + $0xe4] ss:$16 sps:$4 sm:$0xff]   ;;  %v8986_v1 = vld [vmem:[#allocation14 + $0x160] ss:$16 sps:$4 sm:$0xff]  }
 0xee5   :  { %v8919_v34 = vld [vmem:[#allocation14 + $0x2e4] ss:$16 sps:$4 sm:$0xff]   ;;  %v8989_v11 = vld [vmem:[#allocation14 + $0x360] ss:$16 sps:$4 sm:$0xff]  }
 0xee6   :  { %v11522_v23 = vpack.c.bf16 %v5711_v51, %v5711_v51  ;;  %v8925_v51 = vld [vmem:[#allocation14 + $0x2c4] ss:$16 sps:$4 sm:$0xff]  }
 0xee7   :  { %v8991_v42 = vld [vmem:[#allocation14 + $0x364] ss:$16 sps:$4 sm:$0xff]  }
 0xee8   :  { %6134 = vmatmul.mubr.bf16.vlgmr.msra.gmra.mxu1 %v11522_v23  ;;  %6175 = vmatmul.mubr.bf16.vlgmr.msra.gmra.mxu0 %v11522_v23  ;;  %v8994_v50 = vld [vmem:[#allocation14 + $0x144] ss:$16 sps:$4 sm:$0xff]  }
 0xee9   :  { %6184 = vmatpush1.bf16.msra.mxu1 %v8202_v53  ;;  %6225 = vmatpush1.bf16.msra.mxu0 %v8204_v62  ;;  %v5731_v53 = vld [vmem:[#allocation13 + $0x78] sm:$0xff]  ;;  %v8162_v62 = vcombine.low %v5734_v3, %v5738_v5  ;;  %v8967_v3 = vld [vmem:[#allocation14 + $0x3e4] ss:$16 sps:$4 sm:$0xff]   ;;  %v8962_v5 = vld [vmem:[#allocation14 + $0x1e0] ss:$16 sps:$4 sm:$0xff]  }
 0xeea   :  { %6185 = vmatprep.subr.bf16.mxu1 %v8195_v58  ;;  %6226 = vmatprep.subr.bf16.mxu0 %v8197_v37  ;;  %v8157_v6 = vcombine.high %v5727_v27, %v5731_v53  ;;  %v8156_v24 = vcombine.low %v5727_v27, %v5731_v53  ;;  %v8920_v58 = vld [vmem:[#allocation14 + $0xc0] ss:$16 sps:$4 sm:$0xff]   ;;  %v8982_v53 = vld [vmem:[#allocation14 + $0x184] ss:$16 sps:$4 sm:$0xff]  }
 0xeeb   :  { %6215 = vmatprep.mubr.bf16.mxu1 %v12733_v29  ;;  %6256 = vmatprep.mubr.bf16.mxu0 %v12733_v29  ;;  %v8173_v29 = vcombine.high %v5743_v22, %v5747_v19  ;;  %v8923_v37 = vld [vmem:[#allocation14 + $0x2c0] ss:$16 sps:$4 sm:$0xff]   ;;  %v8955_v22 = vld [vmem:[#allocation14 + $0x224] ss:$16 sps:$4 sm:$0xff]  }
 0xeec   :  { %v8958_v19 = vld [vmem:[#allocation14 + $0x4] ss:$16 sps:$4 sm:$0xff]   ;;  %v8977_v27 = vld [vmem:[#allocation14 + $0x3a0] ss:$16 sps:$4 sm:$0xff]  }
 0xeed   :  { %6186 = vmatpush1.bf16.msra.mxu1 %v8194_v43  ;;  %6227 = vmatpush1.bf16.msra.mxu0 %v8196_v30  ;;  %v8934_v43 = vld [vmem:[#allocation14 + $0x84] ss:$16 sps:$4 sm:$0xff]  }
 0xeee   :  { %6187 = vmatprep.subr.bf16.mxu1 %v8187_v16  ;;  %6228 = vmatprep.subr.bf16.mxu0 %v8189_v35  ;;  %v8937_v30 = vld [vmem:[#allocation14 + $0x284] ss:$16 sps:$4 sm:$0xff]   ;;  %v8932_v16 = vld [vmem:[#allocation14 + $0x80] ss:$16 sps:$4 sm:$0xff]  }
 0xeef   :  { %v8940_v35 = vld [vmem:[#allocation14 + $0x64] ss:$16 sps:$4 sm:$0xff]  }
 0xef1   :  { %6188 = vmatpush1.bf16.msra.mxu1 %v8186_v8  ;;  %6229 = vmatpush1.bf16.msra.mxu0 %v8188_v39  ;;  %v8949_v8 = vld [vmem:[#allocation14 + $0x244] ss:$16 sps:$4 sm:$0xff]   ;;  %v8944_v39 = vld [vmem:[#allocation14 + $0x40] ss:$16 sps:$4 sm:$0xff]  }
 0xef2   :  { %6189 = vmatprep.subr.bf16.mxu1 %v8179_v21  ;;  %6230 = vmatprep.subr.bf16.mxu0 %v8181_v40  ;;  %v8947_v21 = vld [vmem:[#allocation14 + $0x240] ss:$16 sps:$4 sm:$0xff]  }
 0xef3   :  { %v8950_v40 = vld [vmem:[#allocation14 + $0x20] ss:$16 sps:$4 sm:$0xff]  }
 0xef5   :  { %6190 = vmatpush1.bf16.msra.mxu1 %v8178_v4  ;;  %6231 = vmatpush1.bf16.msra.mxu0 %v8180_v25  ;;  %v8961_v4 = vld [vmem:[#allocation14 + $0x204] ss:$16 sps:$4 sm:$0xff]   ;;  %v8956_v25 = vld [vmem:[#allocation14] ss:$16 sps:$4 sm:$0xff]  }
 0xef6   :  { %6191 = vmatprep.subr.bf16.mxu1 %v8171_v15  ;;  %6232 = vmatprep.subr.bf16.mxu0 %v8173_v29  ;;  %v8959_v15 = vld [vmem:[#allocation14 + $0x200] ss:$16 sps:$4 sm:$0xff]   ;;  %v8964_v29 = vld [vmem:[#allocation14 + $0x1e4] ss:$16 sps:$4 sm:$0xff]  }
 0xef9   :  { %6192 = vmatpush1.bf16.msra.mxu1 %v8170_v57  ;;  %6233 = vmatpush1.bf16.msra.mxu0 %v8172_v10  ;;  %v8973_v57 = vld [vmem:[#allocation14 + $0x3c4] ss:$16 sps:$4 sm:$0xff]   ;;  %v8968_v10 = vld [vmem:[#allocation14 + $0x1c0] ss:$16 sps:$4 sm:$0xff]  }
 0xefa   :  { %6193 = vmatprep.subr.bf16.mxu1 %v8163_v45  ;;  %6234 = vmatprep.subr.bf16.mxu0 %v8165_v32  ;;  %v8971_v45 = vld [vmem:[#allocation14 + $0x3c0] ss:$16 sps:$4 sm:$0xff]   ;;  %v8976_v32 = vld [vmem:[#allocation14 + $0x1a4] ss:$16 sps:$4 sm:$0xff]  }
 0xefd   :  { %6194 = vmatpush1.bf16.msra.mxu1 %v8162_v62  ;;  %6235 = vmatpush1.bf16.msra.mxu0 %v8164_v0  ;;  %v8985_v62 = vld [vmem:[#allocation14 + $0x384] ss:$16 sps:$4 sm:$0xff]   ;;  %v8980_v0 = vld [vmem:[#allocation14 + $0x180] ss:$16 sps:$4 sm:$0xff]  }
 0xefe   :  { %6195 = vmatprep.subr.bf16.mxu1 %v8155_v13  ;;  %6236 = vmatprep.subr.bf16.mxu0 %v8157_v6  ;;  %v8983_v13 = vld [vmem:[#allocation14 + $0x380] ss:$16 sps:$4 sm:$0xff]   ;;  %v8988_v6 = vld [vmem:[#allocation14 + $0x164] ss:$16 sps:$4 sm:$0xff]  }
 0xf01   :  { %6196 = vmatpush1.bf16.msra.mxu1 %v8154_v59  ;;  %6237 = vmatpush1.bf16.msra.mxu0 %v8156_v24  ;;  %v8997_v59 = vld [vmem:[#allocation14 + $0x344] ss:$16 sps:$4 sm:$0xff]   ;;  %v8992_v24 = vld [vmem:[#allocation14 + $0x140] ss:$16 sps:$4 sm:$0xff]  }
 0xf02   :  { %6197 = vmatprep.subr.bf16.mxu1 %v8147_v14  ;;  %6238 = vmatprep.subr.bf16.mxu0 %v8149_v55  ;;  %v8995_v14 = vld [vmem:[#allocation14 + $0x340] ss:$16 sps:$4 sm:$0xff]   ;;  %v9000_v55 = vld [vmem:[#allocation14 + $0x124] ss:$16 sps:$4 sm:$0xff]  }
 0xf05   :  { %6198 = vmatpush1.bf16.msra.mxu1 %v8146_v2  ;;  %6239 = vmatpush1.bf16.msra.mxu0 %v8148_v48  ;;  %v9003_v2 = vld [vmem:[#allocation14 + $0x324] ss:$16 sps:$4 sm:$0xff]   ;;  %v8998_v48 = vld [vmem:[#allocation14 + $0x120] ss:$16 sps:$4 sm:$0xff]  }
 0xf06   :  { %7158 = vmatprep.subr.bf16.mxu1 %v8916_v54  ;;  %7199 = vmatprep.subr.bf16.mxu0 %v8919_v34  ;;  %v9001_v54 = vld [vmem:[#allocation14 + $0x320] ss:$16 sps:$4 sm:$0xff]   ;;  %v9006_v34 = vld [vmem:[#allocation14 + $0x104] ss:$16 sps:$4 sm:$0xff]  }
 0xf08   :  { %6216 = vmatmul.mubr.bf16.vlgmr.msra.gmra.mxu1 %v11522_v23  ;;  %6257 = vmatmul.mubr.bf16.vlgmr.msra.gmra.mxu0 %v11522_v23  ;;  %v8935_v23 = vld [vmem:[#allocation14 + $0x280] ss:$16 sps:$4 sm:$0xff]  }
 0xf09   :  { %7159 = vmatpush1.bf16.msra.mxu1 %v8914_v9  ;;  %7200 = vmatpush1.bf16.msra.mxu0 %v8917_v31  ;;  %v9009_v9 = vld [vmem:[#allocation14 + $0x304] ss:$16 sps:$4 sm:$0xff]   ;;  %v9004_v31 = vld [vmem:[#allocation14 + $0x100] ss:$16 sps:$4 sm:$0xff]  }
 0xf0a   :  { %7160 = vmatprep.subr.bf16.mxu1 %v8922_v36  ;;  %7201 = vmatprep.subr.bf16.mxu0 %v8925_v51  ;;  %v9007_v36 = vld [vmem:[#allocation14 + $0x300] ss:$16 sps:$4 sm:$0xff]   ;;  %v9012_v51 = vld [vmem:[#allocation14 + $0xec] ss:$16 sps:$4 sm:$0xff]  }
 0xf0d   :  { %7161 = vmatpush1.bf16.msra.mxu1 %v8920_v58  ;;  %7202 = vmatpush1.bf16.msra.mxu0 %v8923_v37  ;;  %v9015_v58 = vld [vmem:[#allocation14 + $0x2ec] ss:$16 sps:$4 sm:$0xff]  }
 0xf0e   :  { %7162 = vmatprep.subr.bf16.mxu1 %v8928_v61  ;;  %7203 = vmatprep.subr.bf16.mxu0 %v8931_v38 }
 0xf11   :  { %7163 = vmatpush1.bf16.msra.mxu1 %v8926_v18  ;;  %7204 = vmatpush1.bf16.msra.mxu0 %v8929_v41 }
 0xf12   :  { %7164 = vmatprep.subr.bf16.mxu1 %v8934_v43  ;;  %7205 = vmatprep.subr.bf16.mxu0 %v8937_v30 }
 0xf15   :  { %7165 = vmatpush1.bf16.msra.mxu1 %v8932_v16  ;;  %7206 = vmatpush1.bf16.msra.mxu0 %v8935_v23  ;;  %v175_v23 = vld [vmem:[%s11595_s12 + $0x20] sm:$0x3] }
 0xf16   :  { %7166 = vmatprep.subr.bf16.mxu1 %v8940_v35  ;;  %7207 = vmatprep.subr.bf16.mxu0 %v8943_v44  ;;  %v177_v35 = vld [vmem:[%s11595_s12 + $0x30] sm:$0x3]  ;;  %v6283_v44 = vsub.s32 5, %v12736_v17 }
 0xf19   :  { %7167 = vmatpush1.bf16.msra.mxu1 %v8938_v33  ;;  %7208 = vmatpush1.bf16.msra.mxu0 %v8941_v56  ;;  %v176_v33 = vld [vmem:[%s11595_s12 + $0x28] sm:$0x3]  ;;  %v178_v56 = vld [vmem:[%s11595_s12 + $0x38] sm:$0x3] }
 0xf1a   :  { %7168 = vmatprep.subr.bf16.mxu1 %v8946_v60  ;;  %7209 = vmatprep.subr.bf16.mxu0 %v8949_v8  ;;  %v12738_v60 = vld [vmem:[#allocation26_spill] sm:$0xff] }
 0xf1b   :  { %v6333_v8 = vrot.slane %v175_v23, %v12738_v60 }
 0xf1d   :  { %7169 = vmatpush1.bf16.msra.mxu1 %v8944_v39  ;;  %7210 = vmatpush1.bf16.msra.mxu0 %v8947_v21  ;;  %v6341_v39 = vrot.slane %v177_v35, %v12738_v60  ;;  %v6304_v21 = vpop.permute.xlu0 %6303 }
 0xf1e   :  { %7170 = vmatprep.subr.bf16.mxu1 %v8952_v46  ;;  %7211 = vmatprep.subr.bf16.mxu0 %v8955_v22 }
 0xf21   :  { %7171 = vmatpush1.bf16.msra.mxu1 %v8950_v40  ;;  %7212 = vmatpush1.bf16.msra.mxu0 %v8953_v7  ;;  %v12739_v40 = vld [vmem:[#allocation25_spill] sm:$0xff] }
 0xf22   :  { %7172 = vmatprep.subr.bf16.mxu1 %v8958_v19  ;;  %7213 = vmatprep.subr.bf16.mxu0 %v8961_v4  ;;  %v6309_v46 = vrot.slane %v175_v23, %v12739_v40  ;;  %v6317_v7 = vrot.slane %v177_v35, %v12739_v40  ;;  %v6313_v4 = vrot.slane %v176_v33, %v12739_v40 }
 0xf25   :  { %7173 = vmatpush1.bf16.msra.mxu1 %v8956_v25  ;;  %7214 = vmatpush1.bf16.msra.mxu0 %v8959_v15  ;;  %v6321_v25 = vrot.slane %v178_v56, %v12739_v40  ;;  %v6337_v15 = vrot.slane %v176_v33, %v12738_v60  ;;  %v9010_v33 = vld [vmem:[#allocation14 + $0xe8] ss:$16 sps:$4 sm:$0xff]  }
 0xf26   :  { %7174 = vmatprep.subr.bf16.mxu1 %v8964_v29  ;;  %7215 = vmatprep.subr.bf16.mxu0 %v8967_v3  ;;  %v6345_v29 = vrot.slane %v178_v56, %v12738_v60  ;;  %v9013_v56 = vld [vmem:[#allocation14 + $0x2e8] ss:$16 sps:$4 sm:$0xff]  }
 0xf27   :  { %v9016_v40 = vld [vmem:[#allocation14 + $0xc8] ss:$16 sps:$4 sm:$0xff]  }
 0xf29   :  { %7175 = vmatpush2.bf16.msra.mxu1 %v8962_v5  ;;  %7216 = vmatpush2.bf16.msra.mxu0 %v8965_v52  ;;  %v6284_v5 = vrot.slane %v11492_v47, %v6283_v44  ;;  %v6347_v47 = vmul.f32 %v6337_v15, %v6304_v21  ;;  %v9033_v15 = vld [vmem:[#allocation14 + $0x28c] ss:$16 sps:$4 sm:$0xff]  }
 0xf2a   :  { %7176 = vmatprep.subr.bf16.mxu1 %v8970_v63  ;;  %7217 = vmatprep.subr.bf16.mxu0 %v8973_v57  ;;  %v6292_v63 = vrot.slane %v11499_v49, %v6283_v44  ;;  %v6346_v57 = vmul.f32 %v6333_v8, %v6304_v21 }
 0xf2d   :  { %7177 = vmatpush2.bf16.msra.mxu1 %v8968_v10  ;;  %7218 = vmatpush2.bf16.msra.mxu0 %v8971_v45  ;;  %v6348_v10 = vmul.f32 %v6341_v39, %v6304_v21  ;;  %v9018_v39 = vld [vmem:[#allocation14 + $0xcc] ss:$16 sps:$4 sm:$0xff]  }
 0xf2e   :  { %7178 = vmatprep.subr.bf16.mxu1 %v8976_v32  ;;  %7219 = vmatprep.subr.bf16.mxu0 %v8979_v26  ;;  %v6288_v32 = vrot.slane %v11506_v12, %v6283_v44  ;;  %v6323_v12 = vmul.f32 %v6313_v4, %v6304_v21  ;;  %v9025_v4 = vld [vmem:[#allocation14 + $0x2a8] ss:$16 sps:$4 sm:$0xff]  }
 0xf31   :  { %7179 = vmatpush2.bf16.msra.mxu1 %v8974_v28  ;;  %7220 = vmatpush2.bf16.msra.mxu0 %v8977_v27  ;;  %v6296_v28 = vrot.slane %v11513_v20, %v6283_v44 }
 0xf32   :  { %7180 = vmatprep.subr.bf16.mxu1 %v8982_v53  ;;  %7221 = vmatprep.subr.bf16.mxu0 %v8985_v62 }
 0xf35   :  { %7181 = vmatpush2.bf16.msra.mxu1 %v8980_v0  ;;  %7222 = vmatpush2.bf16.msra.mxu0 %v8983_v13  ;;  %v6322_v13 = vmul.f32 %v6309_v46, %v6304_v21  ;;  %v9019_v46 = vld [vmem:[#allocation14 + $0x2c8] ss:$16 sps:$4 sm:$0xff]  }
 0xf36   :  { %7182 = vmatprep.subr.bf16.mxu1 %v8988_v6  ;;  %7223 = vmatprep.subr.bf16.mxu0 %v8991_v42  ;;  %v6324_v6 = vmul.f32 %v6317_v7, %v6304_v21  ;;  %v9024_v7 = vld [vmem:[#allocation14 + $0xac] ss:$16 sps:$4 sm:$0xff]  }
 0xf39   :  { %7183 = vmatpush2.bf16.msra.mxu1 %v8986_v1  ;;  %7224 = vmatpush2.bf16.msra.mxu0 %v8989_v11  ;;  %v6349_v11 = vmul.f32 %v6345_v29, %v6304_v21  ;;  %v9028_v29 = vld [vmem:[#allocation14 + $0x88] ss:$16 sps:$4 sm:$0xff]  }
 0xf3a   :  { %7184 = vmatprep.subr.bf16.mxu1 %v8994_v50  ;;  %7225 = vmatprep.subr.bf16.mxu0 %v8997_v59 }
 0xf3d   :  { %7185 = vmatpush2.bf16.msra.mxu1 %v8992_v24  ;;  %7226 = vmatpush2.bf16.msra.mxu0 %v8995_v14  ;;  %v6354_v14 = vrot.slane %v6346_v57, 2  ;;  %v9037_v57 = vld [vmem:[#allocation14 + $0x268] ss:$16 sps:$4 sm:$0xff]  }
 0xf3e   :  { %7186 = vmatprep.subr.bf16.mxu1 %v9000_v55  ;;  %7227 = vmatprep.subr.bf16.mxu0 %v9003_v2  ;;  %v6356_v55 = vrot.slane %v6348_v10, 2  ;;  %v6325_v2 = vmul.f32 %v6321_v25, %v6304_v21  ;;  %v9021_v21 = vld [vmem:[#allocation14 + $0x2cc] ss:$16 sps:$4 sm:$0xff]  }
 0xf3f   :  { %v9030_v25 = vld [vmem:[#allocation14 + $0x8c] ss:$16 sps:$4 sm:$0xff]  }
 0xf40   :  { %v9042_v10 = vld [vmem:[#allocation14 + $0x4c] ss:$16 sps:$4 sm:$0xff]  }
 0xf41   :  { %7187 = vmatpush2.bf16.msra.mxu1 %v8998_v48  ;;  %7228 = vmatpush2.bf16.msra.mxu0 %v9001_v54 }
 0xf42   :  { %7188 = vmatprep.subr.bf16.mxu1 %v9006_v34  ;;  %7229 = vmatprep.subr.bf16.mxu0 %v9009_v9 }
 0xf45   :  { %7189 = vmatpush2.bf16.msra.mxu1 %v9004_v31  ;;  %7230 = vmatpush2.bf16.msra.mxu0 %v9007_v36  ;;  %v6355_v36 = vrot.slane %v6347_v47, 2  ;;  %v9063_v47 = vld [vmem:[#allocation14 + $0x3ec] ss:$16 sps:$4 sm:$0xff]  }
 0xf46   :  { %7240 = vmatprep.subr.bf16.mxu1 %v9012_v51  ;;  %7281 = vmatprep.subr.bf16.mxu0 %v9015_v58  ;;  %v6357_v51 = vrot.slane %v6349_v11, 2  ;;  %v9058_v11 = vld [vmem:[#allocation14 + $0x1e8] ss:$16 sps:$4 sm:$0xff]  }
 0xfa8   :  { %v6135_v37 = vpop.f32.mrf.mxu1  ;;  %v6176_v61 = vpop.f32.mrf.mxu0 }
 0xfaa   :  { %v6137_v38 = vpop.f32.mrf.mxu1  ;;  %v6178_v18 = vpop.f32.mrf.mxu0 }
 0xfac   :  { %v6139_v41 = vpop.f32.mrf.mxu1  ;;  %v6180_v43 = vpop.f32.mrf.mxu0 }
 0xfae   :  { %v6140_v30 = vpop.f32.mrf.mxu1  ;;  %v6181_v16 = vpop.f32.mrf.mxu0 }
 0xfc8   :  { %v6217_v22 = vpop.f32.mrf.mxu1  ;;  %v6258_v19 = vpop.f32.mrf.mxu0 }
 0xfc9   :  { %v6269_v3 = vrot.slane %v6217_v22, 2  ;;  %v6271_v52 = vrot.slane %v6258_v19, 2  ;;  %v9027_v22 = vld [vmem:[#allocation14 + $0x2ac] ss:$16 sps:$4 sm:$0xff]   ;;  %v9022_v19 = vld [vmem:[#allocation14 + $0xa8] ss:$16 sps:$4 sm:$0xff]  }
 0xfca   :  { %v6219_v45 = vpop.f32.mrf.mxu1  ;;  %v6260_v26 = vpop.f32.mrf.mxu0 }
 0xfcb   :  { %v6277_v27 = vadd.f32 %v6269_v3, %v6135_v37  ;;  %v6279_v53 = vadd.f32 %v6271_v52, %v6176_v61  ;;  %v6270_v62 = vrot.slane %v6219_v45, 2  ;;  %v6272_v0 = vrot.slane %v6260_v26, 2  ;;  %v9031_v3 = vld [vmem:[#allocation14 + $0x288] ss:$16 sps:$4 sm:$0xff]   ;;  %v9039_v52 = vld [vmem:[#allocation14 + $0x26c] ss:$16 sps:$4 sm:$0xff]  }
 0xfcc   :  { %v6221_v42 = vpop.f32.mrf.mxu1  ;;  %v6262_v1 = vpop.f32.mrf.mxu0  ;;  %v9045_v45 = vld [vmem:[#allocation14 + $0x24c] ss:$16 sps:$4 sm:$0xff]   ;;  %v9043_v26 = vld [vmem:[#allocation14 + $0x248] ss:$16 sps:$4 sm:$0xff]  }
 0xfcd   :  { %v6297_v50 = vadd.f32 %v6284_v5, %v6277_v27  ;;  %v6299_v49 = vadd.f32 %v6292_v63, %v6279_v53  ;;  %v6278_v59 = vadd.f32 %v6270_v62, %v6137_v38  ;;  %v6280_v24 = vadd.f32 %v6272_v0, %v6178_v18  ;;  %v9036_v5 = vld [vmem:[#allocation14 + $0x6c] ss:$16 sps:$4 sm:$0xff]   ;;  %v9034_v63 = vld [vmem:[#allocation14 + $0x68] ss:$16 sps:$4 sm:$0xff]  }
 0xfce   :  { %v6222_v48 = vpop.f32.mrf.mxu1  ;;  %v6263_v20 = vpop.f32.mrf.mxu0  ;;  %v9051_v27 = vld [vmem:[#allocation14 + $0x22c] ss:$16 sps:$4 sm:$0xff]   ;;  %v9046_v53 = vld [vmem:[#allocation14 + $0x28] ss:$16 sps:$4 sm:$0xff]  }
 0xfcf   :  { %v6326_v54 = vadd.f32 %v6322_v13, %v6297_v50  ;;  %v6328_v34 = vadd.f32 %v6324_v6, %v6299_v49  ;;  %v6298_v9 = vadd.f32 %v6288_v32, %v6278_v59  ;;  %v6300_v31 = vadd.f32 %v6296_v28, %v6280_v24  ;;  %v9040_v32 = vld [vmem:[#allocation14 + $0x48] ss:$16 sps:$4 sm:$0xff]   ;;  %v9048_v28 = vld [vmem:[#allocation14 + $0x2c] ss:$16 sps:$4 sm:$0xff]  }
 0xfd0   :  { %v9049_v62 = vld [vmem:[#allocation14 + $0x228] ss:$16 sps:$4 sm:$0xff]   ;;  %v9054_v0 = vld [vmem:[#allocation14 + $0xc] ss:$16 sps:$4 sm:$0xff]  }
 0xfd1   :  { %v6362_v58 = vadd.f32 %v6354_v14, %v6326_v54  ;;  %v6364_v37 = vadd.f32 %v6356_v55, %v6328_v34  ;;  %v6327_v61 = vadd.f32 %v6323_v12, %v6298_v9  ;;  %v6329_v41 = vadd.f32 %v6325_v2, %v6300_v31  ;;  %v9057_v13 = vld [vmem:[#allocation14 + $0x20c] ss:$16 sps:$4 sm:$0xff]   ;;  %v9052_v6 = vld [vmem:[#allocation14 + $0x8] ss:$16 sps:$4 sm:$0xff]  }
 0xfd2   :  { %v9055_v42 = vld [vmem:[#allocation14 + $0x208] ss:$16 sps:$4 sm:$0xff]   ;;  %v9060_v1 = vld [vmem:[#allocation14 + $0x1ec] ss:$16 sps:$4 sm:$0xff]  }
 0xfd3   :  { %v6363_v43 = vadd.f32 %v6355_v36, %v6327_v61  ;;  %v6365_v30 = vadd.f32 %v6357_v51, %v6329_v41  ;;  %v6366_v38 = vmax.f32 %v6362_v58, 0.0  ;;  %v6368_v18 = vmax.f32 %v6364_v37, 0.0  ;;  %v9061_v50 = vld [vmem:[#allocation14 + $0x3e8] ss:$16 sps:$4 sm:$0xff]   ;;  %v9066_v49 = vld [vmem:[#allocation14 + $0x1cc] ss:$16 sps:$4 sm:$0xff]  }
 0xfd4   :  { %v9069_v59 = vld [vmem:[#allocation14 + $0x3cc] ss:$16 sps:$4 sm:$0xff]   ;;  %v9064_v24 = vld [vmem:[#allocation14 + $0x1c8] ss:$16 sps:$4 sm:$0xff]  }
 0xfd5   :  { %v6367_v16 = vmax.f32 %v6363_v43, 0.0  ;;  %v6369_v23 = vmax.f32 %v6365_v30, 0.0  ;;  %v11555_v60 = vpack.c.bf16 %v6366_v38, %v6366_v38  ;;  %v11557_v8 = vpack.c.bf16 %v6368_v18, %v6368_v18  ;;  %v9067_v14 = vld [vmem:[#allocation14 + $0x3c8] ss:$16 sps:$4 sm:$0xff]   ;;  %v9072_v55 = vld [vmem:[#allocation14 + $0x1ac] ss:$16 sps:$4 sm:$0xff]  }
 0xfd6   :  { %v9075_v12 = vld [vmem:[#allocation14 + $0x3ac] ss:$16 sps:$4 sm:$0xff]   ;;  %v9070_v2 = vld [vmem:[#allocation14 + $0x1a8] ss:$16 sps:$4 sm:$0xff]  }
 0xfd7   :  { %v6499_v35 = vpack.c.bf16 %v6367_v16, %v6367_v16  ;;  %v6501_v44 = vpack.c.bf16 %v6369_v23, %v6369_v23  ;;  %v9073_v48 = vld [vmem:[#allocation14 + $0x3a8] ss:$16 sps:$4 sm:$0xff]   ;;  %v9078_v20 = vld [vmem:[#allocation14 + $0x18c] ss:$16 sps:$4 sm:$0xff]  }
 0xfd8   :  { %v9081_v54 = vld [vmem:[#allocation14 + $0x38c] ss:$16 sps:$4 sm:$0xff]   ;;  %v9076_v34 = vld [vmem:[#allocation14 + $0x188] ss:$16 sps:$4 sm:$0xff]  }
 0xfd9   :  { %7190 = vmatprep.mubr.bf16.mxu1 %v6499_v35  ;;  %7231 = vmatprep.mubr.bf16.mxu0 %v6501_v44  ;;  %v9079_v9 = vld [vmem:[#allocation14 + $0x388] ss:$16 sps:$4 sm:$0xff]   ;;  %v9084_v31 = vld [vmem:[#allocation14 + $0x16c] ss:$16 sps:$4 sm:$0xff]  }
 0xfda   :  { %7191 = vmatmul.mubr.bf16.vlgmr.msra.gmra.mxu1 %v11555_v60  ;;  %7232 = vmatmul.mubr.bf16.vlgmr.msra.gmra.mxu0 %v11557_v8  ;;  %v9087_v36 = vld [vmem:[#allocation14 + $0x36c] ss:$16 sps:$4 sm:$0xff]   ;;  %v9082_v51 = vld [vmem:[#allocation14 + $0x168] ss:$16 sps:$4 sm:$0xff]  }
 0xfdb   :  { %7241 = vmatpush1.bf16.msra.mxu1 %v9010_v33  ;;  %7282 = vmatpush1.bf16.msra.mxu0 %v9013_v56  ;;  %v9085_v58 = vld [vmem:[#allocation14 + $0x368] ss:$16 sps:$4 sm:$0xff]   ;;  %v9090_v37 = vld [vmem:[#allocation14 + $0x14c] ss:$16 sps:$4 sm:$0xff]  }
 0xfdc   :  { %7272 = vmatprep.mubr.bf16.mxu1 %v6499_v35  ;;  %7313 = vmatprep.mubr.bf16.mxu0 %v6501_v44  ;;  %v9093_v61 = vld [vmem:[#allocation14 + $0x34c] ss:$16 sps:$4 sm:$0xff]   ;;  %v9088_v41 = vld [vmem:[#allocation14 + $0x148] ss:$16 sps:$4 sm:$0xff]  }
 0xfdd   :  { %7242 = vmatprep.subr.bf16.mxu1 %v9018_v39  ;;  %7283 = vmatprep.subr.bf16.mxu0 %v9021_v21  ;;  %v9091_v43 = vld [vmem:[#allocation14 + $0x348] ss:$16 sps:$4 sm:$0xff]   ;;  %v9096_v30 = vld [vmem:[#allocation14 + $0x12c] ss:$16 sps:$4 sm:$0xff]   ;;  %v9108_v21 = vld [vmem:[#allocation16 + $0x70] sm:$0xff]  }
 0xfde   :  { %v9099_v38 = vld [vmem:[#allocation14 + $0x32c] ss:$16 sps:$4 sm:$0xff]   ;;  %v9094_v18 = vld [vmem:[#allocation14 + $0x128] ss:$16 sps:$4 sm:$0xff]  }
 0xfdf   :  { %7243 = vmatpush1.bf16.msra.mxu1 %v9016_v40  ;;  %7284 = vmatpush1.bf16.msra.mxu0 %v9019_v46  ;;  %v9097_v16 = vld [vmem:[#allocation14 + $0x328] ss:$16 sps:$4 sm:$0xff]   ;;  %v9102_v23 = vld [vmem:[#allocation14 + $0x10c] ss:$16 sps:$4 sm:$0xff]   ;;  %v9109_v40 = vld [vmem:[#allocation16 + $0x30] sm:$0xff]  }
 0xfe0   :  { %7244 = vmatprep.subr.bf16.mxu1 %v9024_v7  ;;  %7285 = vmatprep.subr.bf16.mxu0 %v9027_v22  ;;  %v9105_v35 = vld [vmem:[#allocation14 + $0x30c] ss:$16 sps:$4 sm:$0xff]   ;;  %v9100_v44 = vld [vmem:[#allocation14 + $0x108] ss:$16 sps:$4 sm:$0xff]   ;;  %v9112_v22 = vld [vmem:[#allocation16 + $0x60] sm:$0xff]  }
 0xfe1   :  { %v9103_v33 = vld [vmem:[#allocation14 + $0x308] ss:$16 sps:$4 sm:$0xff]  }
 0xfe2   :  { %v9106_v56 = vld [vmem:[#allocation16 + $0x78] sm:$0xff]   ;;  %v9110_v46 = vld [vmem:[#allocation16 + $0x68] sm:$0xff]  }
 0xfe3   :  { %7245 = vmatpush1.bf16.msra.mxu1 %v9022_v19  ;;  %7286 = vmatpush1.bf16.msra.mxu0 %v9025_v4  ;;  %v9107_v39 = vld [vmem:[#allocation16 + $0x38] sm:$0xff]   ;;  %v9111_v7 = vld [vmem:[#allocation16 + $0x28] sm:$0xff]   ;;  %v9113_v19 = vld [vmem:[#allocation16 + $0x20] sm:$0xff]  }
 0xfe4   :  { %7246 = vmatprep.subr.bf16.mxu1 %v9030_v25  ;;  %7287 = vmatprep.subr.bf16.mxu0 %v9033_v15  ;;  %v9114_v4 = vld [vmem:[#allocation16 + $0x58] sm:$0xff]  }
 0xfe5   :  { %v9122_v25 = vld [vmem:[#allocation16 + $0xf8] sm:$0xff]  }
 0xfe6   :  { %v9123_v15 = vld [vmem:[#allocation16 + $0xb8] sm:$0xff]  }
 0xfe7   :  { %7247 = vmatpush1.bf16.msra.mxu1 %v9028_v29  ;;  %7288 = vmatpush1.bf16.msra.mxu0 %v9031_v3  ;;  %v9124_v29 = vld [vmem:[#allocation16 + $0xf0] sm:$0xff]   ;;  %v9115_v3 = vld [vmem:[#allocation16 + $0x18] sm:$0xff]  }
 0xfe8   :  { %7248 = vmatprep.subr.bf16.mxu1 %v9036_v5  ;;  %7289 = vmatprep.subr.bf16.mxu0 %v9039_v52  ;;  %v9126_v5 = vld [vmem:[#allocation16 + $0xe8] sm:$0xff]   ;;  %v9117_v52 = vld [vmem:[#allocation16 + $0x10] sm:$0xff]  }
 0xfeb   :  { %7249 = vmatpush1.bf16.msra.mxu1 %v9034_v63  ;;  %7290 = vmatpush1.bf16.msra.mxu0 %v9037_v57  ;;  %v9118_v63 = vld [vmem:[#allocation16 + $0x48] sm:$0xff]  }
 0xfec   :  { %7250 = vmatprep.subr.bf16.mxu1 %v9042_v10  ;;  %7291 = vmatprep.subr.bf16.mxu0 %v9045_v45  ;;  %v9127_v57 = vld [vmem:[#allocation16 + $0xa8] sm:$0xff]   ;;  %v9128_v10 = vld [vmem:[#allocation16 + $0xe0] sm:$0xff]  }
 0xfed   :  { %v9119_v45 = vld [vmem:[#allocation16 + $0x8] sm:$0xff]  }
 0xfef   :  { %7251 = vmatpush1.bf16.msra.mxu1 %v9040_v32  ;;  %7292 = vmatpush1.bf16.msra.mxu0 %v9043_v26  ;;  %v9120_v32 = vld [vmem:[#allocation16 + $0x40] sm:$0xff]  }
 0xff0   :  { %7252 = vmatprep.subr.bf16.mxu1 %v9048_v28  ;;  %7293 = vmatprep.subr.bf16.mxu0 %v9051_v27  ;;  %v9129_v26 = vld [vmem:[#allocation16 + $0xa0] sm:$0xff]   ;;  %v9130_v28 = vld [vmem:[#allocation16 + $0xd8] sm:$0xff]  }
 0xff1   :  { %v9121_v27 = vld [vmem:[#allocation16] sm:$0xff]  }
 0xff3   :  { %7253 = vmatpush1.bf16.msra.mxu1 %v9046_v53  ;;  %7294 = vmatpush1.bf16.msra.mxu0 %v9049_v62  ;;  %v9131_v53 = vld [vmem:[#allocation16 + $0x98] sm:$0xff]   ;;  %v9132_v62 = vld [vmem:[#allocation16 + $0xd0] sm:$0xff]  }
 0xff4   :  { %7254 = vmatprep.subr.bf16.mxu1 %v9054_v0  ;;  %7295 = vmatprep.subr.bf16.mxu0 %v9057_v13  ;;  %v9133_v0 = vld [vmem:[#allocation16 + $0x90] sm:$0xff]   ;;  %v9134_v13 = vld [vmem:[#allocation16 + $0xc8] sm:$0xff]  }
 0xff7   :  { %7255 = vmatpush1.bf16.msra.mxu1 %v9052_v6  ;;  %7296 = vmatpush1.bf16.msra.mxu0 %v9055_v42  ;;  %v9135_v6 = vld [vmem:[#allocation16 + $0x88] sm:$0xff]   ;;  %v9136_v42 = vld [vmem:[#allocation16 + $0xc0] sm:$0xff]  }
 0xff8   :  { %7256 = vmatprep.subr.bf16.mxu1 %v9060_v1  ;;  %7297 = vmatprep.subr.bf16.mxu0 %v9063_v47  ;;  %v9137_v1 = vld [vmem:[#allocation16 + $0x80] sm:$0xff]  }
 0xff9   :  { %v9314_v47 = vld [vmem:[%s11595_s12] sm:$0xff] }
 0xffb   :  { %7257 = vmatpush2.bf16.msra.mxu1 %v9058_v11  ;;  %7298 = vmatpush2.bf16.msra.mxu0 %v9061_v50  ;;  %v12740_v11 = vld [vmem:[#allocation95_spill] sm:$0xff] }
 0xffc   :  { %7258 = vmatprep.subr.bf16.mxu1 %v9066_v49  ;;  %7299 = vmatprep.subr.bf16.mxu0 %v9069_v59  ;;  %v6505_v50 = vrot.slane %v9314_v47, %v12740_v11  ;;  %v9315_v49 = vld [vmem:[%s11595_s12 + $0x8] sm:$0xff] }
 0xffd   :  { %v6509_v59 = vrot.slane %v9315_v49, %v12740_v11 }
 0xfff   :  { %7259 = vmatpush2.bf16.msra.mxu1 %v9064_v24  ;;  %7300 = vmatpush2.bf16.msra.mxu0 %v9067_v14 }
0x1000   :  { %7260 = vmatprep.subr.bf16.mxu1 %v9072_v55  ;;  %7301 = vmatprep.subr.bf16.mxu0 %v9075_v12 }
0x1003   :  { %7261 = vmatpush2.bf16.msra.mxu1 %v9070_v2  ;;  %7302 = vmatpush2.bf16.msra.mxu0 %v9073_v48 }
0x1004   :  { %7262 = vmatprep.subr.bf16.mxu1 %v9078_v20  ;;  %7303 = vmatprep.subr.bf16.mxu0 %v9081_v54 }
0x1007   :  { %7263 = vmatpush2.bf16.msra.mxu1 %v9076_v34  ;;  %7304 = vmatpush2.bf16.msra.mxu0 %v9079_v9 }
0x1008   :  { %7264 = vmatprep.subr.bf16.mxu1 %v9084_v31  ;;  %7305 = vmatprep.subr.bf16.mxu0 %v9087_v36 }
0x100b   :  { %7265 = vmatpush2.bf16.msra.mxu1 %v9082_v51  ;;  %7306 = vmatpush2.bf16.msra.mxu0 %v9085_v58 }
0x100c   :  { %7266 = vmatprep.subr.bf16.mxu1 %v9090_v37  ;;  %7307 = vmatprep.subr.bf16.mxu0 %v9093_v61 }
0x100f   :  { %7267 = vmatpush2.bf16.msra.mxu1 %v9088_v41  ;;  %7308 = vmatpush2.bf16.msra.mxu0 %v9091_v43  ;;  %v9316_v41 = vld [vmem:[%s11595_s12 + $0x10] sm:$0xff] }
0x1010   :  { %7268 = vmatprep.subr.bf16.mxu1 %v9096_v30  ;;  %7309 = vmatprep.subr.bf16.mxu0 %v9099_v38  ;;  %v6513_v43 = vrot.slane %v9316_v41, %v12740_v11  ;;  %v9317_v30 = vld [vmem:[%s11595_s12 + $0x18] sm:$0xff]  ;;  %s9549_s12 = smov [#allocation17]  }
0x1011   :  { %v6517_v38 = vrot.slane %v9317_v30, %v12740_v11  ;;  %s7678_s11 = sshll.u32 %s9549_s12, 4  ;;  %s7679_s11 = int_to_ptr.vmem [resolvable:$true] %s7678_s11 }
0x1012   :  { %s9498_s16 = scalar_lea.vmem %s7679_s11, 32  ;;  %p9503_p4 = scmp.lt.s32.totalorder %s7679_s11, %s7679_s11 }
0x1013   :  { %7269 = vmatpush2.bf16.msra.mxu1 %v9094_v18  ;;  %7310 = vmatpush2.bf16.msra.mxu0 %v9097_v16  ;;  %p9499_p3 = scmp.ne.s32.totalorder %s7679_s11, %s9498_s16  ;;  %p9504_p5 = scmp.lt.s32.totalorder %s9498_s16, %s9498_s16 }
0x1014   :  { %7270 = vmatprep.subr.bf16.mxu1 %v9102_v23  ;;  %7311 = vmatprep.subr.bf16.mxu0 %v9105_v35 }
0x1015   :  { %p9505_p6 = por %p9504_p5, %p9503_p4 }
0x1017   :  { %7271 = vmatpush2.bf16.msra.mxu1 %v9100_v44  ;;  %7312 = vmatpush2.bf16.msra.mxu0 %v9103_v33  ;;  %p9506_p7 = pnand %p9505_p6, %p9499_p3 }
0x1018   :  { %8466 = vmatprep.subr.bf16.mxu1 %v9106_v56  ;;  %8488 = vmatprep.subr.bf16.mxu0 %v9122_v25 }
0x101a   :  { %7273 = vmatmul.mubr.bf16.vlgmr.msra.gmra.mxu1 %v11555_v60  ;;  %7314 = vmatmul.mubr.bf16.vlgmr.msra.gmra.mxu0 %v11557_v8  ;;  %v9116_v60 = vld [vmem:[#allocation16 + $0x50] sm:$0xff]  }
0x101b   :  { %8467 = vmatpush3.bf16.msra.mxu1 %v9107_v39  ;;  %8489 = vmatpush3.bf16.msra.mxu0 %v9123_v15  ;;  %v9125_v8 = vld [vmem:[#allocation16 + $0xb0] sm:$0xff]  }
0x101c   :  { %8468 = vmatprep.subr.bf16.mxu1 %v9108_v21  ;;  %8490 = vmatprep.subr.bf16.mxu0 %v9124_v29 }
0x101f   :  { %8469 = vmatpush3.bf16.msra.mxu1 %v9109_v40  ;;  %8491 = vmatpush3.bf16.msra.mxu0 %v9125_v8  ;;  %v7396_v8 = vsub.s32 7, %v12736_v17 }
0x1020   :  { %8470 = vmatprep.subr.bf16.mxu1 %v9110_v46  ;;  %8492 = vmatprep.subr.bf16.mxu0 %v9126_v5 }
0x1021   :  { %v7397_v5 = vrot.slane %v9314_v47, %v7396_v8 }
0x1023   :  { %8471 = vmatpush3.bf16.msra.mxu1 %v9111_v7  ;;  %8493 = vmatpush3.bf16.msra.mxu0 %v9127_v57 }
0x1024   :  { %8472 = vmatprep.subr.bf16.mxu1 %v9112_v22  ;;  %8494 = vmatprep.subr.bf16.mxu0 %v9128_v10 }
0x1027   :  { %8473 = vmatpush3.bf16.msra.mxu1 %v9113_v19  ;;  %8495 = vmatpush3.bf16.msra.mxu0 %v9129_v26 }
0x1028   :  { %8474 = vmatprep.subr.bf16.mxu1 %v9114_v4  ;;  %8496 = vmatprep.subr.bf16.mxu0 %v9130_v28 }
0x102b   :  { %8475 = vmatpush3.bf16.msra.mxu1 %v9115_v3  ;;  %8497 = vmatpush3.bf16.msra.mxu0 %v9131_v53 }
0x102c   :  { %8476 = vmatprep.subr.bf16.mxu1 %v9116_v60  ;;  %8498 = vmatprep.subr.bf16.mxu0 %v9132_v62 }
0x102f   :  { %8477 = vmatpush3.bf16.msra.mxu1 %v9117_v52  ;;  %8499 = vmatpush3.bf16.msra.mxu0 %v9133_v0 }
0x1030   :  { %8478 = vmatprep.subr.bf16.mxu1 %v9118_v63  ;;  %8500 = vmatprep.subr.bf16.mxu0 %v9134_v13 }
0x1033   :  { %8479 = vmatpush3.bf16.msra.mxu1 %v9119_v45  ;;  %8501 = vmatpush3.bf16.msra.mxu0 %v9135_v6 }
0x1034   :  { %8480 = vmatprep.subr.bf16.mxu1 %v9120_v32  ;;  %8502 = vmatprep.subr.bf16.mxu0 %v9136_v42 }
0x1037   :  { %8481 = vmatpush3.bf16.msra.mxu1 %v9121_v27  ;;  %8503 = vmatpush3.bf16.msra.mxu0 %v9137_v1 }
0x109a   :  { %v7192_v24 = vpop.f32.mrf.mxu1  ;;  %v7233_v14 = vpop.f32.mrf.mxu0 }
0x109b   :  { %v7193_v55 = vadd.f32 %v7192_v24, %v6505_v50 }
0x109c   :  { %v7194_v12 = vpop.f32.mrf.mxu1  ;;  %v7235_v2 = vpop.f32.mrf.mxu0 }
0x109d   :  { %v7234_v48 = vadd.f32 %v7233_v14, %v7193_v55  ;;  %v7195_v20 = vadd.f32 %v7194_v12, %v6509_v59 }
0x109e   :  { %v7196_v54 = vpop.f32.mrf.mxu1  ;;  %v7237_v34 = vpop.f32.mrf.mxu0 }
0x109f   :  { %v7236_v9 = vadd.f32 %v7235_v2, %v7195_v20  ;;  %v7322_v31 = vmax.f32 %v7234_v48, 0.0 }
0x10a0   :  { %v7197_v36 = vpop.f32.mrf.mxu1  ;;  %v7238_v51 = vpop.f32.mrf.mxu0 }
0x10a1   :  { %v7323_v58 = vmax.f32 %v7236_v9, 0.0  ;;  %v7390_v61 = vpack.c.bf16 %v7322_v31, %v7322_v31 }
0x10a3   :  { %v7391_v37 = vpack.c.bf16 %v7323_v58, %v7323_v58 }
0x10a5   :  { %7622 = vmatprep.mubr.bf16.mxu1 %v7391_v37 }
0x10a6   :  { %7623 = vmatmul.mubr.bf16.vlgmr.msra.gmra.mxu1 %v7390_v61 }
0x10da   :  { %v7274_v18 = vpop.f32.mrf.mxu1  ;;  %v7315_v16 = vpop.f32.mrf.mxu0 }
0x10db   :  { %v7275_v23 = vadd.f32 %v7274_v18, %v6513_v43 }
0x10dc   :  { %v7276_v35 = vpop.f32.mrf.mxu1  ;;  %v7317_v44 = vpop.f32.mrf.mxu0 }
0x10dd   :  { %v7316_v33 = vadd.f32 %v7315_v16, %v7275_v23  ;;  %v7277_v56 = vadd.f32 %v7276_v35, %v6517_v38 }
0x10de   :  { %v7278_v39 = vpop.f32.mrf.mxu1  ;;  %v7319_v21 = vpop.f32.mrf.mxu0 }
0x10df   :  { %v7318_v40 = vadd.f32 %v7317_v44, %v7277_v56  ;;  %v7324_v46 = vmax.f32 %v7316_v33, 0.0 }
0x10e0   :  { %v7279_v7 = vpop.f32.mrf.mxu1  ;;  %v7320_v22 = vpop.f32.mrf.mxu0 }
0x10e1   :  { %v7325_v19 = vmax.f32 %v7318_v40, 0.0  ;;  %v7392_v25 = vpack.c.bf16 %v7324_v46, %v7324_v46 }
0x10e3   :  { %v7393_v4 = vpack.c.bf16 %v7325_v19, %v7325_v19 }
0x10e5   :  { %7662 = vmatprep.mubr.bf16.mxu0 %v7393_v4 }
0x10e6   :  { %7663 = vmatmul.mubr.bf16.vlgmr.msra.gmra.mxu0 %v7392_v25 }
0x1166   :  { %v8482_v15 = vpop.f32.mrf.mxu1 }
0x1168   :  { %v8483_v29 = vpop.f32.mrf.mxu1 }
0x1169   :  { %v8484_v52 = vadd.f32 %v8483_v29, %v8482_v15 }
0x116a   :  { %v8485_v3 = vpop.f32.mrf.mxu1 }
0x116b   :  { %v7625_v10 = vadd.f32 %v8484_v52, %v7397_v5 }
0x116c   :  { %v8486_v60 = vpop.f32.mrf.mxu1 }
0x11a6   :  { %v8504_v63 = vpop.f32.mrf.mxu0 }
0x11a8   :  { %v8505_v57 = vpop.f32.mrf.mxu0 }
0x11a9   :  { %v8506_v45 = vadd.f32 %v8505_v57, %v8504_v63 }
0x11aa   :  { %v8507_v32 = vpop.f32.mrf.mxu0 }
0x11ab   :  { %v7665_v26 = vadd.f32 %v8506_v45, %v7625_v10 }
0x11ac   :  { %v8508_v28 = vpop.f32.mrf.mxu0 }
0x11ad   :  { %7671 = vst.msk [vmem:[#allocation17] sm:$0x3] %vm7670_vm9, %v7665_v26 }
0x11ae   :  { %9509 = shalt.err (!%p9506_p7)
}
0x11af   :  { %7681 = dma.vmem_to_hbm [thread:$0]  %s7679_s11, 32, %s11597_s14, [#allocation4]  }
0x11b0   :  { %9528 = dma.done.wait [#allocation4], 32  }
0x11b1   :  { %9529 = vsyncadd [#allocation4], 4294967264 }
0x11b2   :  { %7685 = vsyncpa [#allocation3], 1 }
0x11b3   :  { %7686 = vsyncpa [#allocation6], 1 }
0x11b4   :  { %7687 = vsyncpa [#allocation9], 1 }
0x11b5   :  { %7688 = vsyncpa [#allocation12], 1 }
0x11b6   :  { %7689 = vsyncpa [#allocation15], 1 }
0x11b7   :  { %7690 = vsyncpa [#allocation4], 1 }

</bundles_post_ra>
